<compile_context>
chip_gen: v7x
topology: tpu7x:2x2x1
jax: 0.10.0
libtpu: 0.0.40
codegen_flags: <defaults>
</compile_context>

<pallas_src>
import functools

import jax
import jax.numpy as jnp
from jax.experimental import pallas as pl
from jax.experimental.pallas import tpu as pltpu

HIDDEN = 2048


# ----------------------------------------------------------------------------
# Fused kernel: lin1 + relu + lin2(int8 W) + relu + (mean|logv) heads + reparam
# ----------------------------------------------------------------------------
def _gaussian_net_kernel(
    x_ref, w1_ref, b1_ref, w2_ref, s2_ref, b2_ref, wh_ref, bh_ref, eps_ref,
    out_ref,
    *, latent_dim,
):
    L = latent_dim

    # lin1: h1 = relu(x @ W1 + b1)   (K = in_dim, tiny)
    h1 = jnp.dot(
        x_ref[...].astype(jnp.bfloat16), w1_ref[...],
        preferred_element_type=jnp.float32,
    ) + b1_ref[...]
    h1 = jnp.maximum(h1, 0.0)

    # lin2: W2 streamed as int8; dequant-cast to bf16 on the VPU, per-output-
    # channel scale folded into the f32 epilogue together with b2.
    h2 = jnp.dot(
        h1.astype(jnp.bfloat16), w2_ref[...].astype(jnp.bfloat16),
        preferred_element_type=jnp.float32,
    )
    h2 = jnp.maximum(h2 * s2_ref[...] + b2_ref[...], 0.0)

    # Fused heads ([W_mean | W_logv] concatenated along N at init).
    heads = jnp.dot(
        h2.astype(jnp.bfloat16), wh_ref[...],
        preferred_element_type=jnp.float32,
    ) + bh_ref[...]

    mean = heads[:, :L]
    logv = heads[:, L:]
    std = jnp.exp(0.5 * logv)            # EUP
    z = eps_ref[...] * std + mean        # VPU; eps broadcast over batch

    # Single lane-dense output tile: [ z | mean | std ]
    out_ref[:, 0:L] = z.astype(out_ref.dtype)
    out_ref[:, L:2 * L] = mean.astype(out_ref.dtype)
    out_ref[:, 2 * L:3 * L] = std.astype(out_ref.dtype)


def gaussian_network_forward(params, x, eps):
    """Returns (z, (mean, std), mean, std).

    The torch version returns torch.distributions.Normal(mean, std) as the
    second element; a distribution object has no JAX-array equivalent, so its
    (mean, std) parameters are returned in its place.
    """
    # TODO(synk): Normal(mean, std) distribution object has no array equivalent;
    # returning its (mean, std) parameters instead.
    w1, b1 = params["lin1"]
    w2q, s2, b2 = params["lin2"]
    wh, bh = params["head"]

    B, in_dim = x.shape
    H = w2q.shape[0]
    L2 = wh.shape[1]
    L = L2 // 2
    assert w1.shape == (in_dim, H) and w2q.shape == (H, H)

    kernel = functools.partial(_gaussian_net_kernel, latent_dim=L)

    flops = 2 * B * (in_dim * H + H * H + H * L2)
    bytes_accessed = int(
        x.size * x.dtype.itemsize
        + w1.size * w1.dtype.itemsize + b1.size * b1.dtype.itemsize
        + w2q.size * w2q.dtype.itemsize + s2.size * s2.dtype.itemsize
        + b2.size * b2.dtype.itemsize
        + wh.size * wh.dtype.itemsize + bh.size * bh.dtype.itemsize
        + L * 4 + B * 3 * L * 4
    )

    out = pl.pallas_call(
        kernel,
        out_shape=jax.ShapeDtypeStruct((B, 3 * L), jnp.float32),
        grid_spec=pltpu.PrefetchScalarGridSpec(
            num_scalar_prefetch=0,
            grid=(1,),                                       # single fused step
            in_specs=[
                pl.BlockSpec((B, in_dim), lambda j: (0, 0)),  # x
                pl.BlockSpec((in_dim, H), lambda j: (0, 0)),  # W1 (bf16)
                pl.BlockSpec((1, H), lambda j: (0, 0)),       # b1
                pl.BlockSpec((H, H), lambda j: (0, 0)),       # W2 (int8)
                pl.BlockSpec((1, H), lambda j: (0, 0)),       # W2 scales
                pl.BlockSpec((1, H), lambda j: (0, 0)),       # b2
                pl.BlockSpec((H, L2), lambda j: (0, 0)),      # [Wm|Wv] (bf16)
                pl.BlockSpec((1, L2), lambda j: (0, 0)),      # [bm|bv]
                pl.BlockSpec((1, L), lambda j: (0, 0)),       # eps
            ],
            out_specs=pl.BlockSpec((B, 3 * L), lambda j: (0, 0)),
        ),
        compiler_params=pltpu.CompilerParams(
            dimension_semantics=("arbitrary",),
            vmem_limit_bytes=48 * 1024 * 1024,   # ~18 MiB used; safe on v5e/v6e/v7x
        ),
        cost_estimate=pl.CostEstimate(
            flops=flops,
            transcendentals=B * L,
            bytes_accessed=bytes_accessed,
        ),
    )(x, w1, b1, w2q, s2, b2, wh, bh, eps.reshape(1, L))

    z = out[:, :L]
    mean = out[:, L:2 * L]
    std = out[:, 2 * L:]
    return z, (mean, std), mean, std


# ----------------------------------------------------------------------------
# Params + pure-JAX reference
# ----------------------------------------------------------------------------
def init_params(key, in_dim, latent_dim, *, hidden=HIDDEN):
    """torch.nn.Linear-style init (uniform +-1/sqrt(fan_in)).

    Weights stored transposed vs torch ((in, out)).  W1 / head weights are
    bf16; W2 is int8 with per-output-channel f32 scales (dominant HBM stream
    halved again vs bf16).  The two head projections are concatenated once
    here so the per-call path does no concat/reshape work.
    """
    def lin_init_f32(k, fan_in, fan_out):
        kw, kb = jax.random.split(k)
        bound = float(fan_in) ** -0.5
        w = jax.random.uniform(kw, (fan_in, fan_out), jnp.float32, -bound, bound)
        b = jax.random.uniform(kb, (fan_out,), jnp.float32, -bound, bound)
        return w, b

    k1, k2, k3, k4 = jax.random.split(key, 4)
    w1, b1 = lin_init_f32(k1, in_dim, hidden)
    w2, b2 = lin_init_f32(k2, hidden, hidden)
    wm, bm = lin_init_f32(k3, hidden, latent_dim)
    wv, bv = lin_init_f32(k4, hidden, latent_dim)

    # int8 symmetric per-output-channel quantization of W2.
    # TODO(synk): on v7x use fp8 e4m3 here (MXU-native; avoids the VPU dequant).
    amax = jnp.maximum(jnp.max(jnp.abs(w2), axis=0, keepdims=True), 1e-8)
    s2 = (amax / 127.0).astype(jnp.float32)                     # (1, H)
    w2q = jnp.clip(jnp.round(w2 / s2), -127.0, 127.0).astype(jnp.int8)

    wh = jnp.concatenate([wm, wv], axis=1).astype(jnp.bfloat16)  # (H, 2L)
    bh = jnp.concatenate([bm, bv], axis=0).reshape(1, 2 * latent_dim)

    return {
        "lin1": (w1.astype(jnp.bfloat16), b1.reshape(1, hidden)),
        "lin2": (w2q, s2, b2.reshape(1, hidden)),
        "head": (wh, bh),
    }


def reference_forward(params, x, eps):
    """Pure-JAX reference mirroring the kernel's numerics (bf16 weights /
    bf16-rounded matmul inputs, int8 W2 with post-matmul scales, f32 accum)."""
    f32 = lambda a: a.astype(jnp.float32)
    bfr = lambda a: a.astype(jnp.bfloat16).astype(jnp.float32)
    w1, b1 = params["lin1"]
    w2q, s2, b2 = params["lin2"]
    wh, bh = params["head"]
    L = wh.shape[1] // 2

    h1 = jnp.maximum(bfr(x) @ f32(w1) + b1, 0.0)
    h2 = jnp.maximum((bfr(h1) @ f32(w2q)) * s2 + b2, 0.0)
    heads = bfr(h2) @ f32(wh) + bh
    mean = heads[:, :L]
    logv = heads[:, L:]
    std = jnp.exp(0.5 * logv)
    z = eps[None, :] * std + mean
    return z, mean, std


if __name__ == "__main__":
    in_dim = 64
    latent_dim = 32
    batch = 8

    key = jax.random.PRNGKey(0)
    kp, kx, ke = jax.random.split(key, 3)

    params = init_params(kp, in_dim, latent_dim)
    x = jax.random.normal(kx, (batch, in_dim), jnp.float32)
    # torch.randn([latent_dim]) -> a single eps vector broadcast over the batch,
    # passed in explicitly for determinism.
    eps = jax.random.normal(ke, (latent_dim,), jnp.float32)

    z, (mean_p, std_p), mean, std = gaussian_network_forward(params, x, eps)
    jax.block_until_ready((z, mean, std))

    z_ref, mean_ref, std_ref = reference_forward(params, x, eps)
    assert jnp.allclose(mean, mean_ref, atol=3e-3, rtol=3e-3)
    assert jnp.allclose(std, std_ref, atol=3e-3, rtol=3e-3)
    assert jnp.allclose(z, z_ref, atol=3e-3, rtol=3e-3)

    print("KERNEL_OK")
</pallas_src>

<mosaic_0001>
module attributes {stable_mosaic.version = 11 : i64} {
  func.func @_gaussian_net_kernel(%arg0: i32, %arg1: memref<8x64xf32, #tpu.memory_space<vmem>>, %arg2: memref<64x2048xbf16, #tpu.memory_space<vmem>>, %arg3: memref<1x2048xf32, #tpu.memory_space<vmem>>, %arg4: memref<2048x2048xi8, #tpu.memory_space<vmem>>, %arg5: memref<1x2048xf32, #tpu.memory_space<vmem>>, %arg6: memref<1x2048xf32, #tpu.memory_space<vmem>>, %arg7: memref<2048x64xbf16, #tpu.memory_space<vmem>>, %arg8: memref<1x64xf32, #tpu.memory_space<vmem>>, %arg9: memref<1x32xf32, #tpu.memory_space<vmem>>, %arg10: memref<8x96xf32, #tpu.memory_space<vmem>>) attributes {dimension_semantics = [#tpu.dimension_semantics<arbitrary>], iteration_bounds = array<i64: 1>, scalar_prefetch = 0 : i64, scratch_operands = 0 : i64, tpu.core_type = #tpu.core_type<tc>, window_params = [{pipeline_mode = #tpu.pipeline_mode<synchronous>, transform_indices = @transform_0, window_bounds = array<i64: 8, 64>}, {pipeline_mode = #tpu.pipeline_mode<synchronous>, transform_indices = @transform_1, window_bounds = array<i64: 64, 2048>}, {pipeline_mode = #tpu.pipeline_mode<synchronous>, transform_indices = @transform_2, window_bounds = array<i64: 1, 2048>}, {pipeline_mode = #tpu.pipeline_mode<synchronous>, transform_indices = @transform_3, window_bounds = array<i64: 2048, 2048>}, {pipeline_mode = #tpu.pipeline_mode<synchronous>, transform_indices = @transform_4, window_bounds = array<i64: 1, 2048>}, {pipeline_mode = #tpu.pipeline_mode<synchronous>, transform_indices = @transform_5, window_bounds = array<i64: 1, 2048>}, {pipeline_mode = #tpu.pipeline_mode<synchronous>, transform_indices = @transform_6, window_bounds = array<i64: 2048, 64>}, {pipeline_mode = #tpu.pipeline_mode<synchronous>, transform_indices = @transform_7, window_bounds = array<i64: 1, 64>}, {pipeline_mode = #tpu.pipeline_mode<synchronous>, transform_indices = @transform_8, window_bounds = array<i64: 1, 32>}, {pipeline_mode = #tpu.pipeline_mode<synchronous>, transform_indices = @transform_9, window_bounds = array<i64: 8, 96>}]} {
    %c0 = arith.constant 0 : index
    %c0_0 = arith.constant 0 : index
    %0 = vector.load %arg1[%c0, %c0_0] : memref<8x64xf32, #tpu.memory_space<vmem>>, vector<8x64xf32>
    %1 = arith.truncf %0 : vector<8x64xf32> to vector<8x64xbf16>
    %c0_1 = arith.constant 0 : index
    %c0_2 = arith.constant 0 : index
    %2 = vector.load %arg2[%c0_1, %c0_2] : memref<64x2048xbf16, #tpu.memory_space<vmem>>, vector<64x2048xbf16>
    %cst = arith.constant dense<0.000000e+00> : vector<8x2048xf32>
    %3 = tpu.matmul %1, %2, %cst {dimension_numbers = #tpu.dot_dimension_numbers<[1], [0], [0], [1], [0, 0, 1, 1], [], []>} : vector<8x64xbf16>, vector<64x2048xbf16>, vector<8x2048xf32> -> vector<8x2048xf32>
    %c0_3 = arith.constant 0 : index
    %c0_4 = arith.constant 0 : index
    %4 = vector.load %arg3[%c0_3, %c0_4] : memref<1x2048xf32, #tpu.memory_space<vmem>>, vector<1x2048xf32>
    %5 = vector.broadcast %4 : vector<1x2048xf32> to vector<8x2048xf32>
    %6 = arith.addf %3, %5 : vector<8x2048xf32>
    %cst_5 = arith.constant 0.000000e+00 : f32
    %7 = vector.broadcast %cst_5 : f32 to vector<8x2048xf32>
    %8 = arith.maximumf %6, %7 : vector<8x2048xf32>
    %9 = arith.truncf %8 : vector<8x2048xf32> to vector<8x2048xbf16>
    %c0_6 = arith.constant 0 : index
    %c0_7 = arith.constant 0 : index
    %10 = vector.load %arg4[%c0_6, %c0_7] : memref<2048x2048xi8, #tpu.memory_space<vmem>>, vector<2048x2048xi8>
    %11 = arith.sitofp %10 : vector<2048x2048xi8> to vector<2048x2048xbf16>
    %cst_8 = arith.constant dense<0.000000e+00> : vector<8x2048xf32>
    %12 = tpu.matmul %9, %11, %cst_8 {dimension_numbers = #tpu.dot_dimension_numbers<[1], [0], [0], [1], [0, 0, 1, 1], [], []>} : vector<8x2048xbf16>, vector<2048x2048xbf16>, vector<8x2048xf32> -> vector<8x2048xf32>
    %c0_9 = arith.constant 0 : index
    %c0_10 = arith.constant 0 : index
    %13 = vector.load %arg5[%c0_9, %c0_10] : memref<1x2048xf32, #tpu.memory_space<vmem>>, vector<1x2048xf32>
    %14 = vector.broadcast %13 : vector<1x2048xf32> to vector<8x2048xf32>
    %15 = arith.mulf %12, %14 : vector<8x2048xf32>
    %c0_11 = arith.constant 0 : index
    %c0_12 = arith.constant 0 : index
    %16 = vector.load %arg6[%c0_11, %c0_12] : memref<1x2048xf32, #tpu.memory_space<vmem>>, vector<1x2048xf32>
    %17 = vector.broadcast %16 : vector<1x2048xf32> to vector<8x2048xf32>
    %18 = arith.addf %15, %17 : vector<8x2048xf32>
    %cst_13 = arith.constant 0.000000e+00 : f32
    %19 = vector.broadcast %cst_13 : f32 to vector<8x2048xf32>
    %20 = arith.maximumf %18, %19 : vector<8x2048xf32>
    %21 = arith.truncf %20 : vector<8x2048xf32> to vector<8x2048xbf16>
    %c0_14 = arith.constant 0 : index
    %c0_15 = arith.constant 0 : index
    %22 = vector.load %arg7[%c0_14, %c0_15] : memref<2048x64xbf16, #tpu.memory_space<vmem>>, vector<2048x64xbf16>
    %cst_16 = arith.constant dense<0.000000e+00> : vector<8x64xf32>
    %23 = tpu.matmul %21, %22, %cst_16 {dimension_numbers = #tpu.dot_dimension_numbers<[1], [0], [0], [1], [0, 0, 1, 1], [], []>} : vector<8x2048xbf16>, vector<2048x64xbf16>, vector<8x64xf32> -> vector<8x64xf32>
    %c0_17 = arith.constant 0 : index
    %c0_18 = arith.constant 0 : index
    %24 = vector.load %arg8[%c0_17, %c0_18] : memref<1x64xf32, #tpu.memory_space<vmem>>, vector<1x64xf32>
    %25 = vector.broadcast %24 : vector<1x64xf32> to vector<8x64xf32>
    %26 = arith.addf %23, %25 : vector<8x64xf32>
    %27 = vector.extract_strided_slice %26 {offsets = [0, 0], sizes = [8, 32], strides = [1, 1]} : vector<8x64xf32> to vector<8x32xf32>
    %28 = vector.extract_strided_slice %26 {offsets = [0, 32], sizes = [8, 32], strides = [1, 1]} : vector<8x64xf32> to vector<8x32xf32>
    %cst_19 = arith.constant 5.000000e-01 : f32
    %29 = vector.broadcast %cst_19 : f32 to vector<8x32xf32>
    %30 = arith.mulf %29, %28 : vector<8x32xf32>
    %31 = math.exp %30 : vector<8x32xf32>
    %c0_20 = arith.constant 0 : index
    %c0_21 = arith.constant 0 : index
    %32 = vector.load %arg9[%c0_20, %c0_21] : memref<1x32xf32, #tpu.memory_space<vmem>>, vector<1x32xf32>
    %33 = vector.broadcast %32 : vector<1x32xf32> to vector<8x32xf32>
    %34 = arith.mulf %33, %31 : vector<8x32xf32>
    %35 = arith.addf %34, %27 : vector<8x32xf32>
    %c0_22 = arith.constant 0 : index
    %c0_23 = arith.constant 0 : index
    %36 = vector.load %arg10[%c0_22, %c0_23] : memref<8x96xf32, #tpu.memory_space<vmem>>, vector<8x32xf32>
    tpu.vector_store %arg10[%c0_22, %c0_23], %35 {strides = array<i32>} : memref<8x96xf32, #tpu.memory_space<vmem>>, vector<8x32xf32>,
    %c0_24 = arith.constant 0 : index
    %c32 = arith.constant 32 : index
    %37 = vector.load %arg10[%c0_24, %c32] : memref<8x96xf32, #tpu.memory_space<vmem>>, vector<8x32xf32>
    tpu.vector_store %arg10[%c0_24, %c32], %27 {strides = array<i32>} : memref<8x96xf32, #tpu.memory_space<vmem>>, vector<8x32xf32>,
    %c0_25 = arith.constant 0 : index
    %c64 = arith.constant 64 : index
    %38 = vector.load %arg10[%c0_25, %c64] : memref<8x96xf32, #tpu.memory_space<vmem>>, vector<8x32xf32>
    tpu.vector_store %arg10[%c0_25, %c64], %31 {strides = array<i32>} : memref<8x96xf32, #tpu.memory_space<vmem>>, vector<8x32xf32>,
    return
  }
  func.func @transform_0(%arg0: i32) -> (i32, i32) {
    %c0_i32 = arith.constant 0 : i32
    %c0_i32_0 = arith.constant 0 : i32
    %c0_i32_1 = arith.constant 0 : i32
    return %c0_i32, %c0_i32_0 : i32, i32
  }
  func.func @transform_1(%arg0: i32) -> (i32, i32) {
    %c0_i32 = arith.constant 0 : i32
    %c0_i32_0 = arith.constant 0 : i32
    %c0_i32_1 = arith.constant 0 : i32
    return %c0_i32, %c0_i32_0 : i32, i32
  }
  func.func @transform_2(%arg0: i32) -> (i32, i32) {
    %c0_i32 = arith.constant 0 : i32
    %c0_i32_0 = arith.constant 0 : i32
    %c0_i32_1 = arith.constant 0 : i32
    return %c0_i32, %c0_i32_0 : i32, i32
  }
  func.func @transform_3(%arg0: i32) -> (i32, i32) {
    %c0_i32 = arith.constant 0 : i32
    %c0_i32_0 = arith.constant 0 : i32
    %c0_i32_1 = arith.constant 0 : i32
    return %c0_i32, %c0_i32_0 : i32, i32
  }
  func.func @transform_4(%arg0: i32) -> (i32, i32) {
    %c0_i32 = arith.constant 0 : i32
    %c0_i32_0 = arith.constant 0 : i32
    %c0_i32_1 = arith.constant 0 : i32
    return %c0_i32, %c0_i32_0 : i32, i32
  }
  func.func @transform_5(%arg0: i32) -> (i32, i32) {
    %c0_i32 = arith.constant 0 : i32
    %c0_i32_0 = arith.constant 0 : i32
    %c0_i32_1 = arith.constant 0 : i32
    return %c0_i32, %c0_i32_0 : i32, i32
  }
  func.func @transform_6(%arg0: i32) -> (i32, i32) {
    %c0_i32 = arith.constant 0 : i32
    %c0_i32_0 = arith.constant 0 : i32
    %c0_i32_1 = arith.constant 0 : i32
    return %c0_i32, %c0_i32_0 : i32, i32
  }
  func.func @transform_7(%arg0: i32) -> (i32, i32) {
    %c0_i32 = arith.constant 0 : i32
    %c0_i32_0 = arith.constant 0 : i32
    %c0_i32_1 = arith.constant 0 : i32
    return %c0_i32, %c0_i32_0 : i32, i32
  }
  func.func @transform_8(%arg0: i32) -> (i32, i32) {
    %c0_i32 = arith.constant 0 : i32
    %c0_i32_0 = arith.constant 0 : i32
    %c0_i32_1 = arith.constant 0 : i32
    return %c0_i32, %c0_i32_0 : i32, i32
  }
  func.func @transform_9(%arg0: i32) -> (i32, i32) {
    %c0_i32 = arith.constant 0 : i32
    %c0_i32_0 = arith.constant 0 : i32
    %c0_i32_1 = arith.constant 0 : i32
    return %c0_i32, %c0_i32_0 : i32, i32
  }
}

</mosaic_0001>

<bundles_post_ra>
// kernel: tpu_custom_call.1
= control target key start
LH: loop header
LB: loop body
LE: loop exit
PB: predicated region body
PF: predicated region fallthrough
CT: control target
= control target key end

     0   :  { %14 = vsyncpa [#allocation3], 0  ;;  %s10203_s0 = inlined_call_operand.hbm [shape: f32[8,64], index: 0, kind: input, shape index: {}]   ;;  %s10204_s1 = inlined_call_operand.hbm [shape: bf16[64,2048], index: 1, kind: input, shape index: {}]   ;;  %s10205_s2 = inlined_call_operand.hbm [shape: f32[1,2048], index: 2, kind: input, shape index: {}]   ;;  %s10206_s3 = inlined_call_operand.hbm [shape: s8[2048,2048], index: 3, kind: input, shape index: {}]   ;;  %s10207_s4 = inlined_call_operand.hbm [shape: f32[1,2048], index: 4, kind: input, shape index: {}]   ;;  %s10208_s5 = inlined_call_operand.hbm [shape: f32[1,2048], index: 5, kind: input, shape index: {}]   ;;  %s10209_s6 = inlined_call_operand.vmem [shape: bf16[2048,64], index: 6, kind: input, shape index: {}]   ;;  %s10210_s7 = inlined_call_operand.hbm [shape: f32[1,64], index: 7, kind: input, shape index: {}]   ;;  %s10211_s8 = inlined_call_operand.hbm [shape: f32[1,32], index: 8, kind: input, shape index: {}]   ;;  %s10212_s9 = inlined_call_operand.hbm [shape: f32[8,96], index: 9, kind: output, shape index: {}]  }
   0x1   :  { %15 = vsyncpa [#allocation6], 0 }
   0x2   :  { %16 = vsyncpa [#allocation9], 0 }
   0x3   :  { %17 = vsyncpa [#allocation12], 0 }
   0x4   :  { %18 = vsyncpa [#allocation15], 0 }
   0x5   :  { %19 = vsyncpa [#allocation4], 0  ;;  %s9252_s30 = smov [#allocation5]   ;;  %s9042_s13 = scalar_lea.hbm %s10204_s1, 8192 }
   0x6   :  { %s35_s10 = sshll.u32 %s9252_s30, 4  ;;  %p9043_p0 = scmp.ne.s32.totalorder %s10204_s1, %s9042_s13  ;;  %s36_s10 = int_to_ptr.vmem [resolvable:$true] %s35_s10 }
   0x7   :  { %p9046_p1 = scmp.lt.u32.totalorder %s9042_s13, %s10204_s1 }
   0x9   :  { %p9048_p2 = pnand %p9046_p1, %p9043_p0 }
   0xb   :  { %9051 = shalt.err (!%p9048_p2)
}
   0xc   :  { %s9052_s18 = scalar_lea.vmem %s36_s10, 8192  ;;  %p9057_p4 = scmp.lt.s32.totalorder %s36_s10, %s36_s10 }
   0xd   :  { %p9053_p3 = scmp.ne.s32.totalorder %s36_s10, %s9052_s18  ;;  %p9058_p5 = scmp.lt.s32.totalorder %s9052_s18, %s9052_s18 }
   0xf   :  { %p9059_p6 = por %p9058_p5, %p9057_p4 }
  0x11   :  { %p9060_p7 = pnand %p9059_p6, %p9053_p3 }
  0x13   :  { %9063 = shalt.err (!%p9060_p7)
}
  0x14   :  { %s9253_s19 = smov 1024   ;;  %s9254_s20 = smov 64  }
  0x15   :  { %41 = dma.hbm_to_vmem [thread:$0]  %s10204_s1, 8192, %s36_s10, [#allocation6], %s9253_s19, %s9253_s19, %s9254_s20  }
  0x16   :  { %s9255_s23 = smov [#allocation8]   ;;  %s9064_s27 = scalar_lea.hbm %s10206_s3, 131072 }
  0x17   :  { %s57_s24 = sshll.u32 %s9255_s23, 4  ;;  %p9065_p8 = scmp.ne.s32.totalorder %s10206_s3, %s9064_s27  ;;  %s58_s24 = int_to_ptr.vmem [resolvable:$true] %s57_s24 }
  0x18   :  { %p9068_p9 = scmp.lt.u32.totalorder %s9064_s27, %s10206_s3 }
  0x1a   :  { %p9070_p10 = pnand %p9068_p9, %p9065_p8 }
  0x1c   :  { %9073 = shalt.err (!%p9070_p10)
}
  0x1d   :  { %s9074_s12 = scalar_lea.vmem %s58_s24, 131072  ;;  %p9079_p12 = scmp.lt.s32.totalorder %s58_s24, %s58_s24 }
  0x1e   :  { %p9075_p11 = scmp.ne.s32.totalorder %s58_s24, %s9074_s12  ;;  %p9080_p13 = scmp.lt.s32.totalorder %s9074_s12, %s9074_s12 }
  0x20   :  { %p9081_p0 = por %p9080_p13, %p9079_p12 }
  0x22   :  { %p9082_p1 = pnand %p9081_p0, %p9075_p11 }
  0x24   :  { %9085 = shalt.err (!%p9082_p1)
}
  0x25   :  { %s9256_s1 = smov 2048   ;;  %s9257_s10 = smov 128  }
  0x26   :  { %63 = dma.hbm_to_vmem [thread:$0]  %s10206_s3, 131072, %s58_s24, [#allocation9], %s9256_s1, %s9256_s1, %s9257_s10  }
  0x27   :  { %s9258_s15 = smov [#allocation11]   ;;  %s9259_s17 = smov [#allocation2]  }
  0x28   :  { %s80_s16 = sshll.u32 %s9258_s15, 4  ;;  %s26_s18 = sshll.u32 %s9259_s17, 4  ;;  %s81_s16 = int_to_ptr.vmem [resolvable:$true] %s80_s16  ;;  %s27_s18 = int_to_ptr.vmem [resolvable:$true] %s26_s18 }
  0x29   :  { %s9086_s21 = scalar_lea.hbm %s10208_s5, 256 }
  0x2a   :  { %p9087_p2 = scmp.ne.s32.totalorder %s10208_s5, %s9086_s21  ;;  %p9090_p3 = scmp.lt.u32.totalorder %s9086_s21, %s10208_s5 }
  0x2c   :  { %p9092_p4 = pnand %p9090_p3, %p9087_p2 }
  0x2e   :  { %9095 = shalt.err (!%p9092_p4)
}
  0x2f   :  { %s9096_s3 = scalar_lea.vmem %s81_s16, 256  ;;  %p9101_p6 = scmp.lt.s32.totalorder %s81_s16, %s81_s16 }
  0x30   :  { %p9097_p5 = scmp.ne.s32.totalorder %s81_s16, %s9096_s3  ;;  %p9102_p7 = scmp.lt.s32.totalorder %s9096_s3, %s9096_s3 }
  0x32   :  { %p9103_p8 = por %p9102_p7, %p9101_p6 }
  0x34   :  { %p9104_p9 = pnand %p9103_p8, %p9097_p5 }
  0x36   :  { %9107 = shalt.err (!%p9104_p9)
}
  0x37   :  { %83 = dma.hbm_to_vmem [thread:$0]  %s10208_s5, 256, %s81_s16, [#allocation12]  }
  0x38   :  { %s9108_s30 = scalar_lea.hbm %s10203_s0, 128 }
  0x39   :  { %p9109_p10 = scmp.ne.s32.totalorder %s10203_s0, %s9108_s30  ;;  %p9112_p11 = scmp.lt.u32.totalorder %s9108_s30, %s10203_s0 }
  0x3b   :  { %p9114_p12 = pnand %p9112_p11, %p9109_p10 }
  0x3d   :  { %9117 = shalt.err (!%p9114_p12)
}
  0x3e   :  { %s9118_s13 = scalar_lea.vmem %s27_s18, 128  ;;  %p9123_p0 = scmp.lt.s32.totalorder %s27_s18, %s27_s18 }
  0x3f   :  { %p9119_p13 = scmp.ne.s32.totalorder %s27_s18, %s9118_s13  ;;  %p9124_p1 = scmp.lt.s32.totalorder %s9118_s13, %s9118_s13 }
  0x41   :  { %p9125_p2 = por %p9124_p1, %p9123_p0 }
  0x43   :  { %p9126_p3 = pnand %p9125_p2, %p9119_p13 }
  0x45   :  { %9129 = shalt.err (!%p9126_p3)
}
  0x46   :  { %29 = dma.hbm_to_vmem [thread:$0]  %s10203_s0, 128, %s27_s18, [#allocation3]  }
  0x47   :  { %s9260_s15 = smov [#allocation7]   ;;  %s9261_s17 = smov [#allocation10]  }
  0x48   :  { %s48_s16 = sshll.u32 %s9260_s15, 4  ;;  %s70_s19 = sshll.u32 %s9261_s17, 4  ;;  %s49_s16 = int_to_ptr.vmem [resolvable:$true] %s48_s16  ;;  %s71_s19 = int_to_ptr.vmem [resolvable:$true] %s70_s19 }
  0x49   :  { %s9130_s22 = scalar_lea.hbm %s10205_s2, 256 }
  0x4a   :  { %p9131_p4 = scmp.ne.s32.totalorder %s10205_s2, %s9130_s22  ;;  %p9134_p5 = scmp.lt.u32.totalorder %s9130_s22, %s10205_s2 }
  0x4c   :  { %p9136_p6 = pnand %p9134_p5, %p9131_p4 }
  0x4e   :  { %9139 = shalt.err (!%p9136_p6)
}
  0x4f   :  { %s9140_s0 = scalar_lea.vmem %s49_s16, 256  ;;  %p9145_p8 = scmp.lt.s32.totalorder %s49_s16, %s49_s16 }
  0x50   :  { %p9141_p7 = scmp.ne.s32.totalorder %s49_s16, %s9140_s0  ;;  %p9146_p9 = scmp.lt.s32.totalorder %s9140_s0, %s9140_s0 }
  0x52   :  { %p9147_p10 = por %p9146_p9, %p9145_p8 }
  0x54   :  { %p9148_p11 = pnand %p9147_p10, %p9141_p7 }
  0x56   :  { %9151 = shalt.err (!%p9148_p11)
}
  0x57   :  { %51 = dma.hbm_to_vmem [thread:$0]  %s10205_s2, 256, %s49_s16, [#allocation6]  }
  0x58   :  { %s9152_s29 = scalar_lea.hbm %s10207_s4, 256 }
  0x59   :  { %p9153_p12 = scmp.ne.s32.totalorder %s10207_s4, %s9152_s29  ;;  %p9156_p13 = scmp.lt.u32.totalorder %s9152_s29, %s10207_s4 }
  0x5b   :  { %p9158_p0 = pnand %p9156_p13, %p9153_p12 }
  0x5d   :  { %9161 = shalt.err (!%p9158_p0)
}
  0x5e   :  { %s9162_s10 = scalar_lea.vmem %s71_s19, 256  ;;  %p9167_p2 = scmp.lt.s32.totalorder %s71_s19, %s71_s19 }
  0x5f   :  { %p9163_p1 = scmp.ne.s32.totalorder %s71_s19, %s9162_s10  ;;  %p9168_p3 = scmp.lt.s32.totalorder %s9162_s10, %s9162_s10 }
  0x61   :  { %p9169_p4 = por %p9168_p3, %p9167_p2 }
  0x63   :  { %p9170_p5 = pnand %p9169_p4, %p9163_p1 }
  0x65   :  { %9173 = shalt.err (!%p9170_p5)
}
  0x66   :  { %73 = dma.hbm_to_vmem [thread:$0]  %s10207_s4, 256, %s71_s19, [#allocation9]  }
  0x67   :  { %s9262_s5 = smov [#allocation13]   ;;  %s9263_s15 = smov [#allocation14]  }
  0x68   :  { %s92_s14 = sshll.u32 %s9262_s5, 4  ;;  %s102_s16 = sshll.u32 %s9263_s15, 4  ;;  %s93_s14 = int_to_ptr.vmem [resolvable:$true] %s92_s14  ;;  %s103_s16 = int_to_ptr.vmem [resolvable:$true] %s102_s16 }
  0x69   :  { %s9174_s21 = scalar_lea.hbm %s10210_s7, 16 }
  0x6a   :  { %p9175_p6 = scmp.ne.s32.totalorder %s10210_s7, %s9174_s21  ;;  %p9178_p7 = scmp.lt.u32.totalorder %s9174_s21, %s10210_s7 }
  0x6c   :  { %p9180_p8 = pnand %p9178_p7, %p9175_p6 }
  0x6e   :  { %9183 = shalt.err (!%p9180_p8)
}
  0x6f   :  { %s9184_s4 = scalar_lea.vmem %s93_s14, 16  ;;  %s9188_s19 = scalar_lea.vmem %s93_s14, 32 }
  0x70   :  { %p9185_p9 = scmp.ne.s32.totalorder %s93_s14, %s9184_s4  ;;  %p9189_p10 = scmp.lt.s32.totalorder %s93_s14, %s93_s14 }
  0x71   :  { %p9190_p11 = scmp.lt.s32.totalorder %s9188_s19, %s9184_s4 }
  0x73   :  { %p9191_p12 = por %p9190_p11, %p9189_p10 }
  0x75   :  { %p9192_p13 = pnand %p9191_p12, %p9185_p9 }
  0x77   :  { %9195 = shalt.err (!%p9192_p13)
}
  0x78   :  { %95 = dma.hbm_to_vmem [thread:$0]  %s10210_s7, 16, %s93_s14, [#allocation12]  }
  0x79   :  { %s9196_s27 = scalar_lea.hbm %s10211_s8, 16 }
  0x7a   :  { %p9197_p0 = scmp.ne.s32.totalorder %s10211_s8, %s9196_s27  ;;  %p9200_p1 = scmp.lt.u32.totalorder %s9196_s27, %s10211_s8 }
  0x7c   :  { %p9202_p2 = pnand %p9200_p1, %p9197_p0 }
  0x7e   :  { %9205 = shalt.err (!%p9202_p2)
}
  0x7f   :  { %s9206_s12 = scalar_lea.vmem %s103_s16, 16  ;;  %s9210_s1 = scalar_lea.vmem %s103_s16, 32 }
  0x80   :  { %p9207_p3 = scmp.ne.s32.totalorder %s103_s16, %s9206_s12  ;;  %p9211_p4 = scmp.lt.s32.totalorder %s103_s16, %s103_s16 }
  0x81   :  { %p9212_p5 = scmp.lt.s32.totalorder %s9210_s1, %s9206_s12 }
  0x83   :  { %p9213_p6 = por %p9212_p5, %p9211_p4 }
  0x85   :  { %p9214_p7 = pnand %p9213_p6, %p9207_p3 }
  0x87   :  { %9217 = shalt.err (!%p9214_p7)
}
  0x88   :  { %105 = dma.hbm_to_vmem [thread:$0]  %s10211_s8, 16, %s103_s16, [#allocation15]  }
  0x89   :  { %9240 = dma.done.wait [#allocation3], 128  }
  0x8a   :  { %9241 = vsyncadd [#allocation3], 4294967168 }
  0x8b   :  { %9242 = dma.done.wait [#allocation6], 8448  }
  0x8c   :  { %9243 = vsyncadd [#allocation6], 4294958848 }
  0x8d   :  { %9244 = dma.done.wait [#allocation9], 131328  }
  0x8e   :  { %9245 = vsyncadd [#allocation9], 4294835968 }
  0x8f   :  { %9246 = dma.done.wait [#allocation12], 272  }
  0x90   :  { %9247 = vsyncadd [#allocation12], 4294967024 }
  0x91   :  { %9248 = dma.done.wait [#allocation15], 16  }
  0x92   :  { %9249 = vsyncadd [#allocation15], 4294967280  ;;  %v9264_v0 = vmov 0   ;;  %v133_v1 = vld [vmem:[#allocation5] sm:$0xff]  ;;  %v134_v10 = vld [vmem:[#allocation5 + $0x8] sm:$0xff]  ;;  %vm601_vm0 = vcmask 523264  }
  0x93   :  { %637 = vmatprep.mubr.bf16.mxu0 %v9264_v0  ;;  %678 = vmatprep.mubr.bf16.mxu1 %v9264_v0  ;;  %v141_v2 = vld [vmem:[#allocation5 + $0x40] sm:$0xff]  ;;  %v142_v11 = vld [vmem:[#allocation5 + $0x48] sm:$0xff]  ;;  %v135_v29 = vld [vmem:[#allocation5 + $0x10] sm:$0xff]  ;;  %s9266_s11 = smov 96   ;;  %vm8260_vm1 = vcmask 261120   ;;  %s9267_s12 = smov [#allocation16]  }
  0x94   :  { %v149_v3 = vld [vmem:[#allocation5 + $0x80] sm:$0xff]  ;;  %v8293_v4 = vcombine.high %v133_v1, %v141_v2  ;;  %v8292_v5 = vcombine.low %v133_v1, %v141_v2  ;;  %v150_v12 = vld [vmem:[#allocation5 + $0x88] sm:$0xff]  ;;  %v8295_v14 = vcombine.high %v134_v10, %v142_v11  ;;  %v8294_v15 = vcombine.low %v134_v10, %v142_v11  ;;  %v143_v30 = vld [vmem:[#allocation5 + $0x50] sm:$0xff]  ;;  %s8279_s1 = sshll.u32 %s9267_s12, 4  ;;  %s8280_s1 = int_to_ptr.vmem [resolvable:$true] %s8279_s1 }
  0x95   :  { %v157_v6 = vld [vmem:[#allocation5 + $0xc0] sm:$0xff]  ;;  %v158_v16 = vld [vmem:[#allocation5 + $0xc8] sm:$0xff]  ;;  %v131_v33 = vld [vmem:[#allocation2] sm:$0xff]  ;;  %v8297_v35 = vcombine.high %v135_v29, %v143_v30  ;;  %v8296_v42 = vcombine.low %v135_v29, %v143_v30  ;;  %vm8266_vm2 = vcmask 523520   ;;  %vm8271_vm3 = vcmask 785920   ;;  %s9218_s7 = scalar_lea.vmem %s8280_s1, 128  ;;  %p9223_p9 = scmp.lt.s32.totalorder %s8280_s1, %s8280_s1 }
  0x96   :  { %v8309_v7 = vcombine.high %v149_v3, %v157_v6  ;;  %v165_v8 = vld [vmem:[#allocation5 + $0x100] sm:$0xff]  ;;  %605 = vmatprep.subr.bf16.mxu0 %v8293_v4  ;;  %v8308_v13 = vcombine.low %v149_v3, %v157_v6  ;;  %v8311_v18 = vcombine.high %v150_v12, %v158_v16  ;;  %v166_v19 = vld [vmem:[#allocation5 + $0x108] sm:$0xff]  ;;  %646 = vmatprep.subr.bf16.mxu1 %v8295_v14  ;;  %v136_v36 = vld [vmem:[#allocation5 + $0x18] sm:$0xff]  ;;  %p9219_p8 = scmp.ne.s32.totalorder %s8280_s1, %s9218_s7  ;;  %p9224_p10 = scmp.lt.s32.totalorder %s9218_s7, %s9218_s7 }
  0x97   :  { %v173_v9 = vld [vmem:[#allocation5 + $0x140] sm:$0xff]  ;;  %606 = vmatpush1.bf16.msra.mxu0 %v8292_v5  ;;  %v174_v20 = vld [vmem:[#allocation5 + $0x148] sm:$0xff]  ;;  %647 = vmatpush1.bf16.msra.mxu1 %v8294_v15  ;;  %v8310_v23 = vcombine.low %v150_v12, %v158_v16  ;;  %v144_v37 = vld [vmem:[#allocation5 + $0x58] sm:$0xff]  ;;  %v9416_v40 = vpack.c.bf16 %v131_v33, %v131_v33 }
  0x98   :  { %607 = vmatprep.subr.bf16.mxu0 %v8309_v7  ;;  %v8325_v17 = vcombine.high %v165_v8, %v173_v9  ;;  %v181_v21 = vld [vmem:[#allocation5 + $0x180] sm:$0xff]  ;;  %v8324_v24 = vcombine.low %v165_v8, %v173_v9  ;;  %648 = vmatprep.subr.bf16.mxu1 %v8311_v18  ;;  %v8327_v25 = vcombine.high %v166_v19, %v174_v20  ;;  %v182_v27 = vld [vmem:[#allocation5 + $0x188] sm:$0xff]  ;;  %v151_v38 = vld [vmem:[#allocation5 + $0x90] sm:$0xff]  ;;  %p9225_p11 = por %p9224_p10, %p9223_p9 }
  0x99   :  { %v189_v22 = vld [vmem:[#allocation5 + $0x1c0] sm:$0xff]  ;;  %v190_v28 = vld [vmem:[#allocation5 + $0x1c8] sm:$0xff]  ;;  %v8326_v31 = vcombine.low %v166_v19, %v174_v20  ;;  %v159_v39 = vld [vmem:[#allocation5 + $0xd0] sm:$0xff]  ;;  %v8299_v43 = vcombine.high %v136_v36, %v144_v37  ;;  %v8298_v49 = vcombine.low %v136_v36, %v144_v37 }
  0x9a   :  { %v8341_v26 = vcombine.high %v181_v21, %v189_v22  ;;  %v8340_v32 = vcombine.low %v181_v21, %v189_v22  ;;  %v8343_v34 = vcombine.high %v182_v27, %v190_v28  ;;  %v8342_v41 = vcombine.low %v182_v27, %v190_v28  ;;  %v152_v45 = vld [vmem:[#allocation5 + $0x98] sm:$0xff]  ;;  %v167_v47 = vld [vmem:[#allocation5 + $0x110] sm:$0xff]  ;;  %v137_v63 = vld [vmem:[#allocation5 + $0x20] sm:$0xff]  ;;  %p9226_p12 = pnand %p9225_p11, %p9219_p8 }
  0x9b   :  { %608 = vmatpush1.bf16.msra.mxu0 %v8308_v13  ;;  %649 = vmatpush1.bf16.msra.mxu1 %v8310_v23  ;;  %v8313_v44 = vcombine.high %v151_v38, %v159_v39  ;;  %v160_v46 = vld [vmem:[#allocation5 + $0xd8] sm:$0xff]  ;;  %v175_v48 = vld [vmem:[#allocation5 + $0x150] sm:$0xff]  ;;  %v8312_v50 = vcombine.low %v151_v38, %v159_v39  ;;  %v145_v1 = vld [vmem:[#allocation5 + $0x60] sm:$0xff] }
  0x9c   :  { %609 = vmatprep.subr.bf16.mxu0 %v8325_v17  ;;  %650 = vmatprep.subr.bf16.mxu1 %v8327_v25  ;;  %v8315_v51 = vcombine.high %v152_v45, %v160_v46  ;;  %v8329_v52 = vcombine.high %v167_v47, %v175_v48  ;;  %v168_v53 = vld [vmem:[#allocation5 + $0x118] sm:$0xff]  ;;  %v183_v55 = vld [vmem:[#allocation5 + $0x190] sm:$0xff]  ;;  %v8314_v57 = vcombine.low %v152_v45, %v160_v46  ;;  %v138_v6 = vld [vmem:[#allocation5 + $0x28] sm:$0xff] }
  0x9d   :  { %v176_v54 = vld [vmem:[#allocation5 + $0x158] sm:$0xff]  ;;  %v191_v56 = vld [vmem:[#allocation5 + $0x1d0] sm:$0xff]  ;;  %v8328_v58 = vcombine.low %v167_v47, %v175_v48  ;;  %v8301_v5 = vcombine.high %v137_v63, %v145_v1  ;;  %v146_v7 = vld [vmem:[#allocation5 + $0x68] sm:$0xff]  ;;  %v8300_v13 = vcombine.low %v137_v63, %v145_v1 }
  0x9e   :  { %v8331_v59 = vcombine.high %v168_v53, %v176_v54  ;;  %v8345_v60 = vcombine.high %v183_v55, %v191_v56  ;;  %v184_v61 = vld [vmem:[#allocation5 + $0x198] sm:$0xff]  ;;  %v8330_v2 = vcombine.low %v168_v53, %v176_v54  ;;  %v8344_v3 = vcombine.low %v183_v55, %v191_v56  ;;  %v153_v8 = vld [vmem:[#allocation5 + $0xa0] sm:$0xff]  ;;  %v154_v11 = vld [vmem:[#allocation5 + $0xa8] sm:$0xff] }
  0x9f   :  { %610 = vmatpush1.bf16.msra.mxu0 %v8324_v24  ;;  %651 = vmatpush1.bf16.msra.mxu1 %v8326_v31  ;;  %v192_v62 = vld [vmem:[#allocation5 + $0x1d8] sm:$0xff]  ;;  %v161_v9 = vld [vmem:[#allocation5 + $0xe0] sm:$0xff]  ;;  %v162_v12 = vld [vmem:[#allocation5 + $0xe8] sm:$0xff]  ;;  %v8303_v14 = vcombine.high %v138_v6, %v146_v7  ;;  %v8302_v18 = vcombine.low %v138_v6, %v146_v7 }
  0xa0   :  { %611 = vmatprep.subr.bf16.mxu0 %v8341_v26  ;;  %652 = vmatprep.subr.bf16.mxu1 %v8343_v34  ;;  %v8347_v4 = vcombine.high %v184_v61, %v192_v62  ;;  %v8346_v10 = vcombine.low %v184_v61, %v192_v62  ;;  %v169_v15 = vld [vmem:[#allocation5 + $0x120] sm:$0xff]  ;;  %v8317_v17 = vcombine.high %v153_v8, %v161_v9  ;;  %v170_v19 = vld [vmem:[#allocation5 + $0x128] sm:$0xff]  ;;  %v139_v31 = vld [vmem:[#allocation5 + $0x30] sm:$0xff] }
  0xa1   :  { %v177_v16 = vld [vmem:[#allocation5 + $0x160] sm:$0xff]  ;;  %v178_v20 = vld [vmem:[#allocation5 + $0x168] sm:$0xff]  ;;  %v8316_v21 = vcombine.low %v153_v8, %v161_v9  ;;  %v8319_v22 = vcombine.high %v154_v11, %v162_v12  ;;  %v8318_v26 = vcombine.low %v154_v11, %v162_v12  ;;  %v148_v36 = vld [vmem:[#allocation5 + $0x78] sm:$0xff] }
  0xa2   :  { %v185_v23 = vld [vmem:[#allocation5 + $0x1a0] sm:$0xff]  ;;  %v8333_v25 = vcombine.high %v169_v15, %v177_v16  ;;  %v186_v27 = vld [vmem:[#allocation5 + $0x1a8] sm:$0xff]  ;;  %v8332_v29 = vcombine.low %v169_v15, %v177_v16  ;;  %v8335_v30 = vcombine.high %v170_v19, %v178_v20  ;;  %v8334_v34 = vcombine.low %v170_v19, %v178_v20  ;;  %v155_v39 = vld [vmem:[#allocation5 + $0xb0] sm:$0xff] }
  0xa3   :  { %612 = vmatpush1.bf16.msra.mxu0 %v8340_v32  ;;  %653 = vmatpush1.bf16.msra.mxu1 %v8342_v41  ;;  %v193_v24 = vld [vmem:[#allocation5 + $0x1e0] sm:$0xff]  ;;  %v194_v28 = vld [vmem:[#allocation5 + $0x1e8] sm:$0xff]  ;;  %v147_v32 = vld [vmem:[#allocation5 + $0x70] sm:$0xff] }
  0xa4   :  { %687 = vmatprep.subr.bf16.mxu0 %v8297_v35  ;;  %728 = vmatprep.subr.bf16.mxu1 %v8299_v43  ;;  %v8349_v33 = vcombine.high %v185_v23, %v193_v24  ;;  %v140_v35 = vld [vmem:[#allocation5 + $0x38] sm:$0xff]  ;;  %v8348_v37 = vcombine.low %v185_v23, %v193_v24  ;;  %v8351_v38 = vcombine.high %v186_v27, %v194_v28  ;;  %v163_v41 = vld [vmem:[#allocation5 + $0xf0] sm:$0xff]  ;;  %v967_v9 = vld [vmem:[#allocation8 + $0x10] sm:$0xff] }
  0xa5   :  { %v8350_v43 = vcombine.low %v186_v27, %v194_v28  ;;  %v164_v45 = vld [vmem:[#allocation5 + $0xf8] sm:$0xff]  ;;  %v8304_v46 = vcombine.low %v139_v31, %v147_v32  ;;  %v8307_v47 = vcombine.high %v140_v35, %v148_v36  ;;  %v171_v48 = vld [vmem:[#allocation5 + $0x130] sm:$0xff]  ;;  %v8320_v54 = vcombine.low %v155_v39, %v163_v41  ;;  %v984_v15 = vld [vmem:[#allocation8 + $0x98] sm:$0xff] }
  0xa6   :  { %8356 = vmatmul.mubr.msk.bf16.vlgmr.msra.gmra.mrb[0].mxu0 %vm601_vm0, %v9416_v40  ;;  %8357 = vmatmul.mubr.msk.bf16.vlgmr.msra.gmra.mrb[0].mxu1 %vm601_vm0, %v9416_v40  ;;  %v180_v53 = vld [vmem:[#allocation5 + $0x178] sm:$0xff]  ;;  %v187_v56 = vld [vmem:[#allocation5 + $0x1b0] sm:$0xff]  ;;  %v983_v20 = vld [vmem:[#allocation8 + $0x90] sm:$0xff] }
  0xa7   :  { %688 = vmatpush1.bf16.msra.mxu0 %v8296_v42  ;;  %719 = vmatprep.mubr.bf16.mxu0 %v9264_v0  ;;  %v8305_v42 = vcombine.high %v139_v31, %v147_v32  ;;  %v196_v61 = vld [vmem:[#allocation5 + $0x1f8] sm:$0xff]  ;;  %v981_v16 = vld [vmem:[#allocation8 + $0x80] sm:$0xff]  ;;  %v1000_v27 = vld [vmem:[#allocation8 + $0x118] sm:$0xff]  ;;  %v2039_v32 = vunpack.c.h.s8.bf16 %v983_v20 }
  0xa8   :  { %689 = vmatprep.subr.bf16.mxu0 %v8313_v44  ;;  %729 = vmatpush1.bf16.msra.mxu1 %v8298_v49  ;;  %v156_v44 = vld [vmem:[#allocation5 + $0xb8] sm:$0xff]  ;;  %v179_v49 = vld [vmem:[#allocation5 + $0x170] sm:$0xff]  ;;  %v2021_v23 = vunpack.c.l.s8.bf16 %v981_v16  ;;  %v999_v31 = vld [vmem:[#allocation8 + $0x110] sm:$0xff] }
  0xa9   :  { %760 = vmatprep.mubr.bf16.mxu1 %v9264_v0  ;;  %730 = vmatprep.subr.bf16.mxu1 %v8315_v51  ;;  %v8306_v51 = vcombine.low %v140_v35, %v148_v36  ;;  %v8323_v55 = vcombine.high %v156_v44, %v164_v45  ;;  %v8336_v62 = vcombine.low %v171_v48, %v179_v49  ;;  %v966_v1 = vld [vmem:[#allocation8 + $0x8] sm:$0xff]  ;;  %v997_v28 = vld [vmem:[#allocation8 + $0x100] sm:$0xff] }
  0xaa   :  { %v1990_v8 = vunpack.c.l.s8.bf16 %v966_v1  ;;  %v982_v12 = vld [vmem:[#allocation8 + $0x88] sm:$0xff] }
  0xab   :  { %690 = vmatpush1.bf16.msra.mxu0 %v8312_v50  ;;  %v8321_v50 = vcombine.high %v155_v39, %v163_v41  ;;  %v2022_v19 = vunpack.c.l.s8.bf16 %v982_v12  ;;  %v998_v24 = vld [vmem:[#allocation8 + $0x108] sm:$0xff]  ;;  %v1013_v39 = vld [vmem:[#allocation8 + $0x180] sm:$0xff]  ;;  %v2072_v41 = vunpack.c.h.s8.bf16 %v1000_v27 }
  0xac   :  { %691 = vmatprep.subr.bf16.mxu0 %v8329_v52  ;;  %731 = vmatpush1.bf16.msra.mxu1 %v8314_v57  ;;  %v172_v52 = vld [vmem:[#allocation5 + $0x138] sm:$0xff]  ;;  %v195_v57 = vld [vmem:[#allocation5 + $0x1f0] sm:$0xff]  ;;  %v2070_v36 = vunpack.c.h.s8.bf16 %v998_v24 }
  0xad   :  { %732 = vmatprep.subr.bf16.mxu1 %v8331_v59  ;;  %v8322_v59 = vcombine.low %v156_v44, %v164_v45  ;;  %v8339_v63 = vcombine.high %v172_v52, %v180_v53  ;;  %v8352_v6 = vcombine.low %v187_v56, %v195_v57  ;;  %v1014_v35 = vld [vmem:[#allocation8 + $0x188] sm:$0xff]  ;;  %v1015_v44 = vld [vmem:[#allocation8 + $0x190] sm:$0xff]  ;;  %v2071_v45 = vunpack.c.h.s8.bf16 %v999_v31 }
  0xaf   :  { %692 = vmatpush1.bf16.msra.mxu0 %v8328_v58  ;;  %v8337_v58 = vcombine.high %v171_v48, %v179_v49  ;;  %v1030_v48 = vld [vmem:[#allocation8 + $0x208] sm:$0xff]  ;;  %v2102_v49 = vunpack.c.h.s8.bf16 %v1014_v35 }
  0xb0   :  { %693 = vmatprep.subr.bf16.mxu0 %v8345_v60  ;;  %733 = vmatpush1.bf16.msra.mxu1 %v8330_v2  ;;  %v188_v60 = vld [vmem:[#allocation5 + $0x1b8] sm:$0xff]  ;;  %v8353_v2 = vcombine.high %v187_v56, %v195_v57  ;;  %v1031_v56 = vld [vmem:[#allocation8 + $0x210] sm:$0xff]  ;;  %v2103_v57 = vunpack.c.h.s8.bf16 %v1015_v44 }
  0xb1   :  { %734 = vmatprep.subr.bf16.mxu1 %v8347_v4  ;;  %v968_v4 = vld [vmem:[#allocation8 + $0x18] sm:$0xff]  ;;  %v8355_v7 = vcombine.high %v188_v60, %v196_v61 }
  0xb3   :  { %694 = vmatpush1.bf16.msra.mxu0 %v8344_v3  ;;  %v8338_v3 = vcombine.low %v172_v52, %v180_v53  ;;  %v1029_v52 = vld [vmem:[#allocation8 + $0x200] sm:$0xff] }
  0xb4   :  { %769 = vmatprep.subr.bf16.mxu0 %v8301_v5  ;;  %735 = vmatpush1.bf16.msra.mxu1 %v8346_v10  ;;  %v965_v5 = vld [vmem:[#allocation8] sm:$0xff]  ;;  %v1992_v10 = vunpack.c.l.s8.bf16 %v968_v4 }
  0xb5   :  { %810 = vmatprep.subr.bf16.mxu1 %v8303_v14  ;;  %v1989_v11 = vunpack.c.l.s8.bf16 %v965_v5  ;;  %v1991_v14 = vunpack.c.l.s8.bf16 %v967_v9 }
  0xb6   :  { %8358 = vmatmul.mubr.msk.bf16.vlgmr.msra.gmra.mrb[4].mxu0 %vm601_vm0, %v9416_v40 }
  0xb7   :  { %770 = vmatpush1.bf16.msra.mxu0 %v8300_v13  ;;  %801 = vmatprep.mubr.bf16.mxu0 %v9264_v0  ;;  %v2006_v13 = vunpack.c.h.s8.bf16 %v966_v1  ;;  %v2133_v1 = vunpack.c.h.s8.bf16 %v1029_v52 }
  0xb8   :  { %771 = vmatprep.subr.bf16.mxu0 %v8317_v17  ;;  %8359 = vmatmul.mubr.msk.bf16.vlgmr.msra.gmra.mrb[4].mxu1 %vm601_vm0, %v9416_v40  ;;  %v2008_v17 = vunpack.c.h.s8.bf16 %v968_v4 }
  0xb9   :  { %811 = vmatpush1.bf16.msra.mxu1 %v8302_v18  ;;  %842 = vmatprep.mubr.bf16.mxu1 %v9264_v0  ;;  %v2005_v18 = vunpack.c.h.s8.bf16 %v965_v5  ;;  %v1047_v5 = vld [vmem:[#allocation8 + $0x290] sm:$0xff] }
  0xba   :  { %812 = vmatprep.subr.bf16.mxu1 %v8319_v22  ;;  %v2024_v22 = vunpack.c.l.s8.bf16 %v984_v15 }
  0xbb   :  { %772 = vmatpush1.bf16.msra.mxu0 %v8316_v21  ;;  %v2007_v21 = vunpack.c.h.s8.bf16 %v967_v9  ;;  %v1062_v9 = vld [vmem:[#allocation8 + $0x308] sm:$0xff] }
  0xbc   :  { %773 = vmatprep.subr.bf16.mxu0 %v8333_v25  ;;  %v2038_v25 = vunpack.c.h.s8.bf16 %v982_v12 }
  0xbd   :  { %813 = vmatpush1.bf16.msra.mxu1 %v8318_v26  ;;  %v2023_v26 = vunpack.c.l.s8.bf16 %v983_v20  ;;  %v1078_v20 = vld [vmem:[#allocation8 + $0x388] sm:$0xff] }
  0xbe   :  { %814 = vmatprep.subr.bf16.mxu1 %v8335_v30  ;;  %v2037_v30 = vunpack.c.h.s8.bf16 %v981_v16  ;;  %v1063_v16 = vld [vmem:[#allocation8 + $0x310] sm:$0xff] }
  0xbf   :  { %774 = vmatpush1.bf16.msra.mxu0 %v8332_v29  ;;  %v2040_v29 = vunpack.c.h.s8.bf16 %v984_v15  ;;  %v1061_v15 = vld [vmem:[#allocation8 + $0x300] sm:$0xff] }
  0xc0   :  { %775 = vmatprep.subr.bf16.mxu0 %v8349_v33  ;;  %v2056_v33 = vunpack.c.l.s8.bf16 %v1000_v27  ;;  %v1077_v27 = vld [vmem:[#allocation8 + $0x380] sm:$0xff] }
  0xc1   :  { %815 = vmatpush1.bf16.msra.mxu1 %v8334_v34  ;;  %v2053_v34 = vunpack.c.l.s8.bf16 %v997_v28 }
  0xc2   :  { %816 = vmatprep.subr.bf16.mxu1 %v8351_v38  ;;  %v1016_v38 = vld [vmem:[#allocation8 + $0x198] sm:$0xff] }
  0xc3   :  { %776 = vmatpush1.bf16.msra.mxu0 %v8348_v37  ;;  %v2055_v37 = vunpack.c.l.s8.bf16 %v999_v31  ;;  %v2104_v53 = vunpack.c.h.s8.bf16 %v1016_v38  ;;  %v2230_v31 = vunpack.c.h.s8.bf16 %v1078_v20 }
  0xc4   :  { %851 = vmatprep.subr.bf16.mxu0 %v8305_v42  ;;  %v2069_v42 = vunpack.c.h.s8.bf16 %v997_v28  ;;  %v2199_v28 = vunpack.c.h.s8.bf16 %v1063_v16 }
  0xc5   :  { %817 = vmatpush1.bf16.msra.mxu1 %v8350_v43  ;;  %v2086_v43 = vunpack.c.l.s8.bf16 %v1014_v35  ;;  %v2229_v35 = vunpack.c.h.s8.bf16 %v1077_v27 }
  0xc6   :  { %8360 = vmatmul.mubr.msk.bf16.vlgmr.msra.gmra.mrb[8].mxu0 %vm601_vm0, %v9416_v40  ;;  %892 = vmatprep.subr.bf16.mxu1 %v8307_v47  ;;  %v2085_v47 = vunpack.c.l.s8.bf16 %v1013_v39 }
  0xc7   :  { %852 = vmatpush1.bf16.msra.mxu0 %v8304_v46  ;;  %883 = vmatprep.mubr.bf16.mxu0 %v9264_v0  ;;  %v2088_v46 = vunpack.c.l.s8.bf16 %v1016_v38 }
  0xc8   :  { %853 = vmatprep.subr.bf16.mxu0 %v8321_v50  ;;  %8361 = vmatmul.mubr.msk.bf16.vlgmr.msra.gmra.mrb[8].mxu1 %vm601_vm0, %v9416_v40  ;;  %v2087_v50 = vunpack.c.l.s8.bf16 %v1015_v44  ;;  %v9445_v44 = vld [vmem:[#allocation7] sm:$0xff] }
  0xc9   :  { %893 = vmatpush1.bf16.msra.mxu1 %v8306_v51  ;;  %924 = vmatprep.mubr.bf16.mxu1 %v9264_v0  ;;  %v8354_v0 = vcombine.low %v188_v60, %v196_v61  ;;  %v1032_v51 = vld [vmem:[#allocation8 + $0x218] sm:$0xff]  ;;  %v1046_v60 = vld [vmem:[#allocation8 + $0x288] sm:$0xff]  ;;  %v2134_v61 = vunpack.c.h.s8.bf16 %v1030_v48 }
  0xca   :  { %894 = vmatprep.subr.bf16.mxu1 %v8323_v55  ;;  %v2118_v55 = vunpack.c.l.s8.bf16 %v1030_v48  ;;  %v2150_v4 = vunpack.c.l.s8.bf16 %v1046_v60 }
  0xcb   :  { %854 = vmatpush1.bf16.msra.mxu0 %v8320_v54  ;;  %v2101_v54 = vunpack.c.h.s8.bf16 %v1013_v39 }
  0xcc   :  { %855 = vmatprep.subr.bf16.mxu0 %v8337_v58  ;;  %v2120_v58 = vunpack.c.l.s8.bf16 %v1032_v51 }
  0xcd   :  { %895 = vmatpush1.bf16.msra.mxu1 %v8322_v59  ;;  %v2117_v59 = vunpack.c.l.s8.bf16 %v1029_v52 }
  0xce   :  { %896 = vmatprep.subr.bf16.mxu1 %v8339_v63  ;;  %v2136_v63 = vunpack.c.h.s8.bf16 %v1032_v51 }
  0xcf   :  { %856 = vmatpush1.bf16.msra.mxu0 %v8336_v62  ;;  %v2119_v62 = vunpack.c.l.s8.bf16 %v1031_v56 }
  0xd0   :  { %857 = vmatprep.subr.bf16.mxu0 %v8353_v2  ;;  %v1048_v2 = vld [vmem:[#allocation8 + $0x298] sm:$0xff] }
  0xd1   :  { %897 = vmatpush1.bf16.msra.mxu1 %v8338_v3  ;;  %v1045_v3 = vld [vmem:[#allocation8 + $0x280] sm:$0xff] }
  0xd2   :  { %898 = vmatprep.subr.bf16.mxu1 %v8355_v7  ;;  %v2152_v7 = vunpack.c.l.s8.bf16 %v1048_v2  ;;  %v2165_v12 = vunpack.c.h.s8.bf16 %v1045_v3 }
  0xd3   :  { %858 = vmatpush1.bf16.msra.mxu0 %v8352_v6  ;;  %v2135_v6 = vunpack.c.h.s8.bf16 %v1031_v56 }
  0xd4   :  { %4037 = vmatprep.subr.bf16.mxu0 %v1990_v8  ;;  %v2149_v8 = vunpack.c.l.s8.bf16 %v1045_v3 }
  0xd5   :  { %899 = vmatpush1.bf16.msra.mxu1 %v8354_v0  ;;  %v2166_v0 = vunpack.c.h.s8.bf16 %v1046_v60 }
  0xd6   :  { %8362 = vmatmul.mubr.msk.bf16.vlgmr.msra.gmra.mrb[12].mxu0 %vm601_vm0, %v9416_v40  ;;  %4365 = vmatprep.subr.bf16.mxu1 %v1992_v10  ;;  %v2151_v10 = vunpack.c.l.s8.bf16 %v1047_v5 }
  0xd7   :  { %4038 = vmatpush1.bf16.msra.mxu0 %v1989_v11  ;;  %v2168_v11 = vunpack.c.h.s8.bf16 %v1048_v2 }
  0xd8   :  { %4039 = vmatprep.subr.bf16.mxu0 %v2006_v13  ;;  %8363 = vmatmul.mubr.msk.bf16.vlgmr.msra.gmra.mrb[12].mxu1 %vm601_vm0, %v9416_v40  ;;  %v2054_v40 = vunpack.c.l.s8.bf16 %v998_v24  ;;  %v1064_v13 = vld [vmem:[#allocation8 + $0x318] sm:$0xff]  ;;  %v2197_v24 = vunpack.c.h.s8.bf16 %v1061_v15 }
  0xd9   :  { %4366 = vmatpush1.bf16.msra.mxu1 %v1991_v14  ;;  %v2182_v14 = vunpack.c.l.s8.bf16 %v1062_v9 }
  0xda   :  { %4367 = vmatprep.subr.bf16.mxu1 %v2008_v17  ;;  %v2167_v17 = vunpack.c.h.s8.bf16 %v1047_v5 }
  0xdb   :  { %4040 = vmatpush1.bf16.msra.mxu0 %v2005_v18  ;;  %v2184_v18 = vunpack.c.l.s8.bf16 %v1064_v13 }
  0xdc   :  { %4041 = vmatprep.subr.bf16.mxu0 %v2022_v19  ;;  %v2181_v19 = vunpack.c.l.s8.bf16 %v1061_v15  ;;  %v1109_v15 = vld [vmem:[#allocation8 + $0x480] sm:$0xff] }
  0xdd   :  { %4368 = vmatpush1.bf16.msra.mxu1 %v2007_v21  ;;  %v2198_v21 = vunpack.c.h.s8.bf16 %v1062_v9  ;;  %v1110_v9 = vld [vmem:[#allocation8 + $0x488] sm:$0xff] }
  0xde   :  { %4369 = vmatprep.subr.bf16.mxu1 %v2024_v22  ;;  %v2183_v22 = vunpack.c.l.s8.bf16 %v1063_v16  ;;  %v1111_v16 = vld [vmem:[#allocation8 + $0x490] sm:$0xff] }
  0xdf   :  { %4042 = vmatpush1.bf16.msra.mxu0 %v2021_v23  ;;  %v2200_v23 = vunpack.c.h.s8.bf16 %v1064_v13  ;;  %v2278_v13 = vunpack.c.l.s8.bf16 %v1110_v9 }
  0xe0   :  { %4043 = vmatprep.subr.bf16.mxu0 %v2038_v25  ;;  %v2214_v25 = vunpack.c.l.s8.bf16 %v1078_v20 }
  0xe1   :  { %4370 = vmatpush1.bf16.msra.mxu1 %v2023_v26  ;;  %v1080_v26 = vld [vmem:[#allocation8 + $0x398] sm:$0xff] }
  0xe2   :  { %4371 = vmatprep.subr.bf16.mxu1 %v2040_v29  ;;  %v2216_v29 = vunpack.c.l.s8.bf16 %v1080_v26 }
  0xe3   :  { %4044 = vmatpush1.bf16.msra.mxu0 %v2037_v30  ;;  %v2213_v30 = vunpack.c.l.s8.bf16 %v1077_v27 }
  0xe4   :  { %4045 = vmatprep.subr.bf16.mxu0 %v2054_v40  ;;  %v1079_v40 = vld [vmem:[#allocation8 + $0x390] sm:$0xff] }
  0xe5   :  { %4372 = vmatpush1.bf16.msra.mxu1 %v2039_v32  ;;  %v1094_v32 = vld [vmem:[#allocation8 + $0x408] sm:$0xff]  ;;  %v2231_v38 = vunpack.c.h.s8.bf16 %v1079_v40 }
  0xe6   :  { %4373 = vmatprep.subr.bf16.mxu1 %v2056_v33  ;;  %v2215_v33 = vunpack.c.l.s8.bf16 %v1079_v40  ;;  %v1127_v40 = vld [vmem:[#allocation8 + $0x510] sm:$0xff] }
  0xe7   :  { %4046 = vmatpush1.bf16.msra.mxu0 %v2053_v34  ;;  %v2232_v34 = vunpack.c.h.s8.bf16 %v1080_v26  ;;  %v2295_v26 = vunpack.c.h.s8.bf16 %v1111_v16 }
  0xe8   :  { %4047 = vmatprep.subr.bf16.mxu0 %v2070_v36  ;;  %v2246_v36 = vunpack.c.l.s8.bf16 %v1094_v32 }
  0xe9   :  { %4374 = vmatpush1.bf16.msra.mxu1 %v2055_v37  ;;  %v1096_v37 = vld [vmem:[#allocation8 + $0x418] sm:$0xff] }
  0xea   :  { %4375 = vmatprep.subr.bf16.mxu1 %v2072_v41  ;;  %v2248_v39 = vunpack.c.l.s8.bf16 %v1096_v37  ;;  %v201_v41 = vlaneseq }
  0xeb   :  { %4048 = vmatpush1.bf16.msra.mxu0 %v2069_v42 }
  0xec   :  { %4049 = vmatprep.subr.bf16.mxu0 %v2086_v43  ;;  %v9440_v42 = vshrl.u32 %v201_v41, 7  ;;  %v1142_v41 = vld [vmem:[#allocation8 + $0x588] sm:$0xff] }
  0xed   :  { %4376 = vmatpush1.bf16.msra.mxu1 %v2071_v45 }
  0xee   :  { %4377 = vmatprep.subr.bf16.mxu1 %v2088_v46  ;;  %v9443_v43 = vsub.s32 0, %v9440_v42  ;;  %v9448_v45 = vsub.s32 1, %v9440_v42 }
  0xef   :  { %4050 = vmatpush1.bf16.msra.mxu0 %v2085_v47  ;;  %v9453_v47 = vsub.s32 3, %v9440_v42 }
  0xf0   :  { %4051 = vmatprep.subr.bf16.mxu0 %v2102_v49  ;;  %v204_v46 = vrot.slane %v9445_v44, %v9443_v43  ;;  %v208_v48 = vrot.slane %v9445_v44, %v9448_v45 }
  0xf1   :  { %4378 = vmatpush1.bf16.msra.mxu1 %v2087_v50  ;;  %v216_v52 = vrot.slane %v9445_v44, %v9453_v47 }
  0xf2   :  { %4379 = vmatprep.subr.bf16.mxu1 %v2104_v53 }
  0xf3   :  { %4052 = vmatpush1.bf16.msra.mxu0 %v2101_v54 }
  0xf4   :  { %4053 = vmatprep.subr.bf16.mxu0 %v2118_v55 }
  0xf5   :  { %4380 = vmatpush1.bf16.msra.mxu1 %v2103_v57  ;;  %v1093_v57 = vld [vmem:[#allocation8 + $0x400] sm:$0xff] }
  0xf6   :  { %4381 = vmatprep.subr.bf16.mxu1 %v2120_v58  ;;  %v1095_v58 = vld [vmem:[#allocation8 + $0x410] sm:$0xff]  ;;  %v2245_v2 = vunpack.c.l.s8.bf16 %v1093_v57 }
  0xf7   :  { %4054 = vmatpush1.bf16.msra.mxu0 %v2117_v59  ;;  %v2247_v3 = vunpack.c.l.s8.bf16 %v1095_v58 }
  0xf8   :  { %4055 = vmatprep.subr.bf16.mxu0 %v2134_v61 }
  0xf9   :  { %4382 = vmatpush1.bf16.msra.mxu1 %v2119_v62 }
  0xfa   :  { %4383 = vmatprep.subr.bf16.mxu1 %v2136_v63 }
  0xfb   :  { %4056 = vmatpush1.bf16.msra.mxu0 %v2133_v1 }
  0xfc   :  { %4057 = vmatprep.subr.bf16.mxu0 %v2150_v4 }
  0xfd   :  { %4384 = vmatpush1.bf16.msra.mxu1 %v2135_v6  ;;  %v2262_v6 = vunpack.c.h.s8.bf16 %v1094_v32 }
  0xfe   :  { %4385 = vmatprep.subr.bf16.mxu1 %v2152_v7  ;;  %v2264_v7 = vunpack.c.h.s8.bf16 %v1096_v37 }
  0xff   :  { %4058 = vmatpush1.bf16.msra.mxu0 %v2149_v8 }
 0x100   :  { %4059 = vmatprep.subr.bf16.mxu0 %v2166_v0  ;;  %v1112_v0 = vld [vmem:[#allocation8 + $0x498] sm:$0xff] }
 0x101   :  { %4386 = vmatpush1.bf16.msra.mxu1 %v2151_v10  ;;  %v2296_v20 = vunpack.c.h.s8.bf16 %v1112_v0 }
 0x102   :  { %4387 = vmatprep.subr.bf16.mxu1 %v2168_v11  ;;  %v2261_v11 = vunpack.c.h.s8.bf16 %v1093_v57  ;;  %v2358_v57 = vunpack.c.h.s8.bf16 %v1142_v41 }
 0x103   :  { %4060 = vmatpush1.bf16.msra.mxu0 %v2165_v12  ;;  %v2263_v12 = vunpack.c.h.s8.bf16 %v1095_v58 }
 0x104   :  { %4061 = vmatprep.subr.bf16.mxu0 %v2182_v14  ;;  %v2280_v14 = vunpack.c.l.s8.bf16 %v1112_v0 }
 0x105   :  { %4388 = vmatpush1.bf16.msra.mxu1 %v2167_v17  ;;  %v2277_v17 = vunpack.c.l.s8.bf16 %v1109_v15 }
 0x106   :  { %4389 = vmatprep.subr.bf16.mxu1 %v2184_v18  ;;  %v2279_v18 = vunpack.c.l.s8.bf16 %v1111_v16 }
 0x107   :  { %4062 = vmatpush1.bf16.msra.mxu0 %v2181_v19  ;;  %v2294_v19 = vunpack.c.h.s8.bf16 %v1110_v9 }
 0x108   :  { %4063 = vmatprep.subr.bf16.mxu0 %v2198_v21  ;;  %v1126_v21 = vld [vmem:[#allocation8 + $0x508] sm:$0xff] }
 0x109   :  { %4390 = vmatpush1.bf16.msra.mxu1 %v2183_v22  ;;  %v1128_v22 = vld [vmem:[#allocation8 + $0x518] sm:$0xff] }
 0x10a   :  { %4391 = vmatprep.subr.bf16.mxu1 %v2200_v23 }
 0x10b   :  { %4064 = vmatpush1.bf16.msra.mxu0 %v2197_v24 }
 0x10c   :  { %4065 = vmatprep.subr.bf16.mxu0 %v2214_v25  ;;  %v2293_v25 = vunpack.c.h.s8.bf16 %v1109_v15 }
 0x10d   :  { %4392 = vmatpush1.bf16.msra.mxu1 %v2199_v28  ;;  %v2310_v28 = vunpack.c.l.s8.bf16 %v1126_v21 }
 0x10e   :  { %4393 = vmatprep.subr.bf16.mxu1 %v2216_v29  ;;  %v2312_v29 = vunpack.c.l.s8.bf16 %v1128_v22 }
 0x10f   :  { %4066 = vmatpush1.bf16.msra.mxu0 %v2213_v30  ;;  %v1125_v30 = vld [vmem:[#allocation8 + $0x500] sm:$0xff] }
 0x110   :  { %4067 = vmatprep.subr.bf16.mxu0 %v2230_v31 }
 0x111   :  { %4394 = vmatpush1.bf16.msra.mxu1 %v2215_v33 }
 0x112   :  { %4395 = vmatprep.subr.bf16.mxu1 %v2232_v34 }
 0x113   :  { %4068 = vmatpush1.bf16.msra.mxu0 %v2229_v35  ;;  %v2309_v35 = vunpack.c.l.s8.bf16 %v1125_v30 }
 0x114   :  { %4078 = vmatprep.subr.bf16.mxu0 %v2246_v36  ;;  %v2311_v36 = vunpack.c.l.s8.bf16 %v1127_v40 }
 0x115   :  { %4396 = vmatpush1.bf16.msra.mxu1 %v2231_v38  ;;  %v2326_v38 = vunpack.c.h.s8.bf16 %v1126_v21 }
 0x116   :  { %4406 = vmatprep.subr.bf16.mxu1 %v2248_v39  ;;  %v2328_v39 = vunpack.c.h.s8.bf16 %v1128_v22 }
 0x179   :  { %v639_v49 = vpop.f32.mrb[0].mxu0  ;;  %v9459_v59 = vpop.f32.mrb[0].mxu1 }
 0x17a   :  { %v640_v50 = vadd.f32 %v639_v49, %v204_v46  ;;  %v641_v51 = vpop.f32.mrb[1].mxu0  ;;  %v682_v61 = vpop.f32.mrb[1].mxu1  ;;  %v1144_v46 = vld [vmem:[#allocation8 + $0x598] sm:$0xff]  ;;  %v2327_v49 = vunpack.c.h.s8.bf16 %v1127_v40 }
 0x17b   :  { %v642_v53 = vadd.f32 %v641_v51, %v208_v48  ;;  %v643_v54 = vpop.f32.mrb[2].mxu0  ;;  %v683_v62 = vadd.f32 %v682_v61, %v216_v52  ;;  %v684_v63 = vpop.f32.mrb[2].mxu1  ;;  %v2325_v48 = vunpack.c.h.s8.bf16 %v1125_v30  ;;  %v2344_v51 = vunpack.c.l.s8.bf16 %v1144_v46  ;;  %v1141_v52 = vld [vmem:[#allocation8 + $0x580] sm:$0xff]  ;;  %v1158_v61 = vld [vmem:[#allocation8 + $0x608] sm:$0xff] }
 0x17c   :  { %v933_v55 = vmax.f32 %v640_v50, 0.0  ;;  %v644_v56 = vpop.f32.mrb[3].mxu0  ;;  %v685_v4 = vpop.f32.mrb[3].mxu1  ;;  %v2342_v50 = vunpack.c.l.s8.bf16 %v1142_v41  ;;  %v2341_v54 = vunpack.c.l.s8.bf16 %v1141_v52  ;;  %v2360_v58 = vunpack.c.h.s8.bf16 %v1144_v46 }
 0x17d   :  { %v934_v60 = vmax.f32 %v642_v53, 0.0  ;;  %v936_v8 = vmax.f32 %v683_v62, 0.0  ;;  %v1143_v53 = vld [vmem:[#allocation8 + $0x590] sm:$0xff]  ;;  %v9482_v56 = vsub.s32 2, %v9440_v42  ;;  %v1160_v62 = vld [vmem:[#allocation8 + $0x618] sm:$0xff]  ;;  %v2374_v9 = vunpack.c.l.s8.bf16 %v1158_v61 }
 0x17e   :  { %v9463_v5 = vpack.c.bf16 %v933_v55, %v933_v55  ;;  %v2343_v55 = vunpack.c.l.s8.bf16 %v1143_v53  ;;  %v2376_v0 = vunpack.c.l.s8.bf16 %v1160_v62  ;;  %v2390_v22 = vunpack.c.h.s8.bf16 %v1158_v61 }
 0x17f   :  { %v9461_v1 = vpack.c.bf16 %v934_v60, %v934_v60  ;;  %v9469_v10 = vpack.c.bf16 %v936_v8, %v936_v8  ;;  %v9484_v60 = vld [vmem:[#allocation7 + $0x8] sm:$0xff]  ;;  %v9507_v41 = vsub.s32 6, %v9440_v42 }
 0x180   :  { %v248_v4 = vrot.slane %v9484_v60, %v9453_v47 }
 0x181   :  { %4069 = vmatprep.mubr.bf16.mxu0 %v9461_v1  ;;  %4397 = vmatprep.mubr.bf16.mxu1 %v9461_v1 }
 0x182   :  { %4070 = vmatmul.mubr.bf16.vlgmr.msra.gmra.mrb[16].mxu0 %v9463_v5  ;;  %4398 = vmatmul.mubr.bf16.vlgmr.msra.gmra.mrb[16].mxu1 %v9463_v5 }
 0x183   :  { %4079 = vmatpush1.bf16.msra.mxu0 %v2245_v2  ;;  %4407 = vmatpush1.bf16.msra.mxu1 %v2247_v3  ;;  %v244_v2 = vrot.slane %v9484_v60, %v9482_v56 }
 0x184   :  { %4080 = vmatprep.subr.bf16.mxu0 %v2262_v6  ;;  %4408 = vmatprep.subr.bf16.mxu1 %v2264_v7  ;;  %v2357_v6 = vunpack.c.h.s8.bf16 %v1141_v52  ;;  %v2359_v7 = vunpack.c.h.s8.bf16 %v1143_v53  ;;  %v1192_v52 = vld [vmem:[#allocation8 + $0x718] sm:$0xff] }
 0x185   :  { %4110 = vmatprep.mubr.bf16.mxu0 %v9469_v10  ;;  %4438 = vmatprep.mubr.bf16.mxu1 %v9469_v10 }
 0x187   :  { %4081 = vmatpush1.bf16.msra.mxu0 %v2261_v11  ;;  %4409 = vmatpush1.bf16.msra.mxu1 %v2263_v12  ;;  %v1157_v11 = vld [vmem:[#allocation8 + $0x600] sm:$0xff]  ;;  %v1159_v12 = vld [vmem:[#allocation8 + $0x610] sm:$0xff] }
 0x188   :  { %4082 = vmatprep.subr.bf16.mxu0 %v2278_v13  ;;  %4410 = vmatprep.subr.bf16.mxu1 %v2280_v14 }
 0x189   :  { %v9473_v23 = vpop.f32.mrb[4].mxu0 }
 0x18a   :  { %v9475_v24 = vpop.f32.mrb[5].mxu0 }
 0x18b   :  { %4083 = vmatpush1.bf16.msra.mxu0 %v2277_v17  ;;  %4411 = vmatpush1.bf16.msra.mxu1 %v2279_v18  ;;  %v725_v27 = vpop.f32.mrb[6].mxu0  ;;  %v9477_v31 = vpop.f32.mrb[4].mxu1 }
 0x18c   :  { %4084 = vmatprep.subr.bf16.mxu0 %v2294_v19  ;;  %4412 = vmatprep.subr.bf16.mxu1 %v2296_v20  ;;  %v726_v32 = vpop.f32.mrb[7].mxu0  ;;  %v9479_v33 = vpop.f32.mrb[5].mxu1  ;;  %v2373_v19 = vunpack.c.l.s8.bf16 %v1157_v11  ;;  %v2375_v20 = vunpack.c.l.s8.bf16 %v1159_v12  ;;  %v1176_v27 = vld [vmem:[#allocation8 + $0x698] sm:$0xff] }
 0x18d   :  { %v766_v34 = vpop.f32.mrb[6].mxu1  ;;  %v2408_v40 = vunpack.c.l.s8.bf16 %v1176_v27  ;;  %v1173_v32 = vld [vmem:[#allocation8 + $0x680] sm:$0xff] }
 0x18e   :  { %v767_v37 = vpop.f32.mrb[7].mxu1  ;;  %v1175_v34 = vld [vmem:[#allocation8 + $0x690] sm:$0xff]  ;;  %v2421_v61 = vunpack.c.h.s8.bf16 %v1173_v32 }
 0x18f   :  { %4085 = vmatpush1.bf16.msra.mxu0 %v2293_v25  ;;  %4413 = vmatpush1.bf16.msra.mxu1 %v2295_v26  ;;  %v2392_v25 = vunpack.c.h.s8.bf16 %v1160_v62  ;;  %v1174_v26 = vld [vmem:[#allocation8 + $0x688] sm:$0xff]  ;;  %v2423_v62 = vunpack.c.h.s8.bf16 %v1175_v34 }
 0x190   :  { %4086 = vmatprep.subr.bf16.mxu0 %v2310_v28  ;;  %4414 = vmatprep.subr.bf16.mxu1 %v2312_v29  ;;  %v2389_v28 = vunpack.c.h.s8.bf16 %v1157_v11  ;;  %v2391_v29 = vunpack.c.h.s8.bf16 %v1159_v12  ;;  %v2406_v30 = vunpack.c.l.s8.bf16 %v1174_v26 }
 0x193   :  { %4087 = vmatpush1.bf16.msra.mxu0 %v2309_v35  ;;  %4415 = vmatpush1.bf16.msra.mxu1 %v2311_v36  ;;  %v9499_v35 = vsub.s32 4, %v9440_v42  ;;  %v9502_v36 = vsub.s32 5, %v9440_v42 }
 0x194   :  { %4088 = vmatprep.subr.bf16.mxu0 %v2326_v38  ;;  %4416 = vmatprep.subr.bf16.mxu1 %v2328_v39  ;;  %v2405_v38 = vunpack.c.l.s8.bf16 %v1173_v32  ;;  %v2407_v39 = vunpack.c.l.s8.bf16 %v1175_v34  ;;  %v1207_v32 = vld [vmem:[#allocation8 + $0x790] sm:$0xff] }
 0x195   :  { %v252_v37 = vrot.slane %v9484_v60, %v9499_v35  ;;  %v256_v46 = vrot.slane %v9484_v60, %v9502_v36  ;;  %v224_v34 = vrot.slane %v9445_v44, %v9502_v36 }
 0x197   :  { %4089 = vmatpush1.bf16.msra.mxu0 %v2325_v48  ;;  %4417 = vmatpush1.bf16.msra.mxu1 %v2327_v49  ;;  %v2422_v48 = vunpack.c.h.s8.bf16 %v1174_v26  ;;  %v2424_v49 = vunpack.c.h.s8.bf16 %v1176_v27  ;;  %v212_v26 = vrot.slane %v9445_v44, %v9482_v56 }
 0x198   :  { %4090 = vmatprep.subr.bf16.mxu0 %v2342_v50  ;;  %4418 = vmatprep.subr.bf16.mxu1 %v2344_v51  ;;  %v9512_v50 = vsub.s32 7, %v9440_v42  ;;  %v1190_v51 = vld [vmem:[#allocation8 + $0x708] sm:$0xff] }
 0x199   :  { %v9486_v63 = vpop.f32.mrb[8].mxu0 }
 0x19a   :  { %v9490_v3 = vpop.f32.mrb[9].mxu0 }
 0x19b   :  { %4091 = vmatpush1.bf16.msra.mxu0 %v2341_v54  ;;  %4419 = vmatpush1.bf16.msra.mxu1 %v2343_v55  ;;  %v807_v8 = vpop.f32.mrb[10].mxu0  ;;  %v844_v13 = vpop.f32.mrb[8].mxu1  ;;  %v260_v54 = vrot.slane %v9484_v60, %v9507_v41 }
 0x19c   :  { %4092 = vmatprep.subr.bf16.mxu0 %v2358_v57  ;;  %4420 = vmatprep.subr.bf16.mxu1 %v2360_v58  ;;  %v808_v14 = vpop.f32.mrb[11].mxu0  ;;  %v9494_v15 = vadd.f32 %v844_v13, %v244_v2  ;;  %v846_v16 = vpop.f32.mrb[9].mxu1  ;;  %v264_v58 = vrot.slane %v9484_v60, %v9512_v50  ;;  %v1191_v8 = vld [vmem:[#allocation8 + $0x710] sm:$0xff] }
 0x19d   :  { %v9496_v17 = vadd.f32 %v846_v16, %v248_v4  ;;  %v848_v18 = vpop.f32.mrb[10].mxu1  ;;  %v2438_v4 = vunpack.c.l.s8.bf16 %v1190_v51 }
 0x19e   :  { %v849_v21 = vpop.f32.mrb[11].mxu1  ;;  %v2439_v18 = vunpack.c.l.s8.bf16 %v1191_v8 }
 0x19f   :  { %4093 = vmatpush1.bf16.msra.mxu0 %v2357_v6  ;;  %4421 = vmatpush1.bf16.msra.mxu1 %v2359_v7  ;;  %v2440_v6 = vunpack.c.l.s8.bf16 %v1192_v52  ;;  %v1189_v7 = vld [vmem:[#allocation8 + $0x700] sm:$0xff]  ;;  %v2456_v21 = vunpack.c.h.s8.bf16 %v1192_v52  ;;  %v724_v52 = vadd.f32 %v9475_v24, %v224_v34 }
 0x1a0   :  { %4094 = vmatprep.subr.bf16.mxu0 %v2374_v9  ;;  %4422 = vmatprep.subr.bf16.mxu1 %v2376_v0  ;;  %v2437_v16 = vunpack.c.l.s8.bf16 %v1189_v7  ;;  %v2453_v27 = vunpack.c.h.s8.bf16 %v1189_v7 }
 0x1a3   :  { %4095 = vmatpush1.bf16.msra.mxu0 %v2373_v19  ;;  %4423 = vmatpush1.bf16.msra.mxu1 %v2375_v20  ;;  %v2454_v20 = vunpack.c.h.s8.bf16 %v1190_v51  ;;  %v1224_v51 = vld [vmem:[#allocation8 + $0x818] sm:$0xff] }
 0x1a4   :  { %4096 = vmatprep.subr.bf16.mxu0 %v2390_v22  ;;  %4424 = vmatprep.subr.bf16.mxu1 %v2392_v25  ;;  %v1206_v22 = vld [vmem:[#allocation8 + $0x788] sm:$0xff]  ;;  %v1208_v25 = vld [vmem:[#allocation8 + $0x798] sm:$0xff] }
 0x1a7   :  { %4097 = vmatpush1.bf16.msra.mxu0 %v2389_v28  ;;  %4425 = vmatpush1.bf16.msra.mxu1 %v2391_v29  ;;  %v2455_v28 = vunpack.c.h.s8.bf16 %v1191_v8  ;;  %v2470_v29 = vunpack.c.l.s8.bf16 %v1206_v22  ;;  %v2520_v8 = vunpack.c.h.s8.bf16 %v1224_v51 }
 0x1a8   :  { %4098 = vmatprep.subr.bf16.mxu0 %v2406_v30  ;;  %4426 = vmatprep.subr.bf16.mxu1 %v2408_v40  ;;  %v2472_v30 = vunpack.c.l.s8.bf16 %v1208_v25  ;;  %v1205_v40 = vld [vmem:[#allocation8 + $0x780] sm:$0xff] }
 0x1a9   :  { %v885_v53 = vpop.f32.mrb[12].mxu0 }
 0x1aa   :  { %v9516_v55 = vadd.f32 %v885_v53, %v252_v37  ;;  %v887_v57 = vpop.f32.mrb[13].mxu0  ;;  %v681_v37 = vadd.f32 %v9459_v59, %v212_v26 }
 0x1ab   :  { %4099 = vmatpush1.bf16.msra.mxu0 %v2405_v38  ;;  %4427 = vmatpush1.bf16.msra.mxu1 %v2407_v39  ;;  %v9520_v2 = vadd.f32 %v887_v57, %v256_v46  ;;  %v889_v42 = vpop.f32.mrb[14].mxu0  ;;  %v926_v9 = vpop.f32.mrb[12].mxu1  ;;  %v2469_v38 = vunpack.c.l.s8.bf16 %v1205_v40  ;;  %v2471_v39 = vunpack.c.l.s8.bf16 %v1207_v32  ;;  %v2486_v46 = vunpack.c.h.s8.bf16 %v1206_v22 }
 0x1ac   :  { %4100 = vmatprep.subr.bf16.mxu0 %v2422_v48  ;;  %4428 = vmatprep.subr.bf16.mxu1 %v2424_v49  ;;  %v890_v0 = vpop.f32.mrb[15].mxu0  ;;  %v9522_v11 = vadd.f32 %v926_v9, %v260_v54  ;;  %v928_v12 = vpop.f32.mrb[13].mxu1  ;;  %v2488_v48 = vunpack.c.h.s8.bf16 %v1208_v25  ;;  %v1222_v49 = vld [vmem:[#allocation8 + $0x808] sm:$0xff]  ;;  %v935_v53 = vmax.f32 %v681_v37, 0.0  ;;  %v2485_v54 = vunpack.c.h.s8.bf16 %v1205_v40  ;;  %v1253_v37 = vld [vmem:[#allocation8 + $0x900] sm:$0xff] }
 0x1ad   :  { %v9524_v13 = vadd.f32 %v928_v12, %v264_v58  ;;  %v930_v14 = vpop.f32.mrb[14].mxu1  ;;  %v2487_v57 = vunpack.c.h.s8.bf16 %v1207_v32  ;;  %v2502_v59 = vunpack.c.l.s8.bf16 %v1222_v49  ;;  %v2504_v58 = vunpack.c.l.s8.bf16 %v1224_v51  ;;  %v1238_v9 = vld [vmem:[#allocation8 + $0x888] sm:$0xff]  ;;  %v1240_v0 = vld [vmem:[#allocation8 + $0x898] sm:$0xff] }
 0x1ae   :  { %v931_v19 = vpop.f32.mrb[15].mxu1  ;;  %v938_v42 = vmax.f32 %v724_v52, 0.0  ;;  %v2518_v24 = vunpack.c.h.s8.bf16 %v1222_v49  ;;  %v2550_v26 = vunpack.c.h.s8.bf16 %v1238_v9  ;;  %v1270_v51 = vld [vmem:[#allocation8 + $0x988] sm:$0xff]  ;;  %v1272_v52 = vld [vmem:[#allocation8 + $0x998] sm:$0xff] }
 0x1af   :  { %4101 = vmatpush1.bf16.msra.mxu0 %v2421_v61  ;;  %4429 = vmatpush1.bf16.msra.mxu1 %v2423_v62  ;;  %v1221_v61 = vld [vmem:[#allocation8 + $0x800] sm:$0xff]  ;;  %v1223_v62 = vld [vmem:[#allocation8 + $0x810] sm:$0xff]  ;;  %v2536_v19 = vunpack.c.l.s8.bf16 %v1240_v0 }
 0x1b0   :  { %4102 = vmatprep.subr.bf16.mxu0 %v2438_v4  ;;  %4430 = vmatprep.subr.bf16.mxu1 %v2440_v6  ;;  %v9532_v4 = vpack.c.bf16 %v935_v53, %v935_v53  ;;  %v2501_v6 = vunpack.c.l.s8.bf16 %v1221_v61  ;;  %v2503_v7 = vunpack.c.l.s8.bf16 %v1223_v62  ;;  %v9534_v12 = vpack.c.bf16 %v938_v42, %v938_v42 }
 0x1b1   :  { %v2517_v14 = vunpack.c.h.s8.bf16 %v1221_v61  ;;  %v2581_v53 = vunpack.c.h.s8.bf16 %v1253_v37  ;;  %v1271_v61 = vld [vmem:[#allocation8 + $0x990] sm:$0xff] }
 0x1b2   :  { %v2599_v42 = vunpack.c.l.s8.bf16 %v1271_v61 }
 0x1b3   :  { %4103 = vmatpush1.bf16.msra.mxu0 %v2437_v16  ;;  %4431 = vmatpush1.bf16.msra.mxu1 %v2439_v18  ;;  %v2519_v16 = vunpack.c.h.s8.bf16 %v1223_v62  ;;  %v2534_v18 = vunpack.c.l.s8.bf16 %v1238_v9 }
 0x1b4   :  { %4104 = vmatprep.subr.bf16.mxu0 %v2454_v20  ;;  %4432 = vmatprep.subr.bf16.mxu1 %v2456_v21  ;;  %v1237_v20 = vld [vmem:[#allocation8 + $0x880] sm:$0xff]  ;;  %v1239_v21 = vld [vmem:[#allocation8 + $0x890] sm:$0xff] }
 0x1b5   :  { %v2533_v22 = vunpack.c.l.s8.bf16 %v1237_v20  ;;  %v2535_v25 = vunpack.c.l.s8.bf16 %v1239_v21  ;;  %v2551_v40 = vunpack.c.h.s8.bf16 %v1239_v21 }
 0x1b7   :  { %4105 = vmatpush1.bf16.msra.mxu0 %v2453_v27  ;;  %4433 = vmatpush1.bf16.msra.mxu1 %v2455_v28  ;;  %v2552_v27 = vunpack.c.h.s8.bf16 %v1240_v0  ;;  %v1254_v28 = vld [vmem:[#allocation8 + $0x908] sm:$0xff]  ;;  %v2615_v0 = vunpack.c.h.s8.bf16 %v1271_v61 }
 0x1b8   :  { %4106 = vmatprep.subr.bf16.mxu0 %v2470_v29  ;;  %4434 = vmatprep.subr.bf16.mxu1 %v2472_v30  ;;  %v1256_v29 = vld [vmem:[#allocation8 + $0x918] sm:$0xff]  ;;  %v2549_v30 = vunpack.c.h.s8.bf16 %v1237_v20  ;;  %v2566_v32 = vunpack.c.l.s8.bf16 %v1254_v28 }
 0x1b9   :  { %v2568_v34 = vunpack.c.l.s8.bf16 %v1256_v29  ;;  %v2584_v49 = vunpack.c.h.s8.bf16 %v1256_v29 }
 0x1bb   :  { %4107 = vmatpush1.bf16.msra.mxu0 %v2469_v38  ;;  %4435 = vmatpush1.bf16.msra.mxu1 %v2471_v39  ;;  %v1255_v38 = vld [vmem:[#allocation8 + $0x910] sm:$0xff]  ;;  %v2565_v39 = vunpack.c.l.s8.bf16 %v1253_v37 }
 0x1bc   :  { %4108 = vmatprep.subr.bf16.mxu0 %v2486_v46  ;;  %4436 = vmatprep.subr.bf16.mxu1 %v2488_v48  ;;  %v2567_v46 = vunpack.c.l.s8.bf16 %v1255_v38  ;;  %v2582_v48 = vunpack.c.h.s8.bf16 %v1254_v28 }
 0x1bf   :  { %4109 = vmatpush1.bf16.msra.mxu0 %v2485_v54  ;;  %4437 = vmatpush1.bf16.msra.mxu1 %v2487_v57  ;;  %v2583_v54 = vunpack.c.h.s8.bf16 %v1255_v38  ;;  %v2598_v57 = vunpack.c.l.s8.bf16 %v1270_v51 }
 0x1c0   :  { %4119 = vmatprep.subr.bf16.mxu0 %v2502_v59  ;;  %4447 = vmatprep.subr.bf16.mxu1 %v2504_v58  ;;  %v2600_v59 = vunpack.c.l.s8.bf16 %v1272_v52  ;;  %v1269_v58 = vld [vmem:[#allocation8 + $0x980] sm:$0xff] }
 0x1c1   :  { %v2597_v62 = vunpack.c.l.s8.bf16 %v1269_v58  ;;  %v2613_v9 = vunpack.c.h.s8.bf16 %v1269_v58 }
 0x1c2   :  { %4111 = vmatmul.mubr.bf16.vlgmr.msra.gmra.mrb[16].mxu0 %v9532_v4  ;;  %4439 = vmatmul.mubr.bf16.vlgmr.msra.gmra.mrb[16].mxu1 %v9532_v4 }
 0x1c3   :  { %4120 = vmatpush1.bf16.msra.mxu0 %v2501_v6  ;;  %4448 = vmatpush1.bf16.msra.mxu1 %v2503_v7  ;;  %v2614_v6 = vunpack.c.h.s8.bf16 %v1270_v51  ;;  %v2616_v7 = vunpack.c.h.s8.bf16 %v1272_v52 }
 0x1c4   :  { %4121 = vmatprep.subr.bf16.mxu0 %v2518_v24  ;;  %4449 = vmatprep.subr.bf16.mxu1 %v2520_v8  ;;  %v1286_v24 = vld [vmem:[#allocation8 + $0xa08] sm:$0xff]  ;;  %v1288_v8 = vld [vmem:[#allocation8 + $0xa18] sm:$0xff] }
 0x1c5   :  { %4151 = vmatprep.mubr.bf16.mxu0 %v9534_v12  ;;  %4479 = vmatprep.mubr.bf16.mxu1 %v9534_v12 }
 0x1c7   :  { %4122 = vmatpush1.bf16.msra.mxu0 %v2517_v14  ;;  %4450 = vmatpush1.bf16.msra.mxu1 %v2519_v16  ;;  %v2630_v14 = vunpack.c.l.s8.bf16 %v1286_v24  ;;  %v2632_v16 = vunpack.c.l.s8.bf16 %v1288_v8 }
 0x1c8   :  { %4123 = vmatprep.subr.bf16.mxu0 %v2534_v18  ;;  %4451 = vmatprep.subr.bf16.mxu1 %v2536_v19  ;;  %v1285_v18 = vld [vmem:[#allocation8 + $0xa00] sm:$0xff]  ;;  %v1287_v19 = vld [vmem:[#allocation8 + $0xa10] sm:$0xff] }
 0x1c9   :  { %v2629_v20 = vunpack.c.l.s8.bf16 %v1285_v18  ;;  %v2631_v21 = vunpack.c.l.s8.bf16 %v1287_v19  ;;  %v2645_v28 = vunpack.c.h.s8.bf16 %v1285_v18  ;;  %v2647_v29 = vunpack.c.h.s8.bf16 %v1287_v19  ;;  %v1335_v18 = vld [vmem:[#allocation8 + $0xb90] sm:$0xff] }
 0x1ca   :  { %v232_v19 = vrot.slane %v9445_v44, %v9512_v50 }
 0x1cb   :  { %4124 = vmatpush1.bf16.msra.mxu0 %v2533_v22  ;;  %4452 = vmatpush1.bf16.msra.mxu1 %v2535_v25  ;;  %v2646_v22 = vunpack.c.h.s8.bf16 %v1286_v24  ;;  %v2648_v25 = vunpack.c.h.s8.bf16 %v1288_v8 }
 0x1cc   :  { %4125 = vmatprep.subr.bf16.mxu0 %v2550_v26  ;;  %4453 = vmatprep.subr.bf16.mxu1 %v2552_v27  ;;  %v1302_v26 = vld [vmem:[#allocation8 + $0xa88] sm:$0xff]  ;;  %v1304_v27 = vld [vmem:[#allocation8 + $0xa98] sm:$0xff] }
 0x1cf   :  { %4126 = vmatpush1.bf16.msra.mxu0 %v2549_v30  ;;  %4454 = vmatpush1.bf16.msra.mxu1 %v2551_v40  ;;  %v2662_v30 = vunpack.c.l.s8.bf16 %v1302_v26  ;;  %v2664_v40 = vunpack.c.l.s8.bf16 %v1304_v27 }
 0x1d0   :  { %4127 = vmatprep.subr.bf16.mxu0 %v2566_v32  ;;  %4455 = vmatprep.subr.bf16.mxu1 %v2568_v34  ;;  %v1301_v32 = vld [vmem:[#allocation8 + $0xa80] sm:$0xff]  ;;  %v1303_v34 = vld [vmem:[#allocation8 + $0xa90] sm:$0xff] }
 0x1d1   :  { %v2661_v37 = vunpack.c.l.s8.bf16 %v1301_v32  ;;  %v2663_v38 = vunpack.c.l.s8.bf16 %v1303_v34  ;;  %v2677_v51 = vunpack.c.h.s8.bf16 %v1301_v32  ;;  %v2679_v52 = vunpack.c.h.s8.bf16 %v1303_v34 }
 0x1d3   :  { %4128 = vmatpush1.bf16.msra.mxu0 %v2565_v39  ;;  %4456 = vmatpush1.bf16.msra.mxu1 %v2567_v46  ;;  %v2678_v39 = vunpack.c.h.s8.bf16 %v1302_v26  ;;  %v2680_v46 = vunpack.c.h.s8.bf16 %v1304_v27  ;;  %v765_v27 = vadd.f32 %v9479_v33, %v232_v19 }
 0x1d4   :  { %4129 = vmatprep.subr.bf16.mxu0 %v2582_v48  ;;  %4457 = vmatprep.subr.bf16.mxu1 %v2584_v49  ;;  %v1318_v48 = vld [vmem:[#allocation8 + $0xb08] sm:$0xff]  ;;  %v1320_v49 = vld [vmem:[#allocation8 + $0xb18] sm:$0xff] }
 0x1d7   :  { %4130 = vmatpush1.bf16.msra.mxu0 %v2581_v53  ;;  %4458 = vmatpush1.bf16.msra.mxu1 %v2583_v54  ;;  %v2694_v53 = vunpack.c.l.s8.bf16 %v1318_v48  ;;  %v2696_v54 = vunpack.c.l.s8.bf16 %v1320_v49 }
 0x1d8   :  { %4131 = vmatprep.subr.bf16.mxu0 %v2598_v57  ;;  %4459 = vmatprep.subr.bf16.mxu1 %v2600_v59  ;;  %v1317_v57 = vld [vmem:[#allocation8 + $0xb00] sm:$0xff]  ;;  %v1319_v59 = vld [vmem:[#allocation8 + $0xb10] sm:$0xff] }
 0x1d9   :  { %v2693_v58 = vunpack.c.l.s8.bf16 %v1317_v57  ;;  %v2695_v61 = vunpack.c.l.s8.bf16 %v1319_v59  ;;  %v2709_v24 = vunpack.c.h.s8.bf16 %v1317_v57  ;;  %v2711_v8 = vunpack.c.h.s8.bf16 %v1319_v59 }
 0x1db   :  { %4132 = vmatpush1.bf16.msra.mxu0 %v2597_v62  ;;  %4460 = vmatpush1.bf16.msra.mxu1 %v2599_v42  ;;  %v2710_v62 = vunpack.c.h.s8.bf16 %v1318_v48  ;;  %v2712_v42 = vunpack.c.h.s8.bf16 %v1320_v49 }
 0x1dc   :  { %4133 = vmatprep.subr.bf16.mxu0 %v2614_v6  ;;  %4461 = vmatprep.subr.bf16.mxu1 %v2616_v7  ;;  %v1334_v6 = vld [vmem:[#allocation8 + $0xb88] sm:$0xff]  ;;  %v1336_v7 = vld [vmem:[#allocation8 + $0xb98] sm:$0xff] }
 0x1dd   :  { %v2744_v26 = vunpack.c.h.s8.bf16 %v1336_v7 }
 0x1df   :  { %4134 = vmatpush1.bf16.msra.mxu0 %v2613_v9  ;;  %4462 = vmatpush1.bf16.msra.mxu1 %v2615_v0  ;;  %v220_v9 = vrot.slane %v9445_v44, %v9499_v35  ;;  %v2726_v0 = vunpack.c.l.s8.bf16 %v1334_v6 }
 0x1e0   :  { %4135 = vmatprep.subr.bf16.mxu0 %v2630_v14  ;;  %4463 = vmatprep.subr.bf16.mxu1 %v2632_v16  ;;  %v2728_v14 = vunpack.c.l.s8.bf16 %v1336_v7  ;;  %v1333_v16 = vld [vmem:[#allocation8 + $0xb80] sm:$0xff] }
 0x1e3   :  { %4136 = vmatpush1.bf16.msra.mxu0 %v2629_v20  ;;  %4464 = vmatpush1.bf16.msra.mxu1 %v2631_v21  ;;  %v2725_v20 = vunpack.c.l.s8.bf16 %v1333_v16  ;;  %v2727_v21 = vunpack.c.l.s8.bf16 %v1335_v18 }
 0x1e4   :  { %4137 = vmatprep.subr.bf16.mxu0 %v2646_v22  ;;  %4465 = vmatprep.subr.bf16.mxu1 %v2648_v25  ;;  %v722_v22 = vadd.f32 %v9473_v23, %v220_v9  ;;  %v2742_v25 = vunpack.c.h.s8.bf16 %v1334_v6  ;;  %v1351_v23 = vld [vmem:[#allocation8 + $0xc10] sm:$0xff]  ;;  %v1384_v9 = vld [vmem:[#allocation8 + $0xd18] sm:$0xff] }
 0x1e5   :  { %v2759_v33 = vunpack.c.l.s8.bf16 %v1351_v23  ;;  %v2775_v57 = vunpack.c.h.s8.bf16 %v1351_v23  ;;  %v2824_v19 = vunpack.c.l.s8.bf16 %v1384_v9 }
 0x1e6   :  { %v937_v32 = vmax.f32 %v722_v22, 0.0 }
 0x1e7   :  { %4138 = vmatpush1.bf16.msra.mxu0 %v2645_v28  ;;  %4466 = vmatpush1.bf16.msra.mxu1 %v2647_v29  ;;  %v1350_v28 = vld [vmem:[#allocation8 + $0xc08] sm:$0xff]  ;;  %v1352_v29 = vld [vmem:[#allocation8 + $0xc18] sm:$0xff] }
 0x1e8   :  { %4139 = vmatprep.subr.bf16.mxu0 %v2662_v30  ;;  %4467 = vmatprep.subr.bf16.mxu1 %v2664_v40  ;;  %v2741_v30 = vunpack.c.h.s8.bf16 %v1333_v16  ;;  %v2743_v40 = vunpack.c.h.s8.bf16 %v1335_v18  ;;  %v2758_v44 = vunpack.c.l.s8.bf16 %v1350_v28  ;;  %v2760_v34 = vunpack.c.l.s8.bf16 %v1352_v29  ;;  %v1381_v18 = vld [vmem:[#allocation8 + $0xd00] sm:$0xff] }
 0x1e9   :  { %v2774_v49 = vunpack.c.h.s8.bf16 %v1350_v28  ;;  %v1400_v28 = vld [vmem:[#allocation8 + $0xd98] sm:$0xff] }
 0x1eb   :  { %4140 = vmatpush1.bf16.msra.mxu0 %v2661_v37  ;;  %4468 = vmatpush1.bf16.msra.mxu1 %v2663_v38  ;;  %v1349_v37 = vld [vmem:[#allocation8 + $0xc00] sm:$0xff]  ;;  %v940_v38 = vmax.f32 %v765_v27, 0.0  ;;  %v1398_v27 = vld [vmem:[#allocation8 + $0xd88] sm:$0xff] }
 0x1ec   :  { %4141 = vmatprep.subr.bf16.mxu0 %v2678_v39  ;;  %4469 = vmatprep.subr.bf16.mxu1 %v2680_v46  ;;  %v2757_v39 = vunpack.c.l.s8.bf16 %v1349_v37  ;;  %v9546_v46 = vpack.c.bf16 %v937_v32, %v937_v32  ;;  %v1397_v32 = vld [vmem:[#allocation8 + $0xd80] sm:$0xff]  ;;  %v2870_v23 = vunpack.c.h.s8.bf16 %v1398_v27 }
 0x1ed   :  { %v9548_v48 = vpack.c.bf16 %v940_v38, %v940_v38 }
 0x1ef   :  { %4142 = vmatpush1.bf16.msra.mxu0 %v2677_v51  ;;  %4470 = vmatpush1.bf16.msra.mxu1 %v2679_v52  ;;  %v2776_v51 = vunpack.c.h.s8.bf16 %v1352_v29  ;;  %v1366_v52 = vld [vmem:[#allocation8 + $0xc88] sm:$0xff]  ;;  %v2837_v29 = vunpack.c.h.s8.bf16 %v1381_v18 }
 0x1f0   :  { %4143 = vmatprep.subr.bf16.mxu0 %v2694_v53  ;;  %4471 = vmatprep.subr.bf16.mxu1 %v2696_v54  ;;  %v1368_v53 = vld [vmem:[#allocation8 + $0xc98] sm:$0xff]  ;;  %v2773_v54 = vunpack.c.h.s8.bf16 %v1349_v37  ;;  %v2790_v59 = vunpack.c.l.s8.bf16 %v1366_v52  ;;  %v2806_v7 = vunpack.c.h.s8.bf16 %v1366_v52  ;;  %v2853_v37 = vunpack.c.l.s8.bf16 %v1397_v32 }
 0x1f3   :  { %4144 = vmatpush1.bf16.msra.mxu0 %v2693_v58  ;;  %4472 = vmatpush1.bf16.msra.mxu1 %v2695_v61  ;;  %v1365_v58 = vld [vmem:[#allocation8 + $0xc80] sm:$0xff]  ;;  %v2792_v61 = vunpack.c.l.s8.bf16 %v1368_v53 }
 0x1f4   :  { %4145 = vmatprep.subr.bf16.mxu0 %v2710_v62  ;;  %4473 = vmatprep.subr.bf16.mxu1 %v2712_v42  ;;  %v1367_v62 = vld [vmem:[#allocation8 + $0xc90] sm:$0xff]  ;;  %v2789_v42 = vunpack.c.l.s8.bf16 %v1365_v58 }
 0x1f5   :  { %v2791_v6 = vunpack.c.l.s8.bf16 %v1367_v62 }
 0x1f7   :  { %4146 = vmatpush1.bf16.msra.mxu0 %v2709_v24  ;;  %4474 = vmatpush1.bf16.msra.mxu1 %v2711_v8  ;;  %v2808_v24 = vunpack.c.h.s8.bf16 %v1368_v53  ;;  %v1382_v8 = vld [vmem:[#allocation8 + $0xd08] sm:$0xff] }
 0x1f8   :  { %4147 = vmatprep.subr.bf16.mxu0 %v2726_v0  ;;  %4475 = vmatprep.subr.bf16.mxu1 %v2728_v14  ;;  %v2805_v0 = vunpack.c.h.s8.bf16 %v1365_v58  ;;  %v2807_v14 = vunpack.c.h.s8.bf16 %v1367_v62  ;;  %v2822_v16 = vunpack.c.l.s8.bf16 %v1382_v8 }
 0x1fb   :  { %4148 = vmatpush1.bf16.msra.mxu0 %v2725_v20  ;;  %4476 = vmatpush1.bf16.msra.mxu1 %v2727_v21  ;;  %v1383_v20 = vld [vmem:[#allocation8 + $0xd10] sm:$0xff]  ;;  %v2821_v21 = vunpack.c.l.s8.bf16 %v1381_v18 }
 0x1fc   :  { %4149 = vmatprep.subr.bf16.mxu0 %v2742_v25  ;;  %4477 = vmatprep.subr.bf16.mxu1 %v2744_v26  ;;  %v2823_v22 = vunpack.c.l.s8.bf16 %v1383_v20  ;;  %v2838_v25 = vunpack.c.h.s8.bf16 %v1382_v8  ;;  %v2840_v26 = vunpack.c.h.s8.bf16 %v1384_v9 }
 0x1ff   :  { %4150 = vmatpush1.bf16.msra.mxu0 %v2741_v30  ;;  %4478 = vmatpush1.bf16.msra.mxu1 %v2743_v40  ;;  %v2839_v30 = vunpack.c.h.s8.bf16 %v1383_v20  ;;  %v2854_v40 = vunpack.c.l.s8.bf16 %v1398_v27 }
 0x200   :  { %4160 = vmatprep.subr.bf16.mxu0 %v2758_v44  ;;  %4488 = vmatprep.subr.bf16.mxu1 %v2760_v34  ;;  %v2856_v44 = vunpack.c.l.s8.bf16 %v1400_v28  ;;  %v1399_v34 = vld [vmem:[#allocation8 + $0xd90] sm:$0xff] }
 0x201   :  { %v2855_v38 = vunpack.c.l.s8.bf16 %v1399_v34  ;;  %v2871_v52 = vunpack.c.h.s8.bf16 %v1399_v34 }
 0x202   :  { %4152 = vmatmul.mubr.bf16.vlgmr.msra.gmra.mrb[16].mxu0 %v9546_v46  ;;  %4480 = vmatmul.mubr.bf16.vlgmr.msra.gmra.mrb[16].mxu1 %v9546_v46 }
 0x203   :  { %4161 = vmatpush1.bf16.msra.mxu0 %v2757_v39  ;;  %4192 = vmatprep.mubr.bf16.mxu0 %v9548_v48  ;;  %v2872_v39 = vunpack.c.h.s8.bf16 %v1400_v28 }
 0x204   :  { %4489 = vmatpush1.bf16.msra.mxu1 %v2759_v33  ;;  %4520 = vmatprep.mubr.bf16.mxu1 %v9548_v48  ;;  %v1414_v33 = vld [vmem:[#allocation8 + $0xe08] sm:$0xff] }
 0x205   :  { %4162 = vmatprep.subr.bf16.mxu0 %v2774_v49  ;;  %4490 = vmatprep.subr.bf16.mxu1 %v2776_v51  ;;  %v1416_v49 = vld [vmem:[#allocation8 + $0xe18] sm:$0xff]  ;;  %v2869_v51 = vunpack.c.h.s8.bf16 %v1397_v32  ;;  %v2886_v53 = vunpack.c.l.s8.bf16 %v1414_v33  ;;  %v2902_v62 = vunpack.c.h.s8.bf16 %v1414_v33  ;;  %v9040_v33 = vld [vmem:[#allocation7] sm:$0xff] }
 0x207   :  { %4163 = vmatpush1.bf16.msra.mxu0 %v2773_v54  ;;  %v1413_v54 = vld [vmem:[#allocation8 + $0xe00] sm:$0xff] }
 0x208   :  { %4491 = vmatpush1.bf16.msra.mxu1 %v2775_v57  ;;  %4164 = vmatprep.subr.bf16.mxu0 %v2790_v59  ;;  %v2888_v57 = vunpack.c.l.s8.bf16 %v1416_v49  ;;  %v1415_v59 = vld [vmem:[#allocation8 + $0xe10] sm:$0xff]  ;;  %v2885_v58 = vunpack.c.l.s8.bf16 %v1413_v54 }
 0x209   :  { %4492 = vmatprep.subr.bf16.mxu1 %v2792_v61  ;;  %v2887_v61 = vunpack.c.l.s8.bf16 %v1415_v59  ;;  %v2903_v8 = vunpack.c.h.s8.bf16 %v1415_v59  ;;  %v240_v59 = vrot.slane %v9484_v60, %v9448_v45 }
 0x20b   :  { %4165 = vmatpush1.bf16.msra.mxu0 %v2789_v42  ;;  %v2904_v42 = vunpack.c.h.s8.bf16 %v1416_v49  ;;  %v228_v49 = vrot.slane %v9040_v33, %v9507_v41  ;;  %v1510_v33 = vld [vmem:[#allocation8 + $0x1108] sm:$0xff] }
 0x20c   :  { %4493 = vmatpush1.bf16.msra.mxu1 %v2791_v6  ;;  %4166 = vmatprep.subr.bf16.mxu0 %v2806_v7  ;;  %v1430_v6 = vld [vmem:[#allocation8 + $0xe88] sm:$0xff]  ;;  %v1432_v7 = vld [vmem:[#allocation8 + $0xe98] sm:$0xff] }
 0x20d   :  { %4494 = vmatprep.subr.bf16.mxu1 %v2808_v24  ;;  %v2901_v24 = vunpack.c.h.s8.bf16 %v1413_v54  ;;  %v2918_v9 = vunpack.c.l.s8.bf16 %v1430_v6  ;;  %v2934_v20 = vunpack.c.h.s8.bf16 %v1430_v6 }
 0x20f   :  { %4167 = vmatpush1.bf16.msra.mxu0 %v2805_v0  ;;  %v1429_v0 = vld [vmem:[#allocation8 + $0xe80] sm:$0xff] }
 0x210   :  { %4495 = vmatpush1.bf16.msra.mxu1 %v2807_v14  ;;  %4168 = vmatprep.subr.bf16.mxu0 %v2822_v16  ;;  %v2920_v14 = vunpack.c.l.s8.bf16 %v1432_v7  ;;  %v1431_v16 = vld [vmem:[#allocation8 + $0xe90] sm:$0xff]  ;;  %v2917_v18 = vunpack.c.l.s8.bf16 %v1429_v0 }
 0x211   :  { %4496 = vmatprep.subr.bf16.mxu1 %v2824_v19  ;;  %v2919_v19 = vunpack.c.l.s8.bf16 %v1431_v16  ;;  %v2935_v27 = vunpack.c.h.s8.bf16 %v1431_v16  ;;  %v1477_v16 = vld [vmem:[#allocation8 + $0x1000] sm:$0xff] }
 0x213   :  { %4169 = vmatpush1.bf16.msra.mxu0 %v2821_v21  ;;  %v2936_v21 = vunpack.c.h.s8.bf16 %v1432_v7  ;;  %v1478_v7 = vld [vmem:[#allocation8 + $0x1008] sm:$0xff] }
 0x214   :  { %4497 = vmatpush1.bf16.msra.mxu1 %v2823_v22  ;;  %4170 = vmatprep.subr.bf16.mxu0 %v2838_v25  ;;  %v1446_v22 = vld [vmem:[#allocation8 + $0xf08] sm:$0xff]  ;;  %v1448_v25 = vld [vmem:[#allocation8 + $0xf18] sm:$0xff] }
 0x215   :  { %4498 = vmatprep.subr.bf16.mxu1 %v2840_v26  ;;  %v2933_v26 = vunpack.c.h.s8.bf16 %v1429_v0  ;;  %v2950_v28 = vunpack.c.l.s8.bf16 %v1446_v22  ;;  %v2966_v34 = vunpack.c.h.s8.bf16 %v1446_v22  ;;  %v3030_v22 = vunpack.c.h.s8.bf16 %v1478_v7 }
 0x217   :  { %4171 = vmatpush1.bf16.msra.mxu0 %v2837_v29  ;;  %v1445_v29 = vld [vmem:[#allocation8 + $0xf00] sm:$0xff] }
 0x218   :  { %4499 = vmatpush1.bf16.msra.mxu1 %v2839_v30  ;;  %4172 = vmatprep.subr.bf16.mxu0 %v2854_v40  ;;  %v2952_v30 = vunpack.c.l.s8.bf16 %v1448_v25  ;;  %v1447_v40 = vld [vmem:[#allocation8 + $0xf10] sm:$0xff]  ;;  %v2949_v32 = vunpack.c.l.s8.bf16 %v1445_v29 }
 0x219   :  { %4500 = vmatprep.subr.bf16.mxu1 %v2856_v44  ;;  %v2951_v44 = vunpack.c.l.s8.bf16 %v1447_v40 }
 0x21b   :  { %4173 = vmatpush1.bf16.msra.mxu0 %v2853_v37  ;;  %v2968_v37 = vunpack.c.h.s8.bf16 %v1448_v25  ;;  %v1494_v25 = vld [vmem:[#allocation8 + $0x1088] sm:$0xff] }
 0x21c   :  { %4501 = vmatpush1.bf16.msra.mxu1 %v2855_v38  ;;  %4174 = vmatprep.subr.bf16.mxu0 %v2870_v23  ;;  %v1462_v38 = vld [vmem:[#allocation8 + $0xf88] sm:$0xff]  ;;  %v1464_v23 = vld [vmem:[#allocation8 + $0xf98] sm:$0xff] }
 0x21d   :  { %4502 = vmatprep.subr.bf16.mxu1 %v2872_v39  ;;  %v2965_v39 = vunpack.c.h.s8.bf16 %v1445_v29  ;;  %v2984_v54 = vunpack.c.l.s8.bf16 %v1464_v23  ;;  %v3000_v6 = vunpack.c.h.s8.bf16 %v1464_v23  ;;  %v3029_v29 = vunpack.c.h.s8.bf16 %v1477_v16 }
 0x21e   :  { %v3062_v23 = vunpack.c.h.s8.bf16 %v1494_v25 }
 0x21f   :  { %4175 = vmatpush1.bf16.msra.mxu0 %v2869_v51  ;;  %v2967_v51 = vunpack.c.h.s8.bf16 %v1447_v40  ;;  %v3046_v40 = vunpack.c.l.s8.bf16 %v1494_v25 }
 0x220   :  { %4503 = vmatpush1.bf16.msra.mxu1 %v2871_v52  ;;  %4176 = vmatprep.subr.bf16.mxu0 %v2886_v53  ;;  %v2982_v52 = vunpack.c.l.s8.bf16 %v1462_v38  ;;  %v1461_v53 = vld [vmem:[#allocation8 + $0xf80] sm:$0xff] }
 0x221   :  { %4504 = vmatprep.subr.bf16.mxu1 %v2888_v57  ;;  %v1463_v57 = vld [vmem:[#allocation8 + $0xf90] sm:$0xff] }
 0x222   :  { %v2999_v60 = vunpack.c.h.s8.bf16 %v1463_v57 }
 0x223   :  { %4177 = vmatpush1.bf16.msra.mxu0 %v2885_v58  ;;  %v2981_v58 = vunpack.c.l.s8.bf16 %v1461_v53 }
 0x224   :  { %4505 = vmatpush1.bf16.msra.mxu1 %v2887_v61  ;;  %4178 = vmatprep.subr.bf16.mxu0 %v2902_v62  ;;  %v763_v61 = vadd.f32 %v9477_v31, %v228_v49  ;;  %v2983_v62 = vunpack.c.l.s8.bf16 %v1463_v57  ;;  %v1512_v49 = vld [vmem:[#allocation8 + $0x1118] sm:$0xff] }
 0x225   :  { %4506 = vmatprep.subr.bf16.mxu1 %v2904_v42  ;;  %v2998_v42 = vunpack.c.h.s8.bf16 %v1462_v38  ;;  %v3080_v57 = vunpack.c.l.s8.bf16 %v1512_v49 }
 0x226   :  { %v939_v0 = vmax.f32 %v763_v61, 0.0 }
 0x227   :  { %4179 = vmatpush1.bf16.msra.mxu0 %v2901_v24  ;;  %v806_v24 = vadd.f32 %v9490_v3, %v240_v59  ;;  %v1511_v59 = vld [vmem:[#allocation8 + $0x1110] sm:$0xff] }
 0x228   :  { %4507 = vmatpush1.bf16.msra.mxu1 %v2903_v8  ;;  %4180 = vmatprep.subr.bf16.mxu0 %v2918_v9  ;;  %v1480_v8 = vld [vmem:[#allocation8 + $0x1018] sm:$0xff]  ;;  %v2997_v9 = vunpack.c.h.s8.bf16 %v1461_v53  ;;  %v3078_v53 = vunpack.c.l.s8.bf16 %v1510_v33  ;;  %v3079_v61 = vunpack.c.l.s8.bf16 %v1511_v59 }
 0x229   :  { %4508 = vmatprep.subr.bf16.mxu1 %v2920_v14  ;;  %v3014_v14 = vunpack.c.l.s8.bf16 %v1478_v7  ;;  %v3016_v31 = vunpack.c.l.s8.bf16 %v1480_v8  ;;  %v1528_v7 = vld [vmem:[#allocation8 + $0x1198] sm:$0xff] }
 0x22b   :  { %4181 = vmatpush1.bf16.msra.mxu0 %v2917_v18  ;;  %v1479_v18 = vld [vmem:[#allocation8 + $0x1010] sm:$0xff] }
 0x22c   :  { %4509 = vmatpush1.bf16.msra.mxu1 %v2919_v19  ;;  %4182 = vmatprep.subr.bf16.mxu0 %v2934_v20  ;;  %v942_v19 = vmax.f32 %v806_v24, 0.0  ;;  %v3013_v20 = vunpack.c.l.s8.bf16 %v1477_v16  ;;  %v3015_v3 = vunpack.c.l.s8.bf16 %v1479_v18 }
 0x22d   :  { %4510 = vmatprep.subr.bf16.mxu1 %v2936_v21  ;;  %v9559_v21 = vpack.c.bf16 %v939_v0, %v939_v0  ;;  %v1525_v0 = vld [vmem:[#allocation8 + $0x1180] sm:$0xff] }
 0x22e   :  { %v3109_v16 = vunpack.c.l.s8.bf16 %v1525_v0 }
 0x22f   :  { %4183 = vmatpush1.bf16.msra.mxu0 %v2933_v26  ;;  %v9561_v26 = vpack.c.bf16 %v942_v19, %v942_v19  ;;  %v3128_v19 = vunpack.c.h.s8.bf16 %v1528_v7 }
 0x230   :  { %4511 = vmatpush1.bf16.msra.mxu1 %v2935_v27  ;;  %4184 = vmatprep.subr.bf16.mxu0 %v2950_v28  ;;  %v3032_v27 = vunpack.c.h.s8.bf16 %v1480_v8  ;;  %v1496_v28 = vld [vmem:[#allocation8 + $0x1098] sm:$0xff]  ;;  %v3095_v8 = vunpack.c.h.s8.bf16 %v1511_v59 }
 0x231   :  { %4512 = vmatprep.subr.bf16.mxu1 %v2952_v30  ;;  %v3031_v30 = vunpack.c.h.s8.bf16 %v1479_v18 }
 0x233   :  { %4185 = vmatpush1.bf16.msra.mxu0 %v2949_v32  ;;  %v1493_v32 = vld [vmem:[#allocation8 + $0x1080] sm:$0xff] }
 0x234   :  { %4513 = vmatpush1.bf16.msra.mxu1 %v2951_v44  ;;  %4186 = vmatprep.subr.bf16.mxu0 %v2966_v34  ;;  %v3048_v44 = vunpack.c.l.s8.bf16 %v1496_v28  ;;  %v1495_v34 = vld [vmem:[#allocation8 + $0x1090] sm:$0xff] }
 0x235   :  { %4514 = vmatprep.subr.bf16.mxu1 %v2968_v37  ;;  %v3045_v37 = vunpack.c.l.s8.bf16 %v1493_v32  ;;  %v3047_v38 = vunpack.c.l.s8.bf16 %v1495_v34 }
 0x237   :  { %4187 = vmatpush1.bf16.msra.mxu0 %v2965_v39  ;;  %v3064_v39 = vunpack.c.h.s8.bf16 %v1496_v28  ;;  %v1541_v28 = vld [vmem:[#allocation8 + $0x1200] sm:$0xff] }
 0x238   :  { %4515 = vmatpush1.bf16.msra.mxu1 %v2967_v51  ;;  %4188 = vmatprep.subr.bf16.mxu0 %v2982_v52  ;;  %v3061_v51 = vunpack.c.h.s8.bf16 %v1493_v32  ;;  %v3063_v52 = vunpack.c.h.s8.bf16 %v1495_v34 }
 0x239   :  { %4516 = vmatprep.subr.bf16.mxu1 %v2984_v54  ;;  %v1509_v54 = vld [vmem:[#allocation8 + $0x1100] sm:$0xff] }
 0x23a   :  { %v3093_v24 = vunpack.c.h.s8.bf16 %v1509_v54 }
 0x23b   :  { %4189 = vmatpush1.bf16.msra.mxu0 %v2981_v58  ;;  %v3077_v58 = vunpack.c.l.s8.bf16 %v1509_v54 }
 0x23c   :  { %4517 = vmatpush1.bf16.msra.mxu1 %v2983_v62  ;;  %4190 = vmatprep.subr.bf16.mxu0 %v2998_v42  ;;  %v3094_v62 = vunpack.c.h.s8.bf16 %v1510_v33  ;;  %v3096_v42 = vunpack.c.h.s8.bf16 %v1512_v49  ;;  %v1557_v49 = vld [vmem:[#allocation8 + $0x1280] sm:$0xff] }
 0x23d   :  { %4518 = vmatprep.subr.bf16.mxu1 %v3000_v6  ;;  %v1526_v6 = vld [vmem:[#allocation8 + $0x1188] sm:$0xff] }
 0x23e   :  { %v3126_v18 = vunpack.c.h.s8.bf16 %v1526_v6 }
 0x23f   :  { %4191 = vmatpush1.bf16.msra.mxu0 %v2997_v9  ;;  %v3110_v9 = vunpack.c.l.s8.bf16 %v1526_v6 }
 0x240   :  { %4519 = vmatpush1.bf16.msra.mxu1 %v2999_v60  ;;  %4201 = vmatprep.subr.bf16.mxu0 %v3014_v14  ;;  %v3112_v60 = vunpack.c.l.s8.bf16 %v1528_v7  ;;  %v1527_v14 = vld [vmem:[#allocation8 + $0x1190] sm:$0xff]  ;;  %v1573_v7 = vld [vmem:[#allocation8 + $0x1300] sm:$0xff] }
 0x241   :  { %4529 = vmatprep.subr.bf16.mxu1 %v3016_v31  ;;  %v3111_v31 = vunpack.c.l.s8.bf16 %v1527_v14  ;;  %v3127_v25 = vunpack.c.h.s8.bf16 %v1527_v14 }
 0x242   :  { %4193 = vmatmul.mubr.bf16.vlgmr.msra.gmra.mrb[16].mxu0 %v9559_v21 }
 0x243   :  { %4521 = vmatmul.mubr.bf16.vlgmr.msra.gmra.mrb[16].mxu1 %v9559_v21  ;;  %4202 = vmatpush1.bf16.msra.mxu0 %v3013_v20  ;;  %v1542_v20 = vld [vmem:[#allocation8 + $0x1208] sm:$0xff] }
 0x244   :  { %4233 = vmatprep.mubr.bf16.mxu0 %v9561_v26  ;;  %4530 = vmatpush1.bf16.msra.mxu1 %v3015_v3  ;;  %v1544_v3 = vld [vmem:[#allocation8 + $0x1218] sm:$0xff] }
 0x245   :  { %4561 = vmatprep.mubr.bf16.mxu1 %v9561_v26  ;;  %4203 = vmatprep.subr.bf16.mxu0 %v3030_v22  ;;  %v3125_v22 = vunpack.c.h.s8.bf16 %v1525_v0  ;;  %v3160_v34 = vunpack.c.h.s8.bf16 %v1544_v3 }
 0x246   :  { %4531 = vmatprep.subr.bf16.mxu1 %v3032_v27  ;;  %v3142_v27 = vunpack.c.l.s8.bf16 %v1542_v20 }
 0x247   :  { %4204 = vmatpush1.bf16.msra.mxu0 %v3029_v29  ;;  %v3144_v29 = vunpack.c.l.s8.bf16 %v1544_v3 }
 0x248   :  { %4532 = vmatpush1.bf16.msra.mxu1 %v3031_v30  ;;  %4205 = vmatprep.subr.bf16.mxu0 %v3046_v40  ;;  %v1543_v30 = vld [vmem:[#allocation8 + $0x1210] sm:$0xff]  ;;  %v3141_v40 = vunpack.c.l.s8.bf16 %v1541_v28 }
 0x249   :  { %4533 = vmatprep.subr.bf16.mxu1 %v3048_v44  ;;  %v3143_v32 = vunpack.c.l.s8.bf16 %v1543_v30  ;;  %v3158_v44 = vunpack.c.h.s8.bf16 %v1542_v20 }
 0x24b   :  { %4206 = vmatpush1.bf16.msra.mxu0 %v3045_v37  ;;  %v1558_v37 = vld [vmem:[#allocation8 + $0x1288] sm:$0xff] }
 0x24c   :  { %4534 = vmatpush1.bf16.msra.mxu1 %v3047_v38  ;;  %4207 = vmatprep.subr.bf16.mxu0 %v3062_v23  ;;  %v1560_v38 = vld [vmem:[#allocation8 + $0x1298] sm:$0xff]  ;;  %v3157_v23 = vunpack.c.h.s8.bf16 %v1541_v28  ;;  %v3174_v33 = vunpack.c.l.s8.bf16 %v1558_v37  ;;  %v1591_v28 = vld [vmem:[#allocation8 + $0x1390] sm:$0xff] }
 0x24d   :  { %4535 = vmatprep.subr.bf16.mxu1 %v3064_v39  ;;  %v3159_v39 = vunpack.c.h.s8.bf16 %v1543_v30  ;;  %v3192_v59 = vunpack.c.h.s8.bf16 %v1560_v38 }
 0x24f   :  { %4208 = vmatpush1.bf16.msra.mxu0 %v3061_v51  ;;  %v3176_v51 = vunpack.c.l.s8.bf16 %v1560_v38 }
 0x250   :  { %4536 = vmatpush1.bf16.msra.mxu1 %v3063_v52  ;;  %4209 = vmatprep.subr.bf16.mxu0 %v3078_v53  ;;  %v1559_v52 = vld [vmem:[#allocation8 + $0x1290] sm:$0xff]  ;;  %v3173_v53 = vunpack.c.l.s8.bf16 %v1557_v49 }
 0x251   :  { %4537 = vmatprep.subr.bf16.mxu1 %v3080_v57  ;;  %v3175_v54 = vunpack.c.l.s8.bf16 %v1559_v52  ;;  %v3190_v57 = vunpack.c.h.s8.bf16 %v1558_v37  ;;  %v1608_v37 = vld [vmem:[#allocation8 + $0x1418] sm:$0xff] }
 0x253   :  { %4210 = vmatpush1.bf16.msra.mxu0 %v3077_v58  ;;  %v1574_v58 = vld [vmem:[#allocation8 + $0x1308] sm:$0xff] }
 0x254   :  { %4538 = vmatpush1.bf16.msra.mxu1 %v3079_v61  ;;  %4211 = vmatprep.subr.bf16.mxu0 %v3094_v62  ;;  %v1576_v61 = vld [vmem:[#allocation8 + $0x1318] sm:$0xff]  ;;  %v3189_v62 = vunpack.c.h.s8.bf16 %v1557_v49  ;;  %v3206_v6 = vunpack.c.l.s8.bf16 %v1574_v58  ;;  %v1605_v49 = vld [vmem:[#allocation8 + $0x1400] sm:$0xff] }
 0x255   :  { %4539 = vmatprep.subr.bf16.mxu1 %v3096_v42  ;;  %v3191_v42 = vunpack.c.h.s8.bf16 %v1559_v52  ;;  %v3224_v14 = vunpack.c.h.s8.bf16 %v1576_v61  ;;  %v1607_v52 = vld [vmem:[#allocation8 + $0x1410] sm:$0xff] }
 0x257   :  { %4212 = vmatpush1.bf16.msra.mxu0 %v3093_v24  ;;  %v3208_v24 = vunpack.c.l.s8.bf16 %v1576_v61 }
 0x258   :  { %4540 = vmatpush1.bf16.msra.mxu1 %v3095_v8  ;;  %4213 = vmatprep.subr.bf16.mxu0 %v3110_v9  ;;  %v1575_v8 = vld [vmem:[#allocation8 + $0x1310] sm:$0xff]  ;;  %v3205_v9 = vunpack.c.l.s8.bf16 %v1573_v7 }
 0x259   :  { %4541 = vmatprep.subr.bf16.mxu1 %v3112_v60  ;;  %v3207_v0 = vunpack.c.l.s8.bf16 %v1575_v8  ;;  %v3222_v60 = vunpack.c.h.s8.bf16 %v1574_v58  ;;  %v3223_v3 = vunpack.c.h.s8.bf16 %v1575_v8  ;;  %v1622_v58 = vld [vmem:[#allocation8 + $0x1488] sm:$0xff] }
 0x25b   :  { %4214 = vmatpush1.bf16.msra.mxu0 %v3109_v16  ;;  %v1590_v16 = vld [vmem:[#allocation8 + $0x1388] sm:$0xff] }
 0x25c   :  { %4542 = vmatpush1.bf16.msra.mxu1 %v3111_v31  ;;  %4215 = vmatprep.subr.bf16.mxu0 %v3126_v18  ;;  %v1592_v31 = vld [vmem:[#allocation8 + $0x1398] sm:$0xff]  ;;  %v3221_v18 = vunpack.c.h.s8.bf16 %v1573_v7  ;;  %v3302_v7 = vunpack.c.l.s8.bf16 %v1622_v58 }
 0x25d   :  { %4543 = vmatprep.subr.bf16.mxu1 %v3128_v19  ;;  %v9041_v19 = vld [vmem:[#allocation7 + $0x8] sm:$0xff] }
 0x25e   :  { %v236_v20 = vrot.slane %v9041_v19, %v9443_v43 }
 0x25f   :  { %4216 = vmatpush1.bf16.msra.mxu0 %v3125_v22  ;;  %v3238_v22 = vunpack.c.l.s8.bf16 %v1590_v16 }
 0x260   :  { %4544 = vmatpush1.bf16.msra.mxu1 %v3127_v25  ;;  %4217 = vmatprep.subr.bf16.mxu0 %v3142_v27  ;;  %v1589_v25 = vld [vmem:[#allocation8 + $0x1380] sm:$0xff]  ;;  %v3240_v27 = vunpack.c.l.s8.bf16 %v1592_v31  ;;  %v804_v30 = vadd.f32 %v9486_v63, %v236_v20  ;;  %v944_v63 = vmax.f32 %v9496_v17, 0.0  ;;  %v3285_v17 = vunpack.c.h.s8.bf16 %v1605_v49 }
 0x261   :  { %4545 = vmatprep.subr.bf16.mxu1 %v3144_v29  ;;  %v3237_v29 = vunpack.c.l.s8.bf16 %v1589_v25  ;;  %v3253_v38 = vunpack.c.h.s8.bf16 %v1589_v25 }
 0x262   :  { %v9572_v61 = vpack.c.bf16 %v944_v63, %v944_v63 }
 0x263   :  { %4218 = vmatpush1.bf16.msra.mxu0 %v3141_v40  ;;  %v3239_v40 = vunpack.c.l.s8.bf16 %v1591_v28 }
 0x264   :  { %4546 = vmatpush1.bf16.msra.mxu1 %v3143_v32  ;;  %4219 = vmatprep.subr.bf16.mxu0 %v3158_v44  ;;  %v3254_v32 = vunpack.c.h.s8.bf16 %v1590_v16  ;;  %v3256_v44 = vunpack.c.h.s8.bf16 %v1592_v31  ;;  %v1638_v31 = vld [vmem:[#allocation8 + $0x1508] sm:$0xff] }
 0x265   :  { %4547 = vmatprep.subr.bf16.mxu1 %v3160_v34  ;;  %v1606_v34 = vld [vmem:[#allocation8 + $0x1408] sm:$0xff] }
 0x267   :  { %4220 = vmatpush1.bf16.msra.mxu0 %v3157_v23  ;;  %v941_v23 = vmax.f32 %v804_v30, 0.0  ;;  %v3350_v30 = vunpack.c.h.s8.bf16 %v1638_v31 }
 0x268   :  { %4548 = vmatpush1.bf16.msra.mxu1 %v3159_v39  ;;  %4221 = vmatprep.subr.bf16.mxu0 %v3174_v33  ;;  %v3255_v39 = vunpack.c.h.s8.bf16 %v1591_v28  ;;  %v3270_v33 = vunpack.c.l.s8.bf16 %v1606_v34 }
 0x269   :  { %4549 = vmatprep.subr.bf16.mxu1 %v3176_v51  ;;  %v3272_v51 = vunpack.c.l.s8.bf16 %v1608_v37 }
 0x26b   :  { %4222 = vmatpush1.bf16.msra.mxu0 %v3173_v53  ;;  %v3269_v53 = vunpack.c.l.s8.bf16 %v1605_v49 }
 0x26c   :  { %4550 = vmatpush1.bf16.msra.mxu1 %v3175_v54  ;;  %4223 = vmatprep.subr.bf16.mxu0 %v3190_v57  ;;  %v9570_v54 = vpack.c.bf16 %v941_v23, %v941_v23  ;;  %v3271_v57 = vunpack.c.l.s8.bf16 %v1607_v52  ;;  %v1653_v23 = vld [vmem:[#allocation8 + $0x1580] sm:$0xff] }
 0x26d   :  { %4551 = vmatprep.subr.bf16.mxu1 %v3192_v59  ;;  %v3286_v59 = vunpack.c.h.s8.bf16 %v1606_v34  ;;  %v3365_v49 = vunpack.c.l.s8.bf16 %v1653_v23 }
 0x26f   :  { %4224 = vmatpush1.bf16.msra.mxu0 %v3189_v62  ;;  %v3288_v62 = vunpack.c.h.s8.bf16 %v1608_v37 }
 0x270   :  { %4552 = vmatpush1.bf16.msra.mxu1 %v3191_v42  ;;  %4225 = vmatprep.subr.bf16.mxu0 %v3206_v6  ;;  %v1624_v42 = vld [vmem:[#allocation8 + $0x1498] sm:$0xff]  ;;  %v3287_v6 = vunpack.c.h.s8.bf16 %v1607_v52 }
 0x271   :  { %4553 = vmatprep.subr.bf16.mxu1 %v3208_v24  ;;  %v1621_v24 = vld [vmem:[#allocation8 + $0x1480] sm:$0xff]  ;;  %v3304_v8 = vunpack.c.l.s8.bf16 %v1624_v42  ;;  %v3320_v16 = vunpack.c.h.s8.bf16 %v1624_v42 }
 0x272   :  { %v3317_v19 = vunpack.c.h.s8.bf16 %v1621_v24  ;;  %v1669_v42 = vld [vmem:[#allocation8 + $0x1600] sm:$0xff] }
 0x273   :  { %4226 = vmatpush1.bf16.msra.mxu0 %v3205_v9  ;;  %v1623_v9 = vld [vmem:[#allocation8 + $0x1490] sm:$0xff] }
 0x274   :  { %4554 = vmatpush1.bf16.msra.mxu1 %v3207_v0  ;;  %4227 = vmatprep.subr.bf16.mxu0 %v3222_v60  ;;  %v3301_v0 = vunpack.c.l.s8.bf16 %v1621_v24  ;;  %v3303_v60 = vunpack.c.l.s8.bf16 %v1623_v9  ;;  %v3319_v20 = vunpack.c.h.s8.bf16 %v1623_v9 }
 0x275   :  { %4555 = vmatprep.subr.bf16.mxu1 %v3224_v14  ;;  %v3318_v14 = vunpack.c.h.s8.bf16 %v1622_v58 }
 0x277   :  { %4228 = vmatpush1.bf16.msra.mxu0 %v3221_v18  ;;  %v1640_v18 = vld [vmem:[#allocation8 + $0x1518] sm:$0xff] }
 0x278   :  { %4556 = vmatpush1.bf16.msra.mxu1 %v3223_v3  ;;  %4229 = vmatprep.subr.bf16.mxu0 %v3238_v22  ;;  %v3334_v3 = vunpack.c.l.s8.bf16 %v1638_v31  ;;  %v1637_v22 = vld [vmem:[#allocation8 + $0x1500] sm:$0xff]  ;;  %v3336_v25 = vunpack.c.l.s8.bf16 %v1640_v18 }
 0x279   :  { %4557 = vmatprep.subr.bf16.mxu1 %v3240_v27  ;;  %v1639_v27 = vld [vmem:[#allocation8 + $0x1510] sm:$0xff]  ;;  %v3333_v28 = vunpack.c.l.s8.bf16 %v1637_v22  ;;  %v3349_v34 = vunpack.c.h.s8.bf16 %v1637_v22 }
 0x27a   :  { %v3351_v37 = vunpack.c.h.s8.bf16 %v1639_v27 }
 0x27b   :  { %4230 = vmatpush1.bf16.msra.mxu0 %v3237_v29  ;;  %v3335_v29 = vunpack.c.l.s8.bf16 %v1639_v27 }
 0x27c   :  { %4558 = vmatpush1.bf16.msra.mxu1 %v3239_v40  ;;  %4231 = vmatprep.subr.bf16.mxu0 %v3254_v32  ;;  %v3352_v40 = vunpack.c.h.s8.bf16 %v1640_v18  ;;  %v1654_v32 = vld [vmem:[#allocation8 + $0x1588] sm:$0xff]  ;;  %v1685_v18 = vld [vmem:[#allocation8 + $0x1680] sm:$0xff] }
 0x27d   :  { %4559 = vmatprep.subr.bf16.mxu1 %v3256_v44  ;;  %v1656_v44 = vld [vmem:[#allocation8 + $0x1598] sm:$0xff]  ;;  %v3382_v52 = vunpack.c.h.s8.bf16 %v1654_v32 }
 0x27e   :  { %v3384_v63 = vunpack.c.h.s8.bf16 %v1656_v44 }
 0x27f   :  { %4232 = vmatpush1.bf16.msra.mxu0 %v3253_v38  ;;  %v3366_v38 = vunpack.c.l.s8.bf16 %v1654_v32 }
 0x280   :  { %4560 = vmatpush1.bf16.msra.mxu1 %v3255_v39  ;;  %4242 = vmatprep.subr.bf16.mxu0 %v3270_v33  ;;  %v3368_v39 = vunpack.c.l.s8.bf16 %v1656_v44  ;;  %v1655_v33 = vld [vmem:[#allocation8 + $0x1590] sm:$0xff]  ;;  %v1701_v44 = vld [vmem:[#allocation8 + $0x1700] sm:$0xff] }
 0x281   :  { %4570 = vmatprep.subr.bf16.mxu1 %v3272_v51  ;;  %v3367_v51 = vunpack.c.l.s8.bf16 %v1655_v33  ;;  %v3383_v58 = vunpack.c.h.s8.bf16 %v1655_v33 }
 0x282   :  { %4234 = vmatmul.mubr.bf16.vlgmr.msra.gmra.mrb[16].mxu0 %v9570_v54 }
 0x283   :  { %4562 = vmatmul.mubr.bf16.vlgmr.msra.gmra.mrb[16].mxu1 %v9570_v54  ;;  %4243 = vmatpush1.bf16.msra.mxu0 %v3269_v53  ;;  %v1670_v53 = vld [vmem:[#allocation8 + $0x1608] sm:$0xff] }
 0x284   :  { %4274 = vmatprep.mubr.bf16.mxu0 %v9572_v61  ;;  %4571 = vmatpush1.bf16.msra.mxu1 %v3271_v57  ;;  %v1672_v57 = vld [vmem:[#allocation8 + $0x1618] sm:$0xff] }
 0x285   :  { %4602 = vmatprep.mubr.bf16.mxu1 %v9572_v61  ;;  %4244 = vmatprep.subr.bf16.mxu0 %v3286_v59  ;;  %v3381_v59 = vunpack.c.h.s8.bf16 %v1653_v23  ;;  %v3416_v9 = vunpack.c.h.s8.bf16 %v1672_v57 }
 0x286   :  { %4572 = vmatprep.subr.bf16.mxu1 %v3288_v62  ;;  %v3398_v62 = vunpack.c.l.s8.bf16 %v1670_v53 }
 0x287   :  { %4245 = vmatpush1.bf16.msra.mxu0 %v3285_v17  ;;  %v3400_v17 = vunpack.c.l.s8.bf16 %v1672_v57  ;;  %v1717_v57 = vld [vmem:[#allocation8 + $0x1780] sm:$0xff] }
 0x288   :  { %4573 = vmatpush1.bf16.msra.mxu1 %v3287_v6  ;;  %4246 = vmatprep.subr.bf16.mxu0 %v3302_v7  ;;  %v1671_v6 = vld [vmem:[#allocation8 + $0x1610] sm:$0xff]  ;;  %v3397_v7 = vunpack.c.l.s8.bf16 %v1669_v42 }
 0x289   :  { %4574 = vmatprep.subr.bf16.mxu1 %v3304_v8  ;;  %v3399_v24 = vunpack.c.l.s8.bf16 %v1671_v6  ;;  %v3414_v8 = vunpack.c.h.s8.bf16 %v1670_v53 }
 0x28b   :  { %4247 = vmatpush1.bf16.msra.mxu0 %v3301_v0  ;;  %v1686_v0 = vld [vmem:[#allocation8 + $0x1688] sm:$0xff] }
 0x28c   :  { %4575 = vmatpush1.bf16.msra.mxu1 %v3303_v60  ;;  %4248 = vmatprep.subr.bf16.mxu0 %v3318_v14  ;;  %v1688_v60 = vld [vmem:[#allocation8 + $0x1698] sm:$0xff]  ;;  %v3413_v14 = vunpack.c.h.s8.bf16 %v1669_v42  ;;  %v3430_v31 = vunpack.c.l.s8.bf16 %v1686_v0 }
 0x28d   :  { %4576 = vmatprep.subr.bf16.mxu1 %v3320_v16  ;;  %v3415_v16 = vunpack.c.h.s8.bf16 %v1671_v6  ;;  %v3448_v27 = vunpack.c.h.s8.bf16 %v1688_v60 }
 0x28f   :  { %4249 = vmatpush1.bf16.msra.mxu0 %v3317_v19  ;;  %v3432_v19 = vunpack.c.l.s8.bf16 %v1688_v60 }
 0x290   :  { %4577 = vmatpush1.bf16.msra.mxu1 %v3319_v20  ;;  %4250 = vmatprep.subr.bf16.mxu0 %v3334_v3  ;;  %v1687_v20 = vld [vmem:[#allocation8 + $0x1690] sm:$0xff]  ;;  %v3429_v3 = vunpack.c.l.s8.bf16 %v1685_v18 }
 0x291   :  { %4578 = vmatprep.subr.bf16.mxu1 %v3336_v25  ;;  %v3431_v22 = vunpack.c.l.s8.bf16 %v1687_v20  ;;  %v3446_v25 = vunpack.c.h.s8.bf16 %v1686_v0 }
 0x293   :  { %4251 = vmatpush1.bf16.msra.mxu0 %v3333_v28  ;;  %v1702_v28 = vld [vmem:[#allocation8 + $0x1708] sm:$0xff] }
 0x294   :  { %4579 = vmatpush1.bf16.msra.mxu1 %v3335_v29  ;;  %4252 = vmatprep.subr.bf16.mxu0 %v3350_v30  ;;  %v1704_v29 = vld [vmem:[#allocation8 + $0x1718] sm:$0xff]  ;;  %v3445_v30 = vunpack.c.h.s8.bf16 %v1685_v18  ;;  %v3462_v32 = vunpack.c.l.s8.bf16 %v1702_v28  ;;  %v946_v18 = vmax.f32 %v9520_v2, 0.0 }
 0x295   :  { %4580 = vmatprep.subr.bf16.mxu1 %v3352_v40  ;;  %v3447_v40 = vunpack.c.h.s8.bf16 %v1687_v20  ;;  %v3480_v33 = vunpack.c.h.s8.bf16 %v1704_v29 }
 0x297   :  { %4253 = vmatpush1.bf16.msra.mxu0 %v3349_v34  ;;  %v3464_v34 = vunpack.c.l.s8.bf16 %v1704_v29 }
 0x298   :  { %4581 = vmatpush1.bf16.msra.mxu1 %v3351_v37  ;;  %4254 = vmatprep.subr.bf16.mxu0 %v3366_v38  ;;  %v1703_v37 = vld [vmem:[#allocation8 + $0x1710] sm:$0xff]  ;;  %v3461_v38 = vunpack.c.l.s8.bf16 %v1701_v44 }
 0x299   :  { %4582 = vmatprep.subr.bf16.mxu1 %v3368_v39  ;;  %v3463_v23 = vunpack.c.l.s8.bf16 %v1703_v37  ;;  %v3478_v39 = vunpack.c.h.s8.bf16 %v1702_v28  ;;  %v1752_v28 = vld [vmem:[#allocation8 + $0x1898] sm:$0xff] }
 0x29b   :  { %4255 = vmatpush1.bf16.msra.mxu0 %v3365_v49  ;;  %v1718_v49 = vld [vmem:[#allocation8 + $0x1788] sm:$0xff] }
 0x29c   :  { %4583 = vmatpush1.bf16.msra.mxu1 %v3367_v51  ;;  %4256 = vmatprep.subr.bf16.mxu0 %v3382_v52  ;;  %v1720_v51 = vld [vmem:[#allocation8 + $0x1798] sm:$0xff]  ;;  %v3477_v52 = vunpack.c.h.s8.bf16 %v1701_v44  ;;  %v3494_v53 = vunpack.c.l.s8.bf16 %v1718_v49  ;;  %v1751_v44 = vld [vmem:[#allocation8 + $0x1890] sm:$0xff] }
 0x29d   :  { %4584 = vmatprep.subr.bf16.mxu1 %v3384_v63  ;;  %v3479_v63 = vunpack.c.h.s8.bf16 %v1703_v37  ;;  %v3512_v6 = vunpack.c.h.s8.bf16 %v1720_v51  ;;  %v3559_v37 = vunpack.c.l.s8.bf16 %v1751_v44 }
 0x29f   :  { %4257 = vmatpush1.bf16.msra.mxu0 %v3381_v59  ;;  %v3496_v59 = vunpack.c.l.s8.bf16 %v1720_v51  ;;  %v3575_v51 = vunpack.c.h.s8.bf16 %v1751_v44 }
 0x2a0   :  { %4585 = vmatpush1.bf16.msra.mxu1 %v3383_v58  ;;  %4258 = vmatprep.subr.bf16.mxu0 %v3398_v62  ;;  %v1719_v58 = vld [vmem:[#allocation8 + $0x1790] sm:$0xff]  ;;  %v3493_v62 = vunpack.c.l.s8.bf16 %v1717_v57 }
 0x2a1   :  { %4586 = vmatprep.subr.bf16.mxu1 %v3400_v17  ;;  %v3495_v42 = vunpack.c.l.s8.bf16 %v1719_v58  ;;  %v3510_v17 = vunpack.c.h.s8.bf16 %v1718_v49  ;;  %v3511_v0 = vunpack.c.h.s8.bf16 %v1719_v58 }
 0x2a3   :  { %4259 = vmatpush1.bf16.msra.mxu0 %v3397_v7  ;;  %v1734_v7 = vld [vmem:[#allocation8 + $0x1808] sm:$0xff] }
 0x2a4   :  { %4587 = vmatpush1.bf16.msra.mxu1 %v3399_v24  ;;  %4260 = vmatprep.subr.bf16.mxu0 %v3414_v8  ;;  %v1736_v24 = vld [vmem:[#allocation8 + $0x1818] sm:$0xff]  ;;  %v3509_v8 = vunpack.c.h.s8.bf16 %v1717_v57  ;;  %v3526_v60 = vunpack.c.l.s8.bf16 %v1734_v7  ;;  %v1767_v57 = vld [vmem:[#allocation8 + $0x1910] sm:$0xff] }
 0x2a5   :  { %4588 = vmatprep.subr.bf16.mxu1 %v3416_v9  ;;  %v943_v9 = vmax.f32 %v9494_v15, 0.0  ;;  %v1750_v15 = vld [vmem:[#allocation8 + $0x1888] sm:$0xff]  ;;  %v3591_v58 = vunpack.c.l.s8.bf16 %v1767_v57 }
 0x2a7   :  { %4261 = vmatpush1.bf16.msra.mxu0 %v3413_v14  ;;  %v1733_v14 = vld [vmem:[#allocation8 + $0x1800] sm:$0xff]  ;;  %v9580_v20 = vpack.c.bf16 %v943_v9, %v943_v9 }
 0x2a8   :  { %4589 = vmatpush1.bf16.msra.mxu1 %v3415_v16  ;;  %4262 = vmatprep.subr.bf16.mxu0 %v3430_v31  ;;  %v3528_v16 = vunpack.c.l.s8.bf16 %v1736_v24  ;;  %v1735_v31 = vld [vmem:[#allocation8 + $0x1810] sm:$0xff]  ;;  %v3541_v2 = vunpack.c.h.s8.bf16 %v1733_v14  ;;  %v1781_v9 = vld [vmem:[#allocation8 + $0x1980] sm:$0xff] }
 0x2a9   :  { %4590 = vmatprep.subr.bf16.mxu1 %v3432_v19  ;;  %v3525_v19 = vunpack.c.l.s8.bf16 %v1733_v14  ;;  %v3543_v29 = vunpack.c.h.s8.bf16 %v1735_v31  ;;  %v3621_v14 = vunpack.c.l.s8.bf16 %v1781_v9 }
 0x2ab   :  { %4263 = vmatpush1.bf16.msra.mxu0 %v3429_v3  ;;  %v3527_v3 = vunpack.c.l.s8.bf16 %v1735_v31 }
 0x2ac   :  { %4591 = vmatpush1.bf16.msra.mxu1 %v3431_v22  ;;  %4264 = vmatprep.subr.bf16.mxu0 %v3446_v25  ;;  %v3542_v22 = vunpack.c.h.s8.bf16 %v1734_v7  ;;  %v9582_v25 = vpack.c.bf16 %v946_v18, %v946_v18 }
 0x2ad   :  { %4592 = vmatprep.subr.bf16.mxu1 %v3448_v27  ;;  %v3544_v27 = vunpack.c.h.s8.bf16 %v1736_v24  ;;  %v3607_v24 = vunpack.c.h.s8.bf16 %v1767_v57 }
 0x2af   :  { %4265 = vmatpush1.bf16.msra.mxu0 %v3445_v30  ;;  %v3558_v30 = vunpack.c.l.s8.bf16 %v1750_v15 }
 0x2b0   :  { %4593 = vmatpush1.bf16.msra.mxu1 %v3447_v40  ;;  %4266 = vmatprep.subr.bf16.mxu0 %v3462_v32  ;;  %v1749_v40 = vld [vmem:[#allocation8 + $0x1880] sm:$0xff]  ;;  %v3560_v32 = vunpack.c.l.s8.bf16 %v1752_v28 }
 0x2b1   :  { %4594 = vmatprep.subr.bf16.mxu1 %v3464_v34  ;;  %v3557_v34 = vunpack.c.l.s8.bf16 %v1749_v40  ;;  %v3573_v49 = vunpack.c.h.s8.bf16 %v1749_v40 }
 0x2b3   :  { %4267 = vmatpush1.bf16.msra.mxu0 %v3461_v38  ;;  %v3574_v38 = vunpack.c.h.s8.bf16 %v1750_v15 }
 0x2b4   :  { %4595 = vmatpush1.bf16.msra.mxu1 %v3463_v23  ;;  %4268 = vmatprep.subr.bf16.mxu0 %v3478_v39  ;;  %v3576_v23 = vunpack.c.h.s8.bf16 %v1752_v28  ;;  %v1766_v39 = vld [vmem:[#allocation8 + $0x1908] sm:$0xff]  ;;  %v1797_v28 = vld [vmem:[#allocation8 + $0x1a00] sm:$0xff] }
 0x2b5   :  { %4596 = vmatprep.subr.bf16.mxu1 %v3480_v33  ;;  %v1768_v33 = vld [vmem:[#allocation8 + $0x1918] sm:$0xff] }
 0x2b7   :  { %4269 = vmatpush1.bf16.msra.mxu0 %v3477_v52  ;;  %v3590_v52 = vunpack.c.l.s8.bf16 %v1766_v39 }
 0x2b8   :  { %4597 = vmatpush1.bf16.msra.mxu1 %v3479_v63  ;;  %4270 = vmatprep.subr.bf16.mxu0 %v3494_v53  ;;  %v1765_v63 = vld [vmem:[#allocation8 + $0x1900] sm:$0xff]  ;;  %v3592_v53 = vunpack.c.l.s8.bf16 %v1768_v33 }
 0x2b9   :  { %4598 = vmatprep.subr.bf16.mxu1 %v3496_v59  ;;  %v3589_v59 = vunpack.c.l.s8.bf16 %v1765_v63  ;;  %v3605_v7 = vunpack.c.h.s8.bf16 %v1765_v63 }
 0x2bb   :  { %4271 = vmatpush1.bf16.msra.mxu0 %v3493_v62  ;;  %v3606_v62 = vunpack.c.h.s8.bf16 %v1766_v39 }
 0x2bc   :  { %4599 = vmatpush1.bf16.msra.mxu1 %v3495_v42  ;;  %4272 = vmatprep.subr.bf16.mxu0 %v3510_v17  ;;  %v3608_v42 = vunpack.c.h.s8.bf16 %v1768_v33  ;;  %v1782_v17 = vld [vmem:[#allocation8 + $0x1988] sm:$0xff]  ;;  %v1813_v33 = vld [vmem:[#allocation8 + $0x1a80] sm:$0xff] }
 0x2bd   :  { %4600 = vmatprep.subr.bf16.mxu1 %v3512_v6  ;;  %v1784_v6 = vld [vmem:[#allocation8 + $0x1998] sm:$0xff]  ;;  %v3638_v31 = vunpack.c.h.s8.bf16 %v1782_v17 }
 0x2be   :  { %v3640_v18 = vunpack.c.h.s8.bf16 %v1784_v6 }
 0x2bf   :  { %4273 = vmatpush1.bf16.msra.mxu0 %v3509_v8  ;;  %v3622_v8 = vunpack.c.l.s8.bf16 %v1782_v17 }
 0x2c0   :  { %4601 = vmatpush1.bf16.msra.mxu1 %v3511_v0  ;;  %4283 = vmatprep.subr.bf16.mxu0 %v3526_v60  ;;  %v3624_v0 = vunpack.c.l.s8.bf16 %v1784_v6  ;;  %v1783_v60 = vld [vmem:[#allocation8 + $0x1990] sm:$0xff]  ;;  %v1829_v6 = vld [vmem:[#allocation8 + $0x1b00] sm:$0xff] }
 0x2c1   :  { %4611 = vmatprep.subr.bf16.mxu1 %v3528_v16  ;;  %v3623_v16 = vunpack.c.l.s8.bf16 %v1783_v60  ;;  %v3639_v15 = vunpack.c.h.s8.bf16 %v1783_v60 }
 0x2c2   :  { %4275 = vmatmul.mubr.bf16.vlgmr.msra.gmra.mrb[16].mxu0 %v9580_v20 }
 0x2c3   :  { %4603 = vmatmul.mubr.bf16.vlgmr.msra.gmra.mrb[16].mxu1 %v9580_v20  ;;  %4284 = vmatpush1.bf16.msra.mxu0 %v3525_v19  ;;  %v1798_v19 = vld [vmem:[#allocation8 + $0x1a08] sm:$0xff] }
 0x2c4   :  { %4315 = vmatprep.mubr.bf16.mxu0 %v9582_v25  ;;  %4612 = vmatpush1.bf16.msra.mxu1 %v3527_v3  ;;  %v1800_v3 = vld [vmem:[#allocation8 + $0x1a18] sm:$0xff] }
 0x2c5   :  { %4643 = vmatprep.mubr.bf16.mxu1 %v9582_v25  ;;  %4285 = vmatprep.subr.bf16.mxu0 %v3542_v22  ;;  %v3637_v22 = vunpack.c.h.s8.bf16 %v1781_v9  ;;  %v3672_v44 = vunpack.c.h.s8.bf16 %v1800_v3 }
 0x2c6   :  { %4613 = vmatprep.subr.bf16.mxu1 %v3544_v27  ;;  %v3654_v27 = vunpack.c.l.s8.bf16 %v1798_v19 }
 0x2c7   :  { %4286 = vmatpush1.bf16.msra.mxu0 %v3541_v2  ;;  %v3656_v2 = vunpack.c.l.s8.bf16 %v1800_v3  ;;  %v1845_v3 = vld [vmem:[#allocation8 + $0x1b80] sm:$0xff] }
 0x2c8   :  { %4614 = vmatpush1.bf16.msra.mxu1 %v3543_v29  ;;  %4287 = vmatprep.subr.bf16.mxu0 %v3558_v30  ;;  %v1799_v29 = vld [vmem:[#allocation8 + $0x1a10] sm:$0xff]  ;;  %v3653_v30 = vunpack.c.l.s8.bf16 %v1797_v28 }
 0x2c9   :  { %4615 = vmatprep.subr.bf16.mxu1 %v3560_v32  ;;  %v3655_v40 = vunpack.c.l.s8.bf16 %v1799_v29  ;;  %v3670_v32 = vunpack.c.h.s8.bf16 %v1798_v19 }
 0x2cb   :  { %4288 = vmatpush1.bf16.msra.mxu0 %v3557_v34  ;;  %v1814_v34 = vld [vmem:[#allocation8 + $0x1a88] sm:$0xff] }
 0x2cc   :  { %4616 = vmatpush1.bf16.msra.mxu1 %v3559_v37  ;;  %4289 = vmatprep.subr.bf16.mxu0 %v3574_v38  ;;  %v1816_v37 = vld [vmem:[#allocation8 + $0x1a98] sm:$0xff]  ;;  %v3669_v38 = vunpack.c.h.s8.bf16 %v1797_v28  ;;  %v3686_v39 = vunpack.c.l.s8.bf16 %v1814_v34 }
 0x2cd   :  { %4617 = vmatprep.subr.bf16.mxu1 %v3576_v23  ;;  %v3671_v23 = vunpack.c.h.s8.bf16 %v1799_v29  ;;  %v3704_v57 = vunpack.c.h.s8.bf16 %v1816_v37 }
 0x2cf   :  { %4290 = vmatpush1.bf16.msra.mxu0 %v3573_v49  ;;  %v3688_v49 = vunpack.c.l.s8.bf16 %v1816_v37 }
 0x2d0   :  { %4618 = vmatpush1.bf16.msra.mxu1 %v3575_v51  ;;  %4291 = vmatprep.subr.bf16.mxu0 %v3590_v52  ;;  %v1815_v51 = vld [vmem:[#allocation8 + $0x1a90] sm:$0xff]  ;;  %v3685_v52 = vunpack.c.l.s8.bf16 %v1813_v33 }
 0x2d1   :  { %4619 = vmatprep.subr.bf16.mxu1 %v3592_v53  ;;  %v3687_v63 = vunpack.c.l.s8.bf16 %v1815_v51  ;;  %v3702_v53 = vunpack.c.h.s8.bf16 %v1814_v34 }
 0x2d3   :  { %4292 = vmatpush1.bf16.msra.mxu0 %v3589_v59  ;;  %v1830_v59 = vld [vmem:[#allocation8 + $0x1b08] sm:$0xff] }
 0x2d4   :  { %4620 = vmatpush1.bf16.msra.mxu1 %v3591_v58  ;;  %4293 = vmatprep.subr.bf16.mxu0 %v3606_v62  ;;  %v1832_v58 = vld [vmem:[#allocation8 + $0x1b18] sm:$0xff]  ;;  %v3701_v62 = vunpack.c.h.s8.bf16 %v1813_v33  ;;  %v3718_v17 = vunpack.c.l.s8.bf16 %v1830_v59  ;;  %v948_v33 = vmax.f32 %v9524_v13, 0.0 }
 0x2d5   :  { %4621 = vmatprep.subr.bf16.mxu1 %v3608_v42  ;;  %v3703_v42 = vunpack.c.h.s8.bf16 %v1815_v51  ;;  %v3736_v60 = vunpack.c.h.s8.bf16 %v1832_v58 }
 0x2d7   :  { %4294 = vmatpush1.bf16.msra.mxu0 %v3605_v7  ;;  %v3720_v7 = vunpack.c.l.s8.bf16 %v1832_v58 }
 0x2d8   :  { %4622 = vmatpush1.bf16.msra.mxu1 %v3607_v24  ;;  %4295 = vmatprep.subr.bf16.mxu0 %v3622_v8  ;;  %v1831_v24 = vld [vmem:[#allocation8 + $0x1b10] sm:$0xff]  ;;  %v3717_v8 = vunpack.c.l.s8.bf16 %v1829_v6 }
 0x2d9   :  { %4623 = vmatprep.subr.bf16.mxu1 %v3624_v0  ;;  %v3719_v9 = vunpack.c.l.s8.bf16 %v1831_v24  ;;  %v3734_v0 = vunpack.c.h.s8.bf16 %v1830_v59  ;;  %v1880_v59 = vld [vmem:[#allocation8 + $0x1c98] sm:$0xff] }
 0x2db   :  { %4296 = vmatpush1.bf16.msra.mxu0 %v3621_v14  ;;  %v1846_v14 = vld [vmem:[#allocation8 + $0x1b88] sm:$0xff] }
 0x2dc   :  { %4624 = vmatpush1.bf16.msra.mxu1 %v3623_v16  ;;  %4297 = vmatprep.subr.bf16.mxu0 %v3638_v31  ;;  %v1848_v16 = vld [vmem:[#allocation8 + $0x1b98] sm:$0xff]  ;;  %v3733_v31 = vunpack.c.h.s8.bf16 %v1829_v6  ;;  %v3750_v19 = vunpack.c.l.s8.bf16 %v1846_v14  ;;  %v1879_v6 = vld [vmem:[#allocation8 + $0x1c90] sm:$0xff] }
 0x2dd   :  { %4625 = vmatprep.subr.bf16.mxu1 %v3640_v18  ;;  %v3735_v18 = vunpack.c.h.s8.bf16 %v1831_v24  ;;  %v3768_v29 = vunpack.c.h.s8.bf16 %v1848_v16  ;;  %v3815_v24 = vunpack.c.l.s8.bf16 %v1879_v6 }
 0x2df   :  { %4298 = vmatpush1.bf16.msra.mxu0 %v3637_v22  ;;  %v3752_v22 = vunpack.c.l.s8.bf16 %v1848_v16  ;;  %v3831_v16 = vunpack.c.h.s8.bf16 %v1879_v6 }
 0x2e0   :  { %4626 = vmatpush1.bf16.msra.mxu1 %v3639_v15  ;;  %4299 = vmatprep.subr.bf16.mxu0 %v3654_v27  ;;  %v1847_v15 = vld [vmem:[#allocation8 + $0x1b90] sm:$0xff]  ;;  %v3749_v27 = vunpack.c.l.s8.bf16 %v1845_v3 }
 0x2e1   :  { %4627 = vmatprep.subr.bf16.mxu1 %v3656_v2  ;;  %v3751_v28 = vunpack.c.l.s8.bf16 %v1847_v15  ;;  %v3766_v2 = vunpack.c.h.s8.bf16 %v1846_v14  ;;  %v3767_v34 = vunpack.c.h.s8.bf16 %v1847_v15 }
 0x2e3   :  { %4300 = vmatpush1.bf16.msra.mxu0 %v3653_v30  ;;  %v1862_v30 = vld [vmem:[#allocation8 + $0x1c08] sm:$0xff] }
 0x2e4   :  { %4628 = vmatpush1.bf16.msra.mxu1 %v3655_v40  ;;  %4301 = vmatprep.subr.bf16.mxu0 %v3670_v32  ;;  %v1864_v40 = vld [vmem:[#allocation8 + $0x1c18] sm:$0xff]  ;;  %v3765_v32 = vunpack.c.h.s8.bf16 %v1845_v3  ;;  %v3782_v37 = vunpack.c.l.s8.bf16 %v1862_v30  ;;  %v1895_v3 = vld [vmem:[#allocation8 + $0x1d10] sm:$0xff] }
 0x2e5   :  { %4629 = vmatprep.subr.bf16.mxu1 %v3672_v44  ;;  %v945_v44 = vmax.f32 %v9516_v55, 0.0  ;;  %v1878_v55 = vld [vmem:[#allocation8 + $0x1c88] sm:$0xff]  ;;  %v3847_v15 = vunpack.c.l.s8.bf16 %v1895_v3 }
 0x2e7   :  { %4302 = vmatpush1.bf16.msra.mxu0 %v3669_v38  ;;  %v1861_v38 = vld [vmem:[#allocation8 + $0x1c00] sm:$0xff]  ;;  %v9590_v51 = vpack.c.bf16 %v945_v44, %v945_v44 }
 0x2e8   :  { %4630 = vmatpush1.bf16.msra.mxu1 %v3671_v23  ;;  %4303 = vmatprep.subr.bf16.mxu0 %v3686_v39  ;;  %v3784_v23 = vunpack.c.l.s8.bf16 %v1864_v40  ;;  %v1863_v39 = vld [vmem:[#allocation8 + $0x1c10] sm:$0xff]  ;;  %v3797_v13 = vunpack.c.h.s8.bf16 %v1861_v38  ;;  %v1909_v44 = vld [vmem:[#allocation8 + $0x1d80] sm:$0xff] }
 0x2e9   :  { %4631 = vmatprep.subr.bf16.mxu1 %v3688_v49  ;;  %v3781_v49 = vunpack.c.l.s8.bf16 %v1861_v38  ;;  %v3799_v58 = vunpack.c.h.s8.bf16 %v1863_v39  ;;  %v3877_v38 = vunpack.c.l.s8.bf16 %v1909_v44 }
 0x2eb   :  { %4304 = vmatpush1.bf16.msra.mxu0 %v3685_v52  ;;  %v3783_v52 = vunpack.c.l.s8.bf16 %v1863_v39 }
 0x2ec   :  { %4632 = vmatpush1.bf16.msra.mxu1 %v3687_v63  ;;  %4305 = vmatprep.subr.bf16.mxu0 %v3702_v53  ;;  %v3798_v63 = vunpack.c.h.s8.bf16 %v1862_v30  ;;  %v9592_v53 = vpack.c.bf16 %v948_v33, %v948_v33 }
 0x2ed   :  { %4633 = vmatprep.subr.bf16.mxu1 %v3704_v57  ;;  %v3800_v57 = vunpack.c.h.s8.bf16 %v1864_v40  ;;  %v3863_v40 = vunpack.c.h.s8.bf16 %v1895_v3 }
 0x2ef   :  { %4306 = vmatpush1.bf16.msra.mxu0 %v3701_v62  ;;  %v3814_v62 = vunpack.c.l.s8.bf16 %v1878_v55 }
 0x2f0   :  { %4634 = vmatpush1.bf16.msra.mxu1 %v3703_v42  ;;  %4307 = vmatprep.subr.bf16.mxu0 %v3718_v17  ;;  %v1877_v42 = vld [vmem:[#allocation8 + $0x1c80] sm:$0xff]  ;;  %v3816_v17 = vunpack.c.l.s8.bf16 %v1880_v59 }
 0x2f1   :  { %4635 = vmatprep.subr.bf16.mxu1 %v3720_v7  ;;  %v3813_v7 = vunpack.c.l.s8.bf16 %v1877_v42  ;;  %v3829_v14 = vunpack.c.h.s8.bf16 %v1877_v42 }
 0x2f3   :  { %4308 = vmatpush1.bf16.msra.mxu0 %v3717_v8  ;;  %v3830_v8 = vunpack.c.h.s8.bf16 %v1878_v55 }
 0x2f4   :  { %4636 = vmatpush1.bf16.msra.mxu1 %v3719_v9  ;;  %4309 = vmatprep.subr.bf16.mxu0 %v3734_v0  ;;  %v3832_v9 = vunpack.c.h.s8.bf16 %v1880_v59  ;;  %v1894_v0 = vld [vmem:[#allocation8 + $0x1d08] sm:$0xff]  ;;  %v1925_v59 = vld [vmem:[#allocation8 + $0x1e00] sm:$0xff] }
 0x2f5   :  { %4637 = vmatprep.subr.bf16.mxu1 %v3736_v60  ;;  %v1896_v60 = vld [vmem:[#allocation8 + $0x1d18] sm:$0xff] }
 0x2f7   :  { %4310 = vmatpush1.bf16.msra.mxu0 %v3733_v31  ;;  %v3846_v31 = vunpack.c.l.s8.bf16 %v1894_v0 }
 0x2f8   :  { %4638 = vmatpush1.bf16.msra.mxu1 %v3735_v18  ;;  %4311 = vmatprep.subr.bf16.mxu0 %v3750_v19  ;;  %v1893_v18 = vld [vmem:[#allocation8 + $0x1d00] sm:$0xff]  ;;  %v3848_v19 = vunpack.c.l.s8.bf16 %v1896_v60 }
 0x2f9   :  { %4639 = vmatprep.subr.bf16.mxu1 %v3752_v22  ;;  %v3845_v22 = vunpack.c.l.s8.bf16 %v1893_v18  ;;  %v3861_v30 = vunpack.c.h.s8.bf16 %v1893_v18 }
 0x2fb   :  { %4312 = vmatpush1.bf16.msra.mxu0 %v3749_v27  ;;  %v3862_v27 = vunpack.c.h.s8.bf16 %v1894_v0 }
 0x2fc   :  { %4640 = vmatpush1.bf16.msra.mxu1 %v3751_v28  ;;  %4313 = vmatprep.subr.bf16.mxu0 %v3766_v2  ;;  %v3864_v28 = vunpack.c.h.s8.bf16 %v1896_v60  ;;  %v1910_v2 = vld [vmem:[#allocation8 + $0x1d88] sm:$0xff]  ;;  %v1941_v60 = vld [vmem:[#allocation8 + $0x1e80] sm:$0xff] }
 0x2fd   :  { %4641 = vmatprep.subr.bf16.mxu1 %v3768_v29  ;;  %v1912_v29 = vld [vmem:[#allocation8 + $0x1d98] sm:$0xff]  ;;  %v3894_v39 = vunpack.c.h.s8.bf16 %v1910_v2 }
 0x2fe   :  { %v3896_v33 = vunpack.c.h.s8.bf16 %v1912_v29 }
 0x2ff   :  { %4314 = vmatpush1.bf16.msra.mxu0 %v3765_v32  ;;  %v3878_v32 = vunpack.c.l.s8.bf16 %v1910_v2 }
 0x300   :  { %4642 = vmatpush1.bf16.msra.mxu1 %v3767_v34  ;;  %4324 = vmatprep.subr.bf16.mxu0 %v3782_v37  ;;  %v3880_v34 = vunpack.c.l.s8.bf16 %v1912_v29  ;;  %v1911_v37 = vld [vmem:[#allocation8 + $0x1d90] sm:$0xff]  ;;  %v1957_v29 = vld [vmem:[#allocation8 + $0x1f00] sm:$0xff] }
 0x301   :  { %4652 = vmatprep.subr.bf16.mxu1 %v3784_v23  ;;  %v3879_v23 = vunpack.c.l.s8.bf16 %v1911_v37  ;;  %v3895_v55 = vunpack.c.h.s8.bf16 %v1911_v37 }
 0x302   :  { %4316 = vmatmul.mubr.bf16.vlgmr.msra.gmra.mrb[16].mxu0 %v9590_v51 }
 0x303   :  { %4644 = vmatmul.mubr.bf16.vlgmr.msra.gmra.mrb[16].mxu1 %v9590_v51  ;;  %4325 = vmatpush1.bf16.msra.mxu0 %v3781_v49  ;;  %v1926_v49 = vld [vmem:[#allocation8 + $0x1e08] sm:$0xff] }
 0x304   :  { %4356 = vmatprep.mubr.bf16.mxu0 %v9592_v53  ;;  %4653 = vmatpush1.bf16.msra.mxu1 %v3783_v52  ;;  %v1928_v52 = vld [vmem:[#allocation8 + $0x1e18] sm:$0xff] }
 0x305   :  { %4684 = vmatprep.mubr.bf16.mxu1 %v9592_v53  ;;  %4326 = vmatprep.subr.bf16.mxu0 %v3798_v63  ;;  %v3893_v63 = vunpack.c.h.s8.bf16 %v1909_v44  ;;  %v3928_v6 = vunpack.c.h.s8.bf16 %v1928_v52 }
 0x306   :  { %4654 = vmatprep.subr.bf16.mxu1 %v3800_v57  ;;  %v3910_v57 = vunpack.c.l.s8.bf16 %v1926_v49 }
 0x307   :  { %4327 = vmatpush1.bf16.msra.mxu0 %v3797_v13  ;;  %v3912_v13 = vunpack.c.l.s8.bf16 %v1928_v52  ;;  %v1973_v52 = vld [vmem:[#allocation8 + $0x1f80] sm:$0xff] }
 0x308   :  { %4655 = vmatpush1.bf16.msra.mxu1 %v3799_v58  ;;  %4328 = vmatprep.subr.bf16.mxu0 %v3814_v62  ;;  %v1927_v58 = vld [vmem:[#allocation8 + $0x1e10] sm:$0xff]  ;;  %v3909_v62 = vunpack.c.l.s8.bf16 %v1925_v59 }
 0x309   :  { %4656 = vmatprep.subr.bf16.mxu1 %v3816_v17  ;;  %v3911_v42 = vunpack.c.l.s8.bf16 %v1927_v58  ;;  %v3926_v17 = vunpack.c.h.s8.bf16 %v1926_v49 }
 0x30b   :  { %4329 = vmatpush1.bf16.msra.mxu0 %v3813_v7  ;;  %v1942_v7 = vld [vmem:[#allocation8 + $0x1e88] sm:$0xff] }
 0x30c   :  { %4657 = vmatpush1.bf16.msra.mxu1 %v3815_v24  ;;  %4330 = vmatprep.subr.bf16.mxu0 %v3830_v8  ;;  %v1944_v24 = vld [vmem:[#allocation8 + $0x1e98] sm:$0xff]  ;;  %v3925_v8 = vunpack.c.h.s8.bf16 %v1925_v59  ;;  %v3942_v0 = vunpack.c.l.s8.bf16 %v1942_v7 }
 0x30d   :  { %4658 = vmatprep.subr.bf16.mxu1 %v3832_v9  ;;  %v3927_v9 = vunpack.c.h.s8.bf16 %v1927_v58  ;;  %v3960_v3 = vunpack.c.h.s8.bf16 %v1944_v24 }
 0x30f   :  { %4331 = vmatpush1.bf16.msra.mxu0 %v3829_v14  ;;  %v3944_v14 = vunpack.c.l.s8.bf16 %v1944_v24 }
 0x310   :  { %4659 = vmatpush1.bf16.msra.mxu1 %v3831_v16  ;;  %4332 = vmatprep.subr.bf16.mxu0 %v3846_v31  ;;  %v1943_v16 = vld [vmem:[#allocation8 + $0x1e90] sm:$0xff]  ;;  %v3941_v31 = vunpack.c.l.s8.bf16 %v1941_v60 }
 0x311   :  { %4660 = vmatprep.subr.bf16.mxu1 %v3848_v19  ;;  %v3943_v18 = vunpack.c.l.s8.bf16 %v1943_v16  ;;  %v3958_v19 = vunpack.c.h.s8.bf16 %v1942_v7 }
 0x313   :  { %4333 = vmatpush1.bf16.msra.mxu0 %v3845_v22  ;;  %v1958_v22 = vld [vmem:[#allocation8 + $0x1f08] sm:$0xff] }
 0x314   :  { %4661 = vmatpush1.bf16.msra.mxu1 %v3847_v15  ;;  %4334 = vmatprep.subr.bf16.mxu0 %v3862_v27  ;;  %v1960_v15 = vld [vmem:[#allocation8 + $0x1f18] sm:$0xff]  ;;  %v3957_v27 = vunpack.c.h.s8.bf16 %v1941_v60  ;;  %v3974_v2 = vunpack.c.l.s8.bf16 %v1958_v22 }
 0x315   :  { %4662 = vmatprep.subr.bf16.mxu1 %v3864_v28  ;;  %v3959_v28 = vunpack.c.h.s8.bf16 %v1943_v16  ;;  %v3992_v37 = vunpack.c.h.s8.bf16 %v1960_v15 }
 0x317   :  { %4335 = vmatpush1.bf16.msra.mxu0 %v3861_v30  ;;  %v3976_v30 = vunpack.c.l.s8.bf16 %v1960_v15 }
 0x318   :  { %4663 = vmatpush1.bf16.msra.mxu1 %v3863_v40  ;;  %4336 = vmatprep.subr.bf16.mxu0 %v3878_v32  ;;  %v1959_v40 = vld [vmem:[#allocation8 + $0x1f10] sm:$0xff]  ;;  %v3973_v32 = vunpack.c.l.s8.bf16 %v1957_v29 }
 0x319   :  { %4664 = vmatprep.subr.bf16.mxu1 %v3880_v34  ;;  %v3975_v44 = vunpack.c.l.s8.bf16 %v1959_v40  ;;  %v3990_v34 = vunpack.c.h.s8.bf16 %v1958_v22 }
 0x31b   :  { %4337 = vmatpush1.bf16.msra.mxu0 %v3877_v38  ;;  %v1974_v38 = vld [vmem:[#allocation8 + $0x1f88] sm:$0xff] }
 0x31c   :  { %4665 = vmatpush1.bf16.msra.mxu1 %v3879_v23  ;;  %4338 = vmatprep.subr.bf16.mxu0 %v3894_v39  ;;  %v1976_v23 = vld [vmem:[#allocation8 + $0x1f98] sm:$0xff]  ;;  %v3989_v39 = vunpack.c.h.s8.bf16 %v1957_v29  ;;  %v4006_v49 = vunpack.c.l.s8.bf16 %v1974_v38 }
 0x31d   :  { %4666 = vmatprep.subr.bf16.mxu1 %v3896_v33  ;;  %v3991_v33 = vunpack.c.h.s8.bf16 %v1959_v40  ;;  %v4024_v58 = vunpack.c.h.s8.bf16 %v1976_v23 }
 0x31f   :  { %4339 = vmatpush1.bf16.msra.mxu0 %v3893_v63  ;;  %v4008_v63 = vunpack.c.l.s8.bf16 %v1976_v23 }
 0x320   :  { %4667 = vmatpush1.bf16.msra.mxu1 %v3895_v55  ;;  %4340 = vmatprep.subr.bf16.mxu0 %v3910_v57  ;;  %v1975_v55 = vld [vmem:[#allocation8 + $0x1f90] sm:$0xff]  ;;  %v4005_v57 = vunpack.c.l.s8.bf16 %v1973_v52 }
 0x321   :  { %4668 = vmatprep.subr.bf16.mxu1 %v3912_v13  ;;  %v4007_v59 = vunpack.c.l.s8.bf16 %v1975_v55  ;;  %v4022_v13 = vunpack.c.h.s8.bf16 %v1974_v38  ;;  %v4023_v7 = vunpack.c.h.s8.bf16 %v1975_v55 }
 0x323   :  { %4341 = vmatpush1.bf16.msra.mxu0 %v3909_v62  ;;  %v970_v62 = vld [vmem:[#allocation8 + $0x28] sm:$0xff] }
 0x324   :  { %4669 = vmatpush1.bf16.msra.mxu1 %v3911_v42  ;;  %4342 = vmatprep.subr.bf16.mxu0 %v3926_v17  ;;  %v972_v42 = vld [vmem:[#allocation8 + $0x38] sm:$0xff]  ;;  %v4021_v17 = vunpack.c.h.s8.bf16 %v1973_v52  ;;  %v1994_v24 = vunpack.c.l.s8.bf16 %v970_v62 }
 0x325   :  { %4670 = vmatprep.subr.bf16.mxu1 %v3928_v6  ;;  %v947_v6 = vmax.f32 %v9522_v11, 0.0  ;;  %v2012_v11 = vunpack.c.h.s8.bf16 %v972_v42 }
 0x327   :  { %4343 = vmatpush1.bf16.msra.mxu0 %v3925_v8  ;;  %v969_v8 = vld [vmem:[#allocation8 + $0x20] sm:$0xff] }
 0x328   :  { %4671 = vmatpush1.bf16.msra.mxu1 %v3927_v9  ;;  %4344 = vmatprep.subr.bf16.mxu0 %v3942_v0  ;;  %v1996_v9 = vunpack.c.l.s8.bf16 %v972_v42  ;;  %v971_v0 = vld [vmem:[#allocation8 + $0x30] sm:$0xff]  ;;  %v1993_v60 = vunpack.c.l.s8.bf16 %v969_v8 }
 0x329   :  { %4672 = vmatprep.subr.bf16.mxu1 %v3944_v14  ;;  %v9599_v14 = vpack.c.bf16 %v947_v6, %v947_v6  ;;  %v1995_v16 = vunpack.c.l.s8.bf16 %v971_v0  ;;  %v2011_v22 = vunpack.c.h.s8.bf16 %v971_v0 }
 0x32b   :  { %4345 = vmatpush1.bf16.msra.mxu0 %v3941_v31  ;;  %v2010_v31 = vunpack.c.h.s8.bf16 %v970_v62 }
 0x32c   :  { %4673 = vmatpush1.bf16.msra.mxu1 %v3943_v18  ;;  %4346 = vmatprep.subr.bf16.mxu0 %v3958_v19  ;;  %v986_v18 = vld [vmem:[#allocation8 + $0xa8] sm:$0xff]  ;;  %v988_v19 = vld [vmem:[#allocation8 + $0xb8] sm:$0xff] }
 0x32d   :  { %4674 = vmatprep.subr.bf16.mxu1 %v3960_v3  ;;  %v2009_v3 = vunpack.c.h.s8.bf16 %v969_v8  ;;  %v2026_v15 = vunpack.c.l.s8.bf16 %v986_v18  ;;  %v2042_v40 = vunpack.c.h.s8.bf16 %v986_v18 }
 0x32f   :  { %4347 = vmatpush1.bf16.msra.mxu0 %v3957_v27  ;;  %v985_v27 = vld [vmem:[#allocation8 + $0xa0] sm:$0xff] }
 0x330   :  { %4675 = vmatpush1.bf16.msra.mxu1 %v3959_v28  ;;  %4348 = vmatprep.subr.bf16.mxu0 %v3974_v2  ;;  %v2028_v28 = vunpack.c.l.s8.bf16 %v988_v19  ;;  %v987_v2 = vld [vmem:[#allocation8 + $0xb0] sm:$0xff]  ;;  %v2025_v29 = vunpack.c.l.s8.bf16 %v985_v27 }
 0x331   :  { %4676 = vmatprep.subr.bf16.mxu1 %v3976_v30  ;;  %v2027_v30 = vunpack.c.l.s8.bf16 %v987_v2  ;;  %v2043_v38 = vunpack.c.h.s8.bf16 %v987_v2 }
 0x333   :  { %4349 = vmatpush1.bf16.msra.mxu0 %v3973_v32  ;;  %v2044_v32 = vunpack.c.h.s8.bf16 %v988_v19  ;;  %v1033_v19 = vld [vmem:[#allocation8 + $0x220] sm:$0xff] }
 0x334   :  { %4677 = vmatpush1.bf16.msra.mxu1 %v3975_v44  ;;  %4350 = vmatprep.subr.bf16.mxu0 %v3990_v34  ;;  %v1002_v44 = vld [vmem:[#allocation8 + $0x128] sm:$0xff]  ;;  %v1004_v34 = vld [vmem:[#allocation8 + $0x138] sm:$0xff] }
 0x335   :  { %4678 = vmatprep.subr.bf16.mxu1 %v3992_v37  ;;  %v2041_v37 = vunpack.c.h.s8.bf16 %v985_v27  ;;  %v2058_v23 = vunpack.c.l.s8.bf16 %v1002_v44  ;;  %v2074_v55 = vunpack.c.h.s8.bf16 %v1002_v44 }
 0x337   :  { %4351 = vmatpush1.bf16.msra.mxu0 %v3989_v39  ;;  %v1001_v39 = vld [vmem:[#allocation8 + $0x120] sm:$0xff] }
 0x338   :  { %4679 = vmatpush1.bf16.msra.mxu1 %v3991_v33  ;;  %4352 = vmatprep.subr.bf16.mxu0 %v4006_v49  ;;  %v2060_v33 = vunpack.c.l.s8.bf16 %v1004_v34  ;;  %v1003_v49 = vld [vmem:[#allocation8 + $0x130] sm:$0xff]  ;;  %v2057_v52 = vunpack.c.l.s8.bf16 %v1001_v39 }
 0x339   :  { %4680 = vmatprep.subr.bf16.mxu1 %v4008_v63  ;;  %v2059_v63 = vunpack.c.l.s8.bf16 %v1003_v49  ;;  %v2075_v62 = vunpack.c.h.s8.bf16 %v1003_v49 }
 0x33b   :  { %4353 = vmatpush1.bf16.msra.mxu0 %v4005_v57  ;;  %v2076_v57 = vunpack.c.h.s8.bf16 %v1004_v34  ;;  %v1049_v34 = vld [vmem:[#allocation8 + $0x2a0] sm:$0xff] }
 0x33c   :  { %4681 = vmatpush1.bf16.msra.mxu1 %v4007_v59  ;;  %4354 = vmatprep.subr.bf16.mxu0 %v4022_v13  ;;  %v1018_v59 = vld [vmem:[#allocation8 + $0x1a8] sm:$0xff]  ;;  %v1020_v13 = vld [vmem:[#allocation8 + $0x1b8] sm:$0xff] }
 0x33d   :  { %4682 = vmatprep.subr.bf16.mxu1 %v4024_v58  ;;  %v2073_v58 = vunpack.c.h.s8.bf16 %v1001_v39  ;;  %v2090_v42 = vunpack.c.l.s8.bf16 %v1018_v59  ;;  %v2092_v6 = vunpack.c.l.s8.bf16 %v1020_v13  ;;  %v2108_v0 = vunpack.c.h.s8.bf16 %v1020_v13  ;;  %v1065_v13 = vld [vmem:[#allocation8 + $0x320] sm:$0xff] }
 0x33f   :  { %4355 = vmatpush1.bf16.msra.mxu0 %v4021_v17  ;;  %v1017_v17 = vld [vmem:[#allocation8 + $0x1a0] sm:$0xff] }
 0x340   :  { %4683 = vmatpush1.bf16.msra.mxu1 %v4023_v7  ;;  %4693 = vmatprep.subr.bf16.mxu0 %v1994_v24  ;;  %v1019_v7 = vld [vmem:[#allocation8 + $0x1b0] sm:$0xff]  ;;  %v2089_v24 = vunpack.c.l.s8.bf16 %v1017_v17 }
 0x341   :  { %5021 = vmatprep.subr.bf16.mxu1 %v1996_v9  ;;  %v2091_v8 = vunpack.c.l.s8.bf16 %v1019_v7  ;;  %v2106_v9 = vunpack.c.h.s8.bf16 %v1018_v59  ;;  %v2107_v18 = vunpack.c.h.s8.bf16 %v1019_v7 }
 0x342   :  { %4357 = vmatmul.mubr.bf16.vlgmr.msra.gmra.mrb[16].mxu0 %v9599_v14 }
 0x343   :  { %4685 = vmatmul.mubr.bf16.vlgmr.msra.gmra.mrb[16].mxu1 %v9599_v14  ;;  %4694 = vmatpush1.bf16.msra.mxu0 %v1993_v60  ;;  %v1034_v60 = vld [vmem:[#allocation8 + $0x228] sm:$0xff] }
 0x344   :  { %4725 = vmatprep.mubr.bf16.mxu0 %v9461_v1  ;;  %5022 = vmatpush1.bf16.msra.mxu1 %v1995_v16  ;;  %v1036_v16 = vld [vmem:[#allocation8 + $0x238] sm:$0xff] }
 0x345   :  { %5053 = vmatprep.mubr.bf16.mxu1 %v9461_v1  ;;  %4695 = vmatprep.subr.bf16.mxu0 %v2010_v31  ;;  %v2105_v31 = vunpack.c.h.s8.bf16 %v1017_v17  ;;  %v2140_v2 = vunpack.c.h.s8.bf16 %v1036_v16 }
 0x346   :  { %5023 = vmatprep.subr.bf16.mxu1 %v2012_v11  ;;  %v2122_v11 = vunpack.c.l.s8.bf16 %v1034_v60 }
 0x347   :  { %4696 = vmatpush1.bf16.msra.mxu0 %v2009_v3  ;;  %v2124_v3 = vunpack.c.l.s8.bf16 %v1036_v16  ;;  %v1081_v16 = vld [vmem:[#allocation8 + $0x3a0] sm:$0xff] }
 0x348   :  { %5024 = vmatpush1.bf16.msra.mxu1 %v2011_v22  ;;  %4697 = vmatprep.subr.bf16.mxu0 %v2026_v15  ;;  %v1035_v22 = vld [vmem:[#allocation8 + $0x230] sm:$0xff]  ;;  %v2121_v15 = vunpack.c.l.s8.bf16 %v1033_v19 }
 0x349   :  { %5025 = vmatprep.subr.bf16.mxu1 %v2028_v28  ;;  %v2123_v27 = vunpack.c.l.s8.bf16 %v1035_v22  ;;  %v2138_v28 = vunpack.c.h.s8.bf16 %v1034_v60 }
 0x34b   :  { %4698 = vmatpush1.bf16.msra.mxu0 %v2025_v29  ;;  %v1050_v29 = vld [vmem:[#allocation8 + $0x2a8] sm:$0xff] }
 0x34c   :  { %5026 = vmatpush1.bf16.msra.mxu1 %v2027_v30  ;;  %4699 = vmatprep.subr.bf16.mxu0 %v2042_v40  ;;  %v1052_v30 = vld [vmem:[#allocation8 + $0x2b8] sm:$0xff]  ;;  %v2137_v40 = vunpack.c.h.s8.bf16 %v1033_v19  ;;  %v2154_v44 = vunpack.c.l.s8.bf16 %v1050_v29 }
 0x34d   :  { %5027 = vmatprep.subr.bf16.mxu1 %v2044_v32  ;;  %v2139_v32 = vunpack.c.h.s8.bf16 %v1035_v22  ;;  %v2172_v49 = vunpack.c.h.s8.bf16 %v1052_v30 }
 0x34f   :  { %4700 = vmatpush1.bf16.msra.mxu0 %v2041_v37  ;;  %v2156_v37 = vunpack.c.l.s8.bf16 %v1052_v30  ;;  %v1097_v30 = vld [vmem:[#allocation8 + $0x420] sm:$0xff] }
 0x350   :  { %5028 = vmatpush1.bf16.msra.mxu1 %v2043_v38  ;;  %4701 = vmatprep.subr.bf16.mxu0 %v2058_v23  ;;  %v1051_v38 = vld [vmem:[#allocation8 + $0x2b0] sm:$0xff]  ;;  %v2153_v23 = vunpack.c.l.s8.bf16 %v1049_v34 }
 0x351   :  { %5029 = vmatprep.subr.bf16.mxu1 %v2060_v33  ;;  %v2155_v39 = vunpack.c.l.s8.bf16 %v1051_v38  ;;  %v2170_v33 = vunpack.c.h.s8.bf16 %v1050_v29 }
 0x353   :  { %4702 = vmatpush1.bf16.msra.mxu0 %v2057_v52  ;;  %v1066_v52 = vld [vmem:[#allocation8 + $0x328] sm:$0xff] }
 0x354   :  { %5030 = vmatpush1.bf16.msra.mxu1 %v2059_v63  ;;  %4703 = vmatprep.subr.bf16.mxu0 %v2074_v55  ;;  %v1068_v63 = vld [vmem:[#allocation8 + $0x338] sm:$0xff]  ;;  %v2169_v55 = vunpack.c.h.s8.bf16 %v1049_v34  ;;  %v2186_v59 = vunpack.c.l.s8.bf16 %v1066_v52 }
 0x355   :  { %5031 = vmatprep.subr.bf16.mxu1 %v2076_v57  ;;  %v2171_v57 = vunpack.c.h.s8.bf16 %v1051_v38  ;;  %v2204_v7 = vunpack.c.h.s8.bf16 %v1068_v63  ;;  %v1114_v38 = vld [vmem:[#allocation8 + $0x4a8] sm:$0xff] }
 0x357   :  { %4704 = vmatpush1.bf16.msra.mxu0 %v2073_v58  ;;  %v2188_v58 = vunpack.c.l.s8.bf16 %v1068_v63  ;;  %v1113_v63 = vld [vmem:[#allocation8 + $0x4a0] sm:$0xff] }
 0x358   :  { %5032 = vmatpush1.bf16.msra.mxu1 %v2075_v62  ;;  %4705 = vmatprep.subr.bf16.mxu0 %v2090_v42  ;;  %v1067_v62 = vld [vmem:[#allocation8 + $0x330] sm:$0xff]  ;;  %v2185_v42 = vunpack.c.l.s8.bf16 %v1065_v13 }
 0x359   :  { %5033 = vmatprep.subr.bf16.mxu1 %v2092_v6  ;;  %v2187_v17 = vunpack.c.l.s8.bf16 %v1067_v62  ;;  %v2202_v6 = vunpack.c.h.s8.bf16 %v1066_v52  ;;  %v2282_v52 = vunpack.c.l.s8.bf16 %v1114_v38 }
 0x35b   :  { %4706 = vmatpush1.bf16.msra.mxu0 %v2089_v24  ;;  %v1082_v24 = vld [vmem:[#allocation8 + $0x3a8] sm:$0xff] }
 0x35c   :  { %5034 = vmatpush1.bf16.msra.mxu1 %v2091_v8  ;;  %4707 = vmatprep.subr.bf16.mxu0 %v2106_v9  ;;  %v1084_v8 = vld [vmem:[#allocation8 + $0x3b8] sm:$0xff]  ;;  %v2201_v9 = vunpack.c.h.s8.bf16 %v1065_v13  ;;  %v2218_v60 = vunpack.c.l.s8.bf16 %v1082_v24 }
 0x35d   :  { %5035 = vmatprep.subr.bf16.mxu1 %v2108_v0  ;;  %v2203_v0 = vunpack.c.h.s8.bf16 %v1067_v62  ;;  %v2236_v22 = vunpack.c.h.s8.bf16 %v1084_v8 }
 0x35f   :  { %4708 = vmatpush1.bf16.msra.mxu0 %v2105_v31  ;;  %v2220_v31 = vunpack.c.l.s8.bf16 %v1084_v8  ;;  %v1129_v8 = vld [vmem:[#allocation8 + $0x520] sm:$0xff] }
 0x360   :  { %5036 = vmatpush1.bf16.msra.mxu1 %v2107_v18  ;;  %4709 = vmatprep.subr.bf16.mxu0 %v2122_v11  ;;  %v1083_v18 = vld [vmem:[#allocation8 + $0x3b0] sm:$0xff]  ;;  %v2217_v11 = vunpack.c.l.s8.bf16 %v1081_v16 }
 0x361   :  { %5037 = vmatprep.subr.bf16.mxu1 %v2124_v3  ;;  %v2219_v19 = vunpack.c.l.s8.bf16 %v1083_v18  ;;  %v2234_v3 = vunpack.c.h.s8.bf16 %v1082_v24 }
 0x363   :  { %4710 = vmatpush1.bf16.msra.mxu0 %v2121_v15  ;;  %v1098_v15 = vld [vmem:[#allocation8 + $0x428] sm:$0xff] }
 0x364   :  { %5038 = vmatpush1.bf16.msra.mxu1 %v2123_v27  ;;  %4711 = vmatprep.subr.bf16.mxu0 %v2138_v28  ;;  %v1100_v27 = vld [vmem:[#allocation8 + $0x438] sm:$0xff]  ;;  %v2233_v28 = vunpack.c.h.s8.bf16 %v1081_v16  ;;  %v2250_v29 = vunpack.c.l.s8.bf16 %v1098_v15 }
 0x365   :  { %5039 = vmatprep.subr.bf16.mxu1 %v2140_v2  ;;  %v2235_v2 = vunpack.c.h.s8.bf16 %v1083_v18 }
 0x367   :  { %4712 = vmatpush1.bf16.msra.mxu0 %v2137_v40  ;;  %v2252_v40 = vunpack.c.l.s8.bf16 %v1100_v27 }
 0x368   :  { %5040 = vmatpush1.bf16.msra.mxu1 %v2139_v32  ;;  %4713 = vmatprep.subr.bf16.mxu0 %v2154_v44  ;;  %v1099_v32 = vld [vmem:[#allocation8 + $0x430] sm:$0xff]  ;;  %v2249_v44 = vunpack.c.l.s8.bf16 %v1097_v30 }
 0x369   :  { %5041 = vmatprep.subr.bf16.mxu1 %v2156_v37  ;;  %v2251_v34 = vunpack.c.l.s8.bf16 %v1099_v32  ;;  %v2266_v37 = vunpack.c.h.s8.bf16 %v1098_v15 }
 0x36b   :  { %4714 = vmatpush1.bf16.msra.mxu0 %v2153_v23  ;;  %v2268_v23 = vunpack.c.h.s8.bf16 %v1100_v27  ;;  %v1145_v27 = vld [vmem:[#allocation8 + $0x5a0] sm:$0xff] }
 0x36c   :  { %5042 = vmatpush1.bf16.msra.mxu1 %v2155_v39  ;;  %4715 = vmatprep.subr.bf16.mxu0 %v2170_v33  ;;  %v1116_v39 = vld [vmem:[#allocation8 + $0x4b8] sm:$0xff]  ;;  %v2265_v33 = vunpack.c.h.s8.bf16 %v1097_v30 }
 0x36d   :  { %5043 = vmatprep.subr.bf16.mxu1 %v2172_v49  ;;  %v2267_v49 = vunpack.c.h.s8.bf16 %v1099_v32  ;;  %v2300_v62 = vunpack.c.h.s8.bf16 %v1116_v39 }
 0x36f   :  { %4716 = vmatpush1.bf16.msra.mxu0 %v2169_v55  ;;  %v2284_v55 = vunpack.c.l.s8.bf16 %v1116_v39  ;;  %v1161_v39 = vld [vmem:[#allocation8 + $0x620] sm:$0xff] }
 0x370   :  { %5044 = vmatpush1.bf16.msra.mxu1 %v2171_v57  ;;  %4717 = vmatprep.subr.bf16.mxu0 %v2186_v59  ;;  %v1115_v57 = vld [vmem:[#allocation8 + $0x4b0] sm:$0xff]  ;;  %v2281_v59 = vunpack.c.l.s8.bf16 %v1113_v63 }
 0x371   :  { %5045 = vmatprep.subr.bf16.mxu1 %v2188_v58  ;;  %v2283_v13 = vunpack.c.l.s8.bf16 %v1115_v57  ;;  %v2298_v58 = vunpack.c.h.s8.bf16 %v1114_v38 }
 0x373   :  { %4718 = vmatpush1.bf16.msra.mxu0 %v2185_v42  ;;  %v1130_v42 = vld [vmem:[#allocation8 + $0x528] sm:$0xff] }
 0x374   :  { %5046 = vmatpush1.bf16.msra.mxu1 %v2187_v17  ;;  %4719 = vmatprep.subr.bf16.mxu0 %v2202_v6  ;;  %v1132_v17 = vld [vmem:[#allocation8 + $0x538] sm:$0xff]  ;;  %v2297_v6 = vunpack.c.h.s8.bf16 %v1113_v63  ;;  %v2314_v24 = vunpack.c.l.s8.bf16 %v1130_v42 }
 0x375   :  { %5047 = vmatprep.subr.bf16.mxu1 %v2204_v7  ;;  %v2299_v7 = vunpack.c.h.s8.bf16 %v1115_v57  ;;  %v2332_v18 = vunpack.c.h.s8.bf16 %v1132_v17 }
 0x377   :  { %4720 = vmatpush1.bf16.msra.mxu0 %v2201_v9  ;;  %v2316_v9 = vunpack.c.l.s8.bf16 %v1132_v17  ;;  %v1177_v17 = vld [vmem:[#allocation8 + $0x6a0] sm:$0xff] }
 0x378   :  { %5048 = vmatpush1.bf16.msra.mxu1 %v2203_v0  ;;  %4721 = vmatprep.subr.bf16.mxu0 %v2218_v60  ;;  %v1131_v0 = vld [vmem:[#allocation8 + $0x530] sm:$0xff]  ;;  %v2313_v60 = vunpack.c.l.s8.bf16 %v1129_v8 }
 0x379   :  { %5049 = vmatprep.subr.bf16.mxu1 %v2220_v31  ;;  %v2315_v16 = vunpack.c.l.s8.bf16 %v1131_v0  ;;  %v2330_v31 = vunpack.c.h.s8.bf16 %v1130_v42 }
 0x37b   :  { %4722 = vmatpush1.bf16.msra.mxu0 %v2217_v11  ;;  %v1146_v11 = vld [vmem:[#allocation8 + $0x5a8] sm:$0xff] }
 0x37c   :  { %5050 = vmatpush1.bf16.msra.mxu1 %v2219_v19  ;;  %4723 = vmatprep.subr.bf16.mxu0 %v2234_v3  ;;  %v1148_v19 = vld [vmem:[#allocation8 + $0x5b8] sm:$0xff]  ;;  %v2329_v3 = vunpack.c.h.s8.bf16 %v1129_v8  ;;  %v2346_v15 = vunpack.c.l.s8.bf16 %v1146_v11 }
 0x37d   :  { %5051 = vmatprep.subr.bf16.mxu1 %v2236_v22  ;;  %v2331_v22 = vunpack.c.h.s8.bf16 %v1131_v0  ;;  %v2364_v32 = vunpack.c.h.s8.bf16 %v1148_v19 }
 0x37f   :  { %4724 = vmatpush1.bf16.msra.mxu0 %v2233_v28  ;;  %v2348_v28 = vunpack.c.l.s8.bf16 %v1148_v19  ;;  %v1193_v19 = vld [vmem:[#allocation8 + $0x720] sm:$0xff] }
 0x380   :  { %5052 = vmatpush1.bf16.msra.mxu1 %v2235_v2  ;;  %4734 = vmatprep.subr.bf16.mxu0 %v2250_v29  ;;  %v1147_v2 = vld [vmem:[#allocation8 + $0x5b0] sm:$0xff]  ;;  %v2345_v29 = vunpack.c.l.s8.bf16 %v1145_v27 }
 0x381   :  { %5062 = vmatprep.subr.bf16.mxu1 %v2252_v40  ;;  %v2347_v30 = vunpack.c.l.s8.bf16 %v1147_v2  ;;  %v2362_v40 = vunpack.c.h.s8.bf16 %v1146_v11  ;;  %v2363_v38 = vunpack.c.h.s8.bf16 %v1147_v2 }
 0x382   :  { %4726 = vmatmul.mubr.bf16.vlgmr.msra.gmra.mrb[20].mxu0 %v9463_v5 }
 0x383   :  { %5054 = vmatmul.mubr.bf16.vlgmr.msra.gmra.mrb[20].mxu1 %v9463_v5  ;;  %4735 = vmatpush1.bf16.msra.mxu0 %v2249_v44  ;;  %v1162_v44 = vld [vmem:[#allocation8 + $0x628] sm:$0xff] }
 0x384   :  { %4766 = vmatprep.mubr.bf16.mxu0 %v9469_v10  ;;  %5063 = vmatpush1.bf16.msra.mxu1 %v2251_v34  ;;  %v1164_v34 = vld [vmem:[#allocation8 + $0x638] sm:$0xff] }
 0x385   :  { %5094 = vmatprep.mubr.bf16.mxu1 %v9469_v10  ;;  %4736 = vmatprep.subr.bf16.mxu0 %v2266_v37  ;;  %v2361_v37 = vunpack.c.h.s8.bf16 %v1145_v27  ;;  %v2396_v57 = vunpack.c.h.s8.bf16 %v1164_v34 }
 0x386   :  { %5064 = vmatprep.subr.bf16.mxu1 %v2268_v23  ;;  %v2378_v23 = vunpack.c.l.s8.bf16 %v1162_v44 }
 0x387   :  { %4737 = vmatpush1.bf16.msra.mxu0 %v2265_v33  ;;  %v2380_v33 = vunpack.c.l.s8.bf16 %v1164_v34  ;;  %v1209_v34 = vld [vmem:[#allocation8 + $0x7a0] sm:$0xff] }
 0x388   :  { %5065 = vmatpush1.bf16.msra.mxu1 %v2267_v49  ;;  %4738 = vmatprep.subr.bf16.mxu0 %v2282_v52  ;;  %v1163_v49 = vld [vmem:[#allocation8 + $0x630] sm:$0xff]  ;;  %v2377_v52 = vunpack.c.l.s8.bf16 %v1161_v39 }
 0x389   :  { %5066 = vmatprep.subr.bf16.mxu1 %v2284_v55  ;;  %v2379_v63 = vunpack.c.l.s8.bf16 %v1163_v49  ;;  %v2394_v55 = vunpack.c.h.s8.bf16 %v1162_v44 }
 0x38b   :  { %4739 = vmatpush1.bf16.msra.mxu0 %v2281_v59  ;;  %v1178_v59 = vld [vmem:[#allocation8 + $0x6a8] sm:$0xff] }
 0x38c   :  { %5067 = vmatpush1.bf16.msra.mxu1 %v2283_v13  ;;  %4740 = vmatprep.subr.bf16.mxu0 %v2298_v58  ;;  %v1180_v13 = vld [vmem:[#allocation8 + $0x6b8] sm:$0xff]  ;;  %v2393_v58 = vunpack.c.h.s8.bf16 %v1161_v39  ;;  %v2410_v42 = vunpack.c.l.s8.bf16 %v1178_v59 }
 0x38d   :  { %5068 = vmatprep.subr.bf16.mxu1 %v2300_v62  ;;  %v2395_v62 = vunpack.c.h.s8.bf16 %v1163_v49  ;;  %v2428_v0 = vunpack.c.h.s8.bf16 %v1180_v13 }
 0x38f   :  { %4741 = vmatpush1.bf16.msra.mxu0 %v2297_v6  ;;  %v2412_v6 = vunpack.c.l.s8.bf16 %v1180_v13  ;;  %v1225_v13 = vld [vmem:[#allocation8 + $0x820] sm:$0xff] }
 0x390   :  { %5069 = vmatpush1.bf16.msra.mxu1 %v2299_v7  ;;  %4742 = vmatprep.subr.bf16.mxu0 %v2314_v24  ;;  %v1179_v7 = vld [vmem:[#allocation8 + $0x6b0] sm:$0xff]  ;;  %v2409_v24 = vunpack.c.l.s8.bf16 %v1177_v17 }
 0x391   :  { %5070 = vmatprep.subr.bf16.mxu1 %v2316_v9  ;;  %v2411_v8 = vunpack.c.l.s8.bf16 %v1179_v7  ;;  %v2426_v9 = vunpack.c.h.s8.bf16 %v1178_v59 }
 0x393   :  { %4743 = vmatpush1.bf16.msra.mxu0 %v2313_v60  ;;  %v1194_v60 = vld [vmem:[#allocation8 + $0x728] sm:$0xff] }
 0x394   :  { %5071 = vmatpush1.bf16.msra.mxu1 %v2315_v16  ;;  %4744 = vmatprep.subr.bf16.mxu0 %v2330_v31  ;;  %v1196_v16 = vld [vmem:[#allocation8 + $0x738] sm:$0xff]  ;;  %v2425_v31 = vunpack.c.h.s8.bf16 %v1177_v17  ;;  %v2442_v11 = vunpack.c.l.s8.bf16 %v1194_v60 }
 0x395   :  { %5072 = vmatprep.subr.bf16.mxu1 %v2332_v18  ;;  %v2427_v18 = vunpack.c.h.s8.bf16 %v1179_v7  ;;  %v2460_v2 = vunpack.c.h.s8.bf16 %v1196_v16  ;;  %v1242_v7 = vld [vmem:[#allocation8 + $0x8a8] sm:$0xff] }
 0x397   :  { %4745 = vmatpush1.bf16.msra.mxu0 %v2329_v3  ;;  %v2444_v3 = vunpack.c.l.s8.bf16 %v1196_v16  ;;  %v1241_v16 = vld [vmem:[#allocation8 + $0x8a0] sm:$0xff] }
 0x398   :  { %5073 = vmatpush1.bf16.msra.mxu1 %v2331_v22  ;;  %4746 = vmatprep.subr.bf16.mxu0 %v2346_v15  ;;  %v1195_v22 = vld [vmem:[#allocation8 + $0x730] sm:$0xff]  ;;  %v2441_v15 = vunpack.c.l.s8.bf16 %v1193_v19 }
 0x399   :  { %5074 = vmatprep.subr.bf16.mxu1 %v2348_v28  ;;  %v2443_v27 = vunpack.c.l.s8.bf16 %v1195_v22  ;;  %v2458_v28 = vunpack.c.h.s8.bf16 %v1194_v60  ;;  %v2538_v60 = vunpack.c.l.s8.bf16 %v1242_v7 }
 0x39b   :  { %4747 = vmatpush1.bf16.msra.mxu0 %v2345_v29  ;;  %v1210_v29 = vld [vmem:[#allocation8 + $0x7a8] sm:$0xff] }
 0x39c   :  { %5075 = vmatpush1.bf16.msra.mxu1 %v2347_v30  ;;  %4748 = vmatprep.subr.bf16.mxu0 %v2362_v40  ;;  %v1212_v30 = vld [vmem:[#allocation8 + $0x7b8] sm:$0xff]  ;;  %v2457_v40 = vunpack.c.h.s8.bf16 %v1193_v19  ;;  %v2474_v44 = vunpack.c.l.s8.bf16 %v1210_v29 }
 0x39d   :  { %5076 = vmatprep.subr.bf16.mxu1 %v2364_v32  ;;  %v2459_v32 = vunpack.c.h.s8.bf16 %v1195_v22  ;;  %v2492_v49 = vunpack.c.h.s8.bf16 %v1212_v30 }
 0x39f   :  { %4749 = vmatpush1.bf16.msra.mxu0 %v2361_v37  ;;  %v2476_v37 = vunpack.c.l.s8.bf16 %v1212_v30  ;;  %v1257_v30 = vld [vmem:[#allocation8 + $0x920] sm:$0xff] }
 0x3a0   :  { %5077 = vmatpush1.bf16.msra.mxu1 %v2363_v38  ;;  %4750 = vmatprep.subr.bf16.mxu0 %v2378_v23  ;;  %v1211_v38 = vld [vmem:[#allocation8 + $0x7b0] sm:$0xff]  ;;  %v2473_v23 = vunpack.c.l.s8.bf16 %v1209_v34 }
 0x3a1   :  { %5078 = vmatprep.subr.bf16.mxu1 %v2380_v33  ;;  %v2475_v39 = vunpack.c.l.s8.bf16 %v1211_v38  ;;  %v2490_v33 = vunpack.c.h.s8.bf16 %v1210_v29 }
 0x3a3   :  { %4751 = vmatpush1.bf16.msra.mxu0 %v2377_v52  ;;  %v1226_v52 = vld [vmem:[#allocation8 + $0x828] sm:$0xff] }
 0x3a4   :  { %5079 = vmatpush1.bf16.msra.mxu1 %v2379_v63  ;;  %4752 = vmatprep.subr.bf16.mxu0 %v2394_v55  ;;  %v1228_v63 = vld [vmem:[#allocation8 + $0x838] sm:$0xff]  ;;  %v2489_v55 = vunpack.c.h.s8.bf16 %v1209_v34  ;;  %v2506_v59 = vunpack.c.l.s8.bf16 %v1226_v52 }
 0x3a5   :  { %5080 = vmatprep.subr.bf16.mxu1 %v2396_v57  ;;  %v2491_v57 = vunpack.c.h.s8.bf16 %v1211_v38 }
 0x3a7   :  { %4753 = vmatpush1.bf16.msra.mxu0 %v2393_v58  ;;  %v2508_v58 = vunpack.c.l.s8.bf16 %v1228_v63 }
 0x3a8   :  { %5081 = vmatpush1.bf16.msra.mxu1 %v2395_v62  ;;  %4754 = vmatprep.subr.bf16.mxu0 %v2410_v42  ;;  %v1227_v62 = vld [vmem:[#allocation8 + $0x830] sm:$0xff]  ;;  %v2505_v42 = vunpack.c.l.s8.bf16 %v1225_v13 }
 0x3a9   :  { %5082 = vmatprep.subr.bf16.mxu1 %v2412_v6  ;;  %v2507_v17 = vunpack.c.l.s8.bf16 %v1227_v62  ;;  %v2522_v6 = vunpack.c.h.s8.bf16 %v1226_v52 }
 0x3ab   :  { %4755 = vmatpush1.bf16.msra.mxu0 %v2409_v24  ;;  %v2524_v24 = vunpack.c.h.s8.bf16 %v1228_v63  ;;  %v1273_v63 = vld [vmem:[#allocation8 + $0x9a0] sm:$0xff] }
 0x3ac   :  { %5083 = vmatpush1.bf16.msra.mxu1 %v2411_v8  ;;  %4756 = vmatprep.subr.bf16.mxu0 %v2426_v9  ;;  %v1244_v8 = vld [vmem:[#allocation8 + $0x8b8] sm:$0xff]  ;;  %v2521_v9 = vunpack.c.h.s8.bf16 %v1225_v13 }
 0x3ad   :  { %5084 = vmatprep.subr.bf16.mxu1 %v2428_v0  ;;  %v2523_v0 = vunpack.c.h.s8.bf16 %v1227_v62  ;;  %v2556_v22 = vunpack.c.h.s8.bf16 %v1244_v8 }
 0x3af   :  { %4757 = vmatpush1.bf16.msra.mxu0 %v2425_v31  ;;  %v2540_v31 = vunpack.c.l.s8.bf16 %v1244_v8  ;;  %v1289_v8 = vld [vmem:[#allocation8 + $0xa20] sm:$0xff] }
 0x3b0   :  { %5085 = vmatpush1.bf16.msra.mxu1 %v2427_v18  ;;  %4758 = vmatprep.subr.bf16.mxu0 %v2442_v11  ;;  %v1243_v18 = vld [vmem:[#allocation8 + $0x8b0] sm:$0xff]  ;;  %v2537_v11 = vunpack.c.l.s8.bf16 %v1241_v16 }
 0x3b1   :  { %5086 = vmatprep.subr.bf16.mxu1 %v2444_v3  ;;  %v2539_v19 = vunpack.c.l.s8.bf16 %v1243_v18  ;;  %v2554_v3 = vunpack.c.h.s8.bf16 %v1242_v7 }
 0x3b3   :  { %4759 = vmatpush1.bf16.msra.mxu0 %v2441_v15  ;;  %v1258_v15 = vld [vmem:[#allocation8 + $0x928] sm:$0xff] }
 0x3b4   :  { %5087 = vmatpush1.bf16.msra.mxu1 %v2443_v27  ;;  %4760 = vmatprep.subr.bf16.mxu0 %v2458_v28  ;;  %v1260_v27 = vld [vmem:[#allocation8 + $0x938] sm:$0xff]  ;;  %v2553_v28 = vunpack.c.h.s8.bf16 %v1241_v16  ;;  %v2570_v29 = vunpack.c.l.s8.bf16 %v1258_v15 }
 0x3b5   :  { %5088 = vmatprep.subr.bf16.mxu1 %v2460_v2  ;;  %v2555_v2 = vunpack.c.h.s8.bf16 %v1243_v18  ;;  %v2588_v38 = vunpack.c.h.s8.bf16 %v1260_v27 }
 0x3b7   :  { %4761 = vmatpush1.bf16.msra.mxu0 %v2457_v40  ;;  %v2572_v40 = vunpack.c.l.s8.bf16 %v1260_v27  ;;  %v1305_v27 = vld [vmem:[#allocation8 + $0xaa0] sm:$0xff] }
 0x3b8   :  { %5089 = vmatpush1.bf16.msra.mxu1 %v2459_v32  ;;  %4762 = vmatprep.subr.bf16.mxu0 %v2474_v44  ;;  %v1259_v32 = vld [vmem:[#allocation8 + $0x930] sm:$0xff]  ;;  %v2569_v44 = vunpack.c.l.s8.bf16 %v1257_v30 }
 0x3b9   :  { %5090 = vmatprep.subr.bf16.mxu1 %v2476_v37  ;;  %v2571_v34 = vunpack.c.l.s8.bf16 %v1259_v32  ;;  %v2586_v37 = vunpack.c.h.s8.bf16 %v1258_v15 }
 0x3bb   :  { %4763 = vmatpush1.bf16.msra.mxu0 %v2473_v23  ;;  %v1274_v23 = vld [vmem:[#allocation8 + $0x9a8] sm:$0xff] }
 0x3bc   :  { %5091 = vmatpush1.bf16.msra.mxu1 %v2475_v39  ;;  %4764 = vmatprep.subr.bf16.mxu0 %v2490_v33  ;;  %v1276_v39 = vld [vmem:[#allocation8 + $0x9b8] sm:$0xff]  ;;  %v2585_v33 = vunpack.c.h.s8.bf16 %v1257_v30  ;;  %v2602_v52 = vunpack.c.l.s8.bf16 %v1274_v23 }
 0x3bd   :  { %5092 = vmatprep.subr.bf16.mxu1 %v2492_v49  ;;  %v2587_v49 = vunpack.c.h.s8.bf16 %v1259_v32  ;;  %v2620_v62 = vunpack.c.h.s8.bf16 %v1276_v39 }
 0x3bf   :  { %4765 = vmatpush1.bf16.msra.mxu0 %v2489_v55  ;;  %v2604_v55 = vunpack.c.l.s8.bf16 %v1276_v39  ;;  %v1321_v39 = vld [vmem:[#allocation8 + $0xb20] sm:$0xff] }
 0x3c0   :  { %5093 = vmatpush1.bf16.msra.mxu1 %v2491_v57  ;;  %4775 = vmatprep.subr.bf16.mxu0 %v2506_v59  ;;  %v1275_v57 = vld [vmem:[#allocation8 + $0x9b0] sm:$0xff]  ;;  %v2601_v59 = vunpack.c.l.s8.bf16 %v1273_v63 }
 0x3c1   :  { %5103 = vmatprep.subr.bf16.mxu1 %v2508_v58  ;;  %v2603_v13 = vunpack.c.l.s8.bf16 %v1275_v57  ;;  %v2618_v58 = vunpack.c.h.s8.bf16 %v1274_v23  ;;  %v2619_v7 = vunpack.c.h.s8.bf16 %v1275_v57 }
 0x3c2   :  { %4767 = vmatmul.mubr.bf16.vlgmr.msra.gmra.mrb[20].mxu0 %v9532_v4 }
 0x3c3   :  { %5095 = vmatmul.mubr.bf16.vlgmr.msra.gmra.mrb[20].mxu1 %v9532_v4  ;;  %4776 = vmatpush1.bf16.msra.mxu0 %v2505_v42  ;;  %v1290_v42 = vld [vmem:[#allocation8 + $0xa28] sm:$0xff] }
 0x3c4   :  { %4807 = vmatprep.mubr.bf16.mxu0 %v9534_v12  ;;  %5104 = vmatpush1.bf16.msra.mxu1 %v2507_v17  ;;  %v1292_v17 = vld [vmem:[#allocation8 + $0xa38] sm:$0xff] }
 0x3c5   :  { %5135 = vmatprep.mubr.bf16.mxu1 %v9534_v12  ;;  %4777 = vmatprep.subr.bf16.mxu0 %v2522_v6  ;;  %v2617_v6 = vunpack.c.h.s8.bf16 %v1273_v63  ;;  %v2652_v18 = vunpack.c.h.s8.bf16 %v1292_v17 }
 0x3c6   :  { %5105 = vmatprep.subr.bf16.mxu1 %v2524_v24  ;;  %v2634_v24 = vunpack.c.l.s8.bf16 %v1290_v42 }
 0x3c7   :  { %4778 = vmatpush1.bf16.msra.mxu0 %v2521_v9  ;;  %v2636_v9 = vunpack.c.l.s8.bf16 %v1292_v17  ;;  %v1337_v17 = vld [vmem:[#allocation8 + $0xba0] sm:$0xff] }
 0x3c8   :  { %5106 = vmatpush1.bf16.msra.mxu1 %v2523_v0  ;;  %4779 = vmatprep.subr.bf16.mxu0 %v2538_v60  ;;  %v1291_v0 = vld [vmem:[#allocation8 + $0xa30] sm:$0xff]  ;;  %v2633_v60 = vunpack.c.l.s8.bf16 %v1289_v8 }
 0x3c9   :  { %5107 = vmatprep.subr.bf16.mxu1 %v2540_v31  ;;  %v2635_v16 = vunpack.c.l.s8.bf16 %v1291_v0  ;;  %v2650_v31 = vunpack.c.h.s8.bf16 %v1290_v42 }
 0x3cb   :  { %4780 = vmatpush1.bf16.msra.mxu0 %v2537_v11  ;;  %v1306_v11 = vld [vmem:[#allocation8 + $0xaa8] sm:$0xff] }
 0x3cc   :  { %5108 = vmatpush1.bf16.msra.mxu1 %v2539_v19  ;;  %4781 = vmatprep.subr.bf16.mxu0 %v2554_v3  ;;  %v1308_v19 = vld [vmem:[#allocation8 + $0xab8] sm:$0xff]  ;;  %v2649_v3 = vunpack.c.h.s8.bf16 %v1289_v8  ;;  %v2666_v15 = vunpack.c.l.s8.bf16 %v1306_v11 }
 0x3cd   :  { %5109 = vmatprep.subr.bf16.mxu1 %v2556_v22  ;;  %v2651_v22 = vunpack.c.h.s8.bf16 %v1291_v0  ;;  %v2684_v32 = vunpack.c.h.s8.bf16 %v1308_v19 }
 0x3cf   :  { %4782 = vmatpush1.bf16.msra.mxu0 %v2553_v28  ;;  %v2668_v28 = vunpack.c.l.s8.bf16 %v1308_v19  ;;  %v1353_v19 = vld [vmem:[#allocation8 + $0xc20] sm:$0xff] }
 0x3d0   :  { %5110 = vmatpush1.bf16.msra.mxu1 %v2555_v2  ;;  %4783 = vmatprep.subr.bf16.mxu0 %v2570_v29  ;;  %v1307_v2 = vld [vmem:[#allocation8 + $0xab0] sm:$0xff]  ;;  %v2665_v29 = vunpack.c.l.s8.bf16 %v1305_v27 }
 0x3d1   :  { %5111 = vmatprep.subr.bf16.mxu1 %v2572_v40  ;;  %v2667_v30 = vunpack.c.l.s8.bf16 %v1307_v2  ;;  %v2682_v40 = vunpack.c.h.s8.bf16 %v1306_v11 }
 0x3d3   :  { %4784 = vmatpush1.bf16.msra.mxu0 %v2569_v44  ;;  %v1322_v44 = vld [vmem:[#allocation8 + $0xb28] sm:$0xff] }
 0x3d4   :  { %5112 = vmatpush1.bf16.msra.mxu1 %v2571_v34  ;;  %4785 = vmatprep.subr.bf16.mxu0 %v2586_v37  ;;  %v1324_v34 = vld [vmem:[#allocation8 + $0xb38] sm:$0xff]  ;;  %v2681_v37 = vunpack.c.h.s8.bf16 %v1305_v27  ;;  %v2698_v23 = vunpack.c.l.s8.bf16 %v1322_v44 }
 0x3d5   :  { %5113 = vmatprep.subr.bf16.mxu1 %v2588_v38  ;;  %v2683_v38 = vunpack.c.h.s8.bf16 %v1307_v2  ;;  %v2716_v57 = vunpack.c.h.s8.bf16 %v1324_v34  ;;  %v1370_v2 = vld [vmem:[#allocation8 + $0xca8] sm:$0xff] }
 0x3d7   :  { %4786 = vmatpush1.bf16.msra.mxu0 %v2585_v33  ;;  %v2700_v33 = vunpack.c.l.s8.bf16 %v1324_v34  ;;  %v1369_v34 = vld [vmem:[#allocation8 + $0xca0] sm:$0xff] }
 0x3d8   :  { %5114 = vmatpush1.bf16.msra.mxu1 %v2587_v49  ;;  %4787 = vmatprep.subr.bf16.mxu0 %v2602_v52  ;;  %v1323_v49 = vld [vmem:[#allocation8 + $0xb30] sm:$0xff]  ;;  %v2697_v52 = vunpack.c.l.s8.bf16 %v1321_v39 }
 0x3d9   :  { %5115 = vmatprep.subr.bf16.mxu1 %v2604_v55  ;;  %v2699_v63 = vunpack.c.l.s8.bf16 %v1323_v49  ;;  %v2714_v55 = vunpack.c.h.s8.bf16 %v1322_v44  ;;  %v2794_v44 = vunpack.c.l.s8.bf16 %v1370_v2 }
 0x3db   :  { %4788 = vmatpush1.bf16.msra.mxu0 %v2601_v59  ;;  %v1338_v59 = vld [vmem:[#allocation8 + $0xba8] sm:$0xff] }
 0x3dc   :  { %5116 = vmatpush1.bf16.msra.mxu1 %v2603_v13  ;;  %4789 = vmatprep.subr.bf16.mxu0 %v2618_v58  ;;  %v1340_v13 = vld [vmem:[#allocation8 + $0xbb8] sm:$0xff]  ;;  %v2713_v58 = vunpack.c.h.s8.bf16 %v1321_v39  ;;  %v2730_v42 = vunpack.c.l.s8.bf16 %v1338_v59 }
 0x3dd   :  { %5117 = vmatprep.subr.bf16.mxu1 %v2620_v62  ;;  %v2715_v62 = vunpack.c.h.s8.bf16 %v1323_v49  ;;  %v2748_v0 = vunpack.c.h.s8.bf16 %v1340_v13 }
 0x3df   :  { %4790 = vmatpush1.bf16.msra.mxu0 %v2617_v6  ;;  %v2732_v6 = vunpack.c.l.s8.bf16 %v1340_v13  ;;  %v1385_v13 = vld [vmem:[#allocation8 + $0xd20] sm:$0xff] }
 0x3e0   :  { %5118 = vmatpush1.bf16.msra.mxu1 %v2619_v7  ;;  %4791 = vmatprep.subr.bf16.mxu0 %v2634_v24  ;;  %v1339_v7 = vld [vmem:[#allocation8 + $0xbb0] sm:$0xff]  ;;  %v2729_v24 = vunpack.c.l.s8.bf16 %v1337_v17 }
 0x3e1   :  { %5119 = vmatprep.subr.bf16.mxu1 %v2636_v9  ;;  %v2731_v8 = vunpack.c.l.s8.bf16 %v1339_v7  ;;  %v2746_v9 = vunpack.c.h.s8.bf16 %v1338_v59 }
 0x3e3   :  { %4792 = vmatpush1.bf16.msra.mxu0 %v2633_v60  ;;  %v1354_v60 = vld [vmem:[#allocation8 + $0xc28] sm:$0xff] }
 0x3e4   :  { %5120 = vmatpush1.bf16.msra.mxu1 %v2635_v16  ;;  %4793 = vmatprep.subr.bf16.mxu0 %v2650_v31  ;;  %v1356_v16 = vld [vmem:[#allocation8 + $0xc38] sm:$0xff]  ;;  %v2745_v31 = vunpack.c.h.s8.bf16 %v1337_v17  ;;  %v2762_v11 = vunpack.c.l.s8.bf16 %v1354_v60 }
 0x3e5   :  { %5121 = vmatprep.subr.bf16.mxu1 %v2652_v18  ;;  %v2747_v18 = vunpack.c.h.s8.bf16 %v1339_v7 }
 0x3e7   :  { %4794 = vmatpush1.bf16.msra.mxu0 %v2649_v3  ;;  %v2764_v3 = vunpack.c.l.s8.bf16 %v1356_v16 }
 0x3e8   :  { %5122 = vmatpush1.bf16.msra.mxu1 %v2651_v22  ;;  %4795 = vmatprep.subr.bf16.mxu0 %v2666_v15  ;;  %v1355_v22 = vld [vmem:[#allocation8 + $0xc30] sm:$0xff]  ;;  %v2761_v15 = vunpack.c.l.s8.bf16 %v1353_v19 }
 0x3e9   :  { %5123 = vmatprep.subr.bf16.mxu1 %v2668_v28  ;;  %v2763_v27 = vunpack.c.l.s8.bf16 %v1355_v22  ;;  %v2778_v28 = vunpack.c.h.s8.bf16 %v1354_v60 }
 0x3eb   :  { %4796 = vmatpush1.bf16.msra.mxu0 %v2665_v29  ;;  %v2780_v29 = vunpack.c.h.s8.bf16 %v1356_v16  ;;  %v1401_v16 = vld [vmem:[#allocation8 + $0xda0] sm:$0xff] }
 0x3ec   :  { %5124 = vmatpush1.bf16.msra.mxu1 %v2667_v30  ;;  %4797 = vmatprep.subr.bf16.mxu0 %v2682_v40  ;;  %v1372_v30 = vld [vmem:[#allocation8 + $0xcb8] sm:$0xff]  ;;  %v2777_v40 = vunpack.c.h.s8.bf16 %v1353_v19 }
 0x3ed   :  { %5125 = vmatprep.subr.bf16.mxu1 %v2684_v32  ;;  %v2779_v32 = vunpack.c.h.s8.bf16 %v1355_v22  ;;  %v2812_v49 = vunpack.c.h.s8.bf16 %v1372_v30 }
 0x3ef   :  { %4798 = vmatpush1.bf16.msra.mxu0 %v2681_v37  ;;  %v2796_v37 = vunpack.c.l.s8.bf16 %v1372_v30 }
 0x3f0   :  { %5126 = vmatpush1.bf16.msra.mxu1 %v2683_v38  ;;  %4799 = vmatprep.subr.bf16.mxu0 %v2698_v23  ;;  %v1371_v38 = vld [vmem:[#allocation8 + $0xcb0] sm:$0xff]  ;;  %v2793_v23 = vunpack.c.l.s8.bf16 %v1369_v34 }
 0x3f1   :  { %5127 = vmatprep.subr.bf16.mxu1 %v2700_v33  ;;  %v2795_v39 = vunpack.c.l.s8.bf16 %v1371_v38  ;;  %v2810_v33 = vunpack.c.h.s8.bf16 %v1370_v2 }
 0x3f3   :  { %4800 = vmatpush1.bf16.msra.mxu0 %v2697_v52  ;;  %v1386_v52 = vld [vmem:[#allocation8 + $0xd28] sm:$0xff] }
 0x3f4   :  { %5128 = vmatpush1.bf16.msra.mxu1 %v2699_v63  ;;  %4801 = vmatprep.subr.bf16.mxu0 %v2714_v55  ;;  %v1388_v63 = vld [vmem:[#allocation8 + $0xd38] sm:$0xff]  ;;  %v2809_v55 = vunpack.c.h.s8.bf16 %v1369_v34  ;;  %v2826_v59 = vunpack.c.l.s8.bf16 %v1386_v52 }
 0x3f5   :  { %5129 = vmatprep.subr.bf16.mxu1 %v2716_v57  ;;  %v2811_v57 = vunpack.c.h.s8.bf16 %v1371_v38  ;;  %v2844_v7 = vunpack.c.h.s8.bf16 %v1388_v63  ;;  %v1420_v34 = vld [vmem:[#allocation8 + $0xe38] sm:$0xff] }
 0x3f7   :  { %4802 = vmatpush1.bf16.msra.mxu0 %v2713_v58  ;;  %v2828_v58 = vunpack.c.l.s8.bf16 %v1388_v63 }
 0x3f8   :  { %5130 = vmatpush1.bf16.msra.mxu1 %v2715_v62  ;;  %4803 = vmatprep.subr.bf16.mxu0 %v2730_v42  ;;  %v1387_v62 = vld [vmem:[#allocation8 + $0xd30] sm:$0xff]  ;;  %v2825_v42 = vunpack.c.l.s8.bf16 %v1385_v13 }
 0x3f9   :  { %5131 = vmatprep.subr.bf16.mxu1 %v2732_v6  ;;  %v2827_v17 = vunpack.c.l.s8.bf16 %v1387_v62  ;;  %v2842_v6 = vunpack.c.h.s8.bf16 %v1386_v52 }
 0x3fb   :  { %4804 = vmatpush1.bf16.msra.mxu0 %v2729_v24  ;;  %v1402_v24 = vld [vmem:[#allocation8 + $0xda8] sm:$0xff] }
 0x3fc   :  { %5132 = vmatpush1.bf16.msra.mxu1 %v2731_v8  ;;  %4805 = vmatprep.subr.bf16.mxu0 %v2746_v9  ;;  %v1404_v8 = vld [vmem:[#allocation8 + $0xdb8] sm:$0xff]  ;;  %v2841_v9 = vunpack.c.h.s8.bf16 %v1385_v13  ;;  %v2858_v60 = vunpack.c.l.s8.bf16 %v1402_v24  ;;  %v2874_v30 = vunpack.c.h.s8.bf16 %v1402_v24 }
 0x3fd   :  { %5133 = vmatprep.subr.bf16.mxu1 %v2748_v0  ;;  %v2843_v0 = vunpack.c.h.s8.bf16 %v1387_v62  ;;  %v1436_v13 = vld [vmem:[#allocation8 + $0xeb8] sm:$0xff] }
 0x3ff   :  { %4806 = vmatpush1.bf16.msra.mxu0 %v2745_v31 }
 0x400   :  { %5134 = vmatpush1.bf16.msra.mxu1 %v2747_v18  ;;  %4816 = vmatprep.subr.bf16.mxu0 %v2762_v11  ;;  %v2860_v18 = vunpack.c.l.s8.bf16 %v1404_v8  ;;  %v1403_v11 = vld [vmem:[#allocation8 + $0xdb0] sm:$0xff] }
 0x401   :  { %5144 = vmatprep.subr.bf16.mxu1 %v2764_v3  ;;  %v2875_v38 = vunpack.c.h.s8.bf16 %v1403_v11 }
 0x402   :  { %4808 = vmatmul.mubr.bf16.vlgmr.msra.gmra.mrb[20].mxu0 %v9546_v46 }
 0x403   :  { %5136 = vmatmul.mubr.bf16.vlgmr.msra.gmra.mrb[20].mxu1 %v9546_v46  ;;  %4817 = vmatpush1.bf16.msra.mxu0 %v2761_v15 }
 0x404   :  { %4848 = vmatprep.mubr.bf16.mxu0 %v9548_v48  ;;  %5145 = vmatpush1.bf16.msra.mxu1 %v2763_v27  ;;  %v2857_v27 = vunpack.c.l.s8.bf16 %v1401_v16 }
 0x405   :  { %5176 = vmatprep.mubr.bf16.mxu1 %v9548_v48  ;;  %4818 = vmatprep.subr.bf16.mxu0 %v2778_v28 }
 0x406   :  { %5146 = vmatprep.subr.bf16.mxu1 %v2780_v29  ;;  %v2859_v29 = vunpack.c.l.s8.bf16 %v1403_v11 }
 0x407   :  { %4819 = vmatpush1.bf16.msra.mxu0 %v2777_v40 }
 0x408   :  { %5147 = vmatpush1.bf16.msra.mxu1 %v2779_v32  ;;  %4820 = vmatprep.subr.bf16.mxu0 %v2794_v44  ;;  %v2876_v32 = vunpack.c.h.s8.bf16 %v1404_v8  ;;  %v1418_v44 = vld [vmem:[#allocation8 + $0xe28] sm:$0xff] }
 0x409   :  { %5148 = vmatprep.subr.bf16.mxu1 %v2796_v37  ;;  %v2873_v37 = vunpack.c.h.s8.bf16 %v1401_v16  ;;  %v1452_v16 = vld [vmem:[#allocation8 + $0xf38] sm:$0xff] }
 0x40b   :  { %4821 = vmatpush1.bf16.msra.mxu0 %v2793_v23  ;;  %v2890_v23 = vunpack.c.l.s8.bf16 %v1418_v44 }
 0x40c   :  { %5149 = vmatpush1.bf16.msra.mxu1 %v2795_v39  ;;  %4822 = vmatprep.subr.bf16.mxu0 %v2810_v33  ;;  %v1417_v39 = vld [vmem:[#allocation8 + $0xe20] sm:$0xff]  ;;  %v2892_v33 = vunpack.c.l.s8.bf16 %v1420_v34 }
 0x40d   :  { %5150 = vmatprep.subr.bf16.mxu1 %v2812_v49  ;;  %v1419_v49 = vld [vmem:[#allocation8 + $0xe30] sm:$0xff]  ;;  %v2889_v52 = vunpack.c.l.s8.bf16 %v1417_v39 }
 0x40e   :  { %v2891_v63 = vunpack.c.l.s8.bf16 %v1419_v49  ;;  %v2907_v62 = vunpack.c.h.s8.bf16 %v1419_v49  ;;  %v1467_v49 = vld [vmem:[#allocation8 + $0xfb0] sm:$0xff] }
 0x40f   :  { %4823 = vmatpush1.bf16.msra.mxu0 %v2809_v55  ;;  %v2906_v55 = vunpack.c.h.s8.bf16 %v1418_v44  ;;  %v1466_v44 = vld [vmem:[#allocation8 + $0xfa8] sm:$0xff] }
 0x410   :  { %5151 = vmatpush1.bf16.msra.mxu1 %v2811_v57  ;;  %4824 = vmatprep.subr.bf16.mxu0 %v2826_v59  ;;  %v2908_v57 = vunpack.c.h.s8.bf16 %v1420_v34  ;;  %v1434_v59 = vld [vmem:[#allocation8 + $0xea8] sm:$0xff]  ;;  %v1468_v34 = vld [vmem:[#allocation8 + $0xfb8] sm:$0xff] }
 0x411   :  { %5152 = vmatprep.subr.bf16.mxu1 %v2828_v58  ;;  %v2905_v58 = vunpack.c.h.s8.bf16 %v1417_v39  ;;  %v1465_v39 = vld [vmem:[#allocation8 + $0xfa0] sm:$0xff] }
 0x413   :  { %4825 = vmatpush1.bf16.msra.mxu0 %v2825_v42  ;;  %v2922_v42 = vunpack.c.l.s8.bf16 %v1434_v59 }
 0x414   :  { %5153 = vmatpush1.bf16.msra.mxu1 %v2827_v17  ;;  %4826 = vmatprep.subr.bf16.mxu0 %v2842_v6  ;;  %v1433_v17 = vld [vmem:[#allocation8 + $0xea0] sm:$0xff]  ;;  %v2924_v6 = vunpack.c.l.s8.bf16 %v1436_v13 }
 0x415   :  { %v9617_v31 = vpop.f32.mrb[16].mxu0  ;;  %5154 = vmatprep.subr.bf16.mxu1 %v2844_v7  ;;  %v1435_v7 = vld [vmem:[#allocation8 + $0xeb0] sm:$0xff]  ;;  %v2921_v24 = vunpack.c.l.s8.bf16 %v1433_v17 }
 0x416   :  { %v9619_v19 = vpop.f32.mrb[16].mxu1  ;;  %v9621_v3 = vpop.f32.mrb[17].mxu0  ;;  %v2923_v8 = vunpack.c.l.s8.bf16 %v1435_v7  ;;  %v2939_v11 = vunpack.c.h.s8.bf16 %v1435_v7  ;;  %v1483_v7 = vld [vmem:[#allocation8 + $0x1030] sm:$0xff] }
 0x417   :  { %v9623_v22 = vpop.f32.mrb[17].mxu1  ;;  %v4362_v15 = vpop.f32.mrb[18].mxu0  ;;  %4827 = vmatpush1.bf16.msra.mxu0 %v2841_v9  ;;  %v2938_v9 = vunpack.c.h.s8.bf16 %v1434_v59  ;;  %v1482_v59 = vld [vmem:[#allocation8 + $0x1028] sm:$0xff] }
 0x418   :  { %v4690_v28 = vpop.f32.mrb[18].mxu1  ;;  %5155 = vmatpush1.bf16.msra.mxu1 %v2843_v0  ;;  %v4363_v2 = vpop.f32.mrb[19].mxu0  ;;  %4828 = vmatprep.subr.bf16.mxu0 %v2858_v60  ;;  %v2940_v0 = vunpack.c.h.s8.bf16 %v1436_v13  ;;  %v1450_v60 = vld [vmem:[#allocation8 + $0xf28] sm:$0xff]  ;;  %v1484_v13 = vld [vmem:[#allocation8 + $0x1038] sm:$0xff] }
 0x419   :  { %v4691_v40 = vpop.f32.mrb[19].mxu1  ;;  %5156 = vmatprep.subr.bf16.mxu1 %v2860_v18  ;;  %v2937_v18 = vunpack.c.h.s8.bf16 %v1433_v17  ;;  %v2954_v15 = vunpack.c.l.s8.bf16 %v1450_v60  ;;  %v2956_v28 = vunpack.c.l.s8.bf16 %v1452_v16  ;;  %v1451_v2 = vld [vmem:[#allocation8 + $0xf30] sm:$0xff]  ;;  %v1481_v17 = vld [vmem:[#allocation8 + $0x1020] sm:$0xff] }
 0x41a   :  { %v2970_v40 = vunpack.c.h.s8.bf16 %v1450_v60  ;;  %v3036_v60 = vunpack.c.h.s8.bf16 %v1484_v13 }
 0x41b   :  { %4829 = vmatpush1.bf16.msra.mxu0 %v2857_v27  ;;  %v1449_v27 = vld [vmem:[#allocation8 + $0xf20] sm:$0xff] }
 0x41c   :  { %5157 = vmatpush1.bf16.msra.mxu1 %v2859_v29  ;;  %4830 = vmatprep.subr.bf16.mxu0 %v2874_v30  ;;  %v2953_v29 = vunpack.c.l.s8.bf16 %v1449_v27  ;;  %v2955_v30 = vunpack.c.l.s8.bf16 %v1451_v2 }
 0x41d   :  { %5158 = vmatprep.subr.bf16.mxu1 %v2876_v32  ;;  %v2972_v32 = vunpack.c.h.s8.bf16 %v1452_v16  ;;  %v1500_v16 = vld [vmem:[#allocation8 + $0x10b8] sm:$0xff] }
 0x41f   :  { %4831 = vmatpush1.bf16.msra.mxu0 %v2873_v37  ;;  %v2969_v37 = vunpack.c.h.s8.bf16 %v1449_v27  ;;  %v1497_v27 = vld [vmem:[#allocation8 + $0x10a0] sm:$0xff] }
 0x420   :  { %5159 = vmatpush1.bf16.msra.mxu1 %v2875_v38  ;;  %4832 = vmatprep.subr.bf16.mxu0 %v2890_v23  ;;  %v2971_v38 = vunpack.c.h.s8.bf16 %v1451_v2  ;;  %v2986_v23 = vunpack.c.l.s8.bf16 %v1466_v44  ;;  %v1499_v2 = vld [vmem:[#allocation8 + $0x10b0] sm:$0xff] }
 0x421   :  { %5160 = vmatprep.subr.bf16.mxu1 %v2892_v33  ;;  %v2988_v33 = vunpack.c.l.s8.bf16 %v1468_v34 }
 0x423   :  { %4833 = vmatpush1.bf16.msra.mxu0 %v2889_v52  ;;  %v2985_v52 = vunpack.c.l.s8.bf16 %v1465_v39 }
 0x424   :  { %5161 = vmatpush1.bf16.msra.mxu1 %v2891_v63  ;;  %4834 = vmatprep.subr.bf16.mxu0 %v2906_v55  ;;  %v2987_v63 = vunpack.c.l.s8.bf16 %v1467_v49  ;;  %v3002_v55 = vunpack.c.h.s8.bf16 %v1466_v44  ;;  %v1514_v44 = vld [vmem:[#allocation8 + $0x1128] sm:$0xff] }
 0x425   :  { %5162 = vmatprep.subr.bf16.mxu1 %v2908_v57  ;;  %v3004_v57 = vunpack.c.h.s8.bf16 %v1468_v34  ;;  %v1516_v34 = vld [vmem:[#allocation8 + $0x1138] sm:$0xff] }
 0x427   :  { %4835 = vmatpush1.bf16.msra.mxu0 %v2905_v58  ;;  %v3001_v58 = vunpack.c.h.s8.bf16 %v1465_v39  ;;  %v1513_v39 = vld [vmem:[#allocation8 + $0x1120] sm:$0xff] }
 0x428   :  { %5163 = vmatpush1.bf16.msra.mxu1 %v2907_v62  ;;  %4836 = vmatprep.subr.bf16.mxu0 %v2922_v42  ;;  %v3003_v62 = vunpack.c.h.s8.bf16 %v1467_v49  ;;  %v3018_v42 = vunpack.c.l.s8.bf16 %v1482_v59  ;;  %v1515_v49 = vld [vmem:[#allocation8 + $0x1130] sm:$0xff] }
 0x429   :  { %5164 = vmatprep.subr.bf16.mxu1 %v2924_v6  ;;  %v3020_v6 = vunpack.c.l.s8.bf16 %v1484_v13  ;;  %v1532_v13 = vld [vmem:[#allocation8 + $0x11b8] sm:$0xff] }
 0x42b   :  { %4837 = vmatpush1.bf16.msra.mxu0 %v2921_v24  ;;  %v3017_v24 = vunpack.c.l.s8.bf16 %v1481_v17 }
 0x42c   :  { %5165 = vmatpush1.bf16.msra.mxu1 %v2923_v8  ;;  %4838 = vmatprep.subr.bf16.mxu0 %v2938_v9  ;;  %v3019_v8 = vunpack.c.l.s8.bf16 %v1483_v7  ;;  %v3034_v9 = vunpack.c.h.s8.bf16 %v1482_v59  ;;  %v1530_v59 = vld [vmem:[#allocation8 + $0x11a8] sm:$0xff] }
 0x42d   :  { %5166 = vmatprep.subr.bf16.mxu1 %v2940_v0  ;;  %v1498_v0 = vld [vmem:[#allocation8 + $0x10a8] sm:$0xff] }
 0x42f   :  { %4839 = vmatpush1.bf16.msra.mxu0 %v2937_v18  ;;  %v3033_v18 = vunpack.c.h.s8.bf16 %v1481_v17  ;;  %v1529_v17 = vld [vmem:[#allocation8 + $0x11a0] sm:$0xff] }
 0x430   :  { %5167 = vmatpush1.bf16.msra.mxu1 %v2939_v11  ;;  %4840 = vmatprep.subr.bf16.mxu0 %v2954_v15  ;;  %v3035_v11 = vunpack.c.h.s8.bf16 %v1483_v7  ;;  %v3050_v15 = vunpack.c.l.s8.bf16 %v1498_v0  ;;  %v1531_v7 = vld [vmem:[#allocation8 + $0x11b0] sm:$0xff] }
 0x431   :  { %5168 = vmatprep.subr.bf16.mxu1 %v2956_v28  ;;  %v3052_v28 = vunpack.c.l.s8.bf16 %v1500_v16 }
 0x433   :  { %4841 = vmatpush1.bf16.msra.mxu0 %v2953_v29  ;;  %v3049_v29 = vunpack.c.l.s8.bf16 %v1497_v27 }
 0x434   :  { %5169 = vmatpush1.bf16.msra.mxu1 %v2955_v30  ;;  %4842 = vmatprep.subr.bf16.mxu0 %v2970_v40  ;;  %v3051_v30 = vunpack.c.l.s8.bf16 %v1499_v2  ;;  %v3066_v40 = vunpack.c.h.s8.bf16 %v1498_v0  ;;  %v3132_v0 = vunpack.c.h.s8.bf16 %v1532_v13 }
 0x435   :  { %5170 = vmatprep.subr.bf16.mxu1 %v2972_v32  ;;  %v3068_v32 = vunpack.c.h.s8.bf16 %v1500_v16  ;;  %v1548_v16 = vld [vmem:[#allocation8 + $0x1238] sm:$0xff] }
 0x437   :  { %4843 = vmatpush1.bf16.msra.mxu0 %v2969_v37  ;;  %v3065_v37 = vunpack.c.h.s8.bf16 %v1497_v27  ;;  %v1545_v27 = vld [vmem:[#allocation8 + $0x1220] sm:$0xff] }
 0x438   :  { %5171 = vmatpush1.bf16.msra.mxu1 %v2971_v38  ;;  %4844 = vmatprep.subr.bf16.mxu0 %v2986_v23  ;;  %v3067_v38 = vunpack.c.h.s8.bf16 %v1499_v2  ;;  %v3082_v23 = vunpack.c.l.s8.bf16 %v1514_v44  ;;  %v1547_v2 = vld [vmem:[#allocation8 + $0x1230] sm:$0xff] }
 0x439   :  { %5172 = vmatprep.subr.bf16.mxu1 %v2988_v33  ;;  %v3084_v33 = vunpack.c.l.s8.bf16 %v1516_v34 }
 0x43b   :  { %4845 = vmatpush1.bf16.msra.mxu0 %v2985_v52  ;;  %v3081_v52 = vunpack.c.l.s8.bf16 %v1513_v39 }
 0x43c   :  { %5173 = vmatpush1.bf16.msra.mxu1 %v2987_v63  ;;  %4846 = vmatprep.subr.bf16.mxu0 %v3002_v55  ;;  %v3083_v63 = vunpack.c.l.s8.bf16 %v1515_v49  ;;  %v3098_v55 = vunpack.c.h.s8.bf16 %v1514_v44  ;;  %v1562_v44 = vld [vmem:[#allocation8 + $0x12a8] sm:$0xff] }
 0x43d   :  { %5174 = vmatprep.subr.bf16.mxu1 %v3004_v57  ;;  %v3100_v57 = vunpack.c.h.s8.bf16 %v1516_v34  ;;  %v1564_v34 = vld [vmem:[#allocation8 + $0x12b8] sm:$0xff] }
 0x43f   :  { %4847 = vmatpush1.bf16.msra.mxu0 %v3001_v58  ;;  %v3097_v58 = vunpack.c.h.s8.bf16 %v1513_v39  ;;  %v1561_v39 = vld [vmem:[#allocation8 + $0x12a0] sm:$0xff] }
 0x440   :  { %5175 = vmatpush1.bf16.msra.mxu1 %v3003_v62  ;;  %4857 = vmatprep.subr.bf16.mxu0 %v3018_v42  ;;  %v3099_v62 = vunpack.c.h.s8.bf16 %v1515_v49  ;;  %v3114_v42 = vunpack.c.l.s8.bf16 %v1530_v59  ;;  %v1563_v49 = vld [vmem:[#allocation8 + $0x12b0] sm:$0xff] }
 0x441   :  { %5185 = vmatprep.subr.bf16.mxu1 %v3020_v6  ;;  %v3116_v6 = vunpack.c.l.s8.bf16 %v1532_v13  ;;  %v1580_v13 = vld [vmem:[#allocation8 + $0x1338] sm:$0xff] }
 0x442   :  { %4849 = vmatmul.mubr.bf16.vlgmr.msra.gmra.mrb[20].mxu0 %v9559_v21 }
 0x443   :  { %5177 = vmatmul.mubr.bf16.vlgmr.msra.gmra.mrb[20].mxu1 %v9559_v21  ;;  %4858 = vmatpush1.bf16.msra.mxu0 %v3017_v24  ;;  %v3113_v24 = vunpack.c.l.s8.bf16 %v1529_v17 }
 0x444   :  { %4889 = vmatprep.mubr.bf16.mxu0 %v9561_v26  ;;  %5186 = vmatpush1.bf16.msra.mxu1 %v3019_v8  ;;  %v3115_v8 = vunpack.c.l.s8.bf16 %v1531_v7 }
 0x445   :  { %5217 = vmatprep.mubr.bf16.mxu1 %v9561_v26  ;;  %4859 = vmatprep.subr.bf16.mxu0 %v3034_v9  ;;  %v3130_v9 = vunpack.c.h.s8.bf16 %v1530_v59  ;;  %v1578_v59 = vld [vmem:[#allocation8 + $0x1328] sm:$0xff] }
 0x446   :  { %5187 = vmatprep.subr.bf16.mxu1 %v3036_v60  ;;  %v1546_v60 = vld [vmem:[#allocation8 + $0x1228] sm:$0xff] }
 0x447   :  { %4860 = vmatpush1.bf16.msra.mxu0 %v3033_v18  ;;  %v3129_v18 = vunpack.c.h.s8.bf16 %v1529_v17  ;;  %v1577_v17 = vld [vmem:[#allocation8 + $0x1320] sm:$0xff] }
 0x448   :  { %5188 = vmatpush1.bf16.msra.mxu1 %v3035_v11  ;;  %4861 = vmatprep.subr.bf16.mxu0 %v3050_v15  ;;  %v3131_v11 = vunpack.c.h.s8.bf16 %v1531_v7  ;;  %v3146_v15 = vunpack.c.l.s8.bf16 %v1546_v60  ;;  %v1579_v7 = vld [vmem:[#allocation8 + $0x1330] sm:$0xff] }
 0x449   :  { %5189 = vmatprep.subr.bf16.mxu1 %v3052_v28  ;;  %v3148_v28 = vunpack.c.l.s8.bf16 %v1548_v16 }
 0x44b   :  { %4862 = vmatpush1.bf16.msra.mxu0 %v3049_v29  ;;  %v3145_v29 = vunpack.c.l.s8.bf16 %v1545_v27 }
 0x44c   :  { %5190 = vmatpush1.bf16.msra.mxu1 %v3051_v30  ;;  %4863 = vmatprep.subr.bf16.mxu0 %v3066_v40  ;;  %v3147_v30 = vunpack.c.l.s8.bf16 %v1547_v2  ;;  %v3162_v40 = vunpack.c.h.s8.bf16 %v1546_v60  ;;  %v1594_v60 = vld [vmem:[#allocation8 + $0x13a8] sm:$0xff] }
 0x44d   :  { %5191 = vmatprep.subr.bf16.mxu1 %v3068_v32  ;;  %v3164_v32 = vunpack.c.h.s8.bf16 %v1548_v16  ;;  %v1596_v16 = vld [vmem:[#allocation8 + $0x13b8] sm:$0xff] }
 0x44f   :  { %4864 = vmatpush1.bf16.msra.mxu0 %v3065_v37  ;;  %v3161_v37 = vunpack.c.h.s8.bf16 %v1545_v27  ;;  %v1593_v27 = vld [vmem:[#allocation8 + $0x13a0] sm:$0xff] }
 0x450   :  { %5192 = vmatpush1.bf16.msra.mxu1 %v3067_v38  ;;  %4865 = vmatprep.subr.bf16.mxu0 %v3082_v23  ;;  %v3163_v38 = vunpack.c.h.s8.bf16 %v1547_v2  ;;  %v3178_v23 = vunpack.c.l.s8.bf16 %v1562_v44  ;;  %v1595_v2 = vld [vmem:[#allocation8 + $0x13b0] sm:$0xff] }
 0x451   :  { %5193 = vmatprep.subr.bf16.mxu1 %v3084_v33  ;;  %v3180_v33 = vunpack.c.l.s8.bf16 %v1564_v34 }
 0x453   :  { %4866 = vmatpush1.bf16.msra.mxu0 %v3081_v52  ;;  %v3177_v52 = vunpack.c.l.s8.bf16 %v1561_v39 }
 0x454   :  { %5194 = vmatpush1.bf16.msra.mxu1 %v3083_v63  ;;  %4867 = vmatprep.subr.bf16.mxu0 %v3098_v55  ;;  %v3179_v63 = vunpack.c.l.s8.bf16 %v1563_v49  ;;  %v3194_v55 = vunpack.c.h.s8.bf16 %v1562_v44  ;;  %v1610_v44 = vld [vmem:[#allocation8 + $0x1428] sm:$0xff] }
 0x455   :  { %5195 = vmatprep.subr.bf16.mxu1 %v3100_v57  ;;  %v3196_v57 = vunpack.c.h.s8.bf16 %v1564_v34  ;;  %v1612_v34 = vld [vmem:[#allocation8 + $0x1438] sm:$0xff] }
 0x457   :  { %4868 = vmatpush1.bf16.msra.mxu0 %v3097_v58  ;;  %v3193_v58 = vunpack.c.h.s8.bf16 %v1561_v39  ;;  %v1609_v39 = vld [vmem:[#allocation8 + $0x1420] sm:$0xff] }
 0x458   :  { %5196 = vmatpush1.bf16.msra.mxu1 %v3099_v62  ;;  %4869 = vmatprep.subr.bf16.mxu0 %v3114_v42  ;;  %v3195_v62 = vunpack.c.h.s8.bf16 %v1563_v49  ;;  %v3210_v42 = vunpack.c.l.s8.bf16 %v1578_v59  ;;  %v1611_v49 = vld [vmem:[#allocation8 + $0x1430] sm:$0xff] }
 0x459   :  { %5197 = vmatprep.subr.bf16.mxu1 %v3116_v6  ;;  %v3212_v6 = vunpack.c.l.s8.bf16 %v1580_v13 }
 0x45b   :  { %4870 = vmatpush1.bf16.msra.mxu0 %v3113_v24  ;;  %v3209_v24 = vunpack.c.l.s8.bf16 %v1577_v17 }
 0x45c   :  { %5198 = vmatpush1.bf16.msra.mxu1 %v3115_v8  ;;  %4871 = vmatprep.subr.bf16.mxu0 %v3130_v9  ;;  %v3211_v8 = vunpack.c.l.s8.bf16 %v1579_v7  ;;  %v3226_v9 = vunpack.c.h.s8.bf16 %v1578_v59  ;;  %v3292_v59 = vunpack.c.h.s8.bf16 %v1612_v34 }
 0x45d   :  { %5199 = vmatprep.subr.bf16.mxu1 %v3132_v0  ;;  %v3228_v0 = vunpack.c.h.s8.bf16 %v1580_v13  ;;  %v1628_v13 = vld [vmem:[#allocation8 + $0x14b8] sm:$0xff] }
 0x45f   :  { %4872 = vmatpush1.bf16.msra.mxu0 %v3129_v18  ;;  %v3225_v18 = vunpack.c.h.s8.bf16 %v1577_v17  ;;  %v1625_v17 = vld [vmem:[#allocation8 + $0x14a0] sm:$0xff] }
 0x460   :  { %5200 = vmatpush1.bf16.msra.mxu1 %v3131_v11  ;;  %4873 = vmatprep.subr.bf16.mxu0 %v3146_v15  ;;  %v3227_v11 = vunpack.c.h.s8.bf16 %v1579_v7  ;;  %v3242_v15 = vunpack.c.l.s8.bf16 %v1594_v60  ;;  %v1627_v7 = vld [vmem:[#allocation8 + $0x14b0] sm:$0xff] }
 0x461   :  { %5201 = vmatprep.subr.bf16.mxu1 %v3148_v28  ;;  %v3244_v28 = vunpack.c.l.s8.bf16 %v1596_v16 }
 0x463   :  { %4874 = vmatpush1.bf16.msra.mxu0 %v3145_v29  ;;  %v3241_v29 = vunpack.c.l.s8.bf16 %v1593_v27 }
 0x464   :  { %5202 = vmatpush1.bf16.msra.mxu1 %v3147_v30  ;;  %4875 = vmatprep.subr.bf16.mxu0 %v3162_v40  ;;  %v3243_v30 = vunpack.c.l.s8.bf16 %v1595_v2  ;;  %v3258_v40 = vunpack.c.h.s8.bf16 %v1594_v60  ;;  %v1642_v60 = vld [vmem:[#allocation8 + $0x1528] sm:$0xff] }
 0x465   :  { %5203 = vmatprep.subr.bf16.mxu1 %v3164_v32  ;;  %v3260_v32 = vunpack.c.h.s8.bf16 %v1596_v16  ;;  %v1644_v16 = vld [vmem:[#allocation8 + $0x1538] sm:$0xff] }
 0x467   :  { %4876 = vmatpush1.bf16.msra.mxu0 %v3161_v37  ;;  %v3257_v37 = vunpack.c.h.s8.bf16 %v1593_v27  ;;  %v1641_v27 = vld [vmem:[#allocation8 + $0x1520] sm:$0xff] }
 0x468   :  { %5204 = vmatpush1.bf16.msra.mxu1 %v3163_v38  ;;  %4877 = vmatprep.subr.bf16.mxu0 %v3178_v23  ;;  %v3259_v38 = vunpack.c.h.s8.bf16 %v1595_v2  ;;  %v3274_v23 = vunpack.c.l.s8.bf16 %v1610_v44  ;;  %v1643_v2 = vld [vmem:[#allocation8 + $0x1530] sm:$0xff] }
 0x469   :  { %5205 = vmatprep.subr.bf16.mxu1 %v3180_v33  ;;  %v3276_v33 = vunpack.c.l.s8.bf16 %v1612_v34  ;;  %v1660_v34 = vld [vmem:[#allocation8 + $0x15b8] sm:$0xff] }
 0x46b   :  { %4878 = vmatpush1.bf16.msra.mxu0 %v3177_v52  ;;  %v3273_v52 = vunpack.c.l.s8.bf16 %v1609_v39 }
 0x46c   :  { %5206 = vmatpush1.bf16.msra.mxu1 %v3179_v63  ;;  %4879 = vmatprep.subr.bf16.mxu0 %v3194_v55  ;;  %v3275_v63 = vunpack.c.l.s8.bf16 %v1611_v49  ;;  %v3290_v55 = vunpack.c.h.s8.bf16 %v1610_v44  ;;  %v1658_v44 = vld [vmem:[#allocation8 + $0x15a8] sm:$0xff] }
 0x46d   :  { %5207 = vmatprep.subr.bf16.mxu1 %v3196_v57  ;;  %v1626_v57 = vld [vmem:[#allocation8 + $0x14a8] sm:$0xff] }
 0x46f   :  { %4880 = vmatpush1.bf16.msra.mxu0 %v3193_v58  ;;  %v3289_v58 = vunpack.c.h.s8.bf16 %v1609_v39  ;;  %v1657_v39 = vld [vmem:[#allocation8 + $0x15a0] sm:$0xff] }
 0x470   :  { %5208 = vmatpush1.bf16.msra.mxu1 %v3195_v62  ;;  %4881 = vmatprep.subr.bf16.mxu0 %v3210_v42  ;;  %v3291_v62 = vunpack.c.h.s8.bf16 %v1611_v49  ;;  %v3306_v42 = vunpack.c.l.s8.bf16 %v1626_v57  ;;  %v1659_v49 = vld [vmem:[#allocation8 + $0x15b0] sm:$0xff] }
 0x471   :  { %5209 = vmatprep.subr.bf16.mxu1 %v3212_v6  ;;  %v3308_v6 = vunpack.c.l.s8.bf16 %v1628_v13 }
 0x473   :  { %4882 = vmatpush1.bf16.msra.mxu0 %v3209_v24  ;;  %v3305_v24 = vunpack.c.l.s8.bf16 %v1625_v17 }
 0x474   :  { %5210 = vmatpush1.bf16.msra.mxu1 %v3211_v8  ;;  %4883 = vmatprep.subr.bf16.mxu0 %v3226_v9  ;;  %v3307_v8 = vunpack.c.l.s8.bf16 %v1627_v7  ;;  %v3322_v9 = vunpack.c.h.s8.bf16 %v1626_v57  ;;  %v3388_v57 = vunpack.c.h.s8.bf16 %v1660_v34 }
 0x475   :  { %5211 = vmatprep.subr.bf16.mxu1 %v3228_v0  ;;  %v3324_v0 = vunpack.c.h.s8.bf16 %v1628_v13  ;;  %v1676_v13 = vld [vmem:[#allocation8 + $0x1638] sm:$0xff] }
 0x477   :  { %4884 = vmatpush1.bf16.msra.mxu0 %v3225_v18  ;;  %v3321_v18 = vunpack.c.h.s8.bf16 %v1625_v17  ;;  %v1673_v17 = vld [vmem:[#allocation8 + $0x1620] sm:$0xff] }
 0x478   :  { %5212 = vmatpush1.bf16.msra.mxu1 %v3227_v11  ;;  %4885 = vmatprep.subr.bf16.mxu0 %v3242_v15  ;;  %v3323_v11 = vunpack.c.h.s8.bf16 %v1627_v7  ;;  %v3338_v15 = vunpack.c.l.s8.bf16 %v1642_v60  ;;  %v1675_v7 = vld [vmem:[#allocation8 + $0x1630] sm:$0xff] }
 0x479   :  { %5213 = vmatprep.subr.bf16.mxu1 %v3244_v28  ;;  %v3340_v28 = vunpack.c.l.s8.bf16 %v1644_v16 }
 0x47b   :  { %4886 = vmatpush1.bf16.msra.mxu0 %v3241_v29  ;;  %v3337_v29 = vunpack.c.l.s8.bf16 %v1641_v27 }
 0x47c   :  { %5214 = vmatpush1.bf16.msra.mxu1 %v3243_v30  ;;  %4887 = vmatprep.subr.bf16.mxu0 %v3258_v40  ;;  %v3339_v30 = vunpack.c.l.s8.bf16 %v1643_v2  ;;  %v3354_v40 = vunpack.c.h.s8.bf16 %v1642_v60  ;;  %v1690_v60 = vld [vmem:[#allocation8 + $0x16a8] sm:$0xff] }
 0x47d   :  { %5215 = vmatprep.subr.bf16.mxu1 %v3260_v32  ;;  %v3356_v32 = vunpack.c.h.s8.bf16 %v1644_v16  ;;  %v1692_v16 = vld [vmem:[#allocation8 + $0x16b8] sm:$0xff] }
 0x47f   :  { %4888 = vmatpush1.bf16.msra.mxu0 %v3257_v37  ;;  %v3353_v37 = vunpack.c.h.s8.bf16 %v1641_v27  ;;  %v1689_v27 = vld [vmem:[#allocation8 + $0x16a0] sm:$0xff] }
 0x480   :  { %5216 = vmatpush1.bf16.msra.mxu1 %v3259_v38  ;;  %4898 = vmatprep.subr.bf16.mxu0 %v3274_v23  ;;  %v3355_v38 = vunpack.c.h.s8.bf16 %v1643_v2  ;;  %v3370_v23 = vunpack.c.l.s8.bf16 %v1658_v44  ;;  %v1691_v2 = vld [vmem:[#allocation8 + $0x16b0] sm:$0xff] }
 0x481   :  { %5226 = vmatprep.subr.bf16.mxu1 %v3276_v33  ;;  %v3372_v33 = vunpack.c.l.s8.bf16 %v1660_v34  ;;  %v1708_v34 = vld [vmem:[#allocation8 + $0x1738] sm:$0xff] }
 0x482   :  { %4890 = vmatmul.mubr.bf16.vlgmr.msra.gmra.mrb[20].mxu0 %v9570_v54 }
 0x483   :  { %5218 = vmatmul.mubr.bf16.vlgmr.msra.gmra.mrb[20].mxu1 %v9570_v54  ;;  %4899 = vmatpush1.bf16.msra.mxu0 %v3273_v52  ;;  %v3369_v52 = vunpack.c.l.s8.bf16 %v1657_v39 }
 0x484   :  { %4930 = vmatprep.mubr.bf16.mxu0 %v9572_v61  ;;  %5227 = vmatpush1.bf16.msra.mxu1 %v3275_v63  ;;  %v3371_v63 = vunpack.c.l.s8.bf16 %v1659_v49 }
 0x485   :  { %5258 = vmatprep.mubr.bf16.mxu1 %v9572_v61  ;;  %4900 = vmatprep.subr.bf16.mxu0 %v3290_v55  ;;  %v3386_v55 = vunpack.c.h.s8.bf16 %v1658_v44  ;;  %v1706_v44 = vld [vmem:[#allocation8 + $0x1728] sm:$0xff] }
 0x486   :  { %5228 = vmatprep.subr.bf16.mxu1 %v3292_v59  ;;  %v1674_v59 = vld [vmem:[#allocation8 + $0x1628] sm:$0xff] }
 0x487   :  { %4901 = vmatpush1.bf16.msra.mxu0 %v3289_v58  ;;  %v3385_v58 = vunpack.c.h.s8.bf16 %v1657_v39  ;;  %v1705_v39 = vld [vmem:[#allocation8 + $0x1720] sm:$0xff] }
 0x488   :  { %5229 = vmatpush1.bf16.msra.mxu1 %v3291_v62  ;;  %4902 = vmatprep.subr.bf16.mxu0 %v3306_v42  ;;  %v3387_v62 = vunpack.c.h.s8.bf16 %v1659_v49  ;;  %v3402_v42 = vunpack.c.l.s8.bf16 %v1674_v59  ;;  %v1707_v49 = vld [vmem:[#allocation8 + $0x1730] sm:$0xff] }
 0x489   :  { %5230 = vmatprep.subr.bf16.mxu1 %v3308_v6  ;;  %v3404_v6 = vunpack.c.l.s8.bf16 %v1676_v13 }
 0x48b   :  { %4903 = vmatpush1.bf16.msra.mxu0 %v3305_v24  ;;  %v3401_v24 = vunpack.c.l.s8.bf16 %v1673_v17 }
 0x48c   :  { %5231 = vmatpush1.bf16.msra.mxu1 %v3307_v8  ;;  %4904 = vmatprep.subr.bf16.mxu0 %v3322_v9  ;;  %v3403_v8 = vunpack.c.l.s8.bf16 %v1675_v7  ;;  %v3418_v9 = vunpack.c.h.s8.bf16 %v1674_v59  ;;  %v1722_v59 = vld [vmem:[#allocation8 + $0x17a8] sm:$0xff] }
 0x48d   :  { %5232 = vmatprep.subr.bf16.mxu1 %v3324_v0  ;;  %v3420_v0 = vunpack.c.h.s8.bf16 %v1676_v13  ;;  %v1724_v13 = vld [vmem:[#allocation8 + $0x17b8] sm:$0xff] }
 0x48f   :  { %4905 = vmatpush1.bf16.msra.mxu0 %v3321_v18  ;;  %v3417_v18 = vunpack.c.h.s8.bf16 %v1673_v17  ;;  %v1721_v17 = vld [vmem:[#allocation8 + $0x17a0] sm:$0xff] }
 0x490   :  { %5233 = vmatpush1.bf16.msra.mxu1 %v3323_v11  ;;  %4906 = vmatprep.subr.bf16.mxu0 %v3338_v15  ;;  %v3419_v11 = vunpack.c.h.s8.bf16 %v1675_v7  ;;  %v3434_v15 = vunpack.c.l.s8.bf16 %v1690_v60  ;;  %v1723_v7 = vld [vmem:[#allocation8 + $0x17b0] sm:$0xff] }
 0x491   :  { %5234 = vmatprep.subr.bf16.mxu1 %v3340_v28  ;;  %v3436_v28 = vunpack.c.l.s8.bf16 %v1692_v16 }
 0x493   :  { %4907 = vmatpush1.bf16.msra.mxu0 %v3337_v29  ;;  %v3433_v29 = vunpack.c.l.s8.bf16 %v1689_v27 }
 0x494   :  { %5235 = vmatpush1.bf16.msra.mxu1 %v3339_v30  ;;  %4908 = vmatprep.subr.bf16.mxu0 %v3354_v40  ;;  %v3435_v30 = vunpack.c.l.s8.bf16 %v1691_v2  ;;  %v3450_v40 = vunpack.c.h.s8.bf16 %v1690_v60  ;;  %v1738_v60 = vld [vmem:[#allocation8 + $0x1828] sm:$0xff] }
 0x495   :  { %5236 = vmatprep.subr.bf16.mxu1 %v3356_v32  ;;  %v3452_v32 = vunpack.c.h.s8.bf16 %v1692_v16  ;;  %v1740_v16 = vld [vmem:[#allocation8 + $0x1838] sm:$0xff] }
 0x497   :  { %4909 = vmatpush1.bf16.msra.mxu0 %v3353_v37  ;;  %v3449_v37 = vunpack.c.h.s8.bf16 %v1689_v27  ;;  %v1737_v27 = vld [vmem:[#allocation8 + $0x1820] sm:$0xff] }
 0x498   :  { %5237 = vmatpush1.bf16.msra.mxu1 %v3355_v38  ;;  %4910 = vmatprep.subr.bf16.mxu0 %v3370_v23  ;;  %v3451_v38 = vunpack.c.h.s8.bf16 %v1691_v2  ;;  %v3466_v23 = vunpack.c.l.s8.bf16 %v1706_v44  ;;  %v1739_v2 = vld [vmem:[#allocation8 + $0x1830] sm:$0xff] }
 0x499   :  { %5238 = vmatprep.subr.bf16.mxu1 %v3372_v33  ;;  %v3468_v33 = vunpack.c.l.s8.bf16 %v1708_v34 }
 0x49b   :  { %4911 = vmatpush1.bf16.msra.mxu0 %v3369_v52  ;;  %v3465_v52 = vunpack.c.l.s8.bf16 %v1705_v39 }
 0x49c   :  { %5239 = vmatpush1.bf16.msra.mxu1 %v3371_v63  ;;  %4912 = vmatprep.subr.bf16.mxu0 %v3386_v55  ;;  %v3467_v63 = vunpack.c.l.s8.bf16 %v1707_v49  ;;  %v3482_v55 = vunpack.c.h.s8.bf16 %v1706_v44  ;;  %v3548_v44 = vunpack.c.h.s8.bf16 %v1740_v16 }
 0x49d   :  { %5240 = vmatprep.subr.bf16.mxu1 %v3388_v57  ;;  %v3484_v57 = vunpack.c.h.s8.bf16 %v1708_v34  ;;  %v1756_v34 = vld [vmem:[#allocation8 + $0x18b8] sm:$0xff] }
 0x49f   :  { %4913 = vmatpush1.bf16.msra.mxu0 %v3385_v58  ;;  %v3481_v58 = vunpack.c.h.s8.bf16 %v1705_v39  ;;  %v1753_v39 = vld [vmem:[#allocation8 + $0x18a0] sm:$0xff] }
 0x4a0   :  { %5241 = vmatpush1.bf16.msra.mxu1 %v3387_v62  ;;  %4914 = vmatprep.subr.bf16.mxu0 %v3402_v42  ;;  %v3483_v62 = vunpack.c.h.s8.bf16 %v1707_v49  ;;  %v3498_v42 = vunpack.c.l.s8.bf16 %v1722_v59  ;;  %v1755_v49 = vld [vmem:[#allocation8 + $0x18b0] sm:$0xff] }
 0x4a1   :  { %5242 = vmatprep.subr.bf16.mxu1 %v3404_v6  ;;  %v3500_v6 = vunpack.c.l.s8.bf16 %v1724_v13 }
 0x4a3   :  { %4915 = vmatpush1.bf16.msra.mxu0 %v3401_v24  ;;  %v3497_v24 = vunpack.c.l.s8.bf16 %v1721_v17 }
 0x4a4   :  { %5243 = vmatpush1.bf16.msra.mxu1 %v3403_v8  ;;  %4916 = vmatprep.subr.bf16.mxu0 %v3418_v9  ;;  %v3499_v8 = vunpack.c.l.s8.bf16 %v1723_v7  ;;  %v3514_v9 = vunpack.c.h.s8.bf16 %v1722_v59  ;;  %v1770_v59 = vld [vmem:[#allocation8 + $0x1928] sm:$0xff] }
 0x4a5   :  { %5244 = vmatprep.subr.bf16.mxu1 %v3420_v0  ;;  %v3516_v0 = vunpack.c.h.s8.bf16 %v1724_v13  ;;  %v1772_v13 = vld [vmem:[#allocation8 + $0x1938] sm:$0xff] }
 0x4a7   :  { %4917 = vmatpush1.bf16.msra.mxu0 %v3417_v18  ;;  %v3513_v18 = vunpack.c.h.s8.bf16 %v1721_v17  ;;  %v1769_v17 = vld [vmem:[#allocation8 + $0x1920] sm:$0xff] }
 0x4a8   :  { %5245 = vmatpush1.bf16.msra.mxu1 %v3419_v11  ;;  %4918 = vmatprep.subr.bf16.mxu0 %v3434_v15  ;;  %v3515_v11 = vunpack.c.h.s8.bf16 %v1723_v7  ;;  %v3530_v15 = vunpack.c.l.s8.bf16 %v1738_v60  ;;  %v1771_v7 = vld [vmem:[#allocation8 + $0x1930] sm:$0xff] }
 0x4a9   :  { %5246 = vmatprep.subr.bf16.mxu1 %v3436_v28  ;;  %v3532_v28 = vunpack.c.l.s8.bf16 %v1740_v16  ;;  %v1788_v16 = vld [vmem:[#allocation8 + $0x19b8] sm:$0xff] }
 0x4ab   :  { %4919 = vmatpush1.bf16.msra.mxu0 %v3433_v29  ;;  %v3529_v29 = vunpack.c.l.s8.bf16 %v1737_v27 }
 0x4ac   :  { %5247 = vmatpush1.bf16.msra.mxu1 %v3435_v30  ;;  %4920 = vmatprep.subr.bf16.mxu0 %v3450_v40  ;;  %v3531_v30 = vunpack.c.l.s8.bf16 %v1739_v2  ;;  %v3546_v40 = vunpack.c.h.s8.bf16 %v1738_v60  ;;  %v1786_v60 = vld [vmem:[#allocation8 + $0x19a8] sm:$0xff] }
 0x4ad   :  { %5248 = vmatprep.subr.bf16.mxu1 %v3452_v32  ;;  %v1754_v32 = vld [vmem:[#allocation8 + $0x18a8] sm:$0xff] }
 0x4af   :  { %4921 = vmatpush1.bf16.msra.mxu0 %v3449_v37  ;;  %v3545_v37 = vunpack.c.h.s8.bf16 %v1737_v27  ;;  %v1785_v27 = vld [vmem:[#allocation8 + $0x19a0] sm:$0xff] }
 0x4b0   :  { %5249 = vmatpush1.bf16.msra.mxu1 %v3451_v38  ;;  %4922 = vmatprep.subr.bf16.mxu0 %v3466_v23  ;;  %v3547_v38 = vunpack.c.h.s8.bf16 %v1739_v2  ;;  %v3562_v23 = vunpack.c.l.s8.bf16 %v1754_v32  ;;  %v1787_v2 = vld [vmem:[#allocation8 + $0x19b0] sm:$0xff] }
 0x4b1   :  { %5250 = vmatprep.subr.bf16.mxu1 %v3468_v33  ;;  %v3564_v33 = vunpack.c.l.s8.bf16 %v1756_v34 }
 0x4b3   :  { %4923 = vmatpush1.bf16.msra.mxu0 %v3465_v52  ;;  %v3561_v52 = vunpack.c.l.s8.bf16 %v1753_v39 }
 0x4b4   :  { %5251 = vmatpush1.bf16.msra.mxu1 %v3467_v63  ;;  %4924 = vmatprep.subr.bf16.mxu0 %v3482_v55  ;;  %v3563_v63 = vunpack.c.l.s8.bf16 %v1755_v49  ;;  %v3578_v55 = vunpack.c.h.s8.bf16 %v1754_v32  ;;  %v3644_v32 = vunpack.c.h.s8.bf16 %v1788_v16 }
 0x4b5   :  { %5252 = vmatprep.subr.bf16.mxu1 %v3484_v57  ;;  %v3580_v57 = vunpack.c.h.s8.bf16 %v1756_v34  ;;  %v1804_v34 = vld [vmem:[#allocation8 + $0x1a38] sm:$0xff] }
 0x4b7   :  { %4925 = vmatpush1.bf16.msra.mxu0 %v3481_v58  ;;  %v3577_v58 = vunpack.c.h.s8.bf16 %v1753_v39  ;;  %v1801_v39 = vld [vmem:[#allocation8 + $0x1a20] sm:$0xff] }
 0x4b8   :  { %5253 = vmatpush1.bf16.msra.mxu1 %v3483_v62  ;;  %4926 = vmatprep.subr.bf16.mxu0 %v3498_v42  ;;  %v3579_v62 = vunpack.c.h.s8.bf16 %v1755_v49  ;;  %v3594_v42 = vunpack.c.l.s8.bf16 %v1770_v59  ;;  %v1803_v49 = vld [vmem:[#allocation8 + $0x1a30] sm:$0xff] }
 0x4b9   :  { %5254 = vmatprep.subr.bf16.mxu1 %v3500_v6  ;;  %v3596_v6 = vunpack.c.l.s8.bf16 %v1772_v13 }
 0x4bb   :  { %4927 = vmatpush1.bf16.msra.mxu0 %v3497_v24  ;;  %v3593_v24 = vunpack.c.l.s8.bf16 %v1769_v17 }
 0x4bc   :  { %5255 = vmatpush1.bf16.msra.mxu1 %v3499_v8  ;;  %4928 = vmatprep.subr.bf16.mxu0 %v3514_v9  ;;  %v3595_v8 = vunpack.c.l.s8.bf16 %v1771_v7  ;;  %v3610_v9 = vunpack.c.h.s8.bf16 %v1770_v59  ;;  %v1818_v59 = vld [vmem:[#allocation8 + $0x1aa8] sm:$0xff] }
 0x4bd   :  { %5256 = vmatprep.subr.bf16.mxu1 %v3516_v0  ;;  %v3612_v0 = vunpack.c.h.s8.bf16 %v1772_v13  ;;  %v1820_v13 = vld [vmem:[#allocation8 + $0x1ab8] sm:$0xff] }
 0x4bf   :  { %4929 = vmatpush1.bf16.msra.mxu0 %v3513_v18  ;;  %v3609_v18 = vunpack.c.h.s8.bf16 %v1769_v17  ;;  %v1817_v17 = vld [vmem:[#allocation8 + $0x1aa0] sm:$0xff] }
 0x4c0   :  { %5257 = vmatpush1.bf16.msra.mxu1 %v3515_v11  ;;  %4939 = vmatprep.subr.bf16.mxu0 %v3530_v15  ;;  %v3611_v11 = vunpack.c.h.s8.bf16 %v1771_v7  ;;  %v3626_v15 = vunpack.c.l.s8.bf16 %v1786_v60  ;;  %v1819_v7 = vld [vmem:[#allocation8 + $0x1ab0] sm:$0xff] }
 0x4c1   :  { %5267 = vmatprep.subr.bf16.mxu1 %v3532_v28  ;;  %v3628_v28 = vunpack.c.l.s8.bf16 %v1788_v16  ;;  %v1836_v16 = vld [vmem:[#allocation8 + $0x1b38] sm:$0xff] }
 0x4c2   :  { %4931 = vmatmul.mubr.bf16.vlgmr.msra.gmra.mrb[20].mxu0 %v9580_v20 }
 0x4c3   :  { %5259 = vmatmul.mubr.bf16.vlgmr.msra.gmra.mrb[20].mxu1 %v9580_v20  ;;  %4940 = vmatpush1.bf16.msra.mxu0 %v3529_v29  ;;  %v3625_v29 = vunpack.c.l.s8.bf16 %v1785_v27 }
 0x4c4   :  { %4971 = vmatprep.mubr.bf16.mxu0 %v9582_v25  ;;  %5268 = vmatpush1.bf16.msra.mxu1 %v3531_v30  ;;  %v3627_v30 = vunpack.c.l.s8.bf16 %v1787_v2 }
 0x4c5   :  { %5299 = vmatprep.mubr.bf16.mxu1 %v9582_v25  ;;  %4941 = vmatprep.subr.bf16.mxu0 %v3546_v40  ;;  %v3642_v40 = vunpack.c.h.s8.bf16 %v1786_v60  ;;  %v1834_v60 = vld [vmem:[#allocation8 + $0x1b28] sm:$0xff] }
 0x4c6   :  { %5269 = vmatprep.subr.bf16.mxu1 %v3548_v44  ;;  %v1802_v44 = vld [vmem:[#allocation8 + $0x1a28] sm:$0xff] }
 0x4c7   :  { %4942 = vmatpush1.bf16.msra.mxu0 %v3545_v37  ;;  %v3641_v37 = vunpack.c.h.s8.bf16 %v1785_v27  ;;  %v1833_v27 = vld [vmem:[#allocation8 + $0x1b20] sm:$0xff] }
 0x4c8   :  { %5270 = vmatpush1.bf16.msra.mxu1 %v3547_v38  ;;  %4943 = vmatprep.subr.bf16.mxu0 %v3562_v23  ;;  %v3643_v38 = vunpack.c.h.s8.bf16 %v1787_v2  ;;  %v3658_v23 = vunpack.c.l.s8.bf16 %v1802_v44  ;;  %v1835_v2 = vld [vmem:[#allocation8 + $0x1b30] sm:$0xff] }
 0x4c9   :  { %5271 = vmatprep.subr.bf16.mxu1 %v3564_v33  ;;  %v3660_v33 = vunpack.c.l.s8.bf16 %v1804_v34 }
 0x4cb   :  { %4944 = vmatpush1.bf16.msra.mxu0 %v3561_v52  ;;  %v3657_v52 = vunpack.c.l.s8.bf16 %v1801_v39 }
 0x4cc   :  { %5272 = vmatpush1.bf16.msra.mxu1 %v3563_v63  ;;  %4945 = vmatprep.subr.bf16.mxu0 %v3578_v55  ;;  %v3659_v63 = vunpack.c.l.s8.bf16 %v1803_v49  ;;  %v3674_v55 = vunpack.c.h.s8.bf16 %v1802_v44  ;;  %v1850_v44 = vld [vmem:[#allocation8 + $0x1ba8] sm:$0xff] }
 0x4cd   :  { %5273 = vmatprep.subr.bf16.mxu1 %v3580_v57  ;;  %v3676_v57 = vunpack.c.h.s8.bf16 %v1804_v34  ;;  %v1852_v34 = vld [vmem:[#allocation8 + $0x1bb8] sm:$0xff] }
 0x4cf   :  { %4946 = vmatpush1.bf16.msra.mxu0 %v3577_v58  ;;  %v3673_v58 = vunpack.c.h.s8.bf16 %v1801_v39  ;;  %v1849_v39 = vld [vmem:[#allocation8 + $0x1ba0] sm:$0xff] }
 0x4d0   :  { %5274 = vmatpush1.bf16.msra.mxu1 %v3579_v62  ;;  %4947 = vmatprep.subr.bf16.mxu0 %v3594_v42  ;;  %v3675_v62 = vunpack.c.h.s8.bf16 %v1803_v49  ;;  %v3690_v42 = vunpack.c.l.s8.bf16 %v1818_v59  ;;  %v1851_v49 = vld [vmem:[#allocation8 + $0x1bb0] sm:$0xff] }
 0x4d1   :  { %5275 = vmatprep.subr.bf16.mxu1 %v3596_v6  ;;  %v3692_v6 = vunpack.c.l.s8.bf16 %v1820_v13 }
 0x4d3   :  { %4948 = vmatpush1.bf16.msra.mxu0 %v3593_v24  ;;  %v3689_v24 = vunpack.c.l.s8.bf16 %v1817_v17 }
 0x4d4   :  { %5276 = vmatpush1.bf16.msra.mxu1 %v3595_v8  ;;  %4949 = vmatprep.subr.bf16.mxu0 %v3610_v9  ;;  %v3691_v8 = vunpack.c.l.s8.bf16 %v1819_v7  ;;  %v3706_v9 = vunpack.c.h.s8.bf16 %v1818_v59  ;;  %v1866_v59 = vld [vmem:[#allocation8 + $0x1c28] sm:$0xff] }
 0x4d5   :  { %5277 = vmatprep.subr.bf16.mxu1 %v3612_v0  ;;  %v3708_v0 = vunpack.c.h.s8.bf16 %v1820_v13  ;;  %v1868_v13 = vld [vmem:[#allocation8 + $0x1c38] sm:$0xff] }
 0x4d7   :  { %4950 = vmatpush1.bf16.msra.mxu0 %v3609_v18  ;;  %v3705_v18 = vunpack.c.h.s8.bf16 %v1817_v17  ;;  %v1865_v17 = vld [vmem:[#allocation8 + $0x1c20] sm:$0xff] }
 0x4d8   :  { %5278 = vmatpush1.bf16.msra.mxu1 %v3611_v11  ;;  %4951 = vmatprep.subr.bf16.mxu0 %v3626_v15  ;;  %v3707_v11 = vunpack.c.h.s8.bf16 %v1819_v7  ;;  %v3722_v15 = vunpack.c.l.s8.bf16 %v1834_v60  ;;  %v1867_v7 = vld [vmem:[#allocation8 + $0x1c30] sm:$0xff] }
 0x4d9   :  { %5279 = vmatprep.subr.bf16.mxu1 %v3628_v28  ;;  %v3724_v28 = vunpack.c.l.s8.bf16 %v1836_v16 }
 0x4db   :  { %4952 = vmatpush1.bf16.msra.mxu0 %v3625_v29  ;;  %v3721_v29 = vunpack.c.l.s8.bf16 %v1833_v27 }
 0x4dc   :  { %5280 = vmatpush1.bf16.msra.mxu1 %v3627_v30  ;;  %4953 = vmatprep.subr.bf16.mxu0 %v3642_v40  ;;  %v3723_v30 = vunpack.c.l.s8.bf16 %v1835_v2  ;;  %v3738_v40 = vunpack.c.h.s8.bf16 %v1834_v60  ;;  %v3804_v60 = vunpack.c.h.s8.bf16 %v1868_v13 }
 0x4dd   :  { %5281 = vmatprep.subr.bf16.mxu1 %v3644_v32  ;;  %v3740_v32 = vunpack.c.h.s8.bf16 %v1836_v16  ;;  %v1884_v16 = vld [vmem:[#allocation8 + $0x1cb8] sm:$0xff] }
 0x4df   :  { %4954 = vmatpush1.bf16.msra.mxu0 %v3641_v37  ;;  %v3737_v37 = vunpack.c.h.s8.bf16 %v1833_v27  ;;  %v1881_v27 = vld [vmem:[#allocation8 + $0x1ca0] sm:$0xff] }
 0x4e0   :  { %5282 = vmatpush1.bf16.msra.mxu1 %v3643_v38  ;;  %4955 = vmatprep.subr.bf16.mxu0 %v3658_v23  ;;  %v3739_v38 = vunpack.c.h.s8.bf16 %v1835_v2  ;;  %v3754_v23 = vunpack.c.l.s8.bf16 %v1850_v44  ;;  %v1883_v2 = vld [vmem:[#allocation8 + $0x1cb0] sm:$0xff] }
 0x4e1   :  { %5283 = vmatprep.subr.bf16.mxu1 %v3660_v33  ;;  %v3756_v33 = vunpack.c.l.s8.bf16 %v1852_v34 }
 0x4e3   :  { %4956 = vmatpush1.bf16.msra.mxu0 %v3657_v52  ;;  %v3753_v52 = vunpack.c.l.s8.bf16 %v1849_v39 }
 0x4e4   :  { %5284 = vmatpush1.bf16.msra.mxu1 %v3659_v63  ;;  %4957 = vmatprep.subr.bf16.mxu0 %v3674_v55  ;;  %v3755_v63 = vunpack.c.l.s8.bf16 %v1851_v49  ;;  %v3770_v55 = vunpack.c.h.s8.bf16 %v1850_v44  ;;  %v1898_v44 = vld [vmem:[#allocation8 + $0x1d28] sm:$0xff] }
 0x4e5   :  { %5285 = vmatprep.subr.bf16.mxu1 %v3676_v57  ;;  %v3772_v57 = vunpack.c.h.s8.bf16 %v1852_v34  ;;  %v1900_v34 = vld [vmem:[#allocation8 + $0x1d38] sm:$0xff] }
 0x4e7   :  { %4958 = vmatpush1.bf16.msra.mxu0 %v3673_v58  ;;  %v3769_v58 = vunpack.c.h.s8.bf16 %v1849_v39  ;;  %v1897_v39 = vld [vmem:[#allocation8 + $0x1d20] sm:$0xff] }
 0x4e8   :  { %5286 = vmatpush1.bf16.msra.mxu1 %v3675_v62  ;;  %4959 = vmatprep.subr.bf16.mxu0 %v3690_v42  ;;  %v3771_v62 = vunpack.c.h.s8.bf16 %v1851_v49  ;;  %v3786_v42 = vunpack.c.l.s8.bf16 %v1866_v59  ;;  %v1899_v49 = vld [vmem:[#allocation8 + $0x1d30] sm:$0xff] }
 0x4e9   :  { %5287 = vmatprep.subr.bf16.mxu1 %v3692_v6  ;;  %v3788_v6 = vunpack.c.l.s8.bf16 %v1868_v13  ;;  %v1916_v13 = vld [vmem:[#allocation8 + $0x1db8] sm:$0xff] }
 0x4eb   :  { %4960 = vmatpush1.bf16.msra.mxu0 %v3689_v24  ;;  %v3785_v24 = vunpack.c.l.s8.bf16 %v1865_v17 }
 0x4ec   :  { %5288 = vmatpush1.bf16.msra.mxu1 %v3691_v8  ;;  %4961 = vmatprep.subr.bf16.mxu0 %v3706_v9  ;;  %v3787_v8 = vunpack.c.l.s8.bf16 %v1867_v7  ;;  %v3802_v9 = vunpack.c.h.s8.bf16 %v1866_v59  ;;  %v1914_v59 = vld [vmem:[#allocation8 + $0x1da8] sm:$0xff] }
 0x4ed   :  { %5289 = vmatprep.subr.bf16.mxu1 %v3708_v0  ;;  %v1882_v0 = vld [vmem:[#allocation8 + $0x1ca8] sm:$0xff] }
 0x4ef   :  { %4962 = vmatpush1.bf16.msra.mxu0 %v3705_v18  ;;  %v3801_v18 = vunpack.c.h.s8.bf16 %v1865_v17  ;;  %v1913_v17 = vld [vmem:[#allocation8 + $0x1da0] sm:$0xff] }
 0x4f0   :  { %5290 = vmatpush1.bf16.msra.mxu1 %v3707_v11  ;;  %4963 = vmatprep.subr.bf16.mxu0 %v3722_v15  ;;  %v3803_v11 = vunpack.c.h.s8.bf16 %v1867_v7  ;;  %v3818_v15 = vunpack.c.l.s8.bf16 %v1882_v0  ;;  %v1915_v7 = vld [vmem:[#allocation8 + $0x1db0] sm:$0xff] }
 0x4f1   :  { %5291 = vmatprep.subr.bf16.mxu1 %v3724_v28  ;;  %v3820_v28 = vunpack.c.l.s8.bf16 %v1884_v16 }
 0x4f3   :  { %4964 = vmatpush1.bf16.msra.mxu0 %v3721_v29  ;;  %v3817_v29 = vunpack.c.l.s8.bf16 %v1881_v27 }
 0x4f4   :  { %5292 = vmatpush1.bf16.msra.mxu1 %v3723_v30  ;;  %4965 = vmatprep.subr.bf16.mxu0 %v3738_v40  ;;  %v3819_v30 = vunpack.c.l.s8.bf16 %v1883_v2  ;;  %v3834_v40 = vunpack.c.h.s8.bf16 %v1882_v0  ;;  %v3900_v0 = vunpack.c.h.s8.bf16 %v1916_v13 }
 0x4f5   :  { %5293 = vmatprep.subr.bf16.mxu1 %v3740_v32  ;;  %v3836_v32 = vunpack.c.h.s8.bf16 %v1884_v16  ;;  %v1932_v16 = vld [vmem:[#allocation8 + $0x1e38] sm:$0xff] }
 0x4f7   :  { %4966 = vmatpush1.bf16.msra.mxu0 %v3737_v37  ;;  %v3833_v37 = vunpack.c.h.s8.bf16 %v1881_v27  ;;  %v1929_v27 = vld [vmem:[#allocation8 + $0x1e20] sm:$0xff] }
 0x4f8   :  { %5294 = vmatpush1.bf16.msra.mxu1 %v3739_v38  ;;  %4967 = vmatprep.subr.bf16.mxu0 %v3754_v23  ;;  %v3835_v38 = vunpack.c.h.s8.bf16 %v1883_v2  ;;  %v3850_v23 = vunpack.c.l.s8.bf16 %v1898_v44  ;;  %v1931_v2 = vld [vmem:[#allocation8 + $0x1e30] sm:$0xff] }
 0x4f9   :  { %5295 = vmatprep.subr.bf16.mxu1 %v3756_v33  ;;  %v3852_v33 = vunpack.c.l.s8.bf16 %v1900_v34 }
 0x4fb   :  { %4968 = vmatpush1.bf16.msra.mxu0 %v3753_v52  ;;  %v3849_v52 = vunpack.c.l.s8.bf16 %v1897_v39 }
 0x4fc   :  { %5296 = vmatpush1.bf16.msra.mxu1 %v3755_v63  ;;  %4969 = vmatprep.subr.bf16.mxu0 %v3770_v55  ;;  %v3851_v63 = vunpack.c.l.s8.bf16 %v1899_v49  ;;  %v3866_v55 = vunpack.c.h.s8.bf16 %v1898_v44  ;;  %v1946_v44 = vld [vmem:[#allocation8 + $0x1ea8] sm:$0xff] }
 0x4fd   :  { %5297 = vmatprep.subr.bf16.mxu1 %v3772_v57  ;;  %v3868_v57 = vunpack.c.h.s8.bf16 %v1900_v34  ;;  %v1948_v34 = vld [vmem:[#allocation8 + $0x1eb8] sm:$0xff] }
 0x4ff   :  { %4970 = vmatpush1.bf16.msra.mxu0 %v3769_v58  ;;  %v3865_v58 = vunpack.c.h.s8.bf16 %v1897_v39  ;;  %v1945_v39 = vld [vmem:[#allocation8 + $0x1ea0] sm:$0xff] }
 0x500   :  { %5298 = vmatpush1.bf16.msra.mxu1 %v3771_v62  ;;  %4980 = vmatprep.subr.bf16.mxu0 %v3786_v42  ;;  %v3867_v62 = vunpack.c.h.s8.bf16 %v1899_v49  ;;  %v3882_v42 = vunpack.c.l.s8.bf16 %v1914_v59  ;;  %v1947_v49 = vld [vmem:[#allocation8 + $0x1eb0] sm:$0xff] }
 0x501   :  { %5308 = vmatprep.subr.bf16.mxu1 %v3788_v6  ;;  %v3884_v6 = vunpack.c.l.s8.bf16 %v1916_v13  ;;  %v1964_v13 = vld [vmem:[#allocation8 + $0x1f38] sm:$0xff] }
 0x502   :  { %4972 = vmatmul.mubr.bf16.vlgmr.msra.gmra.mrb[20].mxu0 %v9590_v51 }
 0x503   :  { %5300 = vmatmul.mubr.bf16.vlgmr.msra.gmra.mrb[20].mxu1 %v9590_v51  ;;  %4981 = vmatpush1.bf16.msra.mxu0 %v3785_v24  ;;  %v3881_v24 = vunpack.c.l.s8.bf16 %v1913_v17 }
 0x504   :  { %5012 = vmatprep.mubr.bf16.mxu0 %v9592_v53  ;;  %5309 = vmatpush1.bf16.msra.mxu1 %v3787_v8  ;;  %v3883_v8 = vunpack.c.l.s8.bf16 %v1915_v7 }
 0x505   :  { %5340 = vmatprep.mubr.bf16.mxu1 %v9592_v53  ;;  %4982 = vmatprep.subr.bf16.mxu0 %v3802_v9  ;;  %v3898_v9 = vunpack.c.h.s8.bf16 %v1914_v59  ;;  %v1962_v59 = vld [vmem:[#allocation8 + $0x1f28] sm:$0xff] }
 0x506   :  { %5310 = vmatprep.subr.bf16.mxu1 %v3804_v60  ;;  %v1930_v60 = vld [vmem:[#allocation8 + $0x1e28] sm:$0xff] }
 0x507   :  { %4983 = vmatpush1.bf16.msra.mxu0 %v3801_v18  ;;  %v3897_v18 = vunpack.c.h.s8.bf16 %v1913_v17  ;;  %v1961_v17 = vld [vmem:[#allocation8 + $0x1f20] sm:$0xff] }
 0x508   :  { %5311 = vmatpush1.bf16.msra.mxu1 %v3803_v11  ;;  %4984 = vmatprep.subr.bf16.mxu0 %v3818_v15  ;;  %v3899_v11 = vunpack.c.h.s8.bf16 %v1915_v7  ;;  %v3914_v15 = vunpack.c.l.s8.bf16 %v1930_v60  ;;  %v1963_v7 = vld [vmem:[#allocation8 + $0x1f30] sm:$0xff] }
 0x509   :  { %5312 = vmatprep.subr.bf16.mxu1 %v3820_v28  ;;  %v3916_v28 = vunpack.c.l.s8.bf16 %v1932_v16 }
 0x50b   :  { %4985 = vmatpush1.bf16.msra.mxu0 %v3817_v29  ;;  %v3913_v29 = vunpack.c.l.s8.bf16 %v1929_v27 }
 0x50c   :  { %5313 = vmatpush1.bf16.msra.mxu1 %v3819_v30  ;;  %4986 = vmatprep.subr.bf16.mxu0 %v3834_v40  ;;  %v3915_v30 = vunpack.c.l.s8.bf16 %v1931_v2  ;;  %v3930_v40 = vunpack.c.h.s8.bf16 %v1930_v60  ;;  %v1978_v60 = vld [vmem:[#allocation8 + $0x1fa8] sm:$0xff] }
 0x50d   :  { %5314 = vmatprep.subr.bf16.mxu1 %v3836_v32  ;;  %v3932_v32 = vunpack.c.h.s8.bf16 %v1932_v16  ;;  %v1980_v16 = vld [vmem:[#allocation8 + $0x1fb8] sm:$0xff] }
 0x50f   :  { %4987 = vmatpush1.bf16.msra.mxu0 %v3833_v37  ;;  %v3929_v37 = vunpack.c.h.s8.bf16 %v1929_v27  ;;  %v1977_v27 = vld [vmem:[#allocation8 + $0x1fa0] sm:$0xff] }
 0x510   :  { %5315 = vmatpush1.bf16.msra.mxu1 %v3835_v38  ;;  %4988 = vmatprep.subr.bf16.mxu0 %v3850_v23  ;;  %v3931_v38 = vunpack.c.h.s8.bf16 %v1931_v2  ;;  %v3946_v23 = vunpack.c.l.s8.bf16 %v1946_v44  ;;  %v1979_v2 = vld [vmem:[#allocation8 + $0x1fb0] sm:$0xff] }
 0x511   :  { %5316 = vmatprep.subr.bf16.mxu1 %v3852_v33  ;;  %v3948_v33 = vunpack.c.l.s8.bf16 %v1948_v34 }
 0x513   :  { %4989 = vmatpush1.bf16.msra.mxu0 %v3849_v52  ;;  %v3945_v52 = vunpack.c.l.s8.bf16 %v1945_v39 }
 0x514   :  { %5317 = vmatpush1.bf16.msra.mxu1 %v3851_v63  ;;  %4990 = vmatprep.subr.bf16.mxu0 %v3866_v55  ;;  %v3947_v63 = vunpack.c.l.s8.bf16 %v1947_v49  ;;  %v3962_v55 = vunpack.c.h.s8.bf16 %v1946_v44  ;;  %v974_v44 = vld [vmem:[#allocation8 + $0x48] sm:$0xff] }
 0x515   :  { %5318 = vmatprep.subr.bf16.mxu1 %v3868_v57  ;;  %v3964_v57 = vunpack.c.h.s8.bf16 %v1948_v34  ;;  %v976_v34 = vld [vmem:[#allocation8 + $0x58] sm:$0xff] }
 0x517   :  { %4991 = vmatpush1.bf16.msra.mxu0 %v3865_v58  ;;  %v3961_v58 = vunpack.c.h.s8.bf16 %v1945_v39  ;;  %v973_v39 = vld [vmem:[#allocation8 + $0x40] sm:$0xff] }
 0x518   :  { %5319 = vmatpush1.bf16.msra.mxu1 %v3867_v62  ;;  %4992 = vmatprep.subr.bf16.mxu0 %v3882_v42  ;;  %v3963_v62 = vunpack.c.h.s8.bf16 %v1947_v49  ;;  %v3978_v42 = vunpack.c.l.s8.bf16 %v1962_v59  ;;  %v975_v49 = vld [vmem:[#allocation8 + $0x50] sm:$0xff] }
 0x519   :  { %5320 = vmatprep.subr.bf16.mxu1 %v3884_v6  ;;  %v3980_v6 = vunpack.c.l.s8.bf16 %v1964_v13 }
 0x51b   :  { %4993 = vmatpush1.bf16.msra.mxu0 %v3881_v24  ;;  %v3977_v24 = vunpack.c.l.s8.bf16 %v1961_v17 }
 0x51c   :  { %5321 = vmatpush1.bf16.msra.mxu1 %v3883_v8  ;;  %4994 = vmatprep.subr.bf16.mxu0 %v3898_v9  ;;  %v3979_v8 = vunpack.c.l.s8.bf16 %v1963_v7  ;;  %v3994_v9 = vunpack.c.h.s8.bf16 %v1962_v59  ;;  %v2016_v59 = vunpack.c.h.s8.bf16 %v976_v34 }
 0x51d   :  { %5322 = vmatprep.subr.bf16.mxu1 %v3900_v0  ;;  %v3996_v0 = vunpack.c.h.s8.bf16 %v1964_v13  ;;  %v992_v13 = vld [vmem:[#allocation8 + $0xd8] sm:$0xff] }
 0x51f   :  { %4995 = vmatpush1.bf16.msra.mxu0 %v3897_v18  ;;  %v3993_v18 = vunpack.c.h.s8.bf16 %v1961_v17  ;;  %v989_v17 = vld [vmem:[#allocation8 + $0xc0] sm:$0xff] }
 0x520   :  { %5323 = vmatpush1.bf16.msra.mxu1 %v3899_v11  ;;  %4996 = vmatprep.subr.bf16.mxu0 %v3914_v15  ;;  %v3995_v11 = vunpack.c.h.s8.bf16 %v1963_v7  ;;  %v4010_v15 = vunpack.c.l.s8.bf16 %v1978_v60  ;;  %v991_v7 = vld [vmem:[#allocation8 + $0xd0] sm:$0xff] }
 0x521   :  { %5324 = vmatprep.subr.bf16.mxu1 %v3916_v28  ;;  %v4012_v28 = vunpack.c.l.s8.bf16 %v1980_v16 }
 0x523   :  { %4997 = vmatpush1.bf16.msra.mxu0 %v3913_v29  ;;  %v4009_v29 = vunpack.c.l.s8.bf16 %v1977_v27 }
 0x524   :  { %5325 = vmatpush1.bf16.msra.mxu1 %v3915_v30  ;;  %4998 = vmatprep.subr.bf16.mxu0 %v3930_v40  ;;  %v4011_v30 = vunpack.c.l.s8.bf16 %v1979_v2  ;;  %v4026_v40 = vunpack.c.h.s8.bf16 %v1978_v60  ;;  %v1006_v60 = vld [vmem:[#allocation8 + $0x148] sm:$0xff] }
 0x525   :  { %5326 = vmatprep.subr.bf16.mxu1 %v3932_v32  ;;  %v4028_v32 = vunpack.c.h.s8.bf16 %v1980_v16  ;;  %v1008_v16 = vld [vmem:[#allocation8 + $0x158] sm:$0xff] }
 0x527   :  { %4999 = vmatpush1.bf16.msra.mxu0 %v3929_v37  ;;  %v4025_v37 = vunpack.c.h.s8.bf16 %v1977_v27  ;;  %v1005_v27 = vld [vmem:[#allocation8 + $0x140] sm:$0xff] }
 0x528   :  { %5327 = vmatpush1.bf16.msra.mxu1 %v3931_v38  ;;  %5000 = vmatprep.subr.bf16.mxu0 %v3946_v23  ;;  %v4027_v38 = vunpack.c.h.s8.bf16 %v1979_v2  ;;  %v1998_v23 = vunpack.c.l.s8.bf16 %v974_v44  ;;  %v1007_v2 = vld [vmem:[#allocation8 + $0x150] sm:$0xff] }
 0x529   :  { %5328 = vmatprep.subr.bf16.mxu1 %v3948_v33  ;;  %v2000_v33 = vunpack.c.l.s8.bf16 %v976_v34  ;;  %v1024_v34 = vld [vmem:[#allocation8 + $0x1d8] sm:$0xff] }
 0x52b   :  { %5001 = vmatpush1.bf16.msra.mxu0 %v3945_v52  ;;  %v1997_v52 = vunpack.c.l.s8.bf16 %v973_v39 }
 0x52c   :  { %5329 = vmatpush1.bf16.msra.mxu1 %v3947_v63  ;;  %5002 = vmatprep.subr.bf16.mxu0 %v3962_v55  ;;  %v1999_v63 = vunpack.c.l.s8.bf16 %v975_v49  ;;  %v2014_v55 = vunpack.c.h.s8.bf16 %v974_v44  ;;  %v1022_v44 = vld [vmem:[#allocation8 + $0x1c8] sm:$0xff] }
 0x52d   :  { %5330 = vmatprep.subr.bf16.mxu1 %v3964_v57  ;;  %v990_v57 = vld [vmem:[#allocation8 + $0xc8] sm:$0xff] }
 0x52f   :  { %5003 = vmatpush1.bf16.msra.mxu0 %v3961_v58  ;;  %v2013_v58 = vunpack.c.h.s8.bf16 %v973_v39  ;;  %v1021_v39 = vld [vmem:[#allocation8 + $0x1c0] sm:$0xff] }
 0x530   :  { %5331 = vmatpush1.bf16.msra.mxu1 %v3963_v62  ;;  %5004 = vmatprep.subr.bf16.mxu0 %v3978_v42  ;;  %v2015_v62 = vunpack.c.h.s8.bf16 %v975_v49  ;;  %v2030_v42 = vunpack.c.l.s8.bf16 %v990_v57  ;;  %v1023_v49 = vld [vmem:[#allocation8 + $0x1d0] sm:$0xff] }
 0x531   :  { %5332 = vmatprep.subr.bf16.mxu1 %v3980_v6  ;;  %v2032_v6 = vunpack.c.l.s8.bf16 %v992_v13 }
 0x533   :  { %5005 = vmatpush1.bf16.msra.mxu0 %v3977_v24  ;;  %v2029_v24 = vunpack.c.l.s8.bf16 %v989_v17 }
 0x534   :  { %5333 = vmatpush1.bf16.msra.mxu1 %v3979_v8  ;;  %5006 = vmatprep.subr.bf16.mxu0 %v3994_v9  ;;  %v2031_v8 = vunpack.c.l.s8.bf16 %v991_v7  ;;  %v2046_v9 = vunpack.c.h.s8.bf16 %v990_v57  ;;  %v2112_v57 = vunpack.c.h.s8.bf16 %v1024_v34 }
 0x535   :  { %5334 = vmatprep.subr.bf16.mxu1 %v3996_v0  ;;  %v2048_v0 = vunpack.c.h.s8.bf16 %v992_v13  ;;  %v1040_v13 = vld [vmem:[#allocation8 + $0x258] sm:$0xff] }
 0x537   :  { %5007 = vmatpush1.bf16.msra.mxu0 %v3993_v18  ;;  %v2045_v18 = vunpack.c.h.s8.bf16 %v989_v17  ;;  %v1037_v17 = vld [vmem:[#allocation8 + $0x240] sm:$0xff] }
 0x538   :  { %5335 = vmatpush1.bf16.msra.mxu1 %v3995_v11  ;;  %5008 = vmatprep.subr.bf16.mxu0 %v4010_v15  ;;  %v2047_v11 = vunpack.c.h.s8.bf16 %v991_v7  ;;  %v2062_v15 = vunpack.c.l.s8.bf16 %v1006_v60  ;;  %v1039_v7 = vld [vmem:[#allocation8 + $0x250] sm:$0xff] }
 0x539   :  { %5336 = vmatprep.subr.bf16.mxu1 %v4012_v28  ;;  %v2064_v28 = vunpack.c.l.s8.bf16 %v1008_v16 }
 0x53b   :  { %5009 = vmatpush1.bf16.msra.mxu0 %v4009_v29  ;;  %v2061_v29 = vunpack.c.l.s8.bf16 %v1005_v27 }
 0x53c   :  { %5337 = vmatpush1.bf16.msra.mxu1 %v4011_v30  ;;  %5010 = vmatprep.subr.bf16.mxu0 %v4026_v40  ;;  %v2063_v30 = vunpack.c.l.s8.bf16 %v1007_v2  ;;  %v2078_v40 = vunpack.c.h.s8.bf16 %v1006_v60  ;;  %v1054_v60 = vld [vmem:[#allocation8 + $0x2c8] sm:$0xff] }
 0x53d   :  { %5338 = vmatprep.subr.bf16.mxu1 %v4028_v32  ;;  %v2080_v32 = vunpack.c.h.s8.bf16 %v1008_v16  ;;  %v1056_v16 = vld [vmem:[#allocation8 + $0x2d8] sm:$0xff] }
 0x53f   :  { %5011 = vmatpush1.bf16.msra.mxu0 %v4025_v37  ;;  %v2077_v37 = vunpack.c.h.s8.bf16 %v1005_v27  ;;  %v1053_v27 = vld [vmem:[#allocation8 + $0x2c0] sm:$0xff] }
 0x540   :  { %5339 = vmatpush1.bf16.msra.mxu1 %v4027_v38  ;;  %5349 = vmatprep.subr.bf16.mxu0 %v1998_v23  ;;  %v2079_v38 = vunpack.c.h.s8.bf16 %v1007_v2  ;;  %v2094_v23 = vunpack.c.l.s8.bf16 %v1022_v44  ;;  %v1055_v2 = vld [vmem:[#allocation8 + $0x2d0] sm:$0xff] }
 0x541   :  { %5677 = vmatprep.subr.bf16.mxu1 %v2000_v33  ;;  %v2096_v33 = vunpack.c.l.s8.bf16 %v1024_v34  ;;  %v1072_v34 = vld [vmem:[#allocation8 + $0x358] sm:$0xff] }
 0x542   :  { %5013 = vmatmul.mubr.bf16.vlgmr.msra.gmra.mrb[20].mxu0 %v9599_v14 }
 0x543   :  { %5341 = vmatmul.mubr.bf16.vlgmr.msra.gmra.mrb[20].mxu1 %v9599_v14  ;;  %5350 = vmatpush1.bf16.msra.mxu0 %v1997_v52  ;;  %v2093_v52 = vunpack.c.l.s8.bf16 %v1021_v39 }
 0x544   :  { %5381 = vmatprep.mubr.bf16.mxu0 %v9461_v1  ;;  %5678 = vmatpush1.bf16.msra.mxu1 %v1999_v63  ;;  %v2095_v63 = vunpack.c.l.s8.bf16 %v1023_v49 }
 0x545   :  { %5709 = vmatprep.mubr.bf16.mxu1 %v9461_v1  ;;  %5351 = vmatprep.subr.bf16.mxu0 %v2014_v55  ;;  %v2110_v55 = vunpack.c.h.s8.bf16 %v1022_v44  ;;  %v1070_v44 = vld [vmem:[#allocation8 + $0x348] sm:$0xff] }
 0x546   :  { %5679 = vmatprep.subr.bf16.mxu1 %v2016_v59  ;;  %v1038_v59 = vld [vmem:[#allocation8 + $0x248] sm:$0xff] }
 0x547   :  { %5352 = vmatpush1.bf16.msra.mxu0 %v2013_v58  ;;  %v2109_v58 = vunpack.c.h.s8.bf16 %v1021_v39  ;;  %v1069_v39 = vld [vmem:[#allocation8 + $0x340] sm:$0xff] }
 0x548   :  { %5680 = vmatpush1.bf16.msra.mxu1 %v2015_v62  ;;  %5353 = vmatprep.subr.bf16.mxu0 %v2030_v42  ;;  %v2111_v62 = vunpack.c.h.s8.bf16 %v1023_v49  ;;  %v2126_v42 = vunpack.c.l.s8.bf16 %v1038_v59  ;;  %v1071_v49 = vld [vmem:[#allocation8 + $0x350] sm:$0xff] }
 0x549   :  { %5681 = vmatprep.subr.bf16.mxu1 %v2032_v6  ;;  %v2128_v6 = vunpack.c.l.s8.bf16 %v1040_v13 }
 0x54b   :  { %5354 = vmatpush1.bf16.msra.mxu0 %v2029_v24  ;;  %v2125_v24 = vunpack.c.l.s8.bf16 %v1037_v17 }
 0x54c   :  { %5682 = vmatpush1.bf16.msra.mxu1 %v2031_v8  ;;  %5355 = vmatprep.subr.bf16.mxu0 %v2046_v9  ;;  %v2127_v8 = vunpack.c.l.s8.bf16 %v1039_v7  ;;  %v2142_v9 = vunpack.c.h.s8.bf16 %v1038_v59  ;;  %v1086_v59 = vld [vmem:[#allocation8 + $0x3c8] sm:$0xff] }
 0x54d   :  { %5683 = vmatprep.subr.bf16.mxu1 %v2048_v0  ;;  %v2144_v0 = vunpack.c.h.s8.bf16 %v1040_v13  ;;  %v1088_v13 = vld [vmem:[#allocation8 + $0x3d8] sm:$0xff] }
 0x54f   :  { %5356 = vmatpush1.bf16.msra.mxu0 %v2045_v18  ;;  %v2141_v18 = vunpack.c.h.s8.bf16 %v1037_v17  ;;  %v1085_v17 = vld [vmem:[#allocation8 + $0x3c0] sm:$0xff] }
 0x550   :  { %5684 = vmatpush1.bf16.msra.mxu1 %v2047_v11  ;;  %5357 = vmatprep.subr.bf16.mxu0 %v2062_v15  ;;  %v2143_v11 = vunpack.c.h.s8.bf16 %v1039_v7  ;;  %v2158_v15 = vunpack.c.l.s8.bf16 %v1054_v60  ;;  %v1087_v7 = vld [vmem:[#allocation8 + $0x3d0] sm:$0xff] }
 0x551   :  { %5685 = vmatprep.subr.bf16.mxu1 %v2064_v28  ;;  %v2160_v28 = vunpack.c.l.s8.bf16 %v1056_v16 }
 0x553   :  { %5358 = vmatpush1.bf16.msra.mxu0 %v2061_v29  ;;  %v2157_v29 = vunpack.c.l.s8.bf16 %v1053_v27 }
 0x554   :  { %5686 = vmatpush1.bf16.msra.mxu1 %v2063_v30  ;;  %5359 = vmatprep.subr.bf16.mxu0 %v2078_v40  ;;  %v2159_v30 = vunpack.c.l.s8.bf16 %v1055_v2  ;;  %v2174_v40 = vunpack.c.h.s8.bf16 %v1054_v60  ;;  %v1102_v60 = vld [vmem:[#allocation8 + $0x448] sm:$0xff] }
 0x555   :  { %5687 = vmatprep.subr.bf16.mxu1 %v2080_v32  ;;  %v2176_v32 = vunpack.c.h.s8.bf16 %v1056_v16  ;;  %v1104_v16 = vld [vmem:[#allocation8 + $0x458] sm:$0xff] }
 0x557   :  { %5360 = vmatpush1.bf16.msra.mxu0 %v2077_v37  ;;  %v2173_v37 = vunpack.c.h.s8.bf16 %v1053_v27  ;;  %v1101_v27 = vld [vmem:[#allocation8 + $0x440] sm:$0xff] }
 0x558   :  { %5688 = vmatpush1.bf16.msra.mxu1 %v2079_v38  ;;  %5361 = vmatprep.subr.bf16.mxu0 %v2094_v23  ;;  %v2175_v38 = vunpack.c.h.s8.bf16 %v1055_v2  ;;  %v2190_v23 = vunpack.c.l.s8.bf16 %v1070_v44  ;;  %v1103_v2 = vld [vmem:[#allocation8 + $0x450] sm:$0xff] }
 0x559   :  { %5689 = vmatprep.subr.bf16.mxu1 %v2096_v33  ;;  %v2192_v33 = vunpack.c.l.s8.bf16 %v1072_v34 }
 0x55b   :  { %5362 = vmatpush1.bf16.msra.mxu0 %v2093_v52  ;;  %v2189_v52 = vunpack.c.l.s8.bf16 %v1069_v39 }
 0x55c   :  { %5690 = vmatpush1.bf16.msra.mxu1 %v2095_v63  ;;  %5363 = vmatprep.subr.bf16.mxu0 %v2110_v55  ;;  %v2191_v63 = vunpack.c.l.s8.bf16 %v1071_v49  ;;  %v2206_v55 = vunpack.c.h.s8.bf16 %v1070_v44  ;;  %v2272_v44 = vunpack.c.h.s8.bf16 %v1104_v16 }
 0x55d   :  { %5691 = vmatprep.subr.bf16.mxu1 %v2112_v57  ;;  %v2208_v57 = vunpack.c.h.s8.bf16 %v1072_v34  ;;  %v1120_v34 = vld [vmem:[#allocation8 + $0x4d8] sm:$0xff] }
 0x55f   :  { %5364 = vmatpush1.bf16.msra.mxu0 %v2109_v58  ;;  %v2205_v58 = vunpack.c.h.s8.bf16 %v1069_v39  ;;  %v1117_v39 = vld [vmem:[#allocation8 + $0x4c0] sm:$0xff] }
 0x560   :  { %5692 = vmatpush1.bf16.msra.mxu1 %v2111_v62  ;;  %5365 = vmatprep.subr.bf16.mxu0 %v2126_v42  ;;  %v2207_v62 = vunpack.c.h.s8.bf16 %v1071_v49  ;;  %v2222_v42 = vunpack.c.l.s8.bf16 %v1086_v59  ;;  %v1119_v49 = vld [vmem:[#allocation8 + $0x4d0] sm:$0xff] }
 0x561   :  { %5693 = vmatprep.subr.bf16.mxu1 %v2128_v6  ;;  %v2224_v6 = vunpack.c.l.s8.bf16 %v1088_v13 }
 0x563   :  { %5366 = vmatpush1.bf16.msra.mxu0 %v2125_v24  ;;  %v2221_v24 = vunpack.c.l.s8.bf16 %v1085_v17 }
 0x564   :  { %5694 = vmatpush1.bf16.msra.mxu1 %v2127_v8  ;;  %5367 = vmatprep.subr.bf16.mxu0 %v2142_v9  ;;  %v2223_v8 = vunpack.c.l.s8.bf16 %v1087_v7  ;;  %v2238_v9 = vunpack.c.h.s8.bf16 %v1086_v59  ;;  %v1134_v59 = vld [vmem:[#allocation8 + $0x548] sm:$0xff] }
 0x565   :  { %5695 = vmatprep.subr.bf16.mxu1 %v2144_v0  ;;  %v2240_v0 = vunpack.c.h.s8.bf16 %v1088_v13  ;;  %v1136_v13 = vld [vmem:[#allocation8 + $0x558] sm:$0xff] }
 0x567   :  { %5368 = vmatpush1.bf16.msra.mxu0 %v2141_v18  ;;  %v2237_v18 = vunpack.c.h.s8.bf16 %v1085_v17  ;;  %v1133_v17 = vld [vmem:[#allocation8 + $0x540] sm:$0xff] }
 0x568   :  { %5696 = vmatpush1.bf16.msra.mxu1 %v2143_v11  ;;  %5369 = vmatprep.subr.bf16.mxu0 %v2158_v15  ;;  %v2239_v11 = vunpack.c.h.s8.bf16 %v1087_v7  ;;  %v2254_v15 = vunpack.c.l.s8.bf16 %v1102_v60  ;;  %v1135_v7 = vld [vmem:[#allocation8 + $0x550] sm:$0xff] }
 0x569   :  { %5697 = vmatprep.subr.bf16.mxu1 %v2160_v28  ;;  %v2256_v28 = vunpack.c.l.s8.bf16 %v1104_v16  ;;  %v1152_v16 = vld [vmem:[#allocation8 + $0x5d8] sm:$0xff] }
 0x56b   :  { %5370 = vmatpush1.bf16.msra.mxu0 %v2157_v29  ;;  %v2253_v29 = vunpack.c.l.s8.bf16 %v1101_v27 }
 0x56c   :  { %5698 = vmatpush1.bf16.msra.mxu1 %v2159_v30  ;;  %5371 = vmatprep.subr.bf16.mxu0 %v2174_v40  ;;  %v2255_v30 = vunpack.c.l.s8.bf16 %v1103_v2  ;;  %v2270_v40 = vunpack.c.h.s8.bf16 %v1102_v60  ;;  %v1150_v60 = vld [vmem:[#allocation8 + $0x5c8] sm:$0xff] }
 0x56d   :  { %5699 = vmatprep.subr.bf16.mxu1 %v2176_v32  ;;  %v1118_v32 = vld [vmem:[#allocation8 + $0x4c8] sm:$0xff] }
 0x56f   :  { %5372 = vmatpush1.bf16.msra.mxu0 %v2173_v37  ;;  %v2269_v37 = vunpack.c.h.s8.bf16 %v1101_v27  ;;  %v1149_v27 = vld [vmem:[#allocation8 + $0x5c0] sm:$0xff] }
 0x570   :  { %5700 = vmatpush1.bf16.msra.mxu1 %v2175_v38  ;;  %5373 = vmatprep.subr.bf16.mxu0 %v2190_v23  ;;  %v2271_v38 = vunpack.c.h.s8.bf16 %v1103_v2  ;;  %v2286_v23 = vunpack.c.l.s8.bf16 %v1118_v32  ;;  %v1151_v2 = vld [vmem:[#allocation8 + $0x5d0] sm:$0xff] }
 0x571   :  { %5701 = vmatprep.subr.bf16.mxu1 %v2192_v33  ;;  %v2288_v33 = vunpack.c.l.s8.bf16 %v1120_v34 }
 0x573   :  { %5374 = vmatpush1.bf16.msra.mxu0 %v2189_v52  ;;  %v2285_v52 = vunpack.c.l.s8.bf16 %v1117_v39 }
 0x574   :  { %5702 = vmatpush1.bf16.msra.mxu1 %v2191_v63  ;;  %5375 = vmatprep.subr.bf16.mxu0 %v2206_v55  ;;  %v2287_v63 = vunpack.c.l.s8.bf16 %v1119_v49  ;;  %v2302_v55 = vunpack.c.h.s8.bf16 %v1118_v32  ;;  %v2368_v32 = vunpack.c.h.s8.bf16 %v1152_v16 }
 0x575   :  { %5703 = vmatprep.subr.bf16.mxu1 %v2208_v57  ;;  %v2304_v57 = vunpack.c.h.s8.bf16 %v1120_v34  ;;  %v1168_v34 = vld [vmem:[#allocation8 + $0x658] sm:$0xff] }
 0x577   :  { %5376 = vmatpush1.bf16.msra.mxu0 %v2205_v58  ;;  %v2301_v58 = vunpack.c.h.s8.bf16 %v1117_v39  ;;  %v1165_v39 = vld [vmem:[#allocation8 + $0x640] sm:$0xff] }
 0x578   :  { %5704 = vmatpush1.bf16.msra.mxu1 %v2207_v62  ;;  %5377 = vmatprep.subr.bf16.mxu0 %v2222_v42  ;;  %v2303_v62 = vunpack.c.h.s8.bf16 %v1119_v49  ;;  %v2318_v42 = vunpack.c.l.s8.bf16 %v1134_v59  ;;  %v1167_v49 = vld [vmem:[#allocation8 + $0x650] sm:$0xff] }
 0x579   :  { %5705 = vmatprep.subr.bf16.mxu1 %v2224_v6  ;;  %v2320_v6 = vunpack.c.l.s8.bf16 %v1136_v13 }
 0x57b   :  { %5378 = vmatpush1.bf16.msra.mxu0 %v2221_v24  ;;  %v2317_v24 = vunpack.c.l.s8.bf16 %v1133_v17 }
 0x57c   :  { %5706 = vmatpush1.bf16.msra.mxu1 %v2223_v8  ;;  %5379 = vmatprep.subr.bf16.mxu0 %v2238_v9  ;;  %v2319_v8 = vunpack.c.l.s8.bf16 %v1135_v7  ;;  %v2334_v9 = vunpack.c.h.s8.bf16 %v1134_v59  ;;  %v1182_v59 = vld [vmem:[#allocation8 + $0x6c8] sm:$0xff] }
 0x57d   :  { %5707 = vmatprep.subr.bf16.mxu1 %v2240_v0  ;;  %v2336_v0 = vunpack.c.h.s8.bf16 %v1136_v13  ;;  %v1184_v13 = vld [vmem:[#allocation8 + $0x6d8] sm:$0xff] }
 0x57f   :  { %5380 = vmatpush1.bf16.msra.mxu0 %v2237_v18  ;;  %v2333_v18 = vunpack.c.h.s8.bf16 %v1133_v17  ;;  %v1181_v17 = vld [vmem:[#allocation8 + $0x6c0] sm:$0xff] }
 0x580   :  { %5708 = vmatpush1.bf16.msra.mxu1 %v2239_v11  ;;  %5390 = vmatprep.subr.bf16.mxu0 %v2254_v15  ;;  %v2335_v11 = vunpack.c.h.s8.bf16 %v1135_v7  ;;  %v2350_v15 = vunpack.c.l.s8.bf16 %v1150_v60  ;;  %v1183_v7 = vld [vmem:[#allocation8 + $0x6d0] sm:$0xff] }
 0x581   :  { %5718 = vmatprep.subr.bf16.mxu1 %v2256_v28  ;;  %v2352_v28 = vunpack.c.l.s8.bf16 %v1152_v16  ;;  %v1200_v16 = vld [vmem:[#allocation8 + $0x758] sm:$0xff] }
 0x582   :  { %5382 = vmatmul.mubr.bf16.vlgmr.msra.gmra.mrb[24].mxu0 %v9463_v5 }
 0x583   :  { %5710 = vmatmul.mubr.bf16.vlgmr.msra.gmra.mrb[24].mxu1 %v9463_v5  ;;  %5391 = vmatpush1.bf16.msra.mxu0 %v2253_v29  ;;  %v2349_v29 = vunpack.c.l.s8.bf16 %v1149_v27 }
 0x584   :  { %5422 = vmatprep.mubr.bf16.mxu0 %v9469_v10  ;;  %5719 = vmatpush1.bf16.msra.mxu1 %v2255_v30  ;;  %v2351_v30 = vunpack.c.l.s8.bf16 %v1151_v2 }
 0x585   :  { %5750 = vmatprep.mubr.bf16.mxu1 %v9469_v10  ;;  %5392 = vmatprep.subr.bf16.mxu0 %v2270_v40  ;;  %v2366_v40 = vunpack.c.h.s8.bf16 %v1150_v60  ;;  %v1198_v60 = vld [vmem:[#allocation8 + $0x748] sm:$0xff] }
 0x586   :  { %5720 = vmatprep.subr.bf16.mxu1 %v2272_v44  ;;  %v1166_v44 = vld [vmem:[#allocation8 + $0x648] sm:$0xff] }
 0x587   :  { %5393 = vmatpush1.bf16.msra.mxu0 %v2269_v37  ;;  %v2365_v37 = vunpack.c.h.s8.bf16 %v1149_v27  ;;  %v1197_v27 = vld [vmem:[#allocation8 + $0x740] sm:$0xff] }
 0x588   :  { %5721 = vmatpush1.bf16.msra.mxu1 %v2271_v38  ;;  %5394 = vmatprep.subr.bf16.mxu0 %v2286_v23  ;;  %v2367_v38 = vunpack.c.h.s8.bf16 %v1151_v2  ;;  %v2382_v23 = vunpack.c.l.s8.bf16 %v1166_v44  ;;  %v1199_v2 = vld [vmem:[#allocation8 + $0x750] sm:$0xff] }
 0x589   :  { %5722 = vmatprep.subr.bf16.mxu1 %v2288_v33  ;;  %v2384_v33 = vunpack.c.l.s8.bf16 %v1168_v34 }
 0x58b   :  { %5395 = vmatpush1.bf16.msra.mxu0 %v2285_v52  ;;  %v2381_v52 = vunpack.c.l.s8.bf16 %v1165_v39 }
 0x58c   :  { %5723 = vmatpush1.bf16.msra.mxu1 %v2287_v63  ;;  %5396 = vmatprep.subr.bf16.mxu0 %v2302_v55  ;;  %v2383_v63 = vunpack.c.l.s8.bf16 %v1167_v49  ;;  %v2398_v55 = vunpack.c.h.s8.bf16 %v1166_v44  ;;  %v1214_v44 = vld [vmem:[#allocation8 + $0x7c8] sm:$0xff] }
 0x58d   :  { %5724 = vmatprep.subr.bf16.mxu1 %v2304_v57  ;;  %v2400_v57 = vunpack.c.h.s8.bf16 %v1168_v34  ;;  %v1216_v34 = vld [vmem:[#allocation8 + $0x7d8] sm:$0xff] }
 0x58f   :  { %5397 = vmatpush1.bf16.msra.mxu0 %v2301_v58  ;;  %v2397_v58 = vunpack.c.h.s8.bf16 %v1165_v39  ;;  %v1213_v39 = vld [vmem:[#allocation8 + $0x7c0] sm:$0xff] }
 0x590   :  { %5725 = vmatpush1.bf16.msra.mxu1 %v2303_v62  ;;  %5398 = vmatprep.subr.bf16.mxu0 %v2318_v42  ;;  %v2399_v62 = vunpack.c.h.s8.bf16 %v1167_v49  ;;  %v2414_v42 = vunpack.c.l.s8.bf16 %v1182_v59  ;;  %v1215_v49 = vld [vmem:[#allocation8 + $0x7d0] sm:$0xff] }
 0x591   :  { %5726 = vmatprep.subr.bf16.mxu1 %v2320_v6  ;;  %v2416_v6 = vunpack.c.l.s8.bf16 %v1184_v13 }
 0x593   :  { %5399 = vmatpush1.bf16.msra.mxu0 %v2317_v24  ;;  %v2413_v24 = vunpack.c.l.s8.bf16 %v1181_v17 }
 0x594   :  { %5727 = vmatpush1.bf16.msra.mxu1 %v2319_v8  ;;  %5400 = vmatprep.subr.bf16.mxu0 %v2334_v9  ;;  %v2415_v8 = vunpack.c.l.s8.bf16 %v1183_v7  ;;  %v2430_v9 = vunpack.c.h.s8.bf16 %v1182_v59  ;;  %v1230_v59 = vld [vmem:[#allocation8 + $0x848] sm:$0xff] }
 0x595   :  { %5728 = vmatprep.subr.bf16.mxu1 %v2336_v0  ;;  %v2432_v0 = vunpack.c.h.s8.bf16 %v1184_v13  ;;  %v1232_v13 = vld [vmem:[#allocation8 + $0x858] sm:$0xff] }
 0x597   :  { %5401 = vmatpush1.bf16.msra.mxu0 %v2333_v18  ;;  %v2429_v18 = vunpack.c.h.s8.bf16 %v1181_v17  ;;  %v1229_v17 = vld [vmem:[#allocation8 + $0x840] sm:$0xff] }
 0x598   :  { %5729 = vmatpush1.bf16.msra.mxu1 %v2335_v11  ;;  %5402 = vmatprep.subr.bf16.mxu0 %v2350_v15  ;;  %v2431_v11 = vunpack.c.h.s8.bf16 %v1183_v7  ;;  %v2446_v15 = vunpack.c.l.s8.bf16 %v1198_v60  ;;  %v1231_v7 = vld [vmem:[#allocation8 + $0x850] sm:$0xff] }
 0x599   :  { %5730 = vmatprep.subr.bf16.mxu1 %v2352_v28  ;;  %v2448_v28 = vunpack.c.l.s8.bf16 %v1200_v16 }
 0x59b   :  { %5403 = vmatpush1.bf16.msra.mxu0 %v2349_v29  ;;  %v2445_v29 = vunpack.c.l.s8.bf16 %v1197_v27 }
 0x59c   :  { %5731 = vmatpush1.bf16.msra.mxu1 %v2351_v30  ;;  %5404 = vmatprep.subr.bf16.mxu0 %v2366_v40  ;;  %v2447_v30 = vunpack.c.l.s8.bf16 %v1199_v2  ;;  %v2462_v40 = vunpack.c.h.s8.bf16 %v1198_v60  ;;  %v2528_v60 = vunpack.c.h.s8.bf16 %v1232_v13 }
 0x59d   :  { %5732 = vmatprep.subr.bf16.mxu1 %v2368_v32  ;;  %v2464_v32 = vunpack.c.h.s8.bf16 %v1200_v16  ;;  %v1248_v16 = vld [vmem:[#allocation8 + $0x8d8] sm:$0xff] }
 0x59f   :  { %5405 = vmatpush1.bf16.msra.mxu0 %v2365_v37  ;;  %v2461_v37 = vunpack.c.h.s8.bf16 %v1197_v27  ;;  %v1245_v27 = vld [vmem:[#allocation8 + $0x8c0] sm:$0xff] }
 0x5a0   :  { %5733 = vmatpush1.bf16.msra.mxu1 %v2367_v38  ;;  %5406 = vmatprep.subr.bf16.mxu0 %v2382_v23  ;;  %v2463_v38 = vunpack.c.h.s8.bf16 %v1199_v2  ;;  %v2478_v23 = vunpack.c.l.s8.bf16 %v1214_v44  ;;  %v1247_v2 = vld [vmem:[#allocation8 + $0x8d0] sm:$0xff] }
 0x5a1   :  { %5734 = vmatprep.subr.bf16.mxu1 %v2384_v33  ;;  %v2480_v33 = vunpack.c.l.s8.bf16 %v1216_v34 }
 0x5a3   :  { %5407 = vmatpush1.bf16.msra.mxu0 %v2381_v52  ;;  %v2477_v52 = vunpack.c.l.s8.bf16 %v1213_v39 }
 0x5a4   :  { %5735 = vmatpush1.bf16.msra.mxu1 %v2383_v63  ;;  %5408 = vmatprep.subr.bf16.mxu0 %v2398_v55  ;;  %v2479_v63 = vunpack.c.l.s8.bf16 %v1215_v49  ;;  %v2494_v55 = vunpack.c.h.s8.bf16 %v1214_v44  ;;  %v1262_v44 = vld [vmem:[#allocation8 + $0x948] sm:$0xff] }
 0x5a5   :  { %5736 = vmatprep.subr.bf16.mxu1 %v2400_v57  ;;  %v2496_v57 = vunpack.c.h.s8.bf16 %v1216_v34  ;;  %v1264_v34 = vld [vmem:[#allocation8 + $0x958] sm:$0xff] }
 0x5a7   :  { %5409 = vmatpush1.bf16.msra.mxu0 %v2397_v58  ;;  %v2493_v58 = vunpack.c.h.s8.bf16 %v1213_v39  ;;  %v1261_v39 = vld [vmem:[#allocation8 + $0x940] sm:$0xff] }
 0x5a8   :  { %5737 = vmatpush1.bf16.msra.mxu1 %v2399_v62  ;;  %5410 = vmatprep.subr.bf16.mxu0 %v2414_v42  ;;  %v2495_v62 = vunpack.c.h.s8.bf16 %v1215_v49  ;;  %v2510_v42 = vunpack.c.l.s8.bf16 %v1230_v59  ;;  %v1263_v49 = vld [vmem:[#allocation8 + $0x950] sm:$0xff] }
 0x5a9   :  { %5738 = vmatprep.subr.bf16.mxu1 %v2416_v6  ;;  %v2512_v6 = vunpack.c.l.s8.bf16 %v1232_v13  ;;  %v1280_v13 = vld [vmem:[#allocation8 + $0x9d8] sm:$0xff] }
 0x5ab   :  { %5411 = vmatpush1.bf16.msra.mxu0 %v2413_v24  ;;  %v2509_v24 = vunpack.c.l.s8.bf16 %v1229_v17 }
 0x5ac   :  { %5739 = vmatpush1.bf16.msra.mxu1 %v2415_v8  ;;  %5412 = vmatprep.subr.bf16.mxu0 %v2430_v9  ;;  %v2511_v8 = vunpack.c.l.s8.bf16 %v1231_v7  ;;  %v2526_v9 = vunpack.c.h.s8.bf16 %v1230_v59  ;;  %v1278_v59 = vld [vmem:[#allocation8 + $0x9c8] sm:$0xff] }
 0x5ad   :  { %5740 = vmatprep.subr.bf16.mxu1 %v2432_v0  ;;  %v1246_v0 = vld [vmem:[#allocation8 + $0x8c8] sm:$0xff] }
 0x5af   :  { %5413 = vmatpush1.bf16.msra.mxu0 %v2429_v18  ;;  %v2525_v18 = vunpack.c.h.s8.bf16 %v1229_v17  ;;  %v1277_v17 = vld [vmem:[#allocation8 + $0x9c0] sm:$0xff] }
 0x5b0   :  { %5741 = vmatpush1.bf16.msra.mxu1 %v2431_v11  ;;  %5414 = vmatprep.subr.bf16.mxu0 %v2446_v15  ;;  %v2527_v11 = vunpack.c.h.s8.bf16 %v1231_v7  ;;  %v2542_v15 = vunpack.c.l.s8.bf16 %v1246_v0  ;;  %v1279_v7 = vld [vmem:[#allocation8 + $0x9d0] sm:$0xff] }
 0x5b1   :  { %5742 = vmatprep.subr.bf16.mxu1 %v2448_v28  ;;  %v2544_v28 = vunpack.c.l.s8.bf16 %v1248_v16 }
 0x5b3   :  { %5415 = vmatpush1.bf16.msra.mxu0 %v2445_v29  ;;  %v2541_v29 = vunpack.c.l.s8.bf16 %v1245_v27 }
 0x5b4   :  { %5743 = vmatpush1.bf16.msra.mxu1 %v2447_v30  ;;  %5416 = vmatprep.subr.bf16.mxu0 %v2462_v40  ;;  %v2543_v30 = vunpack.c.l.s8.bf16 %v1247_v2  ;;  %v2558_v40 = vunpack.c.h.s8.bf16 %v1246_v0  ;;  %v2624_v0 = vunpack.c.h.s8.bf16 %v1280_v13 }
 0x5b5   :  { %5744 = vmatprep.subr.bf16.mxu1 %v2464_v32  ;;  %v2560_v32 = vunpack.c.h.s8.bf16 %v1248_v16  ;;  %v1296_v16 = vld [vmem:[#allocation8 + $0xa58] sm:$0xff] }
 0x5b7   :  { %5417 = vmatpush1.bf16.msra.mxu0 %v2461_v37  ;;  %v2557_v37 = vunpack.c.h.s8.bf16 %v1245_v27  ;;  %v1293_v27 = vld [vmem:[#allocation8 + $0xa40] sm:$0xff] }
 0x5b8   :  { %5745 = vmatpush1.bf16.msra.mxu1 %v2463_v38  ;;  %5418 = vmatprep.subr.bf16.mxu0 %v2478_v23  ;;  %v2559_v38 = vunpack.c.h.s8.bf16 %v1247_v2  ;;  %v2574_v23 = vunpack.c.l.s8.bf16 %v1262_v44  ;;  %v1295_v2 = vld [vmem:[#allocation8 + $0xa50] sm:$0xff] }
 0x5b9   :  { %5746 = vmatprep.subr.bf16.mxu1 %v2480_v33  ;;  %v2576_v33 = vunpack.c.l.s8.bf16 %v1264_v34 }
 0x5bb   :  { %5419 = vmatpush1.bf16.msra.mxu0 %v2477_v52  ;;  %v2573_v52 = vunpack.c.l.s8.bf16 %v1261_v39 }
 0x5bc   :  { %5747 = vmatpush1.bf16.msra.mxu1 %v2479_v63  ;;  %5420 = vmatprep.subr.bf16.mxu0 %v2494_v55  ;;  %v2575_v63 = vunpack.c.l.s8.bf16 %v1263_v49  ;;  %v2590_v55 = vunpack.c.h.s8.bf16 %v1262_v44  ;;  %v1310_v44 = vld [vmem:[#allocation8 + $0xac8] sm:$0xff] }
 0x5bd   :  { %5748 = vmatprep.subr.bf16.mxu1 %v2496_v57  ;;  %v2592_v57 = vunpack.c.h.s8.bf16 %v1264_v34  ;;  %v1312_v34 = vld [vmem:[#allocation8 + $0xad8] sm:$0xff] }
 0x5bf   :  { %5421 = vmatpush1.bf16.msra.mxu0 %v2493_v58  ;;  %v2589_v58 = vunpack.c.h.s8.bf16 %v1261_v39  ;;  %v1309_v39 = vld [vmem:[#allocation8 + $0xac0] sm:$0xff] }
 0x5c0   :  { %5749 = vmatpush1.bf16.msra.mxu1 %v2495_v62  ;;  %5431 = vmatprep.subr.bf16.mxu0 %v2510_v42  ;;  %v2591_v62 = vunpack.c.h.s8.bf16 %v1263_v49  ;;  %v2606_v42 = vunpack.c.l.s8.bf16 %v1278_v59  ;;  %v1311_v49 = vld [vmem:[#allocation8 + $0xad0] sm:$0xff] }
 0x5c1   :  { %5759 = vmatprep.subr.bf16.mxu1 %v2512_v6  ;;  %v2608_v6 = vunpack.c.l.s8.bf16 %v1280_v13  ;;  %v1328_v13 = vld [vmem:[#allocation8 + $0xb58] sm:$0xff] }
 0x5c2   :  { %5423 = vmatmul.mubr.bf16.vlgmr.msra.gmra.mrb[24].mxu0 %v9532_v4 }
 0x5c3   :  { %5751 = vmatmul.mubr.bf16.vlgmr.msra.gmra.mrb[24].mxu1 %v9532_v4  ;;  %5432 = vmatpush1.bf16.msra.mxu0 %v2509_v24  ;;  %v2605_v24 = vunpack.c.l.s8.bf16 %v1277_v17 }
 0x5c4   :  { %5463 = vmatprep.mubr.bf16.mxu0 %v9534_v12  ;;  %5760 = vmatpush1.bf16.msra.mxu1 %v2511_v8  ;;  %v2607_v8 = vunpack.c.l.s8.bf16 %v1279_v7 }
 0x5c5   :  { %5791 = vmatprep.mubr.bf16.mxu1 %v9534_v12  ;;  %5433 = vmatprep.subr.bf16.mxu0 %v2526_v9  ;;  %v2622_v9 = vunpack.c.h.s8.bf16 %v1278_v59  ;;  %v1326_v59 = vld [vmem:[#allocation8 + $0xb48] sm:$0xff] }
 0x5c6   :  { %5761 = vmatprep.subr.bf16.mxu1 %v2528_v60  ;;  %v1294_v60 = vld [vmem:[#allocation8 + $0xa48] sm:$0xff] }
 0x5c7   :  { %5434 = vmatpush1.bf16.msra.mxu0 %v2525_v18  ;;  %v2621_v18 = vunpack.c.h.s8.bf16 %v1277_v17  ;;  %v1325_v17 = vld [vmem:[#allocation8 + $0xb40] sm:$0xff] }
 0x5c8   :  { %5762 = vmatpush1.bf16.msra.mxu1 %v2527_v11  ;;  %5435 = vmatprep.subr.bf16.mxu0 %v2542_v15  ;;  %v2623_v11 = vunpack.c.h.s8.bf16 %v1279_v7  ;;  %v2638_v15 = vunpack.c.l.s8.bf16 %v1294_v60  ;;  %v1327_v7 = vld [vmem:[#allocation8 + $0xb50] sm:$0xff] }
 0x5c9   :  { %5763 = vmatprep.subr.bf16.mxu1 %v2544_v28  ;;  %v2640_v28 = vunpack.c.l.s8.bf16 %v1296_v16 }
 0x5cb   :  { %5436 = vmatpush1.bf16.msra.mxu0 %v2541_v29  ;;  %v2637_v29 = vunpack.c.l.s8.bf16 %v1293_v27 }
 0x5cc   :  { %5764 = vmatpush1.bf16.msra.mxu1 %v2543_v30  ;;  %5437 = vmatprep.subr.bf16.mxu0 %v2558_v40  ;;  %v2639_v30 = vunpack.c.l.s8.bf16 %v1295_v2  ;;  %v2654_v40 = vunpack.c.h.s8.bf16 %v1294_v60  ;;  %v1342_v60 = vld [vmem:[#allocation8 + $0xbc8] sm:$0xff] }
 0x5cd   :  { %5765 = vmatprep.subr.bf16.mxu1 %v2560_v32  ;;  %v2656_v32 = vunpack.c.h.s8.bf16 %v1296_v16  ;;  %v1344_v16 = vld [vmem:[#allocation8 + $0xbd8] sm:$0xff] }
 0x5cf   :  { %5438 = vmatpush1.bf16.msra.mxu0 %v2557_v37  ;;  %v2653_v37 = vunpack.c.h.s8.bf16 %v1293_v27  ;;  %v1341_v27 = vld [vmem:[#allocation8 + $0xbc0] sm:$0xff] }
 0x5d0   :  { %5766 = vmatpush1.bf16.msra.mxu1 %v2559_v38  ;;  %5439 = vmatprep.subr.bf16.mxu0 %v2574_v23  ;;  %v2655_v38 = vunpack.c.h.s8.bf16 %v1295_v2  ;;  %v2670_v23 = vunpack.c.l.s8.bf16 %v1310_v44  ;;  %v1343_v2 = vld [vmem:[#allocation8 + $0xbd0] sm:$0xff] }
 0x5d1   :  { %5767 = vmatprep.subr.bf16.mxu1 %v2576_v33  ;;  %v2672_v33 = vunpack.c.l.s8.bf16 %v1312_v34 }
 0x5d3   :  { %5440 = vmatpush1.bf16.msra.mxu0 %v2573_v52  ;;  %v2669_v52 = vunpack.c.l.s8.bf16 %v1309_v39 }
 0x5d4   :  { %5768 = vmatpush1.bf16.msra.mxu1 %v2575_v63  ;;  %5441 = vmatprep.subr.bf16.mxu0 %v2590_v55  ;;  %v2671_v63 = vunpack.c.l.s8.bf16 %v1311_v49  ;;  %v2686_v55 = vunpack.c.h.s8.bf16 %v1310_v44  ;;  %v1358_v44 = vld [vmem:[#allocation8 + $0xc48] sm:$0xff] }
 0x5d5   :  { %5769 = vmatprep.subr.bf16.mxu1 %v2592_v57  ;;  %v2688_v57 = vunpack.c.h.s8.bf16 %v1312_v34  ;;  %v1360_v34 = vld [vmem:[#allocation8 + $0xc58] sm:$0xff] }
 0x5d7   :  { %5442 = vmatpush1.bf16.msra.mxu0 %v2589_v58  ;;  %v2685_v58 = vunpack.c.h.s8.bf16 %v1309_v39  ;;  %v1357_v39 = vld [vmem:[#allocation8 + $0xc40] sm:$0xff] }
 0x5d8   :  { %5770 = vmatpush1.bf16.msra.mxu1 %v2591_v62  ;;  %5443 = vmatprep.subr.bf16.mxu0 %v2606_v42  ;;  %v2687_v62 = vunpack.c.h.s8.bf16 %v1311_v49  ;;  %v2702_v42 = vunpack.c.l.s8.bf16 %v1326_v59  ;;  %v1359_v49 = vld [vmem:[#allocation8 + $0xc50] sm:$0xff] }
 0x5d9   :  { %5771 = vmatprep.subr.bf16.mxu1 %v2608_v6  ;;  %v2704_v6 = vunpack.c.l.s8.bf16 %v1328_v13 }
 0x5db   :  { %5444 = vmatpush1.bf16.msra.mxu0 %v2605_v24  ;;  %v2701_v24 = vunpack.c.l.s8.bf16 %v1325_v17 }
 0x5dc   :  { %5772 = vmatpush1.bf16.msra.mxu1 %v2607_v8  ;;  %5445 = vmatprep.subr.bf16.mxu0 %v2622_v9  ;;  %v2703_v8 = vunpack.c.l.s8.bf16 %v1327_v7  ;;  %v2718_v9 = vunpack.c.h.s8.bf16 %v1326_v59  ;;  %v2784_v59 = vunpack.c.h.s8.bf16 %v1360_v34 }
 0x5dd   :  { %5773 = vmatprep.subr.bf16.mxu1 %v2624_v0  ;;  %v2720_v0 = vunpack.c.h.s8.bf16 %v1328_v13  ;;  %v1376_v13 = vld [vmem:[#allocation8 + $0xcd8] sm:$0xff] }
 0x5df   :  { %5446 = vmatpush1.bf16.msra.mxu0 %v2621_v18  ;;  %v2717_v18 = vunpack.c.h.s8.bf16 %v1325_v17  ;;  %v1373_v17 = vld [vmem:[#allocation8 + $0xcc0] sm:$0xff] }
 0x5e0   :  { %5774 = vmatpush1.bf16.msra.mxu1 %v2623_v11  ;;  %5447 = vmatprep.subr.bf16.mxu0 %v2638_v15  ;;  %v2719_v11 = vunpack.c.h.s8.bf16 %v1327_v7  ;;  %v2734_v15 = vunpack.c.l.s8.bf16 %v1342_v60  ;;  %v1375_v7 = vld [vmem:[#allocation8 + $0xcd0] sm:$0xff] }
 0x5e1   :  { %5775 = vmatprep.subr.bf16.mxu1 %v2640_v28  ;;  %v2736_v28 = vunpack.c.l.s8.bf16 %v1344_v16 }
 0x5e3   :  { %5448 = vmatpush1.bf16.msra.mxu0 %v2637_v29  ;;  %v2733_v29 = vunpack.c.l.s8.bf16 %v1341_v27 }
 0x5e4   :  { %5776 = vmatpush1.bf16.msra.mxu1 %v2639_v30  ;;  %5449 = vmatprep.subr.bf16.mxu0 %v2654_v40  ;;  %v2735_v30 = vunpack.c.l.s8.bf16 %v1343_v2  ;;  %v2750_v40 = vunpack.c.h.s8.bf16 %v1342_v60  ;;  %v1390_v60 = vld [vmem:[#allocation8 + $0xd48] sm:$0xff] }
 0x5e5   :  { %5777 = vmatprep.subr.bf16.mxu1 %v2656_v32  ;;  %v2752_v32 = vunpack.c.h.s8.bf16 %v1344_v16  ;;  %v1392_v16 = vld [vmem:[#allocation8 + $0xd58] sm:$0xff] }
 0x5e7   :  { %5450 = vmatpush1.bf16.msra.mxu0 %v2653_v37  ;;  %v2749_v37 = vunpack.c.h.s8.bf16 %v1341_v27  ;;  %v1389_v27 = vld [vmem:[#allocation8 + $0xd40] sm:$0xff] }
 0x5e8   :  { %5778 = vmatpush1.bf16.msra.mxu1 %v2655_v38  ;;  %5451 = vmatprep.subr.bf16.mxu0 %v2670_v23  ;;  %v2751_v38 = vunpack.c.h.s8.bf16 %v1343_v2  ;;  %v2766_v23 = vunpack.c.l.s8.bf16 %v1358_v44  ;;  %v1391_v2 = vld [vmem:[#allocation8 + $0xd50] sm:$0xff] }
 0x5e9   :  { %5779 = vmatprep.subr.bf16.mxu1 %v2672_v33  ;;  %v2768_v33 = vunpack.c.l.s8.bf16 %v1360_v34  ;;  %v1408_v34 = vld [vmem:[#allocation8 + $0xdd8] sm:$0xff] }
 0x5eb   :  { %5452 = vmatpush1.bf16.msra.mxu0 %v2669_v52  ;;  %v2765_v52 = vunpack.c.l.s8.bf16 %v1357_v39 }
 0x5ec   :  { %5780 = vmatpush1.bf16.msra.mxu1 %v2671_v63  ;;  %5453 = vmatprep.subr.bf16.mxu0 %v2686_v55  ;;  %v2767_v63 = vunpack.c.l.s8.bf16 %v1359_v49  ;;  %v2782_v55 = vunpack.c.h.s8.bf16 %v1358_v44  ;;  %v1406_v44 = vld [vmem:[#allocation8 + $0xdc8] sm:$0xff] }
 0x5ed   :  { %5781 = vmatprep.subr.bf16.mxu1 %v2688_v57  ;;  %v1374_v57 = vld [vmem:[#allocation8 + $0xcc8] sm:$0xff] }
 0x5ef   :  { %5454 = vmatpush1.bf16.msra.mxu0 %v2685_v58  ;;  %v2781_v58 = vunpack.c.h.s8.bf16 %v1357_v39  ;;  %v1405_v39 = vld [vmem:[#allocation8 + $0xdc0] sm:$0xff] }
 0x5f0   :  { %5782 = vmatpush1.bf16.msra.mxu1 %v2687_v62  ;;  %5455 = vmatprep.subr.bf16.mxu0 %v2702_v42  ;;  %v2783_v62 = vunpack.c.h.s8.bf16 %v1359_v49  ;;  %v2798_v42 = vunpack.c.l.s8.bf16 %v1374_v57  ;;  %v2864_v49 = vunpack.c.l.s8.bf16 %v1408_v34 }
 0x5f1   :  { %5783 = vmatprep.subr.bf16.mxu1 %v2704_v6  ;;  %v2800_v6 = vunpack.c.l.s8.bf16 %v1376_v13 }
 0x5f3   :  { %5456 = vmatpush1.bf16.msra.mxu0 %v2701_v24  ;;  %v2797_v24 = vunpack.c.l.s8.bf16 %v1373_v17 }
 0x5f4   :  { %5784 = vmatpush1.bf16.msra.mxu1 %v2703_v8  ;;  %5457 = vmatprep.subr.bf16.mxu0 %v2718_v9  ;;  %v2799_v8 = vunpack.c.l.s8.bf16 %v1375_v7  ;;  %v2814_v9 = vunpack.c.h.s8.bf16 %v1374_v57 }
 0x5f5   :  { %5785 = vmatprep.subr.bf16.mxu1 %v2720_v0  ;;  %v2816_v0 = vunpack.c.h.s8.bf16 %v1376_v13  ;;  %v2861_v13 = vunpack.c.l.s8.bf16 %v1405_v39 }
 0x5f7   :  { %5458 = vmatpush1.bf16.msra.mxu0 %v2717_v18  ;;  %v2813_v18 = vunpack.c.h.s8.bf16 %v1373_v17  ;;  %v2878_v17 = vunpack.c.h.s8.bf16 %v1406_v44 }
 0x5f8   :  { %5786 = vmatpush1.bf16.msra.mxu1 %v2719_v11  ;;  %5459 = vmatprep.subr.bf16.mxu0 %v2734_v15  ;;  %v2815_v11 = vunpack.c.h.s8.bf16 %v1375_v7  ;;  %v2830_v15 = vunpack.c.l.s8.bf16 %v1390_v60  ;;  %v2880_v7 = vunpack.c.h.s8.bf16 %v1408_v34  ;;  %v1437_v34 = vld [vmem:[#allocation8 + $0xec0] sm:$0xff] }
 0x5f9   :  { %5787 = vmatprep.subr.bf16.mxu1 %v2736_v28  ;;  %v2832_v28 = vunpack.c.l.s8.bf16 %v1392_v16 }
 0x5fb   :  { %5460 = vmatpush1.bf16.msra.mxu0 %v2733_v29  ;;  %v2829_v29 = vunpack.c.l.s8.bf16 %v1389_v27 }
 0x5fc   :  { %5788 = vmatpush1.bf16.msra.mxu1 %v2735_v30  ;;  %5461 = vmatprep.subr.bf16.mxu0 %v2750_v40  ;;  %v2831_v30 = vunpack.c.l.s8.bf16 %v1391_v2  ;;  %v2846_v40 = vunpack.c.h.s8.bf16 %v1390_v60 }
 0x5fd   :  { %5789 = vmatprep.subr.bf16.mxu1 %v2752_v32  ;;  %v2848_v32 = vunpack.c.h.s8.bf16 %v1392_v16  ;;  %v1421_v16 = vld [vmem:[#allocation8 + $0xe40] sm:$0xff] }
 0x5ff   :  { %5462 = vmatpush1.bf16.msra.mxu0 %v2749_v37  ;;  %v2845_v37 = vunpack.c.h.s8.bf16 %v1389_v27 }
 0x600   :  { %5790 = vmatpush1.bf16.msra.mxu1 %v2751_v38  ;;  %5472 = vmatprep.subr.bf16.mxu0 %v2766_v23  ;;  %v2847_v38 = vunpack.c.h.s8.bf16 %v1391_v2  ;;  %v2862_v23 = vunpack.c.l.s8.bf16 %v1406_v44 }
 0x601   :  { %5800 = vmatprep.subr.bf16.mxu1 %v2768_v33 }
 0x602   :  { %5464 = vmatmul.mubr.bf16.vlgmr.msra.gmra.mrb[24].mxu0 %v9546_v46 }
 0x603   :  { %5792 = vmatmul.mubr.bf16.vlgmr.msra.gmra.mrb[24].mxu1 %v9546_v46  ;;  %5473 = vmatpush1.bf16.msra.mxu0 %v2765_v52  ;;  %v1407_v52 = vld [vmem:[#allocation8 + $0xdd0] sm:$0xff] }
 0x604   :  { %5504 = vmatprep.mubr.bf16.mxu0 %v9548_v48  ;;  %5801 = vmatpush1.bf16.msra.mxu1 %v2767_v63 }
 0x605   :  { %5832 = vmatprep.mubr.bf16.mxu1 %v9548_v48  ;;  %5474 = vmatprep.subr.bf16.mxu0 %v2782_v55 }
 0x606   :  { %5802 = vmatprep.subr.bf16.mxu1 %v2784_v59 }
 0x607   :  { %5475 = vmatpush1.bf16.msra.mxu0 %v2781_v58 }
 0x608   :  { %5803 = vmatpush1.bf16.msra.mxu1 %v2783_v62  ;;  %5476 = vmatprep.subr.bf16.mxu0 %v2798_v42  ;;  %v2863_v42 = vunpack.c.l.s8.bf16 %v1407_v52 }
 0x609   :  { %5804 = vmatprep.subr.bf16.mxu1 %v2800_v6 }
 0x60b   :  { %5477 = vmatpush1.bf16.msra.mxu0 %v2797_v24  ;;  %v1422_v24 = vld [vmem:[#allocation8 + $0xe48] sm:$0xff] }
 0x60c   :  { %5805 = vmatpush1.bf16.msra.mxu1 %v2799_v8  ;;  %5478 = vmatprep.subr.bf16.mxu0 %v2814_v9  ;;  %v1424_v8 = vld [vmem:[#allocation8 + $0xe58] sm:$0xff]  ;;  %v2877_v9 = vunpack.c.h.s8.bf16 %v1405_v39  ;;  %v2894_v60 = vunpack.c.l.s8.bf16 %v1422_v24 }
 0x60d   :  { %5806 = vmatprep.subr.bf16.mxu1 %v2816_v0  ;;  %v2879_v0 = vunpack.c.h.s8.bf16 %v1407_v52  ;;  %v2912_v2 = vunpack.c.h.s8.bf16 %v1424_v8 }
 0x60f   :  { %5479 = vmatpush1.bf16.msra.mxu0 %v2813_v18  ;;  %v2896_v18 = vunpack.c.l.s8.bf16 %v1424_v8 }
 0x610   :  { %5807 = vmatpush1.bf16.msra.mxu1 %v2815_v11  ;;  %5480 = vmatprep.subr.bf16.mxu0 %v2830_v15  ;;  %v1423_v11 = vld [vmem:[#allocation8 + $0xe50] sm:$0xff]  ;;  %v2893_v15 = vunpack.c.l.s8.bf16 %v1421_v16 }
 0x611   :  { %5808 = vmatprep.subr.bf16.mxu1 %v2832_v28  ;;  %v2895_v27 = vunpack.c.l.s8.bf16 %v1423_v11  ;;  %v2910_v28 = vunpack.c.h.s8.bf16 %v1422_v24 }
 0x613   :  { %5481 = vmatpush1.bf16.msra.mxu0 %v2829_v29  ;;  %v1438_v29 = vld [vmem:[#allocation8 + $0xec8] sm:$0xff] }
 0x614   :  { %5809 = vmatpush1.bf16.msra.mxu1 %v2831_v30  ;;  %5482 = vmatprep.subr.bf16.mxu0 %v2846_v40  ;;  %v1440_v30 = vld [vmem:[#allocation8 + $0xed8] sm:$0xff]  ;;  %v2909_v40 = vunpack.c.h.s8.bf16 %v1421_v16  ;;  %v2926_v44 = vunpack.c.l.s8.bf16 %v1438_v29 }
 0x615   :  { %v9657_v33 = vpop.f32.mrb[20].mxu0  ;;  %5810 = vmatprep.subr.bf16.mxu1 %v2848_v32  ;;  %v2911_v32 = vunpack.c.h.s8.bf16 %v1423_v11  ;;  %v2944_v52 = vunpack.c.h.s8.bf16 %v1440_v30  ;;  %v1472_v16 = vld [vmem:[#allocation8 + $0xfd8] sm:$0xff] }
 0x616   :  { %v9659_v63 = vpop.f32.mrb[20].mxu1  ;;  %v9661_v55 = vpop.f32.mrb[21].mxu0 }
 0x617   :  { %v9663_v57 = vpop.f32.mrb[21].mxu1  ;;  %v5018_v59 = vpop.f32.mrb[22].mxu0  ;;  %5483 = vmatpush1.bf16.msra.mxu0 %v2845_v37  ;;  %v2928_v37 = vunpack.c.l.s8.bf16 %v1440_v30 }
 0x618   :  { %v5346_v58 = vpop.f32.mrb[22].mxu1  ;;  %5811 = vmatpush1.bf16.msra.mxu1 %v2847_v38  ;;  %v5019_v62 = vpop.f32.mrb[23].mxu0  ;;  %5484 = vmatprep.subr.bf16.mxu0 %v2862_v23  ;;  %v1439_v38 = vld [vmem:[#allocation8 + $0xed0] sm:$0xff]  ;;  %v2925_v23 = vunpack.c.l.s8.bf16 %v1437_v34  ;;  %v1454_v59 = vld [vmem:[#allocation8 + $0xf48] sm:$0xff] }
 0x619   :  { %v5347_v6 = vpop.f32.mrb[23].mxu1  ;;  %5812 = vmatprep.subr.bf16.mxu1 %v2864_v49  ;;  %v2927_v39 = vunpack.c.l.s8.bf16 %v1439_v38  ;;  %v2942_v49 = vunpack.c.h.s8.bf16 %v1438_v29  ;;  %v2941_v58 = vunpack.c.h.s8.bf16 %v1437_v34  ;;  %v2943_v62 = vunpack.c.h.s8.bf16 %v1439_v38  ;;  %v1488_v34 = vld [vmem:[#allocation8 + $0x1058] sm:$0xff] }
 0x61b   :  { %5485 = vmatpush1.bf16.msra.mxu0 %v2861_v13  ;;  %v1456_v13 = vld [vmem:[#allocation8 + $0xf58] sm:$0xff] }
 0x61c   :  { %5813 = vmatpush1.bf16.msra.mxu1 %v2863_v42  ;;  %5486 = vmatprep.subr.bf16.mxu0 %v2878_v17  ;;  %v2958_v42 = vunpack.c.l.s8.bf16 %v1454_v59  ;;  %v1453_v17 = vld [vmem:[#allocation8 + $0xf40] sm:$0xff]  ;;  %v2960_v6 = vunpack.c.l.s8.bf16 %v1456_v13 }
 0x61d   :  { %5814 = vmatprep.subr.bf16.mxu1 %v2880_v7  ;;  %v1455_v7 = vld [vmem:[#allocation8 + $0xf50] sm:$0xff]  ;;  %v2957_v24 = vunpack.c.l.s8.bf16 %v1453_v17 }
 0x61e   :  { %v2959_v8 = vunpack.c.l.s8.bf16 %v1455_v7  ;;  %v2975_v11 = vunpack.c.h.s8.bf16 %v1455_v7 }
 0x61f   :  { %5487 = vmatpush1.bf16.msra.mxu0 %v2877_v9  ;;  %v2974_v9 = vunpack.c.h.s8.bf16 %v1454_v59 }
 0x620   :  { %5815 = vmatpush1.bf16.msra.mxu1 %v2879_v0  ;;  %5488 = vmatprep.subr.bf16.mxu0 %v2894_v60  ;;  %v2976_v0 = vunpack.c.h.s8.bf16 %v1456_v13  ;;  %v1470_v60 = vld [vmem:[#allocation8 + $0xfc8] sm:$0xff] }
 0x621   :  { %5816 = vmatprep.subr.bf16.mxu1 %v2896_v18  ;;  %v2973_v18 = vunpack.c.h.s8.bf16 %v1453_v17  ;;  %v1504_v17 = vld [vmem:[#allocation8 + $0x10d8] sm:$0xff] }
 0x623   :  { %5489 = vmatpush1.bf16.msra.mxu0 %v2893_v15  ;;  %v2990_v15 = vunpack.c.l.s8.bf16 %v1470_v60 }
 0x624   :  { %5817 = vmatpush1.bf16.msra.mxu1 %v2895_v27  ;;  %5490 = vmatprep.subr.bf16.mxu0 %v2910_v28  ;;  %v1469_v27 = vld [vmem:[#allocation8 + $0xfc0] sm:$0xff]  ;;  %v2992_v28 = vunpack.c.l.s8.bf16 %v1472_v16 }
 0x625   :  { %5818 = vmatprep.subr.bf16.mxu1 %v2912_v2  ;;  %v1471_v2 = vld [vmem:[#allocation8 + $0xfd0] sm:$0xff]  ;;  %v2989_v29 = vunpack.c.l.s8.bf16 %v1469_v27 }
 0x626   :  { %v2991_v30 = vunpack.c.l.s8.bf16 %v1471_v2  ;;  %v3007_v38 = vunpack.c.h.s8.bf16 %v1471_v2 }
 0x627   :  { %5491 = vmatpush1.bf16.msra.mxu0 %v2909_v40  ;;  %v3006_v40 = vunpack.c.h.s8.bf16 %v1470_v60 }
 0x628   :  { %5819 = vmatpush1.bf16.msra.mxu1 %v2911_v32  ;;  %5492 = vmatprep.subr.bf16.mxu0 %v2926_v44  ;;  %v3008_v32 = vunpack.c.h.s8.bf16 %v1472_v16  ;;  %v1486_v44 = vld [vmem:[#allocation8 + $0x1048] sm:$0xff] }
 0x629   :  { %5820 = vmatprep.subr.bf16.mxu1 %v2928_v37  ;;  %v3005_v37 = vunpack.c.h.s8.bf16 %v1469_v27  ;;  %v1520_v27 = vld [vmem:[#allocation8 + $0x1158] sm:$0xff] }
 0x62b   :  { %5493 = vmatpush1.bf16.msra.mxu0 %v2925_v23  ;;  %v3022_v23 = vunpack.c.l.s8.bf16 %v1486_v44 }
 0x62c   :  { %5821 = vmatpush1.bf16.msra.mxu1 %v2927_v39  ;;  %5494 = vmatprep.subr.bf16.mxu0 %v2942_v49  ;;  %v1485_v39 = vld [vmem:[#allocation8 + $0x1040] sm:$0xff]  ;;  %v3024_v49 = vunpack.c.l.s8.bf16 %v1488_v34 }
 0x62d   :  { %5822 = vmatprep.subr.bf16.mxu1 %v2944_v52  ;;  %v1487_v52 = vld [vmem:[#allocation8 + $0x1050] sm:$0xff]  ;;  %v3021_v59 = vunpack.c.l.s8.bf16 %v1485_v39 }
 0x62e   :  { %v3023_v13 = vunpack.c.l.s8.bf16 %v1487_v52  ;;  %v3039_v7 = vunpack.c.h.s8.bf16 %v1487_v52 }
 0x62f   :  { %5495 = vmatpush1.bf16.msra.mxu0 %v2941_v58  ;;  %v3038_v58 = vunpack.c.h.s8.bf16 %v1486_v44 }
 0x630   :  { %5823 = vmatpush1.bf16.msra.mxu1 %v2943_v62  ;;  %5496 = vmatprep.subr.bf16.mxu0 %v2958_v42  ;;  %v1502_v62 = vld [vmem:[#allocation8 + $0x10c8] sm:$0xff]  ;;  %v3040_v42 = vunpack.c.h.s8.bf16 %v1488_v34 }
 0x631   :  { %5824 = vmatprep.subr.bf16.mxu1 %v2960_v6  ;;  %v3037_v6 = vunpack.c.h.s8.bf16 %v1485_v39  ;;  %v1536_v39 = vld [vmem:[#allocation8 + $0x11d8] sm:$0xff] }
 0x633   :  { %5497 = vmatpush1.bf16.msra.mxu0 %v2957_v24  ;;  %v3054_v24 = vunpack.c.l.s8.bf16 %v1502_v62 }
 0x634   :  { %5825 = vmatpush1.bf16.msra.mxu1 %v2959_v8  ;;  %5498 = vmatprep.subr.bf16.mxu0 %v2974_v9  ;;  %v1501_v8 = vld [vmem:[#allocation8 + $0x10c0] sm:$0xff]  ;;  %v3056_v9 = vunpack.c.l.s8.bf16 %v1504_v17 }
 0x635   :  { %5826 = vmatprep.subr.bf16.mxu1 %v2976_v0  ;;  %v1503_v0 = vld [vmem:[#allocation8 + $0x10d0] sm:$0xff]  ;;  %v3053_v60 = vunpack.c.l.s8.bf16 %v1501_v8 }
 0x636   :  { %v3055_v16 = vunpack.c.l.s8.bf16 %v1503_v0  ;;  %v3071_v2 = vunpack.c.h.s8.bf16 %v1503_v0 }
 0x637   :  { %5499 = vmatpush1.bf16.msra.mxu0 %v2973_v18  ;;  %v3070_v18 = vunpack.c.h.s8.bf16 %v1502_v62  ;;  %v1535_v62 = vld [vmem:[#allocation8 + $0x11d0] sm:$0xff] }
 0x638   :  { %5827 = vmatpush1.bf16.msra.mxu1 %v2975_v11  ;;  %5500 = vmatprep.subr.bf16.mxu0 %v2990_v15  ;;  %v3072_v11 = vunpack.c.h.s8.bf16 %v1504_v17  ;;  %v1518_v15 = vld [vmem:[#allocation8 + $0x1148] sm:$0xff]  ;;  %v3119_v17 = vunpack.c.l.s8.bf16 %v1535_v62  ;;  %v3135_v0 = vunpack.c.h.s8.bf16 %v1535_v62 }
 0x639   :  { %5828 = vmatprep.subr.bf16.mxu1 %v2992_v28  ;;  %v3069_v28 = vunpack.c.h.s8.bf16 %v1501_v8  ;;  %v1552_v8 = vld [vmem:[#allocation8 + $0x1258] sm:$0xff] }
 0x63b   :  { %5501 = vmatpush1.bf16.msra.mxu0 %v2989_v29  ;;  %v3086_v29 = vunpack.c.l.s8.bf16 %v1518_v15 }
 0x63c   :  { %5829 = vmatpush1.bf16.msra.mxu1 %v2991_v30  ;;  %5502 = vmatprep.subr.bf16.mxu0 %v3006_v40  ;;  %v1517_v30 = vld [vmem:[#allocation8 + $0x1140] sm:$0xff]  ;;  %v3088_v40 = vunpack.c.l.s8.bf16 %v1520_v27 }
 0x63d   :  { %5830 = vmatprep.subr.bf16.mxu1 %v3008_v32  ;;  %v1519_v32 = vld [vmem:[#allocation8 + $0x1150] sm:$0xff]  ;;  %v3085_v44 = vunpack.c.l.s8.bf16 %v1517_v30 }
 0x63e   :  { %v3087_v34 = vunpack.c.l.s8.bf16 %v1519_v32  ;;  %v3103_v52 = vunpack.c.h.s8.bf16 %v1519_v32 }
 0x63f   :  { %5503 = vmatpush1.bf16.msra.mxu0 %v3005_v37  ;;  %v3102_v37 = vunpack.c.h.s8.bf16 %v1518_v15 }
 0x640   :  { %5831 = vmatpush1.bf16.msra.mxu1 %v3007_v38  ;;  %5513 = vmatprep.subr.bf16.mxu0 %v3022_v23  ;;  %v3104_v38 = vunpack.c.h.s8.bf16 %v1520_v27  ;;  %v1534_v23 = vld [vmem:[#allocation8 + $0x11c8] sm:$0xff] }
 0x641   :  { %5841 = vmatprep.subr.bf16.mxu1 %v3024_v49  ;;  %v3101_v49 = vunpack.c.h.s8.bf16 %v1517_v30  ;;  %v1568_v30 = vld [vmem:[#allocation8 + $0x12d8] sm:$0xff] }
 0x642   :  { %5505 = vmatmul.mubr.bf16.vlgmr.msra.gmra.mrb[24].mxu0 %v9559_v21 }
 0x643   :  { %5833 = vmatmul.mubr.bf16.vlgmr.msra.gmra.mrb[24].mxu1 %v9559_v21  ;;  %5514 = vmatpush1.bf16.msra.mxu0 %v3021_v59  ;;  %v3118_v59 = vunpack.c.l.s8.bf16 %v1534_v23 }
 0x644   :  { %5545 = vmatprep.mubr.bf16.mxu0 %v9561_v26  ;;  %5842 = vmatpush1.bf16.msra.mxu1 %v3023_v13  ;;  %v1533_v13 = vld [vmem:[#allocation8 + $0x11c0] sm:$0xff] }
 0x645   :  { %5873 = vmatprep.mubr.bf16.mxu1 %v9561_v26  ;;  %5515 = vmatprep.subr.bf16.mxu0 %v3038_v58  ;;  %v3120_v58 = vunpack.c.l.s8.bf16 %v1536_v39 }
 0x646   :  { %5843 = vmatprep.subr.bf16.mxu1 %v3040_v42  ;;  %v3117_v42 = vunpack.c.l.s8.bf16 %v1533_v13 }
 0x647   :  { %5516 = vmatpush1.bf16.msra.mxu0 %v3037_v6  ;;  %v3134_v6 = vunpack.c.h.s8.bf16 %v1534_v23 }
 0x648   :  { %5844 = vmatpush1.bf16.msra.mxu1 %v3039_v7  ;;  %5517 = vmatprep.subr.bf16.mxu0 %v3054_v24  ;;  %v3136_v7 = vunpack.c.h.s8.bf16 %v1536_v39  ;;  %v1550_v24 = vld [vmem:[#allocation8 + $0x1248] sm:$0xff] }
 0x649   :  { %5845 = vmatprep.subr.bf16.mxu1 %v3056_v9  ;;  %v3133_v9 = vunpack.c.h.s8.bf16 %v1533_v13  ;;  %v1584_v13 = vld [vmem:[#allocation8 + $0x1358] sm:$0xff] }
 0x64b   :  { %5518 = vmatpush1.bf16.msra.mxu0 %v3053_v60  ;;  %v3150_v60 = vunpack.c.l.s8.bf16 %v1550_v24 }
 0x64c   :  { %5846 = vmatpush1.bf16.msra.mxu1 %v3055_v16  ;;  %5519 = vmatprep.subr.bf16.mxu0 %v3070_v18  ;;  %v1549_v16 = vld [vmem:[#allocation8 + $0x1240] sm:$0xff]  ;;  %v3152_v18 = vunpack.c.l.s8.bf16 %v1552_v8 }
 0x64d   :  { %5847 = vmatprep.subr.bf16.mxu1 %v3072_v11  ;;  %v1551_v11 = vld [vmem:[#allocation8 + $0x1250] sm:$0xff]  ;;  %v3149_v15 = vunpack.c.l.s8.bf16 %v1549_v16 }
 0x64e   :  { %v3151_v27 = vunpack.c.l.s8.bf16 %v1551_v11  ;;  %v3167_v32 = vunpack.c.h.s8.bf16 %v1551_v11 }
 0x64f   :  { %5520 = vmatpush1.bf16.msra.mxu0 %v3069_v28  ;;  %v3166_v28 = vunpack.c.h.s8.bf16 %v1550_v24 }
 0x650   :  { %5848 = vmatpush1.bf16.msra.mxu1 %v3071_v2  ;;  %5521 = vmatprep.subr.bf16.mxu0 %v3086_v29  ;;  %v3168_v2 = vunpack.c.h.s8.bf16 %v1552_v8  ;;  %v1566_v29 = vld [vmem:[#allocation8 + $0x12c8] sm:$0xff] }
 0x651   :  { %5849 = vmatprep.subr.bf16.mxu1 %v3088_v40  ;;  %v3165_v40 = vunpack.c.h.s8.bf16 %v1549_v16  ;;  %v1600_v16 = vld [vmem:[#allocation8 + $0x13d8] sm:$0xff] }
 0x653   :  { %5522 = vmatpush1.bf16.msra.mxu0 %v3085_v44  ;;  %v3182_v44 = vunpack.c.l.s8.bf16 %v1566_v29 }
 0x654   :  { %5850 = vmatpush1.bf16.msra.mxu1 %v3087_v34  ;;  %5523 = vmatprep.subr.bf16.mxu0 %v3102_v37  ;;  %v1565_v34 = vld [vmem:[#allocation8 + $0x12c0] sm:$0xff]  ;;  %v3184_v37 = vunpack.c.l.s8.bf16 %v1568_v30 }
 0x655   :  { %5851 = vmatprep.subr.bf16.mxu1 %v3104_v38  ;;  %v1567_v38 = vld [vmem:[#allocation8 + $0x12d0] sm:$0xff]  ;;  %v3181_v23 = vunpack.c.l.s8.bf16 %v1565_v34 }
 0x656   :  { %v3183_v39 = vunpack.c.l.s8.bf16 %v1567_v38  ;;  %v3199_v62 = vunpack.c.h.s8.bf16 %v1567_v38 }
 0x657   :  { %5524 = vmatpush1.bf16.msra.mxu0 %v3101_v49  ;;  %v3198_v49 = vunpack.c.h.s8.bf16 %v1566_v29 }
 0x658   :  { %5852 = vmatpush1.bf16.msra.mxu1 %v3103_v52  ;;  %5525 = vmatprep.subr.bf16.mxu0 %v3118_v59  ;;  %v3200_v52 = vunpack.c.h.s8.bf16 %v1568_v30  ;;  %v1582_v59 = vld [vmem:[#allocation8 + $0x1348] sm:$0xff] }
 0x659   :  { %5853 = vmatprep.subr.bf16.mxu1 %v3120_v58  ;;  %v3197_v58 = vunpack.c.h.s8.bf16 %v1565_v34  ;;  %v1616_v34 = vld [vmem:[#allocation8 + $0x1458] sm:$0xff] }
 0x65b   :  { %5526 = vmatpush1.bf16.msra.mxu0 %v3117_v42  ;;  %v3214_v42 = vunpack.c.l.s8.bf16 %v1582_v59 }
 0x65c   :  { %5854 = vmatpush1.bf16.msra.mxu1 %v3119_v17  ;;  %5527 = vmatprep.subr.bf16.mxu0 %v3134_v6  ;;  %v1581_v17 = vld [vmem:[#allocation8 + $0x1340] sm:$0xff]  ;;  %v3216_v6 = vunpack.c.l.s8.bf16 %v1584_v13 }
 0x65d   :  { %5855 = vmatprep.subr.bf16.mxu1 %v3136_v7  ;;  %v1583_v7 = vld [vmem:[#allocation8 + $0x1350] sm:$0xff]  ;;  %v3213_v24 = vunpack.c.l.s8.bf16 %v1581_v17 }
 0x65e   :  { %v3215_v8 = vunpack.c.l.s8.bf16 %v1583_v7  ;;  %v3231_v11 = vunpack.c.h.s8.bf16 %v1583_v7 }
 0x65f   :  { %5528 = vmatpush1.bf16.msra.mxu0 %v3133_v9  ;;  %v3230_v9 = vunpack.c.h.s8.bf16 %v1582_v59 }
 0x660   :  { %5856 = vmatpush1.bf16.msra.mxu1 %v3135_v0  ;;  %5529 = vmatprep.subr.bf16.mxu0 %v3150_v60  ;;  %v3232_v0 = vunpack.c.h.s8.bf16 %v1584_v13  ;;  %v1598_v60 = vld [vmem:[#allocation8 + $0x13c8] sm:$0xff] }
 0x661   :  { %5857 = vmatprep.subr.bf16.mxu1 %v3152_v18  ;;  %v3229_v18 = vunpack.c.h.s8.bf16 %v1581_v17  ;;  %v1632_v17 = vld [vmem:[#allocation8 + $0x14d8] sm:$0xff] }
 0x663   :  { %5530 = vmatpush1.bf16.msra.mxu0 %v3149_v15  ;;  %v3246_v15 = vunpack.c.l.s8.bf16 %v1598_v60 }
 0x664   :  { %5858 = vmatpush1.bf16.msra.mxu1 %v3151_v27  ;;  %5531 = vmatprep.subr.bf16.mxu0 %v3166_v28  ;;  %v1597_v27 = vld [vmem:[#allocation8 + $0x13c0] sm:$0xff]  ;;  %v3248_v28 = vunpack.c.l.s8.bf16 %v1600_v16 }
 0x665   :  { %5859 = vmatprep.subr.bf16.mxu1 %v3168_v2  ;;  %v1599_v2 = vld [vmem:[#allocation8 + $0x13d0] sm:$0xff]  ;;  %v3245_v29 = vunpack.c.l.s8.bf16 %v1597_v27 }
 0x666   :  { %v3247_v30 = vunpack.c.l.s8.bf16 %v1599_v2  ;;  %v3263_v38 = vunpack.c.h.s8.bf16 %v1599_v2 }
 0x667   :  { %5532 = vmatpush1.bf16.msra.mxu0 %v3165_v40  ;;  %v3262_v40 = vunpack.c.h.s8.bf16 %v1598_v60 }
 0x668   :  { %5860 = vmatpush1.bf16.msra.mxu1 %v3167_v32  ;;  %5533 = vmatprep.subr.bf16.mxu0 %v3182_v44  ;;  %v3264_v32 = vunpack.c.h.s8.bf16 %v1600_v16  ;;  %v1614_v44 = vld [vmem:[#allocation8 + $0x1448] sm:$0xff] }
 0x669   :  { %5861 = vmatprep.subr.bf16.mxu1 %v3184_v37  ;;  %v3261_v37 = vunpack.c.h.s8.bf16 %v1597_v27  ;;  %v1648_v27 = vld [vmem:[#allocation8 + $0x1558] sm:$0xff] }
 0x66b   :  { %5534 = vmatpush1.bf16.msra.mxu0 %v3181_v23  ;;  %v3278_v23 = vunpack.c.l.s8.bf16 %v1614_v44 }
 0x66c   :  { %5862 = vmatpush1.bf16.msra.mxu1 %v3183_v39  ;;  %5535 = vmatprep.subr.bf16.mxu0 %v3198_v49  ;;  %v1613_v39 = vld [vmem:[#allocation8 + $0x1440] sm:$0xff]  ;;  %v3280_v49 = vunpack.c.l.s8.bf16 %v1616_v34 }
 0x66d   :  { %5863 = vmatprep.subr.bf16.mxu1 %v3200_v52  ;;  %v1615_v52 = vld [vmem:[#allocation8 + $0x1450] sm:$0xff]  ;;  %v3277_v59 = vunpack.c.l.s8.bf16 %v1613_v39 }
 0x66e   :  { %v3279_v13 = vunpack.c.l.s8.bf16 %v1615_v52  ;;  %v3295_v7 = vunpack.c.h.s8.bf16 %v1615_v52 }
 0x66f   :  { %5536 = vmatpush1.bf16.msra.mxu0 %v3197_v58  ;;  %v3294_v58 = vunpack.c.h.s8.bf16 %v1614_v44 }
 0x670   :  { %5864 = vmatpush1.bf16.msra.mxu1 %v3199_v62  ;;  %5537 = vmatprep.subr.bf16.mxu0 %v3214_v42  ;;  %v1630_v62 = vld [vmem:[#allocation8 + $0x14c8] sm:$0xff]  ;;  %v3296_v42 = vunpack.c.h.s8.bf16 %v1616_v34 }
 0x671   :  { %5865 = vmatprep.subr.bf16.mxu1 %v3216_v6  ;;  %v3293_v6 = vunpack.c.h.s8.bf16 %v1613_v39  ;;  %v1664_v39 = vld [vmem:[#allocation8 + $0x15d8] sm:$0xff] }
 0x673   :  { %5538 = vmatpush1.bf16.msra.mxu0 %v3213_v24  ;;  %v3310_v24 = vunpack.c.l.s8.bf16 %v1630_v62 }
 0x674   :  { %5866 = vmatpush1.bf16.msra.mxu1 %v3215_v8  ;;  %5539 = vmatprep.subr.bf16.mxu0 %v3230_v9  ;;  %v1629_v8 = vld [vmem:[#allocation8 + $0x14c0] sm:$0xff]  ;;  %v3312_v9 = vunpack.c.l.s8.bf16 %v1632_v17 }
 0x675   :  { %5867 = vmatprep.subr.bf16.mxu1 %v3232_v0  ;;  %v1631_v0 = vld [vmem:[#allocation8 + $0x14d0] sm:$0xff]  ;;  %v3309_v60 = vunpack.c.l.s8.bf16 %v1629_v8 }
 0x676   :  { %v3311_v16 = vunpack.c.l.s8.bf16 %v1631_v0  ;;  %v3327_v2 = vunpack.c.h.s8.bf16 %v1631_v0 }
 0x677   :  { %5540 = vmatpush1.bf16.msra.mxu0 %v3229_v18  ;;  %v3326_v18 = vunpack.c.h.s8.bf16 %v1630_v62  ;;  %v1663_v62 = vld [vmem:[#allocation8 + $0x15d0] sm:$0xff] }
 0x678   :  { %5868 = vmatpush1.bf16.msra.mxu1 %v3231_v11  ;;  %5541 = vmatprep.subr.bf16.mxu0 %v3246_v15  ;;  %v3328_v11 = vunpack.c.h.s8.bf16 %v1632_v17  ;;  %v1646_v15 = vld [vmem:[#allocation8 + $0x1548] sm:$0xff]  ;;  %v3375_v17 = vunpack.c.l.s8.bf16 %v1663_v62  ;;  %v3391_v0 = vunpack.c.h.s8.bf16 %v1663_v62 }
 0x679   :  { %5869 = vmatprep.subr.bf16.mxu1 %v3248_v28  ;;  %v3325_v28 = vunpack.c.h.s8.bf16 %v1629_v8  ;;  %v1680_v8 = vld [vmem:[#allocation8 + $0x1658] sm:$0xff] }
 0x67b   :  { %5542 = vmatpush1.bf16.msra.mxu0 %v3245_v29  ;;  %v3342_v29 = vunpack.c.l.s8.bf16 %v1646_v15 }
 0x67c   :  { %5870 = vmatpush1.bf16.msra.mxu1 %v3247_v30  ;;  %5543 = vmatprep.subr.bf16.mxu0 %v3262_v40  ;;  %v1645_v30 = vld [vmem:[#allocation8 + $0x1540] sm:$0xff]  ;;  %v3344_v40 = vunpack.c.l.s8.bf16 %v1648_v27 }
 0x67d   :  { %5871 = vmatprep.subr.bf16.mxu1 %v3264_v32  ;;  %v1647_v32 = vld [vmem:[#allocation8 + $0x1550] sm:$0xff]  ;;  %v3341_v44 = vunpack.c.l.s8.bf16 %v1645_v30 }
 0x67e   :  { %v3343_v34 = vunpack.c.l.s8.bf16 %v1647_v32  ;;  %v3359_v52 = vunpack.c.h.s8.bf16 %v1647_v32 }
 0x67f   :  { %5544 = vmatpush1.bf16.msra.mxu0 %v3261_v37  ;;  %v3358_v37 = vunpack.c.h.s8.bf16 %v1646_v15 }
 0x680   :  { %5872 = vmatpush1.bf16.msra.mxu1 %v3263_v38  ;;  %5554 = vmatprep.subr.bf16.mxu0 %v3278_v23  ;;  %v3360_v38 = vunpack.c.h.s8.bf16 %v1648_v27  ;;  %v1662_v23 = vld [vmem:[#allocation8 + $0x15c8] sm:$0xff] }
 0x681   :  { %5882 = vmatprep.subr.bf16.mxu1 %v3280_v49  ;;  %v3357_v49 = vunpack.c.h.s8.bf16 %v1645_v30  ;;  %v1696_v30 = vld [vmem:[#allocation8 + $0x16d8] sm:$0xff] }
 0x682   :  { %5546 = vmatmul.mubr.bf16.vlgmr.msra.gmra.mrb[24].mxu0 %v9570_v54 }
 0x683   :  { %5874 = vmatmul.mubr.bf16.vlgmr.msra.gmra.mrb[24].mxu1 %v9570_v54  ;;  %5555 = vmatpush1.bf16.msra.mxu0 %v3277_v59  ;;  %v3374_v59 = vunpack.c.l.s8.bf16 %v1662_v23 }
 0x684   :  { %5586 = vmatprep.mubr.bf16.mxu0 %v9572_v61  ;;  %5883 = vmatpush1.bf16.msra.mxu1 %v3279_v13  ;;  %v1661_v13 = vld [vmem:[#allocation8 + $0x15c0] sm:$0xff] }
 0x685   :  { %5914 = vmatprep.mubr.bf16.mxu1 %v9572_v61  ;;  %5556 = vmatprep.subr.bf16.mxu0 %v3294_v58  ;;  %v3376_v58 = vunpack.c.l.s8.bf16 %v1664_v39 }
 0x686   :  { %5884 = vmatprep.subr.bf16.mxu1 %v3296_v42  ;;  %v3373_v42 = vunpack.c.l.s8.bf16 %v1661_v13 }
 0x687   :  { %5557 = vmatpush1.bf16.msra.mxu0 %v3293_v6  ;;  %v3390_v6 = vunpack.c.h.s8.bf16 %v1662_v23 }
 0x688   :  { %5885 = vmatpush1.bf16.msra.mxu1 %v3295_v7  ;;  %5558 = vmatprep.subr.bf16.mxu0 %v3310_v24  ;;  %v3392_v7 = vunpack.c.h.s8.bf16 %v1664_v39  ;;  %v1678_v24 = vld [vmem:[#allocation8 + $0x1648] sm:$0xff] }
 0x689   :  { %5886 = vmatprep.subr.bf16.mxu1 %v3312_v9  ;;  %v3389_v9 = vunpack.c.h.s8.bf16 %v1661_v13  ;;  %v1712_v13 = vld [vmem:[#allocation8 + $0x1758] sm:$0xff] }
 0x68b   :  { %5559 = vmatpush1.bf16.msra.mxu0 %v3309_v60  ;;  %v3406_v60 = vunpack.c.l.s8.bf16 %v1678_v24 }
 0x68c   :  { %5887 = vmatpush1.bf16.msra.mxu1 %v3311_v16  ;;  %5560 = vmatprep.subr.bf16.mxu0 %v3326_v18  ;;  %v1677_v16 = vld [vmem:[#allocation8 + $0x1640] sm:$0xff]  ;;  %v3408_v18 = vunpack.c.l.s8.bf16 %v1680_v8 }
 0x68d   :  { %5888 = vmatprep.subr.bf16.mxu1 %v3328_v11  ;;  %v1679_v11 = vld [vmem:[#allocation8 + $0x1650] sm:$0xff]  ;;  %v3405_v15 = vunpack.c.l.s8.bf16 %v1677_v16 }
 0x68e   :  { %v3407_v27 = vunpack.c.l.s8.bf16 %v1679_v11  ;;  %v3423_v32 = vunpack.c.h.s8.bf16 %v1679_v11 }
 0x68f   :  { %5561 = vmatpush1.bf16.msra.mxu0 %v3325_v28  ;;  %v3422_v28 = vunpack.c.h.s8.bf16 %v1678_v24 }
 0x690   :  { %5889 = vmatpush1.bf16.msra.mxu1 %v3327_v2  ;;  %5562 = vmatprep.subr.bf16.mxu0 %v3342_v29  ;;  %v3424_v2 = vunpack.c.h.s8.bf16 %v1680_v8  ;;  %v1694_v29 = vld [vmem:[#allocation8 + $0x16c8] sm:$0xff] }
 0x691   :  { %5890 = vmatprep.subr.bf16.mxu1 %v3344_v40  ;;  %v3421_v40 = vunpack.c.h.s8.bf16 %v1677_v16  ;;  %v1728_v16 = vld [vmem:[#allocation8 + $0x17d8] sm:$0xff] }
 0x693   :  { %5563 = vmatpush1.bf16.msra.mxu0 %v3341_v44  ;;  %v3438_v44 = vunpack.c.l.s8.bf16 %v1694_v29 }
 0x694   :  { %5891 = vmatpush1.bf16.msra.mxu1 %v3343_v34  ;;  %5564 = vmatprep.subr.bf16.mxu0 %v3358_v37  ;;  %v1693_v34 = vld [vmem:[#allocation8 + $0x16c0] sm:$0xff]  ;;  %v3440_v37 = vunpack.c.l.s8.bf16 %v1696_v30 }
 0x695   :  { %5892 = vmatprep.subr.bf16.mxu1 %v3360_v38  ;;  %v1695_v38 = vld [vmem:[#allocation8 + $0x16d0] sm:$0xff]  ;;  %v3437_v23 = vunpack.c.l.s8.bf16 %v1693_v34 }
 0x696   :  { %v3439_v39 = vunpack.c.l.s8.bf16 %v1695_v38  ;;  %v3455_v62 = vunpack.c.h.s8.bf16 %v1695_v38 }
 0x697   :  { %5565 = vmatpush1.bf16.msra.mxu0 %v3357_v49  ;;  %v3454_v49 = vunpack.c.h.s8.bf16 %v1694_v29 }
 0x698   :  { %5893 = vmatpush1.bf16.msra.mxu1 %v3359_v52  ;;  %5566 = vmatprep.subr.bf16.mxu0 %v3374_v59  ;;  %v3456_v52 = vunpack.c.h.s8.bf16 %v1696_v30  ;;  %v1710_v59 = vld [vmem:[#allocation8 + $0x1748] sm:$0xff] }
 0x699   :  { %5894 = vmatprep.subr.bf16.mxu1 %v3376_v58  ;;  %v3453_v58 = vunpack.c.h.s8.bf16 %v1693_v34  ;;  %v1744_v34 = vld [vmem:[#allocation8 + $0x1858] sm:$0xff] }
 0x69b   :  { %5567 = vmatpush1.bf16.msra.mxu0 %v3373_v42  ;;  %v3470_v42 = vunpack.c.l.s8.bf16 %v1710_v59 }
 0x69c   :  { %5895 = vmatpush1.bf16.msra.mxu1 %v3375_v17  ;;  %5568 = vmatprep.subr.bf16.mxu0 %v3390_v6  ;;  %v1709_v17 = vld [vmem:[#allocation8 + $0x1740] sm:$0xff]  ;;  %v3472_v6 = vunpack.c.l.s8.bf16 %v1712_v13 }
 0x69d   :  { %5896 = vmatprep.subr.bf16.mxu1 %v3392_v7  ;;  %v1711_v7 = vld [vmem:[#allocation8 + $0x1750] sm:$0xff]  ;;  %v3469_v24 = vunpack.c.l.s8.bf16 %v1709_v17 }
 0x69e   :  { %v3471_v8 = vunpack.c.l.s8.bf16 %v1711_v7  ;;  %v3487_v11 = vunpack.c.h.s8.bf16 %v1711_v7 }
 0x69f   :  { %5569 = vmatpush1.bf16.msra.mxu0 %v3389_v9  ;;  %v3486_v9 = vunpack.c.h.s8.bf16 %v1710_v59 }
 0x6a0   :  { %5897 = vmatpush1.bf16.msra.mxu1 %v3391_v0  ;;  %5570 = vmatprep.subr.bf16.mxu0 %v3406_v60  ;;  %v3488_v0 = vunpack.c.h.s8.bf16 %v1712_v13  ;;  %v1726_v60 = vld [vmem:[#allocation8 + $0x17c8] sm:$0xff] }
 0x6a1   :  { %5898 = vmatprep.subr.bf16.mxu1 %v3408_v18  ;;  %v3485_v18 = vunpack.c.h.s8.bf16 %v1709_v17  ;;  %v1760_v17 = vld [vmem:[#allocation8 + $0x18d8] sm:$0xff] }
 0x6a3   :  { %5571 = vmatpush1.bf16.msra.mxu0 %v3405_v15  ;;  %v3502_v15 = vunpack.c.l.s8.bf16 %v1726_v60 }
 0x6a4   :  { %5899 = vmatpush1.bf16.msra.mxu1 %v3407_v27  ;;  %5572 = vmatprep.subr.bf16.mxu0 %v3422_v28  ;;  %v1725_v27 = vld [vmem:[#allocation8 + $0x17c0] sm:$0xff]  ;;  %v3504_v28 = vunpack.c.l.s8.bf16 %v1728_v16 }
 0x6a5   :  { %5900 = vmatprep.subr.bf16.mxu1 %v3424_v2  ;;  %v1727_v2 = vld [vmem:[#allocation8 + $0x17d0] sm:$0xff]  ;;  %v3501_v29 = vunpack.c.l.s8.bf16 %v1725_v27 }
 0x6a6   :  { %v3503_v30 = vunpack.c.l.s8.bf16 %v1727_v2  ;;  %v3519_v38 = vunpack.c.h.s8.bf16 %v1727_v2 }
 0x6a7   :  { %5573 = vmatpush1.bf16.msra.mxu0 %v3421_v40  ;;  %v3518_v40 = vunpack.c.h.s8.bf16 %v1726_v60 }
 0x6a8   :  { %5901 = vmatpush1.bf16.msra.mxu1 %v3423_v32  ;;  %5574 = vmatprep.subr.bf16.mxu0 %v3438_v44  ;;  %v3520_v32 = vunpack.c.h.s8.bf16 %v1728_v16  ;;  %v1742_v44 = vld [vmem:[#allocation8 + $0x1848] sm:$0xff] }
 0x6a9   :  { %5902 = vmatprep.subr.bf16.mxu1 %v3440_v37  ;;  %v3517_v37 = vunpack.c.h.s8.bf16 %v1725_v27  ;;  %v1776_v27 = vld [vmem:[#allocation8 + $0x1958] sm:$0xff] }
 0x6ab   :  { %5575 = vmatpush1.bf16.msra.mxu0 %v3437_v23  ;;  %v3534_v23 = vunpack.c.l.s8.bf16 %v1742_v44 }
 0x6ac   :  { %5903 = vmatpush1.bf16.msra.mxu1 %v3439_v39  ;;  %5576 = vmatprep.subr.bf16.mxu0 %v3454_v49  ;;  %v1741_v39 = vld [vmem:[#allocation8 + $0x1840] sm:$0xff]  ;;  %v3536_v49 = vunpack.c.l.s8.bf16 %v1744_v34 }
 0x6ad   :  { %5904 = vmatprep.subr.bf16.mxu1 %v3456_v52  ;;  %v1743_v52 = vld [vmem:[#allocation8 + $0x1850] sm:$0xff]  ;;  %v3533_v59 = vunpack.c.l.s8.bf16 %v1741_v39 }
 0x6ae   :  { %v3535_v13 = vunpack.c.l.s8.bf16 %v1743_v52  ;;  %v3551_v7 = vunpack.c.h.s8.bf16 %v1743_v52 }
 0x6af   :  { %5577 = vmatpush1.bf16.msra.mxu0 %v3453_v58  ;;  %v3550_v58 = vunpack.c.h.s8.bf16 %v1742_v44 }
 0x6b0   :  { %5905 = vmatpush1.bf16.msra.mxu1 %v3455_v62  ;;  %5578 = vmatprep.subr.bf16.mxu0 %v3470_v42  ;;  %v1758_v62 = vld [vmem:[#allocation8 + $0x18c8] sm:$0xff]  ;;  %v3552_v42 = vunpack.c.h.s8.bf16 %v1744_v34 }
 0x6b1   :  { %5906 = vmatprep.subr.bf16.mxu1 %v3472_v6  ;;  %v3549_v6 = vunpack.c.h.s8.bf16 %v1741_v39  ;;  %v1792_v39 = vld [vmem:[#allocation8 + $0x19d8] sm:$0xff] }
 0x6b3   :  { %5579 = vmatpush1.bf16.msra.mxu0 %v3469_v24  ;;  %v3566_v24 = vunpack.c.l.s8.bf16 %v1758_v62 }
 0x6b4   :  { %5907 = vmatpush1.bf16.msra.mxu1 %v3471_v8  ;;  %5580 = vmatprep.subr.bf16.mxu0 %v3486_v9  ;;  %v1757_v8 = vld [vmem:[#allocation8 + $0x18c0] sm:$0xff]  ;;  %v3568_v9 = vunpack.c.l.s8.bf16 %v1760_v17 }
 0x6b5   :  { %5908 = vmatprep.subr.bf16.mxu1 %v3488_v0  ;;  %v1759_v0 = vld [vmem:[#allocation8 + $0x18d0] sm:$0xff]  ;;  %v3565_v60 = vunpack.c.l.s8.bf16 %v1757_v8 }
 0x6b6   :  { %v3567_v16 = vunpack.c.l.s8.bf16 %v1759_v0  ;;  %v3583_v2 = vunpack.c.h.s8.bf16 %v1759_v0 }
 0x6b7   :  { %5581 = vmatpush1.bf16.msra.mxu0 %v3485_v18  ;;  %v3582_v18 = vunpack.c.h.s8.bf16 %v1758_v62  ;;  %v1791_v62 = vld [vmem:[#allocation8 + $0x19d0] sm:$0xff] }
 0x6b8   :  { %5909 = vmatpush1.bf16.msra.mxu1 %v3487_v11  ;;  %5582 = vmatprep.subr.bf16.mxu0 %v3502_v15  ;;  %v3584_v11 = vunpack.c.h.s8.bf16 %v1760_v17  ;;  %v1774_v15 = vld [vmem:[#allocation8 + $0x1948] sm:$0xff]  ;;  %v3631_v17 = vunpack.c.l.s8.bf16 %v1791_v62  ;;  %v3647_v0 = vunpack.c.h.s8.bf16 %v1791_v62 }
 0x6b9   :  { %5910 = vmatprep.subr.bf16.mxu1 %v3504_v28  ;;  %v3581_v28 = vunpack.c.h.s8.bf16 %v1757_v8  ;;  %v1808_v8 = vld [vmem:[#allocation8 + $0x1a58] sm:$0xff] }
 0x6bb   :  { %5583 = vmatpush1.bf16.msra.mxu0 %v3501_v29  ;;  %v3598_v29 = vunpack.c.l.s8.bf16 %v1774_v15 }
 0x6bc   :  { %5911 = vmatpush1.bf16.msra.mxu1 %v3503_v30  ;;  %5584 = vmatprep.subr.bf16.mxu0 %v3518_v40  ;;  %v1773_v30 = vld [vmem:[#allocation8 + $0x1940] sm:$0xff]  ;;  %v3600_v40 = vunpack.c.l.s8.bf16 %v1776_v27 }
 0x6bd   :  { %5912 = vmatprep.subr.bf16.mxu1 %v3520_v32  ;;  %v1775_v32 = vld [vmem:[#allocation8 + $0x1950] sm:$0xff]  ;;  %v3597_v44 = vunpack.c.l.s8.bf16 %v1773_v30 }
 0x6be   :  { %v3599_v34 = vunpack.c.l.s8.bf16 %v1775_v32  ;;  %v3615_v52 = vunpack.c.h.s8.bf16 %v1775_v32 }
 0x6bf   :  { %5585 = vmatpush1.bf16.msra.mxu0 %v3517_v37  ;;  %v3614_v37 = vunpack.c.h.s8.bf16 %v1774_v15 }
 0x6c0   :  { %5913 = vmatpush1.bf16.msra.mxu1 %v3519_v38  ;;  %5595 = vmatprep.subr.bf16.mxu0 %v3534_v23  ;;  %v3616_v38 = vunpack.c.h.s8.bf16 %v1776_v27  ;;  %v1790_v23 = vld [vmem:[#allocation8 + $0x19c8] sm:$0xff] }
 0x6c1   :  { %5923 = vmatprep.subr.bf16.mxu1 %v3536_v49  ;;  %v3613_v49 = vunpack.c.h.s8.bf16 %v1773_v30  ;;  %v1824_v30 = vld [vmem:[#allocation8 + $0x1ad8] sm:$0xff] }
 0x6c2   :  { %5587 = vmatmul.mubr.bf16.vlgmr.msra.gmra.mrb[24].mxu0 %v9580_v20 }
 0x6c3   :  { %5915 = vmatmul.mubr.bf16.vlgmr.msra.gmra.mrb[24].mxu1 %v9580_v20  ;;  %5596 = vmatpush1.bf16.msra.mxu0 %v3533_v59  ;;  %v3630_v59 = vunpack.c.l.s8.bf16 %v1790_v23 }
 0x6c4   :  { %5627 = vmatprep.mubr.bf16.mxu0 %v9582_v25  ;;  %5924 = vmatpush1.bf16.msra.mxu1 %v3535_v13  ;;  %v1789_v13 = vld [vmem:[#allocation8 + $0x19c0] sm:$0xff] }
 0x6c5   :  { %5955 = vmatprep.mubr.bf16.mxu1 %v9582_v25  ;;  %5597 = vmatprep.subr.bf16.mxu0 %v3550_v58  ;;  %v3632_v58 = vunpack.c.l.s8.bf16 %v1792_v39 }
 0x6c6   :  { %5925 = vmatprep.subr.bf16.mxu1 %v3552_v42  ;;  %v3629_v42 = vunpack.c.l.s8.bf16 %v1789_v13 }
 0x6c7   :  { %5598 = vmatpush1.bf16.msra.mxu0 %v3549_v6  ;;  %v3646_v6 = vunpack.c.h.s8.bf16 %v1790_v23 }
 0x6c8   :  { %5926 = vmatpush1.bf16.msra.mxu1 %v3551_v7  ;;  %5599 = vmatprep.subr.bf16.mxu0 %v3566_v24  ;;  %v3648_v7 = vunpack.c.h.s8.bf16 %v1792_v39  ;;  %v1806_v24 = vld [vmem:[#allocation8 + $0x1a48] sm:$0xff] }
 0x6c9   :  { %5927 = vmatprep.subr.bf16.mxu1 %v3568_v9  ;;  %v3645_v9 = vunpack.c.h.s8.bf16 %v1789_v13  ;;  %v1840_v13 = vld [vmem:[#allocation8 + $0x1b58] sm:$0xff] }
 0x6cb   :  { %5600 = vmatpush1.bf16.msra.mxu0 %v3565_v60  ;;  %v3662_v60 = vunpack.c.l.s8.bf16 %v1806_v24 }
 0x6cc   :  { %5928 = vmatpush1.bf16.msra.mxu1 %v3567_v16  ;;  %5601 = vmatprep.subr.bf16.mxu0 %v3582_v18  ;;  %v1805_v16 = vld [vmem:[#allocation8 + $0x1a40] sm:$0xff]  ;;  %v3664_v18 = vunpack.c.l.s8.bf16 %v1808_v8 }
 0x6cd   :  { %5929 = vmatprep.subr.bf16.mxu1 %v3584_v11  ;;  %v1807_v11 = vld [vmem:[#allocation8 + $0x1a50] sm:$0xff]  ;;  %v3661_v15 = vunpack.c.l.s8.bf16 %v1805_v16 }
 0x6ce   :  { %v3663_v27 = vunpack.c.l.s8.bf16 %v1807_v11  ;;  %v3679_v32 = vunpack.c.h.s8.bf16 %v1807_v11 }
 0x6cf   :  { %5602 = vmatpush1.bf16.msra.mxu0 %v3581_v28  ;;  %v3678_v28 = vunpack.c.h.s8.bf16 %v1806_v24 }
 0x6d0   :  { %5930 = vmatpush1.bf16.msra.mxu1 %v3583_v2  ;;  %5603 = vmatprep.subr.bf16.mxu0 %v3598_v29  ;;  %v3680_v2 = vunpack.c.h.s8.bf16 %v1808_v8  ;;  %v1822_v29 = vld [vmem:[#allocation8 + $0x1ac8] sm:$0xff] }
 0x6d1   :  { %5931 = vmatprep.subr.bf16.mxu1 %v3600_v40  ;;  %v3677_v40 = vunpack.c.h.s8.bf16 %v1805_v16  ;;  %v1856_v16 = vld [vmem:[#allocation8 + $0x1bd8] sm:$0xff] }
 0x6d3   :  { %5604 = vmatpush1.bf16.msra.mxu0 %v3597_v44  ;;  %v3694_v44 = vunpack.c.l.s8.bf16 %v1822_v29 }
 0x6d4   :  { %5932 = vmatpush1.bf16.msra.mxu1 %v3599_v34  ;;  %5605 = vmatprep.subr.bf16.mxu0 %v3614_v37  ;;  %v1821_v34 = vld [vmem:[#allocation8 + $0x1ac0] sm:$0xff]  ;;  %v3696_v37 = vunpack.c.l.s8.bf16 %v1824_v30 }
 0x6d5   :  { %5933 = vmatprep.subr.bf16.mxu1 %v3616_v38  ;;  %v1823_v38 = vld [vmem:[#allocation8 + $0x1ad0] sm:$0xff]  ;;  %v3693_v23 = vunpack.c.l.s8.bf16 %v1821_v34 }
 0x6d6   :  { %v3695_v39 = vunpack.c.l.s8.bf16 %v1823_v38  ;;  %v3711_v62 = vunpack.c.h.s8.bf16 %v1823_v38 }
 0x6d7   :  { %5606 = vmatpush1.bf16.msra.mxu0 %v3613_v49  ;;  %v3710_v49 = vunpack.c.h.s8.bf16 %v1822_v29 }
 0x6d8   :  { %5934 = vmatpush1.bf16.msra.mxu1 %v3615_v52  ;;  %5607 = vmatprep.subr.bf16.mxu0 %v3630_v59  ;;  %v3712_v52 = vunpack.c.h.s8.bf16 %v1824_v30  ;;  %v1838_v59 = vld [vmem:[#allocation8 + $0x1b48] sm:$0xff] }
 0x6d9   :  { %5935 = vmatprep.subr.bf16.mxu1 %v3632_v58  ;;  %v3709_v58 = vunpack.c.h.s8.bf16 %v1821_v34  ;;  %v1872_v34 = vld [vmem:[#allocation8 + $0x1c58] sm:$0xff] }
 0x6db   :  { %5608 = vmatpush1.bf16.msra.mxu0 %v3629_v42  ;;  %v3726_v42 = vunpack.c.l.s8.bf16 %v1838_v59 }
 0x6dc   :  { %5936 = vmatpush1.bf16.msra.mxu1 %v3631_v17  ;;  %5609 = vmatprep.subr.bf16.mxu0 %v3646_v6  ;;  %v1837_v17 = vld [vmem:[#allocation8 + $0x1b40] sm:$0xff]  ;;  %v3728_v6 = vunpack.c.l.s8.bf16 %v1840_v13 }
 0x6dd   :  { %5937 = vmatprep.subr.bf16.mxu1 %v3648_v7  ;;  %v1839_v7 = vld [vmem:[#allocation8 + $0x1b50] sm:$0xff]  ;;  %v3725_v24 = vunpack.c.l.s8.bf16 %v1837_v17 }
 0x6de   :  { %v3727_v8 = vunpack.c.l.s8.bf16 %v1839_v7  ;;  %v3743_v11 = vunpack.c.h.s8.bf16 %v1839_v7 }
 0x6df   :  { %5610 = vmatpush1.bf16.msra.mxu0 %v3645_v9  ;;  %v3742_v9 = vunpack.c.h.s8.bf16 %v1838_v59 }
 0x6e0   :  { %5938 = vmatpush1.bf16.msra.mxu1 %v3647_v0  ;;  %5611 = vmatprep.subr.bf16.mxu0 %v3662_v60  ;;  %v3744_v0 = vunpack.c.h.s8.bf16 %v1840_v13  ;;  %v1854_v60 = vld [vmem:[#allocation8 + $0x1bc8] sm:$0xff] }
 0x6e1   :  { %5939 = vmatprep.subr.bf16.mxu1 %v3664_v18  ;;  %v3741_v18 = vunpack.c.h.s8.bf16 %v1837_v17  ;;  %v1888_v17 = vld [vmem:[#allocation8 + $0x1cd8] sm:$0xff] }
 0x6e3   :  { %5612 = vmatpush1.bf16.msra.mxu0 %v3661_v15  ;;  %v3758_v15 = vunpack.c.l.s8.bf16 %v1854_v60 }
 0x6e4   :  { %5940 = vmatpush1.bf16.msra.mxu1 %v3663_v27  ;;  %5613 = vmatprep.subr.bf16.mxu0 %v3678_v28  ;;  %v1853_v27 = vld [vmem:[#allocation8 + $0x1bc0] sm:$0xff]  ;;  %v3760_v28 = vunpack.c.l.s8.bf16 %v1856_v16 }
 0x6e5   :  { %5941 = vmatprep.subr.bf16.mxu1 %v3680_v2  ;;  %v1855_v2 = vld [vmem:[#allocation8 + $0x1bd0] sm:$0xff]  ;;  %v3757_v29 = vunpack.c.l.s8.bf16 %v1853_v27 }
 0x6e6   :  { %v3759_v30 = vunpack.c.l.s8.bf16 %v1855_v2  ;;  %v3775_v38 = vunpack.c.h.s8.bf16 %v1855_v2 }
 0x6e7   :  { %5614 = vmatpush1.bf16.msra.mxu0 %v3677_v40  ;;  %v3774_v40 = vunpack.c.h.s8.bf16 %v1854_v60 }
 0x6e8   :  { %5942 = vmatpush1.bf16.msra.mxu1 %v3679_v32  ;;  %5615 = vmatprep.subr.bf16.mxu0 %v3694_v44  ;;  %v3776_v32 = vunpack.c.h.s8.bf16 %v1856_v16  ;;  %v1870_v44 = vld [vmem:[#allocation8 + $0x1c48] sm:$0xff] }
 0x6e9   :  { %5943 = vmatprep.subr.bf16.mxu1 %v3696_v37  ;;  %v3773_v37 = vunpack.c.h.s8.bf16 %v1853_v27  ;;  %v1904_v27 = vld [vmem:[#allocation8 + $0x1d58] sm:$0xff] }
 0x6eb   :  { %5616 = vmatpush1.bf16.msra.mxu0 %v3693_v23  ;;  %v3790_v23 = vunpack.c.l.s8.bf16 %v1870_v44 }
 0x6ec   :  { %5944 = vmatpush1.bf16.msra.mxu1 %v3695_v39  ;;  %5617 = vmatprep.subr.bf16.mxu0 %v3710_v49  ;;  %v1869_v39 = vld [vmem:[#allocation8 + $0x1c40] sm:$0xff]  ;;  %v3792_v49 = vunpack.c.l.s8.bf16 %v1872_v34 }
 0x6ed   :  { %5945 = vmatprep.subr.bf16.mxu1 %v3712_v52  ;;  %v1871_v52 = vld [vmem:[#allocation8 + $0x1c50] sm:$0xff]  ;;  %v3789_v59 = vunpack.c.l.s8.bf16 %v1869_v39 }
 0x6ee   :  { %v3791_v13 = vunpack.c.l.s8.bf16 %v1871_v52  ;;  %v3807_v7 = vunpack.c.h.s8.bf16 %v1871_v52 }
 0x6ef   :  { %5618 = vmatpush1.bf16.msra.mxu0 %v3709_v58  ;;  %v3806_v58 = vunpack.c.h.s8.bf16 %v1870_v44 }
 0x6f0   :  { %5946 = vmatpush1.bf16.msra.mxu1 %v3711_v62  ;;  %5619 = vmatprep.subr.bf16.mxu0 %v3726_v42  ;;  %v1886_v62 = vld [vmem:[#allocation8 + $0x1cc8] sm:$0xff]  ;;  %v3808_v42 = vunpack.c.h.s8.bf16 %v1872_v34 }
 0x6f1   :  { %5947 = vmatprep.subr.bf16.mxu1 %v3728_v6  ;;  %v3805_v6 = vunpack.c.h.s8.bf16 %v1869_v39  ;;  %v1920_v39 = vld [vmem:[#allocation8 + $0x1dd8] sm:$0xff] }
 0x6f3   :  { %5620 = vmatpush1.bf16.msra.mxu0 %v3725_v24  ;;  %v3822_v24 = vunpack.c.l.s8.bf16 %v1886_v62 }
 0x6f4   :  { %5948 = vmatpush1.bf16.msra.mxu1 %v3727_v8  ;;  %5621 = vmatprep.subr.bf16.mxu0 %v3742_v9  ;;  %v1885_v8 = vld [vmem:[#allocation8 + $0x1cc0] sm:$0xff]  ;;  %v3824_v9 = vunpack.c.l.s8.bf16 %v1888_v17 }
 0x6f5   :  { %5949 = vmatprep.subr.bf16.mxu1 %v3744_v0  ;;  %v1887_v0 = vld [vmem:[#allocation8 + $0x1cd0] sm:$0xff]  ;;  %v3821_v60 = vunpack.c.l.s8.bf16 %v1885_v8 }
 0x6f6   :  { %v3823_v16 = vunpack.c.l.s8.bf16 %v1887_v0  ;;  %v3839_v2 = vunpack.c.h.s8.bf16 %v1887_v0 }
 0x6f7   :  { %5622 = vmatpush1.bf16.msra.mxu0 %v3741_v18  ;;  %v3838_v18 = vunpack.c.h.s8.bf16 %v1886_v62  ;;  %v1919_v62 = vld [vmem:[#allocation8 + $0x1dd0] sm:$0xff] }
 0x6f8   :  { %5950 = vmatpush1.bf16.msra.mxu1 %v3743_v11  ;;  %5623 = vmatprep.subr.bf16.mxu0 %v3758_v15  ;;  %v3840_v11 = vunpack.c.h.s8.bf16 %v1888_v17  ;;  %v1902_v15 = vld [vmem:[#allocation8 + $0x1d48] sm:$0xff]  ;;  %v3887_v17 = vunpack.c.l.s8.bf16 %v1919_v62  ;;  %v3903_v0 = vunpack.c.h.s8.bf16 %v1919_v62 }
 0x6f9   :  { %5951 = vmatprep.subr.bf16.mxu1 %v3760_v28  ;;  %v3837_v28 = vunpack.c.h.s8.bf16 %v1885_v8  ;;  %v1936_v8 = vld [vmem:[#allocation8 + $0x1e58] sm:$0xff] }
 0x6fb   :  { %5624 = vmatpush1.bf16.msra.mxu0 %v3757_v29  ;;  %v3854_v29 = vunpack.c.l.s8.bf16 %v1902_v15 }
 0x6fc   :  { %5952 = vmatpush1.bf16.msra.mxu1 %v3759_v30  ;;  %5625 = vmatprep.subr.bf16.mxu0 %v3774_v40  ;;  %v1901_v30 = vld [vmem:[#allocation8 + $0x1d40] sm:$0xff]  ;;  %v3856_v40 = vunpack.c.l.s8.bf16 %v1904_v27 }
 0x6fd   :  { %5953 = vmatprep.subr.bf16.mxu1 %v3776_v32  ;;  %v1903_v32 = vld [vmem:[#allocation8 + $0x1d50] sm:$0xff]  ;;  %v3853_v44 = vunpack.c.l.s8.bf16 %v1901_v30 }
 0x6fe   :  { %v3855_v34 = vunpack.c.l.s8.bf16 %v1903_v32  ;;  %v3871_v52 = vunpack.c.h.s8.bf16 %v1903_v32 }
 0x6ff   :  { %5626 = vmatpush1.bf16.msra.mxu0 %v3773_v37  ;;  %v3870_v37 = vunpack.c.h.s8.bf16 %v1902_v15 }
 0x700   :  { %5954 = vmatpush1.bf16.msra.mxu1 %v3775_v38  ;;  %5636 = vmatprep.subr.bf16.mxu0 %v3790_v23  ;;  %v3872_v38 = vunpack.c.h.s8.bf16 %v1904_v27  ;;  %v1918_v23 = vld [vmem:[#allocation8 + $0x1dc8] sm:$0xff] }
 0x701   :  { %5964 = vmatprep.subr.bf16.mxu1 %v3792_v49  ;;  %v3869_v49 = vunpack.c.h.s8.bf16 %v1901_v30  ;;  %v1952_v30 = vld [vmem:[#allocation8 + $0x1ed8] sm:$0xff] }
 0x702   :  { %5628 = vmatmul.mubr.bf16.vlgmr.msra.gmra.mrb[24].mxu0 %v9590_v51 }
 0x703   :  { %5956 = vmatmul.mubr.bf16.vlgmr.msra.gmra.mrb[24].mxu1 %v9590_v51  ;;  %5637 = vmatpush1.bf16.msra.mxu0 %v3789_v59  ;;  %v3886_v59 = vunpack.c.l.s8.bf16 %v1918_v23 }
 0x704   :  { %5668 = vmatprep.mubr.bf16.mxu0 %v9592_v53  ;;  %5965 = vmatpush1.bf16.msra.mxu1 %v3791_v13  ;;  %v1917_v13 = vld [vmem:[#allocation8 + $0x1dc0] sm:$0xff] }
 0x705   :  { %5996 = vmatprep.mubr.bf16.mxu1 %v9592_v53  ;;  %5638 = vmatprep.subr.bf16.mxu0 %v3806_v58  ;;  %v3888_v58 = vunpack.c.l.s8.bf16 %v1920_v39 }
 0x706   :  { %5966 = vmatprep.subr.bf16.mxu1 %v3808_v42  ;;  %v3885_v42 = vunpack.c.l.s8.bf16 %v1917_v13 }
 0x707   :  { %5639 = vmatpush1.bf16.msra.mxu0 %v3805_v6  ;;  %v3902_v6 = vunpack.c.h.s8.bf16 %v1918_v23 }
 0x708   :  { %5967 = vmatpush1.bf16.msra.mxu1 %v3807_v7  ;;  %5640 = vmatprep.subr.bf16.mxu0 %v3822_v24  ;;  %v3904_v7 = vunpack.c.h.s8.bf16 %v1920_v39  ;;  %v1934_v24 = vld [vmem:[#allocation8 + $0x1e48] sm:$0xff] }
 0x709   :  { %5968 = vmatprep.subr.bf16.mxu1 %v3824_v9  ;;  %v3901_v9 = vunpack.c.h.s8.bf16 %v1917_v13  ;;  %v1968_v13 = vld [vmem:[#allocation8 + $0x1f58] sm:$0xff] }
 0x70b   :  { %5641 = vmatpush1.bf16.msra.mxu0 %v3821_v60  ;;  %v3918_v60 = vunpack.c.l.s8.bf16 %v1934_v24 }
 0x70c   :  { %5969 = vmatpush1.bf16.msra.mxu1 %v3823_v16  ;;  %5642 = vmatprep.subr.bf16.mxu0 %v3838_v18  ;;  %v1933_v16 = vld [vmem:[#allocation8 + $0x1e40] sm:$0xff]  ;;  %v3920_v18 = vunpack.c.l.s8.bf16 %v1936_v8 }
 0x70d   :  { %5970 = vmatprep.subr.bf16.mxu1 %v3840_v11  ;;  %v1935_v11 = vld [vmem:[#allocation8 + $0x1e50] sm:$0xff]  ;;  %v3917_v15 = vunpack.c.l.s8.bf16 %v1933_v16 }
 0x70e   :  { %v3919_v27 = vunpack.c.l.s8.bf16 %v1935_v11  ;;  %v3935_v32 = vunpack.c.h.s8.bf16 %v1935_v11 }
 0x70f   :  { %5643 = vmatpush1.bf16.msra.mxu0 %v3837_v28  ;;  %v3934_v28 = vunpack.c.h.s8.bf16 %v1934_v24 }
 0x710   :  { %5971 = vmatpush1.bf16.msra.mxu1 %v3839_v2  ;;  %5644 = vmatprep.subr.bf16.mxu0 %v3854_v29  ;;  %v3936_v2 = vunpack.c.h.s8.bf16 %v1936_v8  ;;  %v1950_v29 = vld [vmem:[#allocation8 + $0x1ec8] sm:$0xff] }
 0x711   :  { %5972 = vmatprep.subr.bf16.mxu1 %v3856_v40  ;;  %v3933_v40 = vunpack.c.h.s8.bf16 %v1933_v16  ;;  %v1984_v16 = vld [vmem:[#allocation8 + $0x1fd8] sm:$0xff] }
 0x713   :  { %5645 = vmatpush1.bf16.msra.mxu0 %v3853_v44  ;;  %v3950_v44 = vunpack.c.l.s8.bf16 %v1950_v29 }
 0x714   :  { %5973 = vmatpush1.bf16.msra.mxu1 %v3855_v34  ;;  %5646 = vmatprep.subr.bf16.mxu0 %v3870_v37  ;;  %v1949_v34 = vld [vmem:[#allocation8 + $0x1ec0] sm:$0xff]  ;;  %v3952_v37 = vunpack.c.l.s8.bf16 %v1952_v30 }
 0x715   :  { %5974 = vmatprep.subr.bf16.mxu1 %v3872_v38  ;;  %v1951_v38 = vld [vmem:[#allocation8 + $0x1ed0] sm:$0xff]  ;;  %v3949_v23 = vunpack.c.l.s8.bf16 %v1949_v34 }
 0x716   :  { %v3951_v39 = vunpack.c.l.s8.bf16 %v1951_v38  ;;  %v3967_v62 = vunpack.c.h.s8.bf16 %v1951_v38 }
 0x717   :  { %5647 = vmatpush1.bf16.msra.mxu0 %v3869_v49  ;;  %v3966_v49 = vunpack.c.h.s8.bf16 %v1950_v29 }
 0x718   :  { %5975 = vmatpush1.bf16.msra.mxu1 %v3871_v52  ;;  %5648 = vmatprep.subr.bf16.mxu0 %v3886_v59  ;;  %v3968_v52 = vunpack.c.h.s8.bf16 %v1952_v30  ;;  %v1966_v59 = vld [vmem:[#allocation8 + $0x1f48] sm:$0xff] }
 0x719   :  { %5976 = vmatprep.subr.bf16.mxu1 %v3888_v58  ;;  %v3965_v58 = vunpack.c.h.s8.bf16 %v1949_v34  ;;  %v980_v34 = vld [vmem:[#allocation8 + $0x78] sm:$0xff] }
 0x71b   :  { %5649 = vmatpush1.bf16.msra.mxu0 %v3885_v42  ;;  %v3982_v42 = vunpack.c.l.s8.bf16 %v1966_v59 }
 0x71c   :  { %5977 = vmatpush1.bf16.msra.mxu1 %v3887_v17  ;;  %5650 = vmatprep.subr.bf16.mxu0 %v3902_v6  ;;  %v1965_v17 = vld [vmem:[#allocation8 + $0x1f40] sm:$0xff]  ;;  %v3984_v6 = vunpack.c.l.s8.bf16 %v1968_v13 }
 0x71d   :  { %5978 = vmatprep.subr.bf16.mxu1 %v3904_v7  ;;  %v1967_v7 = vld [vmem:[#allocation8 + $0x1f50] sm:$0xff]  ;;  %v3981_v24 = vunpack.c.l.s8.bf16 %v1965_v17 }
 0x71e   :  { %v3983_v8 = vunpack.c.l.s8.bf16 %v1967_v7  ;;  %v3999_v11 = vunpack.c.h.s8.bf16 %v1967_v7 }
 0x71f   :  { %5651 = vmatpush1.bf16.msra.mxu0 %v3901_v9  ;;  %v3998_v9 = vunpack.c.h.s8.bf16 %v1966_v59 }
 0x720   :  { %5979 = vmatpush1.bf16.msra.mxu1 %v3903_v0  ;;  %5652 = vmatprep.subr.bf16.mxu0 %v3918_v60  ;;  %v4000_v0 = vunpack.c.h.s8.bf16 %v1968_v13  ;;  %v1982_v60 = vld [vmem:[#allocation8 + $0x1fc8] sm:$0xff] }
 0x721   :  { %5980 = vmatprep.subr.bf16.mxu1 %v3920_v18  ;;  %v3997_v18 = vunpack.c.h.s8.bf16 %v1965_v17  ;;  %v996_v17 = vld [vmem:[#allocation8 + $0xf8] sm:$0xff] }
 0x723   :  { %5653 = vmatpush1.bf16.msra.mxu0 %v3917_v15  ;;  %v4014_v15 = vunpack.c.l.s8.bf16 %v1982_v60 }
 0x724   :  { %5981 = vmatpush1.bf16.msra.mxu1 %v3919_v27  ;;  %5654 = vmatprep.subr.bf16.mxu0 %v3934_v28  ;;  %v1981_v27 = vld [vmem:[#allocation8 + $0x1fc0] sm:$0xff]  ;;  %v4016_v28 = vunpack.c.l.s8.bf16 %v1984_v16 }
 0x725   :  { %5982 = vmatprep.subr.bf16.mxu1 %v3936_v2  ;;  %v1983_v2 = vld [vmem:[#allocation8 + $0x1fd0] sm:$0xff]  ;;  %v4013_v29 = vunpack.c.l.s8.bf16 %v1981_v27 }
 0x726   :  { %v4015_v30 = vunpack.c.l.s8.bf16 %v1983_v2  ;;  %v4031_v38 = vunpack.c.h.s8.bf16 %v1983_v2 }
 0x727   :  { %5655 = vmatpush1.bf16.msra.mxu0 %v3933_v40  ;;  %v4030_v40 = vunpack.c.h.s8.bf16 %v1982_v60 }
 0x728   :  { %5983 = vmatpush1.bf16.msra.mxu1 %v3935_v32  ;;  %5656 = vmatprep.subr.bf16.mxu0 %v3950_v44  ;;  %v4032_v32 = vunpack.c.h.s8.bf16 %v1984_v16  ;;  %v978_v44 = vld [vmem:[#allocation8 + $0x68] sm:$0xff] }
 0x729   :  { %5984 = vmatprep.subr.bf16.mxu1 %v3952_v37  ;;  %v4029_v37 = vunpack.c.h.s8.bf16 %v1981_v27  ;;  %v1012_v27 = vld [vmem:[#allocation8 + $0x178] sm:$0xff] }
 0x72b   :  { %5657 = vmatpush1.bf16.msra.mxu0 %v3949_v23  ;;  %v2002_v23 = vunpack.c.l.s8.bf16 %v978_v44 }
 0x72c   :  { %5985 = vmatpush1.bf16.msra.mxu1 %v3951_v39  ;;  %5658 = vmatprep.subr.bf16.mxu0 %v3966_v49  ;;  %v977_v39 = vld [vmem:[#allocation8 + $0x60] sm:$0xff]  ;;  %v2004_v49 = vunpack.c.l.s8.bf16 %v980_v34 }
 0x72d   :  { %5986 = vmatprep.subr.bf16.mxu1 %v3968_v52  ;;  %v979_v52 = vld [vmem:[#allocation8 + $0x70] sm:$0xff]  ;;  %v2001_v59 = vunpack.c.l.s8.bf16 %v977_v39 }
 0x72e   :  { %v2003_v13 = vunpack.c.l.s8.bf16 %v979_v52  ;;  %v2019_v7 = vunpack.c.h.s8.bf16 %v979_v52 }
 0x72f   :  { %5659 = vmatpush1.bf16.msra.mxu0 %v3965_v58  ;;  %v2018_v58 = vunpack.c.h.s8.bf16 %v978_v44 }
 0x730   :  { %5987 = vmatpush1.bf16.msra.mxu1 %v3967_v62  ;;  %5660 = vmatprep.subr.bf16.mxu0 %v3982_v42  ;;  %v994_v62 = vld [vmem:[#allocation8 + $0xe8] sm:$0xff]  ;;  %v2020_v42 = vunpack.c.h.s8.bf16 %v980_v34 }
 0x731   :  { %5988 = vmatprep.subr.bf16.mxu1 %v3984_v6  ;;  %v2017_v6 = vunpack.c.h.s8.bf16 %v977_v39 }
 0x733   :  { %5661 = vmatpush1.bf16.msra.mxu0 %v3981_v24  ;;  %v2034_v24 = vunpack.c.l.s8.bf16 %v994_v62 }
 0x734   :  { %5989 = vmatpush1.bf16.msra.mxu1 %v3983_v8  ;;  %5662 = vmatprep.subr.bf16.mxu0 %v3998_v9  ;;  %v993_v8 = vld [vmem:[#allocation8 + $0xe0] sm:$0xff]  ;;  %v2036_v9 = vunpack.c.l.s8.bf16 %v996_v17 }
 0x735   :  { %5990 = vmatprep.subr.bf16.mxu1 %v4000_v0  ;;  %v995_v0 = vld [vmem:[#allocation8 + $0xf0] sm:$0xff]  ;;  %v2033_v60 = vunpack.c.l.s8.bf16 %v993_v8 }
 0x736   :  { %v2035_v16 = vunpack.c.l.s8.bf16 %v995_v0  ;;  %v2051_v2 = vunpack.c.h.s8.bf16 %v995_v0 }
 0x737   :  { %5663 = vmatpush1.bf16.msra.mxu0 %v3997_v18  ;;  %v2050_v18 = vunpack.c.h.s8.bf16 %v994_v62 }
 0x738   :  { %5991 = vmatpush1.bf16.msra.mxu1 %v3999_v11  ;;  %5664 = vmatprep.subr.bf16.mxu0 %v4014_v15  ;;  %v2052_v11 = vunpack.c.h.s8.bf16 %v996_v17  ;;  %v1010_v15 = vld [vmem:[#allocation8 + $0x168] sm:$0xff] }
 0x739   :  { %5992 = vmatprep.subr.bf16.mxu1 %v4016_v28  ;;  %v2049_v28 = vunpack.c.h.s8.bf16 %v993_v8  ;;  %v2082_v34 = vunpack.c.h.s8.bf16 %v1010_v15 }
 0x73b   :  { %5665 = vmatpush1.bf16.msra.mxu0 %v4013_v29  ;;  %v1009_v29 = vld [vmem:[#allocation8 + $0x160] sm:$0xff] }
 0x73c   :  { %5993 = vmatpush1.bf16.msra.mxu1 %v4015_v30  ;;  %5666 = vmatprep.subr.bf16.mxu0 %v4030_v40  ;;  %v2068_v30 = vunpack.c.l.s8.bf16 %v1012_v27  ;;  %v1011_v40 = vld [vmem:[#allocation8 + $0x170] sm:$0xff]  ;;  %v2081_v39 = vunpack.c.h.s8.bf16 %v1009_v29 }
 0x73d   :  { %5994 = vmatprep.subr.bf16.mxu1 %v4032_v32  ;;  %v2065_v32 = vunpack.c.l.s8.bf16 %v1009_v29  ;;  %v2067_v44 = vunpack.c.l.s8.bf16 %v1011_v40 }
 0x73f   :  { %5667 = vmatpush1.bf16.msra.mxu0 %v4029_v37  ;;  %v2084_v37 = vunpack.c.h.s8.bf16 %v1012_v27 }
 0x740   :  { %5995 = vmatpush1.bf16.msra.mxu1 %v4031_v38  ;;  %6005 = vmatprep.subr.bf16.mxu0 %v2002_v23  ;;  %v1026_v38 = vld [vmem:[#allocation8 + $0x1e8] sm:$0xff]  ;;  %v1028_v23 = vld [vmem:[#allocation8 + $0x1f8] sm:$0xff] }
 0x741   :  { %6333 = vmatprep.subr.bf16.mxu1 %v2004_v49  ;;  %v2083_v49 = vunpack.c.h.s8.bf16 %v1011_v40  ;;  %v2098_v52 = vunpack.c.l.s8.bf16 %v1026_v38  ;;  %v2114_v17 = vunpack.c.h.s8.bf16 %v1026_v38 }
 0x742   :  { %5669 = vmatmul.mubr.bf16.vlgmr.msra.gmra.mrb[24].mxu0 %v9599_v14 }
 0x743   :  { %5997 = vmatmul.mubr.bf16.vlgmr.msra.gmra.mrb[24].mxu1 %v9599_v14  ;;  %6006 = vmatpush1.bf16.msra.mxu0 %v2001_v59  ;;  %v1025_v59 = vld [vmem:[#allocation8 + $0x1e0] sm:$0xff] }
 0x744   :  { %6037 = vmatprep.mubr.bf16.mxu0 %v9461_v1  ;;  %6334 = vmatpush1.bf16.msra.mxu1 %v2003_v13  ;;  %v2100_v13 = vunpack.c.l.s8.bf16 %v1028_v23  ;;  %v2097_v62 = vunpack.c.l.s8.bf16 %v1025_v59  ;;  %v2113_v8 = vunpack.c.h.s8.bf16 %v1025_v59 }
 0x745   :  { %6365 = vmatprep.mubr.bf16.mxu1 %v9461_v1  ;;  %6007 = vmatprep.subr.bf16.mxu0 %v2018_v58  ;;  %v2066_v1 = vunpack.c.l.s8.bf16 %v1010_v15  ;;  %v1027_v58 = vld [vmem:[#allocation8 + $0x1f0] sm:$0xff] }
 0x746   :  { %6335 = vmatprep.subr.bf16.mxu1 %v2020_v42  ;;  %v2099_v42 = vunpack.c.l.s8.bf16 %v1027_v58 }
 0x747   :  { %6008 = vmatpush1.bf16.msra.mxu0 %v2017_v6  ;;  %v2116_v6 = vunpack.c.h.s8.bf16 %v1028_v23 }
 0x748   :  { %6336 = vmatpush1.bf16.msra.mxu1 %v2019_v7  ;;  %6009 = vmatprep.subr.bf16.mxu0 %v2034_v24  ;;  %v1042_v7 = vld [vmem:[#allocation8 + $0x268] sm:$0xff]  ;;  %v1044_v24 = vld [vmem:[#allocation8 + $0x278] sm:$0xff] }
 0x749   :  { %6337 = vmatprep.subr.bf16.mxu1 %v2036_v9  ;;  %v2115_v9 = vunpack.c.h.s8.bf16 %v1027_v58  ;;  %v2130_v0 = vunpack.c.l.s8.bf16 %v1042_v7  ;;  %v2146_v27 = vunpack.c.h.s8.bf16 %v1042_v7 }
 0x74b   :  { %6010 = vmatpush1.bf16.msra.mxu0 %v2033_v60  ;;  %v1041_v60 = vld [vmem:[#allocation8 + $0x260] sm:$0xff] }
 0x74c   :  { %6338 = vmatpush1.bf16.msra.mxu1 %v2035_v16  ;;  %6011 = vmatprep.subr.bf16.mxu0 %v2050_v18  ;;  %v2132_v16 = vunpack.c.l.s8.bf16 %v1044_v24  ;;  %v1043_v18 = vld [vmem:[#allocation8 + $0x270] sm:$0xff]  ;;  %v2145_v29 = vunpack.c.h.s8.bf16 %v1041_v60 }
 0x74d   :  { %6339 = vmatprep.subr.bf16.mxu1 %v2052_v11  ;;  %v2129_v11 = vunpack.c.l.s8.bf16 %v1041_v60  ;;  %v2131_v15 = vunpack.c.l.s8.bf16 %v1043_v18 }
 0x74f   :  { %6012 = vmatpush1.bf16.msra.mxu0 %v2049_v28  ;;  %v2148_v28 = vunpack.c.h.s8.bf16 %v1044_v24 }
 0x750   :  { %6340 = vmatpush1.bf16.msra.mxu1 %v2051_v2  ;;  %6013 = vmatprep.subr.bf16.mxu0 %v2066_v1  ;;  %v1058_v2 = vld [vmem:[#allocation8 + $0x2e8] sm:$0xff]  ;;  %v1060_v1 = vld [vmem:[#allocation8 + $0x2f8] sm:$0xff] }
 0x751   :  { %6341 = vmatprep.subr.bf16.mxu1 %v2068_v30  ;;  %v2147_v30 = vunpack.c.h.s8.bf16 %v1043_v18  ;;  %v2162_v40 = vunpack.c.l.s8.bf16 %v1058_v2  ;;  %v2178_v23 = vunpack.c.h.s8.bf16 %v1058_v2 }
 0x753   :  { %6014 = vmatpush1.bf16.msra.mxu0 %v2065_v32  ;;  %v1057_v32 = vld [vmem:[#allocation8 + $0x2e0] sm:$0xff] }
 0x754   :  { %6342 = vmatpush1.bf16.msra.mxu1 %v2067_v44  ;;  %6015 = vmatprep.subr.bf16.mxu0 %v2082_v34  ;;  %v2164_v44 = vunpack.c.l.s8.bf16 %v1060_v1  ;;  %v1059_v34 = vld [vmem:[#allocation8 + $0x2f0] sm:$0xff]  ;;  %v2177_v59 = vunpack.c.h.s8.bf16 %v1057_v32 }
 0x755   :  { %6343 = vmatprep.subr.bf16.mxu1 %v2084_v37  ;;  %v2161_v37 = vunpack.c.l.s8.bf16 %v1057_v32  ;;  %v2163_v38 = vunpack.c.l.s8.bf16 %v1059_v34 }
 0x757   :  { %6016 = vmatpush1.bf16.msra.mxu0 %v2081_v39  ;;  %v2180_v39 = vunpack.c.h.s8.bf16 %v1060_v1 }
 0x758   :  { %6344 = vmatpush1.bf16.msra.mxu1 %v2083_v49  ;;  %6017 = vmatprep.subr.bf16.mxu0 %v2098_v52  ;;  %v1074_v49 = vld [vmem:[#allocation8 + $0x368] sm:$0xff]  ;;  %v1076_v52 = vld [vmem:[#allocation8 + $0x378] sm:$0xff] }
 0x759   :  { %6345 = vmatprep.subr.bf16.mxu1 %v2100_v13  ;;  %v2179_v13 = vunpack.c.h.s8.bf16 %v1059_v34  ;;  %v2194_v58 = vunpack.c.l.s8.bf16 %v1074_v49  ;;  %v2210_v24 = vunpack.c.h.s8.bf16 %v1074_v49 }
 0x75b   :  { %6018 = vmatpush1.bf16.msra.mxu0 %v2097_v62  ;;  %v1073_v62 = vld [vmem:[#allocation8 + $0x360] sm:$0xff] }
 0x75c   :  { %6346 = vmatpush1.bf16.msra.mxu1 %v2099_v42  ;;  %6019 = vmatprep.subr.bf16.mxu0 %v2114_v17  ;;  %v2196_v42 = vunpack.c.l.s8.bf16 %v1076_v52  ;;  %v1075_v17 = vld [vmem:[#allocation8 + $0x370] sm:$0xff]  ;;  %v2209_v60 = vunpack.c.h.s8.bf16 %v1073_v62 }
 0x75d   :  { %6347 = vmatprep.subr.bf16.mxu1 %v2116_v6  ;;  %v2193_v6 = vunpack.c.l.s8.bf16 %v1073_v62  ;;  %v2195_v7 = vunpack.c.l.s8.bf16 %v1075_v17 }
 0x75f   :  { %6020 = vmatpush1.bf16.msra.mxu0 %v2113_v8  ;;  %v2212_v8 = vunpack.c.h.s8.bf16 %v1076_v52 }
 0x760   :  { %6348 = vmatpush1.bf16.msra.mxu1 %v2115_v9  ;;  %6021 = vmatprep.subr.bf16.mxu0 %v2130_v0  ;;  %v1090_v9 = vld [vmem:[#allocation8 + $0x3e8] sm:$0xff]  ;;  %v1092_v0 = vld [vmem:[#allocation8 + $0x3f8] sm:$0xff] }
 0x761   :  { %6349 = vmatprep.subr.bf16.mxu1 %v2132_v16  ;;  %v2211_v16 = vunpack.c.h.s8.bf16 %v1075_v17  ;;  %v2226_v18 = vunpack.c.l.s8.bf16 %v1090_v9  ;;  %v2242_v1 = vunpack.c.h.s8.bf16 %v1090_v9 }
 0x763   :  { %6022 = vmatpush1.bf16.msra.mxu0 %v2129_v11  ;;  %v1089_v11 = vld [vmem:[#allocation8 + $0x3e0] sm:$0xff] }
 0x764   :  { %6350 = vmatpush1.bf16.msra.mxu1 %v2131_v15  ;;  %6023 = vmatprep.subr.bf16.mxu0 %v2146_v27  ;;  %v2228_v15 = vunpack.c.l.s8.bf16 %v1092_v0  ;;  %v1091_v27 = vld [vmem:[#allocation8 + $0x3f0] sm:$0xff]  ;;  %v2241_v32 = vunpack.c.h.s8.bf16 %v1089_v11 }
 0x765   :  { %6351 = vmatprep.subr.bf16.mxu1 %v2148_v28  ;;  %v2225_v28 = vunpack.c.l.s8.bf16 %v1089_v11  ;;  %v2227_v2 = vunpack.c.l.s8.bf16 %v1091_v27 }
 0x767   :  { %6024 = vmatpush1.bf16.msra.mxu0 %v2145_v29  ;;  %v2244_v29 = vunpack.c.h.s8.bf16 %v1092_v0 }
 0x768   :  { %6352 = vmatpush1.bf16.msra.mxu1 %v2147_v30  ;;  %6025 = vmatprep.subr.bf16.mxu0 %v2162_v40  ;;  %v1106_v30 = vld [vmem:[#allocation8 + $0x468] sm:$0xff]  ;;  %v1108_v40 = vld [vmem:[#allocation8 + $0x478] sm:$0xff] }
 0x769   :  { %6353 = vmatprep.subr.bf16.mxu1 %v2164_v44  ;;  %v2243_v44 = vunpack.c.h.s8.bf16 %v1091_v27  ;;  %v2258_v34 = vunpack.c.l.s8.bf16 %v1106_v30  ;;  %v2274_v52 = vunpack.c.h.s8.bf16 %v1106_v30 }
 0x76b   :  { %6026 = vmatpush1.bf16.msra.mxu0 %v2161_v37  ;;  %v1105_v37 = vld [vmem:[#allocation8 + $0x460] sm:$0xff] }
 0x76c   :  { %6354 = vmatpush1.bf16.msra.mxu1 %v2163_v38  ;;  %6027 = vmatprep.subr.bf16.mxu0 %v2178_v23  ;;  %v2260_v38 = vunpack.c.l.s8.bf16 %v1108_v40  ;;  %v1107_v23 = vld [vmem:[#allocation8 + $0x470] sm:$0xff]  ;;  %v2273_v62 = vunpack.c.h.s8.bf16 %v1105_v37 }
 0x76d   :  { %6355 = vmatprep.subr.bf16.mxu1 %v2180_v39  ;;  %v2257_v39 = vunpack.c.l.s8.bf16 %v1105_v37  ;;  %v2259_v49 = vunpack.c.l.s8.bf16 %v1107_v23 }
 0x76f   :  { %6028 = vmatpush1.bf16.msra.mxu0 %v2177_v59  ;;  %v1122_v59 = vld [vmem:[#allocation8 + $0x4e8] sm:$0xff] }
 0x770   :  { %6356 = vmatpush1.bf16.msra.mxu1 %v2179_v13  ;;  %6029 = vmatprep.subr.bf16.mxu0 %v2194_v58  ;;  %v2276_v13 = vunpack.c.h.s8.bf16 %v1108_v40  ;;  %v1124_v58 = vld [vmem:[#allocation8 + $0x4f8] sm:$0xff]  ;;  %v2290_v17 = vunpack.c.l.s8.bf16 %v1122_v59  ;;  %v1154_v40 = vld [vmem:[#allocation8 + $0x5e8] sm:$0xff] }
 0x771   :  { %6357 = vmatprep.subr.bf16.mxu1 %v2196_v42  ;;  %v2275_v42 = vunpack.c.h.s8.bf16 %v1107_v23  ;;  %v2308_v0 = vunpack.c.h.s8.bf16 %v1124_v58  ;;  %v2354_v37 = vunpack.c.l.s8.bf16 %v1154_v40 }
 0x773   :  { %6030 = vmatpush1.bf16.msra.mxu0 %v2193_v6  ;;  %v1121_v6 = vld [vmem:[#allocation8 + $0x4e0] sm:$0xff] }
 0x774   :  { %6358 = vmatpush1.bf16.msra.mxu1 %v2195_v7  ;;  %6031 = vmatprep.subr.bf16.mxu0 %v2210_v24  ;;  %v2292_v7 = vunpack.c.l.s8.bf16 %v1124_v58  ;;  %v1123_v24 = vld [vmem:[#allocation8 + $0x4f0] sm:$0xff]  ;;  %v1170_v58 = vld [vmem:[#allocation8 + $0x668] sm:$0xff] }
 0x775   :  { %6359 = vmatprep.subr.bf16.mxu1 %v2212_v8  ;;  %v2289_v8 = vunpack.c.l.s8.bf16 %v1121_v6  ;;  %v2291_v9 = vunpack.c.l.s8.bf16 %v1123_v24  ;;  %v2307_v11 = vunpack.c.h.s8.bf16 %v1123_v24 }
 0x777   :  { %6032 = vmatpush1.bf16.msra.mxu0 %v2209_v60  ;;  %v1138_v60 = vld [vmem:[#allocation8 + $0x568] sm:$0xff] }
 0x778   :  { %6360 = vmatpush1.bf16.msra.mxu1 %v2211_v16  ;;  %6033 = vmatprep.subr.bf16.mxu0 %v2226_v18  ;;  %v1140_v16 = vld [vmem:[#allocation8 + $0x578] sm:$0xff]  ;;  %v2305_v18 = vunpack.c.h.s8.bf16 %v1121_v6  ;;  %v2386_v6 = vunpack.c.l.s8.bf16 %v1170_v58 }
 0x779   :  { %6361 = vmatprep.subr.bf16.mxu1 %v2228_v15  ;;  %v1137_v15 = vld [vmem:[#allocation8 + $0x560] sm:$0xff]  ;;  %v2324_v27 = vunpack.c.l.s8.bf16 %v1140_v16  ;;  %v2340_v30 = vunpack.c.h.s8.bf16 %v1140_v16  ;;  %v1186_v16 = vld [vmem:[#allocation8 + $0x6e8] sm:$0xff] }
 0x77b   :  { %6034 = vmatpush1.bf16.msra.mxu0 %v2225_v28  ;;  %v1139_v28 = vld [vmem:[#allocation8 + $0x570] sm:$0xff] }
 0x77c   :  { %6362 = vmatpush1.bf16.msra.mxu1 %v2227_v2  ;;  %6035 = vmatprep.subr.bf16.mxu0 %v2242_v1  ;;  %v2321_v2 = vunpack.c.l.s8.bf16 %v1137_v15  ;;  %v2323_v1 = vunpack.c.l.s8.bf16 %v1139_v28 }
 0x77d   :  { %6363 = vmatprep.subr.bf16.mxu1 %v2244_v29  ;;  %v2338_v29 = vunpack.c.h.s8.bf16 %v1138_v60 }
 0x77f   :  { %6036 = vmatpush1.bf16.msra.mxu0 %v2241_v32  ;;  %v1156_v32 = vld [vmem:[#allocation8 + $0x5f8] sm:$0xff] }
 0x780   :  { %6364 = vmatpush1.bf16.msra.mxu1 %v2243_v44  ;;  %6046 = vmatprep.subr.bf16.mxu0 %v2258_v34  ;;  %v2337_v44 = vunpack.c.h.s8.bf16 %v1137_v15  ;;  %v2339_v34 = vunpack.c.h.s8.bf16 %v1139_v28  ;;  %v2356_v23 = vunpack.c.l.s8.bf16 %v1156_v32  ;;  %v2418_v15 = vunpack.c.l.s8.bf16 %v1186_v16 }
 0x781   :  { %6374 = vmatprep.subr.bf16.mxu1 %v2260_v38  ;;  %v1153_v38 = vld [vmem:[#allocation8 + $0x5e0] sm:$0xff] }
 0x782   :  { %6038 = vmatmul.mubr.bf16.vlgmr.msra.gmra.mrb[28].mxu0 %v9463_v5 }
 0x783   :  { %6366 = vmatmul.mubr.bf16.vlgmr.msra.gmra.mrb[28].mxu1 %v9463_v5  ;;  %6047 = vmatpush1.bf16.msra.mxu0 %v2257_v39  ;;  %v2306_v5 = vunpack.c.h.s8.bf16 %v1122_v59  ;;  %v1155_v39 = vld [vmem:[#allocation8 + $0x5f0] sm:$0xff]  ;;  %v2370_v59 = vunpack.c.h.s8.bf16 %v1154_v40 }
 0x784   :  { %6078 = vmatprep.mubr.bf16.mxu0 %v9469_v10  ;;  %6375 = vmatpush1.bf16.msra.mxu1 %v2259_v49  ;;  %v2353_v49 = vunpack.c.l.s8.bf16 %v1153_v38 }
 0x785   :  { %6406 = vmatprep.mubr.bf16.mxu1 %v9469_v10  ;;  %6048 = vmatprep.subr.bf16.mxu0 %v2274_v52  ;;  %v2322_v10 = vunpack.c.l.s8.bf16 %v1138_v60  ;;  %v2355_v52 = vunpack.c.l.s8.bf16 %v1155_v39 }
 0x786   :  { %6376 = vmatprep.subr.bf16.mxu1 %v2276_v13  ;;  %v2372_v13 = vunpack.c.h.s8.bf16 %v1156_v32  ;;  %v1202_v32 = vld [vmem:[#allocation8 + $0x768] sm:$0xff] }
 0x787   :  { %6049 = vmatpush1.bf16.msra.mxu0 %v2273_v62  ;;  %v1172_v62 = vld [vmem:[#allocation8 + $0x678] sm:$0xff] }
 0x788   :  { %6377 = vmatpush1.bf16.msra.mxu1 %v2275_v42  ;;  %6050 = vmatprep.subr.bf16.mxu0 %v2290_v17  ;;  %v2369_v42 = vunpack.c.h.s8.bf16 %v1153_v38  ;;  %v2371_v17 = vunpack.c.h.s8.bf16 %v1155_v39  ;;  %v2388_v24 = vunpack.c.l.s8.bf16 %v1172_v62  ;;  %v2404_v60 = vunpack.c.h.s8.bf16 %v1172_v62  ;;  %v1218_v62 = vld [vmem:[#allocation8 + $0x7e8] sm:$0xff] }
 0x789   :  { %6378 = vmatprep.subr.bf16.mxu1 %v2292_v7  ;;  %v1169_v7 = vld [vmem:[#allocation8 + $0x660] sm:$0xff]  ;;  %v2450_v38 = vunpack.c.l.s8.bf16 %v1202_v32 }
 0x78b   :  { %6051 = vmatpush1.bf16.msra.mxu0 %v2289_v8  ;;  %v1171_v8 = vld [vmem:[#allocation8 + $0x670] sm:$0xff] }
 0x78c   :  { %6379 = vmatpush1.bf16.msra.mxu1 %v2291_v9  ;;  %6052 = vmatprep.subr.bf16.mxu0 %v2306_v5  ;;  %v2385_v9 = vunpack.c.l.s8.bf16 %v1169_v7  ;;  %v2387_v5 = vunpack.c.l.s8.bf16 %v1171_v8 }
 0x78d   :  { %6380 = vmatprep.subr.bf16.mxu1 %v2308_v0  ;;  %v2402_v0 = vunpack.c.h.s8.bf16 %v1170_v58 }
 0x78f   :  { %6053 = vmatpush1.bf16.msra.mxu0 %v2305_v18  ;;  %v1188_v18 = vld [vmem:[#allocation8 + $0x6f8] sm:$0xff] }
 0x790   :  { %6381 = vmatpush1.bf16.msra.mxu1 %v2307_v11  ;;  %6054 = vmatprep.subr.bf16.mxu0 %v2322_v10  ;;  %v2401_v11 = vunpack.c.h.s8.bf16 %v1169_v7  ;;  %v2403_v10 = vunpack.c.h.s8.bf16 %v1171_v8  ;;  %v2420_v28 = vunpack.c.l.s8.bf16 %v1188_v18  ;;  %v2436_v40 = vunpack.c.h.s8.bf16 %v1188_v18  ;;  %v1234_v18 = vld [vmem:[#allocation8 + $0x868] sm:$0xff] }
 0x791   :  { %6382 = vmatprep.subr.bf16.mxu1 %v2324_v27  ;;  %v1185_v27 = vld [vmem:[#allocation8 + $0x6e0] sm:$0xff]  ;;  %v2482_v7 = vunpack.c.l.s8.bf16 %v1218_v62 }
 0x793   :  { %6055 = vmatpush1.bf16.msra.mxu0 %v2321_v2  ;;  %v1187_v2 = vld [vmem:[#allocation8 + $0x6f0] sm:$0xff] }
 0x794   :  { %6383 = vmatpush1.bf16.msra.mxu1 %v2323_v1  ;;  %6056 = vmatprep.subr.bf16.mxu0 %v2338_v29  ;;  %v2417_v1 = vunpack.c.l.s8.bf16 %v1185_v27  ;;  %v2419_v29 = vunpack.c.l.s8.bf16 %v1187_v2 }
 0x795   :  { %6384 = vmatprep.subr.bf16.mxu1 %v2340_v30  ;;  %v2434_v30 = vunpack.c.h.s8.bf16 %v1186_v16 }
 0x797   :  { %6057 = vmatpush1.bf16.msra.mxu0 %v2337_v44  ;;  %v1204_v44 = vld [vmem:[#allocation8 + $0x778] sm:$0xff] }
 0x798   :  { %6385 = vmatpush1.bf16.msra.mxu1 %v2339_v34  ;;  %6058 = vmatprep.subr.bf16.mxu0 %v2354_v37  ;;  %v2433_v34 = vunpack.c.h.s8.bf16 %v1185_v27  ;;  %v2435_v37 = vunpack.c.h.s8.bf16 %v1187_v2  ;;  %v2452_v39 = vunpack.c.l.s8.bf16 %v1204_v44  ;;  %v2468_v58 = vunpack.c.h.s8.bf16 %v1204_v44 }
 0x799   :  { %6386 = vmatprep.subr.bf16.mxu1 %v2356_v23  ;;  %v1201_v23 = vld [vmem:[#allocation8 + $0x760] sm:$0xff]  ;;  %v2514_v27 = vunpack.c.l.s8.bf16 %v1234_v18 }
 0x79b   :  { %6059 = vmatpush1.bf16.msra.mxu0 %v2353_v49  ;;  %v1203_v49 = vld [vmem:[#allocation8 + $0x770] sm:$0xff] }
 0x79c   :  { %6387 = vmatpush1.bf16.msra.mxu1 %v2355_v52  ;;  %6060 = vmatprep.subr.bf16.mxu0 %v2370_v59  ;;  %v2449_v52 = vunpack.c.l.s8.bf16 %v1201_v23  ;;  %v2451_v59 = vunpack.c.l.s8.bf16 %v1203_v49 }
 0x79d   :  { %6388 = vmatprep.subr.bf16.mxu1 %v2372_v13  ;;  %v2466_v13 = vunpack.c.h.s8.bf16 %v1202_v32  ;;  %v1250_v32 = vld [vmem:[#allocation8 + $0x8e8] sm:$0xff] }
 0x79f   :  { %6061 = vmatpush1.bf16.msra.mxu0 %v2369_v42  ;;  %v1220_v42 = vld [vmem:[#allocation8 + $0x7f8] sm:$0xff] }
 0x7a0   :  { %6389 = vmatpush1.bf16.msra.mxu1 %v2371_v17  ;;  %6062 = vmatprep.subr.bf16.mxu0 %v2386_v6  ;;  %v2465_v17 = vunpack.c.h.s8.bf16 %v1201_v23  ;;  %v2467_v6 = vunpack.c.h.s8.bf16 %v1203_v49  ;;  %v2484_v8 = vunpack.c.l.s8.bf16 %v1220_v42  ;;  %v2500_v16 = vunpack.c.h.s8.bf16 %v1220_v42  ;;  %v1268_v42 = vld [vmem:[#allocation8 + $0x978] sm:$0xff] }
 0x7a1   :  { %6390 = vmatprep.subr.bf16.mxu1 %v2388_v24  ;;  %v1217_v24 = vld [vmem:[#allocation8 + $0x7e0] sm:$0xff]  ;;  %v2546_v23 = vunpack.c.l.s8.bf16 %v1250_v32 }
 0x7a3   :  { %6063 = vmatpush1.bf16.msra.mxu0 %v2385_v9  ;;  %v1219_v9 = vld [vmem:[#allocation8 + $0x7f0] sm:$0xff] }
 0x7a4   :  { %6391 = vmatpush1.bf16.msra.mxu1 %v2387_v5  ;;  %6064 = vmatprep.subr.bf16.mxu0 %v2402_v0  ;;  %v2481_v5 = vunpack.c.l.s8.bf16 %v1217_v24  ;;  %v2483_v0 = vunpack.c.l.s8.bf16 %v1219_v9 }
 0x7a5   :  { %6392 = vmatprep.subr.bf16.mxu1 %v2404_v60  ;;  %v2498_v60 = vunpack.c.h.s8.bf16 %v1218_v62  ;;  %v1266_v62 = vld [vmem:[#allocation8 + $0x968] sm:$0xff] }
 0x7a7   :  { %6065 = vmatpush1.bf16.msra.mxu0 %v2401_v11  ;;  %v1236_v11 = vld [vmem:[#allocation8 + $0x878] sm:$0xff] }
 0x7a8   :  { %6393 = vmatpush1.bf16.msra.mxu1 %v2403_v10  ;;  %6066 = vmatprep.subr.bf16.mxu0 %v2418_v15  ;;  %v2497_v10 = vunpack.c.h.s8.bf16 %v1217_v24  ;;  %v2499_v15 = vunpack.c.h.s8.bf16 %v1219_v9  ;;  %v2516_v2 = vunpack.c.l.s8.bf16 %v1236_v11  ;;  %v2532_v44 = vunpack.c.h.s8.bf16 %v1236_v11 }
 0x7a9   :  { %6394 = vmatprep.subr.bf16.mxu1 %v2420_v28  ;;  %v1233_v28 = vld [vmem:[#allocation8 + $0x860] sm:$0xff]  ;;  %v2580_v24 = vunpack.c.l.s8.bf16 %v1268_v42 }
 0x7ab   :  { %6067 = vmatpush1.bf16.msra.mxu0 %v2417_v1  ;;  %v1235_v1 = vld [vmem:[#allocation8 + $0x870] sm:$0xff] }
 0x7ac   :  { %6395 = vmatpush1.bf16.msra.mxu1 %v2419_v29  ;;  %6068 = vmatprep.subr.bf16.mxu0 %v2434_v30  ;;  %v2513_v29 = vunpack.c.l.s8.bf16 %v1233_v28  ;;  %v2515_v30 = vunpack.c.l.s8.bf16 %v1235_v1 }
 0x7ad   :  { %6396 = vmatprep.subr.bf16.mxu1 %v2436_v40  ;;  %v2530_v40 = vunpack.c.h.s8.bf16 %v1234_v18  ;;  %v1284_v18 = vld [vmem:[#allocation8 + $0x9f8] sm:$0xff] }
 0x7af   :  { %6069 = vmatpush1.bf16.msra.mxu0 %v2433_v34  ;;  %v1252_v34 = vld [vmem:[#allocation8 + $0x8f8] sm:$0xff] }
 0x7b0   :  { %6397 = vmatpush1.bf16.msra.mxu1 %v2435_v37  ;;  %6070 = vmatprep.subr.bf16.mxu0 %v2450_v38  ;;  %v2529_v37 = vunpack.c.h.s8.bf16 %v1233_v28  ;;  %v2531_v38 = vunpack.c.h.s8.bf16 %v1235_v1  ;;  %v2548_v49 = vunpack.c.l.s8.bf16 %v1252_v34  ;;  %v2612_v28 = vunpack.c.l.s8.bf16 %v1284_v18 }
 0x7b1   :  { %6398 = vmatprep.subr.bf16.mxu1 %v2452_v39  ;;  %v1249_v39 = vld [vmem:[#allocation8 + $0x8e0] sm:$0xff] }
 0x7b3   :  { %6071 = vmatpush1.bf16.msra.mxu0 %v2449_v52  ;;  %v1251_v52 = vld [vmem:[#allocation8 + $0x8f0] sm:$0xff] }
 0x7b4   :  { %6399 = vmatpush1.bf16.msra.mxu1 %v2451_v59  ;;  %6072 = vmatprep.subr.bf16.mxu0 %v2466_v13  ;;  %v2545_v59 = vunpack.c.l.s8.bf16 %v1249_v39  ;;  %v2547_v13 = vunpack.c.l.s8.bf16 %v1251_v52 }
 0x7b5   :  { %6400 = vmatprep.subr.bf16.mxu1 %v2468_v58  ;;  %v2564_v58 = vunpack.c.h.s8.bf16 %v1252_v34 }
 0x7b7   :  { %6073 = vmatpush1.bf16.msra.mxu0 %v2465_v17  ;;  %v2561_v17 = vunpack.c.h.s8.bf16 %v1249_v39 }
 0x7b8   :  { %6401 = vmatpush1.bf16.msra.mxu1 %v2467_v6  ;;  %6074 = vmatprep.subr.bf16.mxu0 %v2482_v7  ;;  %v2563_v6 = vunpack.c.h.s8.bf16 %v1251_v52  ;;  %v1265_v7 = vld [vmem:[#allocation8 + $0x960] sm:$0xff] }
 0x7b9   :  { %6402 = vmatprep.subr.bf16.mxu1 %v2484_v8  ;;  %v1267_v8 = vld [vmem:[#allocation8 + $0x970] sm:$0xff]  ;;  %v2577_v9 = vunpack.c.l.s8.bf16 %v1265_v7  ;;  %v2593_v11 = vunpack.c.h.s8.bf16 %v1265_v7 }
 0x7bb   :  { %6075 = vmatpush1.bf16.msra.mxu0 %v2481_v5  ;;  %v2579_v5 = vunpack.c.l.s8.bf16 %v1267_v8 }
 0x7bc   :  { %6403 = vmatpush1.bf16.msra.mxu1 %v2483_v0  ;;  %6076 = vmatprep.subr.bf16.mxu0 %v2498_v60  ;;  %v2594_v0 = vunpack.c.h.s8.bf16 %v1266_v62  ;;  %v2596_v60 = vunpack.c.h.s8.bf16 %v1268_v42 }
 0x7bd   :  { %6404 = vmatprep.subr.bf16.mxu1 %v2500_v16  ;;  %v1282_v16 = vld [vmem:[#allocation8 + $0x9e8] sm:$0xff] }
 0x7bf   :  { %6077 = vmatpush1.bf16.msra.mxu0 %v2497_v10  ;;  %v2595_v10 = vunpack.c.h.s8.bf16 %v1267_v8 }
 0x7c0   :  { %6405 = vmatpush1.bf16.msra.mxu1 %v2499_v15  ;;  %6087 = vmatprep.subr.bf16.mxu0 %v2514_v27  ;;  %v2610_v15 = vunpack.c.l.s8.bf16 %v1282_v16  ;;  %v1281_v27 = vld [vmem:[#allocation8 + $0x9e0] sm:$0xff] }
 0x7c1   :  { %6415 = vmatprep.subr.bf16.mxu1 %v2516_v2  ;;  %v1283_v2 = vld [vmem:[#allocation8 + $0x9f0] sm:$0xff]  ;;  %v2609_v1 = vunpack.c.l.s8.bf16 %v1281_v27  ;;  %v2625_v34 = vunpack.c.h.s8.bf16 %v1281_v27 }
 0x7c2   :  { %6079 = vmatmul.mubr.bf16.vlgmr.msra.gmra.mrb[28].mxu0 %v9532_v4 }
 0x7c3   :  { %6407 = vmatmul.mubr.bf16.vlgmr.msra.gmra.mrb[28].mxu1 %v9532_v4  ;;  %6088 = vmatpush1.bf16.msra.mxu0 %v2513_v29  ;;  %v2562_v4 = vunpack.c.h.s8.bf16 %v1250_v32  ;;  %v2611_v29 = vunpack.c.l.s8.bf16 %v1283_v2  ;;  %v1298_v32 = vld [vmem:[#allocation8 + $0xa68] sm:$0xff] }
 0x7c4   :  { %6119 = vmatprep.mubr.bf16.mxu0 %v9534_v12  ;;  %6416 = vmatpush1.bf16.msra.mxu1 %v2515_v30  ;;  %v2626_v30 = vunpack.c.h.s8.bf16 %v1282_v16  ;;  %v1332_v16 = vld [vmem:[#allocation8 + $0xb78] sm:$0xff] }
 0x7c5   :  { %6447 = vmatprep.mubr.bf16.mxu1 %v9534_v12  ;;  %6089 = vmatprep.subr.bf16.mxu0 %v2530_v40  ;;  %v2578_v12 = vunpack.c.l.s8.bf16 %v1266_v62  ;;  %v2628_v40 = vunpack.c.h.s8.bf16 %v1284_v18  ;;  %v1316_v62 = vld [vmem:[#allocation8 + $0xaf8] sm:$0xff]  ;;  %v2708_v27 = vunpack.c.l.s8.bf16 %v1332_v16 }
 0x7c6   :  { %6417 = vmatprep.subr.bf16.mxu1 %v2532_v44  ;;  %v1300_v44 = vld [vmem:[#allocation8 + $0xa78] sm:$0xff]  ;;  %v2676_v7 = vunpack.c.l.s8.bf16 %v1316_v62 }
 0x7c7   :  { %6090 = vmatpush1.bf16.msra.mxu0 %v2529_v37  ;;  %v2627_v37 = vunpack.c.h.s8.bf16 %v1283_v2  ;;  %v2644_v39 = vunpack.c.l.s8.bf16 %v1300_v44 }
 0x7c8   :  { %6418 = vmatpush1.bf16.msra.mxu1 %v2531_v38  ;;  %6091 = vmatprep.subr.bf16.mxu0 %v2546_v23  ;;  %v2642_v38 = vunpack.c.l.s8.bf16 %v1298_v32  ;;  %v1297_v23 = vld [vmem:[#allocation8 + $0xa60] sm:$0xff] }
 0x7c9   :  { %6419 = vmatprep.subr.bf16.mxu1 %v2548_v49  ;;  %v1299_v49 = vld [vmem:[#allocation8 + $0xa70] sm:$0xff]  ;;  %v2641_v52 = vunpack.c.l.s8.bf16 %v1297_v23  ;;  %v2657_v42 = vunpack.c.h.s8.bf16 %v1297_v23 }
 0x7cb   :  { %6092 = vmatpush1.bf16.msra.mxu0 %v2545_v59  ;;  %v2643_v59 = vunpack.c.l.s8.bf16 %v1299_v49 }
 0x7cc   :  { %6420 = vmatpush1.bf16.msra.mxu1 %v2547_v13  ;;  %6093 = vmatprep.subr.bf16.mxu0 %v2562_v4  ;;  %v2658_v13 = vunpack.c.h.s8.bf16 %v1298_v32  ;;  %v2660_v4 = vunpack.c.h.s8.bf16 %v1300_v44  ;;  %v1348_v32 = vld [vmem:[#allocation8 + $0xbf8] sm:$0xff] }
 0x7cd   :  { %6421 = vmatprep.subr.bf16.mxu1 %v2564_v58  ;;  %v1314_v58 = vld [vmem:[#allocation8 + $0xae8] sm:$0xff]  ;;  %v2740_v23 = vunpack.c.l.s8.bf16 %v1348_v32 }
 0x7cf   :  { %6094 = vmatpush1.bf16.msra.mxu0 %v2561_v17  ;;  %v2659_v17 = vunpack.c.h.s8.bf16 %v1299_v49 }
 0x7d0   :  { %6422 = vmatpush1.bf16.msra.mxu1 %v2563_v6  ;;  %6095 = vmatprep.subr.bf16.mxu0 %v2578_v12  ;;  %v2674_v6 = vunpack.c.l.s8.bf16 %v1314_v58  ;;  %v1313_v12 = vld [vmem:[#allocation8 + $0xae0] sm:$0xff] }
 0x7d1   :  { %6423 = vmatprep.subr.bf16.mxu1 %v2580_v24  ;;  %v1315_v24 = vld [vmem:[#allocation8 + $0xaf0] sm:$0xff]  ;;  %v2673_v8 = vunpack.c.l.s8.bf16 %v1313_v12  ;;  %v2689_v18 = vunpack.c.h.s8.bf16 %v1313_v12 }
 0x7d3   :  { %6096 = vmatpush1.bf16.msra.mxu0 %v2577_v9  ;;  %v2675_v9 = vunpack.c.l.s8.bf16 %v1315_v24 }
 0x7d4   :  { %6424 = vmatpush1.bf16.msra.mxu1 %v2579_v5  ;;  %6097 = vmatprep.subr.bf16.mxu0 %v2594_v0  ;;  %v2690_v5 = vunpack.c.h.s8.bf16 %v1314_v58  ;;  %v2692_v0 = vunpack.c.h.s8.bf16 %v1316_v62  ;;  %v1364_v58 = vld [vmem:[#allocation8 + $0xc78] sm:$0xff] }
 0x7d5   :  { %6425 = vmatprep.subr.bf16.mxu1 %v2596_v60  ;;  %v1330_v60 = vld [vmem:[#allocation8 + $0xb68] sm:$0xff]  ;;  %v2772_v12 = vunpack.c.l.s8.bf16 %v1364_v58 }
 0x7d7   :  { %6098 = vmatpush1.bf16.msra.mxu0 %v2593_v11  ;;  %v2691_v11 = vunpack.c.h.s8.bf16 %v1315_v24 }
 0x7d8   :  { %6426 = vmatpush1.bf16.msra.mxu1 %v2595_v10  ;;  %6099 = vmatprep.subr.bf16.mxu0 %v2610_v15  ;;  %v2706_v10 = vunpack.c.l.s8.bf16 %v1330_v60  ;;  %v1329_v15 = vld [vmem:[#allocation8 + $0xb60] sm:$0xff] }
 0x7d9   :  { %6427 = vmatprep.subr.bf16.mxu1 %v2612_v28  ;;  %v1331_v28 = vld [vmem:[#allocation8 + $0xb70] sm:$0xff]  ;;  %v2705_v2 = vunpack.c.l.s8.bf16 %v1329_v15  ;;  %v2721_v44 = vunpack.c.h.s8.bf16 %v1329_v15 }
 0x7db   :  { %6100 = vmatpush1.bf16.msra.mxu0 %v2609_v1  ;;  %v2707_v1 = vunpack.c.l.s8.bf16 %v1331_v28 }
 0x7dc   :  { %6428 = vmatpush1.bf16.msra.mxu1 %v2611_v29  ;;  %6101 = vmatprep.subr.bf16.mxu0 %v2626_v30  ;;  %v2722_v29 = vunpack.c.h.s8.bf16 %v1330_v60  ;;  %v2724_v30 = vunpack.c.h.s8.bf16 %v1332_v16  ;;  %v1380_v60 = vld [vmem:[#allocation8 + $0xcf8] sm:$0xff] }
 0x7dd   :  { %6429 = vmatprep.subr.bf16.mxu1 %v2628_v40  ;;  %v1346_v40 = vld [vmem:[#allocation8 + $0xbe8] sm:$0xff]  ;;  %v2804_v15 = vunpack.c.l.s8.bf16 %v1380_v60 }
 0x7df   :  { %6102 = vmatpush1.bf16.msra.mxu0 %v2625_v34  ;;  %v2723_v34 = vunpack.c.h.s8.bf16 %v1331_v28 }
 0x7e0   :  { %6430 = vmatpush1.bf16.msra.mxu1 %v2627_v37  ;;  %6103 = vmatprep.subr.bf16.mxu0 %v2642_v38  ;;  %v2738_v37 = vunpack.c.l.s8.bf16 %v1346_v40  ;;  %v1345_v38 = vld [vmem:[#allocation8 + $0xbe0] sm:$0xff] }
 0x7e1   :  { %6431 = vmatprep.subr.bf16.mxu1 %v2644_v39  ;;  %v1347_v39 = vld [vmem:[#allocation8 + $0xbf0] sm:$0xff]  ;;  %v2737_v49 = vunpack.c.l.s8.bf16 %v1345_v38  ;;  %v2753_v62 = vunpack.c.h.s8.bf16 %v1345_v38 }
 0x7e3   :  { %6104 = vmatpush1.bf16.msra.mxu0 %v2641_v52  ;;  %v2739_v52 = vunpack.c.l.s8.bf16 %v1347_v39 }
 0x7e4   :  { %6432 = vmatpush1.bf16.msra.mxu1 %v2643_v59  ;;  %6105 = vmatprep.subr.bf16.mxu0 %v2658_v13  ;;  %v2754_v59 = vunpack.c.h.s8.bf16 %v1346_v40  ;;  %v2756_v13 = vunpack.c.h.s8.bf16 %v1348_v32 }
 0x7e5   :  { %6433 = vmatprep.subr.bf16.mxu1 %v2660_v4  ;;  %v1362_v4 = vld [vmem:[#allocation8 + $0xc68] sm:$0xff] }
 0x7e7   :  { %6106 = vmatpush1.bf16.msra.mxu0 %v2657_v42  ;;  %v2755_v42 = vunpack.c.h.s8.bf16 %v1347_v39 }
 0x7e8   :  { %6434 = vmatpush1.bf16.msra.mxu1 %v2659_v17  ;;  %6107 = vmatprep.subr.bf16.mxu0 %v2674_v6  ;;  %v2770_v17 = vunpack.c.l.s8.bf16 %v1362_v4  ;;  %v1361_v6 = vld [vmem:[#allocation8 + $0xc60] sm:$0xff] }
 0x7e9   :  { %6435 = vmatprep.subr.bf16.mxu1 %v2676_v7  ;;  %v1363_v7 = vld [vmem:[#allocation8 + $0xc70] sm:$0xff]  ;;  %v2769_v24 = vunpack.c.l.s8.bf16 %v1361_v6  ;;  %v2785_v16 = vunpack.c.h.s8.bf16 %v1361_v6 }
 0x7ea   :  { %v1411_v6 = vld [vmem:[#allocation8 + $0xdf0] sm:$0xff] }
 0x7eb   :  { %6108 = vmatpush1.bf16.msra.mxu0 %v2673_v8  ;;  %v2771_v8 = vunpack.c.l.s8.bf16 %v1363_v7 }
 0x7ec   :  { %6436 = vmatpush1.bf16.msra.mxu1 %v2675_v9  ;;  %6109 = vmatprep.subr.bf16.mxu0 %v2690_v5  ;;  %v2786_v9 = vunpack.c.h.s8.bf16 %v1362_v4  ;;  %v1378_v5 = vld [vmem:[#allocation8 + $0xce8] sm:$0xff] }
 0x7ed   :  { %6437 = vmatprep.subr.bf16.mxu1 %v2692_v0  ;;  %v2788_v0 = vunpack.c.h.s8.bf16 %v1364_v58 }
 0x7ef   :  { %6110 = vmatpush1.bf16.msra.mxu0 %v2689_v18  ;;  %v2787_v18 = vunpack.c.h.s8.bf16 %v1363_v7 }
 0x7f0   :  { %6438 = vmatpush1.bf16.msra.mxu1 %v2691_v11  ;;  %6111 = vmatprep.subr.bf16.mxu0 %v2706_v10  ;;  %v2802_v11 = vunpack.c.l.s8.bf16 %v1378_v5  ;;  %v1377_v10 = vld [vmem:[#allocation8 + $0xce0] sm:$0xff] }
 0x7f1   :  { %6439 = vmatprep.subr.bf16.mxu1 %v2708_v27  ;;  %v1379_v27 = vld [vmem:[#allocation8 + $0xcf0] sm:$0xff]  ;;  %v2801_v28 = vunpack.c.l.s8.bf16 %v1377_v10  ;;  %v2817_v40 = vunpack.c.h.s8.bf16 %v1377_v10  ;;  %v1426_v10 = vld [vmem:[#allocation8 + $0xe68] sm:$0xff] }
 0x7f2   :  { %v2819_v32 = vunpack.c.h.s8.bf16 %v1379_v27 }
 0x7f3   :  { %6112 = vmatpush1.bf16.msra.mxu0 %v2705_v2  ;;  %v2803_v2 = vunpack.c.l.s8.bf16 %v1379_v27 }
 0x7f4   :  { %6440 = vmatpush1.bf16.msra.mxu1 %v2707_v1  ;;  %6113 = vmatprep.subr.bf16.mxu0 %v2722_v29  ;;  %v2820_v1 = vunpack.c.h.s8.bf16 %v1380_v60  ;;  %v1394_v29 = vld [vmem:[#allocation8 + $0xd68] sm:$0xff]  ;;  %v2867_v60 = vunpack.c.l.s8.bf16 %v1411_v6 }
 0x7f5   :  { %6441 = vmatprep.subr.bf16.mxu1 %v2724_v30  ;;  %v1396_v30 = vld [vmem:[#allocation8 + $0xd78] sm:$0xff]  ;;  %v2850_v39 = vunpack.c.h.s8.bf16 %v1394_v29 }
 0x7f7   :  { %6114 = vmatpush1.bf16.msra.mxu0 %v2721_v44  ;;  %v1393_v44 = vld [vmem:[#allocation8 + $0xd60] sm:$0xff] }
 0x7f8   :  { %6442 = vmatpush1.bf16.msra.mxu1 %v2723_v34  ;;  %6115 = vmatprep.subr.bf16.mxu0 %v2738_v37  ;;  %v2836_v34 = vunpack.c.l.s8.bf16 %v1396_v30  ;;  %v1395_v37 = vld [vmem:[#allocation8 + $0xd70] sm:$0xff]  ;;  %v2833_v38 = vunpack.c.l.s8.bf16 %v1393_v44 }
 0x7f9   :  { %6443 = vmatprep.subr.bf16.mxu1 %v2740_v23  ;;  %v2835_v23 = vunpack.c.l.s8.bf16 %v1395_v37  ;;  %v2851_v4 = vunpack.c.h.s8.bf16 %v1395_v37 }
 0x7fb   :  { %6116 = vmatpush1.bf16.msra.mxu0 %v2737_v49  ;;  %v2852_v49 = vunpack.c.h.s8.bf16 %v1396_v30 }
 0x7fc   :  { %6444 = vmatpush1.bf16.msra.mxu1 %v2739_v52  ;;  %6117 = vmatprep.subr.bf16.mxu0 %v2754_v59  ;;  %v1410_v52 = vld [vmem:[#allocation8 + $0xde8] sm:$0xff]  ;;  %v1412_v59 = vld [vmem:[#allocation8 + $0xdf8] sm:$0xff] }
 0x7fd   :  { %6445 = vmatprep.subr.bf16.mxu1 %v2756_v13  ;;  %v2849_v13 = vunpack.c.h.s8.bf16 %v1393_v44  ;;  %v2866_v58 = vunpack.c.l.s8.bf16 %v1410_v52  ;;  %v1442_v44 = vld [vmem:[#allocation8 + $0xee8] sm:$0xff] }
 0x7ff   :  { %6118 = vmatpush1.bf16.msra.mxu0 %v2753_v62  ;;  %v1409_v62 = vld [vmem:[#allocation8 + $0xde0] sm:$0xff] }
 0x800   :  { %6446 = vmatpush1.bf16.msra.mxu1 %v2755_v42  ;;  %6128 = vmatprep.subr.bf16.mxu0 %v2770_v17  ;;  %v2868_v17 = vunpack.c.l.s8.bf16 %v1412_v59  ;;  %v2881_v27 = vunpack.c.h.s8.bf16 %v1409_v62 }
 0x801   :  { %6456 = vmatprep.subr.bf16.mxu1 %v2772_v12 }
 0x802   :  { %6120 = vmatmul.mubr.bf16.vlgmr.msra.gmra.mrb[28].mxu0 %v9546_v46 }
 0x803   :  { %6448 = vmatmul.mubr.bf16.vlgmr.msra.gmra.mrb[28].mxu1 %v9546_v46  ;;  %6129 = vmatpush1.bf16.msra.mxu0 %v2769_v24  ;;  %v2818_v46 = vunpack.c.h.s8.bf16 %v1378_v5 }
 0x804   :  { %6160 = vmatprep.mubr.bf16.mxu0 %v9548_v48  ;;  %6457 = vmatpush1.bf16.msra.mxu1 %v2771_v8 }
 0x805   :  { %6488 = vmatprep.mubr.bf16.mxu1 %v9548_v48  ;;  %6130 = vmatprep.subr.bf16.mxu0 %v2786_v9  ;;  %v2834_v48 = vunpack.c.l.s8.bf16 %v1394_v29  ;;  %v2865_v9 = vunpack.c.l.s8.bf16 %v1409_v62  ;;  %v1427_v29 = vld [vmem:[#allocation8 + $0xe70] sm:$0xff]  ;;  %v1458_v62 = vld [vmem:[#allocation8 + $0xf68] sm:$0xff] }
 0x806   :  { %6458 = vmatprep.subr.bf16.mxu1 %v2788_v0 }
 0x807   :  { %6131 = vmatpush1.bf16.msra.mxu0 %v2785_v16  ;;  %v2882_v16 = vunpack.c.h.s8.bf16 %v1410_v52  ;;  %v1443_v52 = vld [vmem:[#allocation8 + $0xef0] sm:$0xff] }
 0x808   :  { %6459 = vmatpush1.bf16.msra.mxu1 %v2787_v18  ;;  %6132 = vmatprep.subr.bf16.mxu0 %v2802_v11  ;;  %v2884_v11 = vunpack.c.h.s8.bf16 %v1412_v59 }
 0x809   :  { %6460 = vmatprep.subr.bf16.mxu1 %v2804_v15  ;;  %v1428_v15 = vld [vmem:[#allocation8 + $0xe78] sm:$0xff] }
 0x80b   :  { %6133 = vmatpush1.bf16.msra.mxu0 %v2801_v28  ;;  %v2883_v28 = vunpack.c.h.s8.bf16 %v1411_v6 }
 0x80c   :  { %6461 = vmatpush1.bf16.msra.mxu1 %v2803_v2  ;;  %6134 = vmatprep.subr.bf16.mxu0 %v2818_v46  ;;  %v2898_v2 = vunpack.c.l.s8.bf16 %v1426_v10  ;;  %v1425_v46 = vld [vmem:[#allocation8 + $0xe60] sm:$0xff] }
 0x80d   :  { %6462 = vmatprep.subr.bf16.mxu1 %v2820_v1  ;;  %v2900_v1 = vunpack.c.l.s8.bf16 %v1428_v15  ;;  %v2897_v30 = vunpack.c.l.s8.bf16 %v1425_v46  ;;  %v2913_v37 = vunpack.c.h.s8.bf16 %v1425_v46 }
 0x80f   :  { %6135 = vmatpush1.bf16.msra.mxu0 %v2817_v40  ;;  %v2899_v40 = vunpack.c.l.s8.bf16 %v1427_v29 }
 0x810   :  { %6463 = vmatpush1.bf16.msra.mxu1 %v2819_v32  ;;  %6136 = vmatprep.subr.bf16.mxu0 %v2834_v48  ;;  %v2914_v32 = vunpack.c.h.s8.bf16 %v1426_v10  ;;  %v2916_v48 = vunpack.c.h.s8.bf16 %v1428_v15  ;;  %v1474_v15 = vld [vmem:[#allocation8 + $0xfe8] sm:$0xff] }
 0x811   :  { %6464 = vmatprep.subr.bf16.mxu1 %v2836_v34  ;;  %v1444_v34 = vld [vmem:[#allocation8 + $0xef8] sm:$0xff]  ;;  %v2994_v46 = vunpack.c.l.s8.bf16 %v1474_v15 }
 0x813   :  { %6137 = vmatpush1.bf16.msra.mxu0 %v2833_v38  ;;  %v2915_v38 = vunpack.c.h.s8.bf16 %v1427_v29 }
 0x814   :  { %6465 = vmatpush1.bf16.msra.mxu1 %v2835_v23  ;;  %6138 = vmatprep.subr.bf16.mxu0 %v2850_v39  ;;  %v2930_v23 = vunpack.c.l.s8.bf16 %v1442_v44  ;;  %v1441_v39 = vld [vmem:[#allocation8 + $0xee0] sm:$0xff] }
 0x815   :  { %v9697_v42 = vpop.f32.mrb[24].mxu0  ;;  %6466 = vmatprep.subr.bf16.mxu1 %v2852_v49  ;;  %v2932_v49 = vunpack.c.l.s8.bf16 %v1444_v34  ;;  %v2929_v59 = vunpack.c.l.s8.bf16 %v1441_v39  ;;  %v2945_v6 = vunpack.c.h.s8.bf16 %v1441_v39 }
 0x816   :  { %v9699_v12 = vpop.f32.mrb[24].mxu1  ;;  %v9701_v7 = vpop.f32.mrb[25].mxu0 }
 0x817   :  { %v9703_v24 = vpop.f32.mrb[25].mxu1  ;;  %v5674_v8 = vpop.f32.mrb[26].mxu0  ;;  %6139 = vmatpush1.bf16.msra.mxu0 %v2849_v13  ;;  %v2931_v13 = vunpack.c.l.s8.bf16 %v1443_v52 }
 0x818   :  { %v6002_v5 = vpop.f32.mrb[26].mxu1  ;;  %6467 = vmatpush1.bf16.msra.mxu1 %v2851_v4  ;;  %v5675_v0 = vpop.f32.mrb[27].mxu0  ;;  %6140 = vmatprep.subr.bf16.mxu0 %v2866_v58  ;;  %v2946_v4 = vunpack.c.h.s8.bf16 %v1442_v44  ;;  %v2948_v58 = vunpack.c.h.s8.bf16 %v1444_v34  ;;  %v2947_v8 = vunpack.c.h.s8.bf16 %v1443_v52  ;;  %v1490_v34 = vld [vmem:[#allocation8 + $0x1068] sm:$0xff] }
 0x819   :  { %v6003_v18 = vpop.f32.mrb[27].mxu1  ;;  %6468 = vmatprep.subr.bf16.mxu1 %v2868_v17  ;;  %v1460_v17 = vld [vmem:[#allocation8 + $0xf78] sm:$0xff]  ;;  %v1457_v5 = vld [vmem:[#allocation8 + $0xf60] sm:$0xff]  ;;  %v3026_v39 = vunpack.c.l.s8.bf16 %v1490_v34 }
 0x81a   :  { %v2964_v0 = vunpack.c.l.s8.bf16 %v1460_v17  ;;  %v2980_v10 = vunpack.c.h.s8.bf16 %v1460_v17 }
 0x81b   :  { %6141 = vmatpush1.bf16.msra.mxu0 %v2865_v9  ;;  %v2962_v9 = vunpack.c.l.s8.bf16 %v1458_v62 }
 0x81c   :  { %6469 = vmatpush1.bf16.msra.mxu1 %v2867_v60  ;;  %6142 = vmatprep.subr.bf16.mxu0 %v2882_v16  ;;  %v1459_v60 = vld [vmem:[#allocation8 + $0xf70] sm:$0xff]  ;;  %v2961_v16 = vunpack.c.l.s8.bf16 %v1457_v5 }
 0x81d   :  { %6470 = vmatprep.subr.bf16.mxu1 %v2884_v11  ;;  %v2963_v18 = vunpack.c.l.s8.bf16 %v1459_v60  ;;  %v2978_v11 = vunpack.c.h.s8.bf16 %v1458_v62  ;;  %v1506_v62 = vld [vmem:[#allocation8 + $0x10e8] sm:$0xff] }
 0x81f   :  { %6143 = vmatpush1.bf16.msra.mxu0 %v2881_v27  ;;  %v1476_v27 = vld [vmem:[#allocation8 + $0xff8] sm:$0xff] }
 0x820   :  { %6471 = vmatpush1.bf16.msra.mxu1 %v2883_v28  ;;  %6144 = vmatprep.subr.bf16.mxu0 %v2898_v2  ;;  %v2977_v28 = vunpack.c.h.s8.bf16 %v1457_v5  ;;  %v2979_v2 = vunpack.c.h.s8.bf16 %v1459_v60  ;;  %v2996_v29 = vunpack.c.l.s8.bf16 %v1476_v27  ;;  %v3012_v44 = vunpack.c.h.s8.bf16 %v1476_v27  ;;  %v1524_v27 = vld [vmem:[#allocation8 + $0x1178] sm:$0xff] }
 0x821   :  { %6472 = vmatprep.subr.bf16.mxu1 %v2900_v1  ;;  %v1473_v1 = vld [vmem:[#allocation8 + $0xfe0] sm:$0xff]  ;;  %v3058_v5 = vunpack.c.l.s8.bf16 %v1506_v62 }
 0x823   :  { %6145 = vmatpush1.bf16.msra.mxu0 %v2897_v30  ;;  %v1475_v30 = vld [vmem:[#allocation8 + $0xff0] sm:$0xff] }
 0x824   :  { %6473 = vmatpush1.bf16.msra.mxu1 %v2899_v40  ;;  %6146 = vmatprep.subr.bf16.mxu0 %v2914_v32  ;;  %v2993_v40 = vunpack.c.l.s8.bf16 %v1473_v1  ;;  %v2995_v32 = vunpack.c.l.s8.bf16 %v1475_v30 }
 0x825   :  { %6474 = vmatprep.subr.bf16.mxu1 %v2916_v48  ;;  %v3010_v48 = vunpack.c.h.s8.bf16 %v1474_v15  ;;  %v1522_v15 = vld [vmem:[#allocation8 + $0x1168] sm:$0xff] }
 0x827   :  { %6147 = vmatpush1.bf16.msra.mxu0 %v2913_v37  ;;  %v1492_v37 = vld [vmem:[#allocation8 + $0x1078] sm:$0xff] }
 0x828   :  { %6475 = vmatpush1.bf16.msra.mxu1 %v2915_v38  ;;  %6148 = vmatprep.subr.bf16.mxu0 %v2930_v23  ;;  %v3009_v38 = vunpack.c.h.s8.bf16 %v1473_v1  ;;  %v3011_v23 = vunpack.c.h.s8.bf16 %v1475_v30  ;;  %v3028_v52 = vunpack.c.l.s8.bf16 %v1492_v37  ;;  %v3044_v17 = vunpack.c.h.s8.bf16 %v1492_v37 }
 0x829   :  { %6476 = vmatprep.subr.bf16.mxu1 %v2932_v49  ;;  %v1489_v49 = vld [vmem:[#allocation8 + $0x1060] sm:$0xff]  ;;  %v3092_v1 = vunpack.c.l.s8.bf16 %v1524_v27 }
 0x82b   :  { %6149 = vmatpush1.bf16.msra.mxu0 %v2929_v59  ;;  %v1491_v59 = vld [vmem:[#allocation8 + $0x1070] sm:$0xff] }
 0x82c   :  { %6477 = vmatpush1.bf16.msra.mxu1 %v2931_v13  ;;  %6150 = vmatprep.subr.bf16.mxu0 %v2946_v4  ;;  %v3025_v13 = vunpack.c.l.s8.bf16 %v1489_v49  ;;  %v3027_v4 = vunpack.c.l.s8.bf16 %v1491_v59 }
 0x82d   :  { %6478 = vmatprep.subr.bf16.mxu1 %v2948_v58  ;;  %v3042_v58 = vunpack.c.h.s8.bf16 %v1490_v34  ;;  %v1540_v34 = vld [vmem:[#allocation8 + $0x11f8] sm:$0xff] }
 0x82f   :  { %6151 = vmatpush1.bf16.msra.mxu0 %v2945_v6  ;;  %v1508_v6 = vld [vmem:[#allocation8 + $0x10f8] sm:$0xff] }
 0x830   :  { %6479 = vmatpush1.bf16.msra.mxu1 %v2947_v8  ;;  %6152 = vmatprep.subr.bf16.mxu0 %v2962_v9  ;;  %v3041_v8 = vunpack.c.h.s8.bf16 %v1489_v49  ;;  %v3043_v9 = vunpack.c.h.s8.bf16 %v1491_v59  ;;  %v3060_v60 = vunpack.c.l.s8.bf16 %v1508_v6  ;;  %v3124_v49 = vunpack.c.l.s8.bf16 %v1540_v34 }
 0x831   :  { %6480 = vmatprep.subr.bf16.mxu1 %v2964_v0  ;;  %v1505_v0 = vld [vmem:[#allocation8 + $0x10e0] sm:$0xff] }
 0x833   :  { %6153 = vmatpush1.bf16.msra.mxu0 %v2961_v16  ;;  %v1507_v16 = vld [vmem:[#allocation8 + $0x10f0] sm:$0xff] }
 0x834   :  { %6481 = vmatpush1.bf16.msra.mxu1 %v2963_v18  ;;  %6154 = vmatprep.subr.bf16.mxu0 %v2978_v11  ;;  %v3057_v18 = vunpack.c.l.s8.bf16 %v1505_v0  ;;  %v3059_v11 = vunpack.c.l.s8.bf16 %v1507_v16 }
 0x835   :  { %6482 = vmatprep.subr.bf16.mxu1 %v2980_v10  ;;  %v3076_v10 = vunpack.c.h.s8.bf16 %v1508_v6 }
 0x837   :  { %6155 = vmatpush1.bf16.msra.mxu0 %v2977_v28  ;;  %v3073_v28 = vunpack.c.h.s8.bf16 %v1505_v0 }
 0x838   :  { %6483 = vmatpush1.bf16.msra.mxu1 %v2979_v2  ;;  %6156 = vmatprep.subr.bf16.mxu0 %v2994_v46  ;;  %v3075_v2 = vunpack.c.h.s8.bf16 %v1507_v16  ;;  %v1521_v46 = vld [vmem:[#allocation8 + $0x1160] sm:$0xff] }
 0x839   :  { %6484 = vmatprep.subr.bf16.mxu1 %v2996_v29  ;;  %v1523_v29 = vld [vmem:[#allocation8 + $0x1170] sm:$0xff]  ;;  %v3089_v30 = vunpack.c.l.s8.bf16 %v1521_v46  ;;  %v3105_v37 = vunpack.c.h.s8.bf16 %v1521_v46 }
 0x83b   :  { %6157 = vmatpush1.bf16.msra.mxu0 %v2993_v40  ;;  %v3091_v40 = vunpack.c.l.s8.bf16 %v1523_v29 }
 0x83c   :  { %6485 = vmatpush1.bf16.msra.mxu1 %v2995_v32  ;;  %6158 = vmatprep.subr.bf16.mxu0 %v3010_v48  ;;  %v3106_v32 = vunpack.c.h.s8.bf16 %v1522_v15  ;;  %v3108_v48 = vunpack.c.h.s8.bf16 %v1524_v27 }
 0x83d   :  { %6486 = vmatprep.subr.bf16.mxu1 %v3012_v44  ;;  %v1538_v44 = vld [vmem:[#allocation8 + $0x11e8] sm:$0xff] }
 0x83f   :  { %6159 = vmatpush1.bf16.msra.mxu0 %v3009_v38  ;;  %v3107_v38 = vunpack.c.h.s8.bf16 %v1523_v29 }
 0x840   :  { %6487 = vmatpush1.bf16.msra.mxu1 %v3011_v23  ;;  %6169 = vmatprep.subr.bf16.mxu0 %v3026_v39  ;;  %v3122_v23 = vunpack.c.l.s8.bf16 %v1538_v44  ;;  %v1537_v39 = vld [vmem:[#allocation8 + $0x11e0] sm:$0xff] }
 0x841   :  { %6497 = vmatprep.subr.bf16.mxu1 %v3028_v52  ;;  %v1539_v52 = vld [vmem:[#allocation8 + $0x11f0] sm:$0xff]  ;;  %v3121_v59 = vunpack.c.l.s8.bf16 %v1537_v39  ;;  %v3137_v6 = vunpack.c.h.s8.bf16 %v1537_v39 }
 0x842   :  { %6161 = vmatmul.mubr.bf16.vlgmr.msra.gmra.mrb[28].mxu0 %v9559_v21 }
 0x843   :  { %6489 = vmatmul.mubr.bf16.vlgmr.msra.gmra.mrb[28].mxu1 %v9559_v21  ;;  %6170 = vmatpush1.bf16.msra.mxu0 %v3025_v13  ;;  %v3074_v21 = vunpack.c.h.s8.bf16 %v1506_v62  ;;  %v3123_v13 = vunpack.c.l.s8.bf16 %v1539_v52  ;;  %v1554_v62 = vld [vmem:[#allocation8 + $0x1268] sm:$0xff] }
 0x844   :  { %6201 = vmatprep.mubr.bf16.mxu0 %v9561_v26  ;;  %6498 = vmatpush1.bf16.msra.mxu1 %v3027_v4  ;;  %v3138_v4 = vunpack.c.h.s8.bf16 %v1538_v44  ;;  %v1588_v44 = vld [vmem:[#allocation8 + $0x1378] sm:$0xff] }
 0x845   :  { %6529 = vmatprep.mubr.bf16.mxu1 %v9561_v26  ;;  %6171 = vmatprep.subr.bf16.mxu0 %v3042_v58  ;;  %v3090_v26 = vunpack.c.l.s8.bf16 %v1522_v15  ;;  %v3140_v58 = vunpack.c.h.s8.bf16 %v1540_v34  ;;  %v1572_v15 = vld [vmem:[#allocation8 + $0x12f8] sm:$0xff]  ;;  %v3220_v39 = vunpack.c.l.s8.bf16 %v1588_v44 }
 0x846   :  { %6499 = vmatprep.subr.bf16.mxu1 %v3044_v17  ;;  %v1556_v17 = vld [vmem:[#allocation8 + $0x1278] sm:$0xff]  ;;  %v3188_v46 = vunpack.c.l.s8.bf16 %v1572_v15 }
 0x847   :  { %6172 = vmatpush1.bf16.msra.mxu0 %v3041_v8  ;;  %v3139_v8 = vunpack.c.h.s8.bf16 %v1539_v52  ;;  %v3156_v0 = vunpack.c.l.s8.bf16 %v1556_v17 }
 0x848   :  { %6500 = vmatpush1.bf16.msra.mxu1 %v3043_v9  ;;  %6173 = vmatprep.subr.bf16.mxu0 %v3058_v5  ;;  %v3154_v9 = vunpack.c.l.s8.bf16 %v1554_v62  ;;  %v1553_v5 = vld [vmem:[#allocation8 + $0x1260] sm:$0xff] }
 0x849   :  { %6501 = vmatprep.subr.bf16.mxu1 %v3060_v60  ;;  %v1555_v60 = vld [vmem:[#allocation8 + $0x1270] sm:$0xff]  ;;  %v3153_v16 = vunpack.c.l.s8.bf16 %v1553_v5  ;;  %v3169_v27 = vunpack.c.h.s8.bf16 %v1553_v5 }
 0x84b   :  { %6174 = vmatpush1.bf16.msra.mxu0 %v3057_v18  ;;  %v3155_v18 = vunpack.c.l.s8.bf16 %v1555_v60 }
 0x84c   :  { %6502 = vmatpush1.bf16.msra.mxu1 %v3059_v11  ;;  %6175 = vmatprep.subr.bf16.mxu0 %v3074_v21  ;;  %v3170_v11 = vunpack.c.h.s8.bf16 %v1554_v62  ;;  %v3172_v21 = vunpack.c.h.s8.bf16 %v1556_v17  ;;  %v1604_v62 = vld [vmem:[#allocation8 + $0x13f8] sm:$0xff] }
 0x84d   :  { %6503 = vmatprep.subr.bf16.mxu1 %v3076_v10  ;;  %v1570_v10 = vld [vmem:[#allocation8 + $0x12e8] sm:$0xff]  ;;  %v3252_v5 = vunpack.c.l.s8.bf16 %v1604_v62 }
 0x84f   :  { %6176 = vmatpush1.bf16.msra.mxu0 %v3073_v28  ;;  %v3171_v28 = vunpack.c.h.s8.bf16 %v1555_v60 }
 0x850   :  { %6504 = vmatpush1.bf16.msra.mxu1 %v3075_v2  ;;  %6177 = vmatprep.subr.bf16.mxu0 %v3090_v26  ;;  %v3186_v2 = vunpack.c.l.s8.bf16 %v1570_v10  ;;  %v1569_v26 = vld [vmem:[#allocation8 + $0x12e0] sm:$0xff] }
 0x851   :  { %6505 = vmatprep.subr.bf16.mxu1 %v3092_v1  ;;  %v1571_v1 = vld [vmem:[#allocation8 + $0x12f0] sm:$0xff]  ;;  %v3185_v29 = vunpack.c.l.s8.bf16 %v1569_v26  ;;  %v3201_v34 = vunpack.c.h.s8.bf16 %v1569_v26 }
 0x853   :  { %6178 = vmatpush1.bf16.msra.mxu0 %v3089_v30  ;;  %v3187_v30 = vunpack.c.l.s8.bf16 %v1571_v1 }
 0x854   :  { %6506 = vmatpush1.bf16.msra.mxu1 %v3091_v40  ;;  %6179 = vmatprep.subr.bf16.mxu0 %v3106_v32  ;;  %v3202_v40 = vunpack.c.h.s8.bf16 %v1570_v10  ;;  %v3204_v32 = vunpack.c.h.s8.bf16 %v1572_v15  ;;  %v1620_v10 = vld [vmem:[#allocation8 + $0x1478] sm:$0xff] }
 0x855   :  { %6507 = vmatprep.subr.bf16.mxu1 %v3108_v48  ;;  %v1586_v48 = vld [vmem:[#allocation8 + $0x1368] sm:$0xff]  ;;  %v3284_v26 = vunpack.c.l.s8.bf16 %v1620_v10 }
 0x857   :  { %6180 = vmatpush1.bf16.msra.mxu0 %v3105_v37  ;;  %v3203_v37 = vunpack.c.h.s8.bf16 %v1571_v1 }
 0x858   :  { %6508 = vmatpush1.bf16.msra.mxu1 %v3107_v38  ;;  %6181 = vmatprep.subr.bf16.mxu0 %v3122_v23  ;;  %v3218_v38 = vunpack.c.l.s8.bf16 %v1586_v48  ;;  %v1585_v23 = vld [vmem:[#allocation8 + $0x1360] sm:$0xff] }
 0x859   :  { %6509 = vmatprep.subr.bf16.mxu1 %v3124_v49  ;;  %v1587_v49 = vld [vmem:[#allocation8 + $0x1370] sm:$0xff]  ;;  %v3217_v52 = vunpack.c.l.s8.bf16 %v1585_v23  ;;  %v3233_v17 = vunpack.c.h.s8.bf16 %v1585_v23 }
 0x85b   :  { %6182 = vmatpush1.bf16.msra.mxu0 %v3121_v59  ;;  %v3219_v59 = vunpack.c.l.s8.bf16 %v1587_v49 }
 0x85c   :  { %6510 = vmatpush1.bf16.msra.mxu1 %v3123_v13  ;;  %6183 = vmatprep.subr.bf16.mxu0 %v3138_v4  ;;  %v3234_v13 = vunpack.c.h.s8.bf16 %v1586_v48  ;;  %v3236_v4 = vunpack.c.h.s8.bf16 %v1588_v44  ;;  %v1636_v48 = vld [vmem:[#allocation8 + $0x14f8] sm:$0xff] }
 0x85d   :  { %6511 = vmatprep.subr.bf16.mxu1 %v3140_v58  ;;  %v1602_v58 = vld [vmem:[#allocation8 + $0x13e8] sm:$0xff]  ;;  %v3316_v23 = vunpack.c.l.s8.bf16 %v1636_v48 }
 0x85f   :  { %6184 = vmatpush1.bf16.msra.mxu0 %v3137_v6  ;;  %v3235_v6 = vunpack.c.h.s8.bf16 %v1587_v49 }
 0x860   :  { %6512 = vmatpush1.bf16.msra.mxu1 %v3139_v8  ;;  %6185 = vmatprep.subr.bf16.mxu0 %v3154_v9  ;;  %v3250_v8 = vunpack.c.l.s8.bf16 %v1602_v58  ;;  %v1601_v9 = vld [vmem:[#allocation8 + $0x13e0] sm:$0xff] }
 0x861   :  { %6513 = vmatprep.subr.bf16.mxu1 %v3156_v0  ;;  %v1603_v0 = vld [vmem:[#allocation8 + $0x13f0] sm:$0xff]  ;;  %v3249_v60 = vunpack.c.l.s8.bf16 %v1601_v9  ;;  %v3265_v15 = vunpack.c.h.s8.bf16 %v1601_v9 }
 0x863   :  { %6186 = vmatpush1.bf16.msra.mxu0 %v3153_v16  ;;  %v3251_v16 = vunpack.c.l.s8.bf16 %v1603_v0 }
 0x864   :  { %6514 = vmatpush1.bf16.msra.mxu1 %v3155_v18  ;;  %6187 = vmatprep.subr.bf16.mxu0 %v3170_v11  ;;  %v3266_v18 = vunpack.c.h.s8.bf16 %v1602_v58  ;;  %v3268_v11 = vunpack.c.h.s8.bf16 %v1604_v62 }
 0x865   :  { %6515 = vmatprep.subr.bf16.mxu1 %v3172_v21  ;;  %v1618_v21 = vld [vmem:[#allocation8 + $0x1468] sm:$0xff] }
 0x867   :  { %6188 = vmatpush1.bf16.msra.mxu0 %v3169_v27  ;;  %v3267_v27 = vunpack.c.h.s8.bf16 %v1603_v0 }
 0x868   :  { %6516 = vmatpush1.bf16.msra.mxu1 %v3171_v28  ;;  %6189 = vmatprep.subr.bf16.mxu0 %v3186_v2  ;;  %v3282_v28 = vunpack.c.l.s8.bf16 %v1618_v21  ;;  %v1617_v2 = vld [vmem:[#allocation8 + $0x1460] sm:$0xff] }
 0x869   :  { %6517 = vmatprep.subr.bf16.mxu1 %v3188_v46  ;;  %v1619_v46 = vld [vmem:[#allocation8 + $0x1470] sm:$0xff]  ;;  %v3281_v1 = vunpack.c.l.s8.bf16 %v1617_v2  ;;  %v3297_v44 = vunpack.c.h.s8.bf16 %v1617_v2 }
 0x86b   :  { %6190 = vmatpush1.bf16.msra.mxu0 %v3185_v29  ;;  %v3283_v29 = vunpack.c.l.s8.bf16 %v1619_v46 }
 0x86c   :  { %6518 = vmatpush1.bf16.msra.mxu1 %v3187_v30  ;;  %6191 = vmatprep.subr.bf16.mxu0 %v3202_v40  ;;  %v3298_v30 = vunpack.c.h.s8.bf16 %v1618_v21  ;;  %v1634_v40 = vld [vmem:[#allocation8 + $0x14e8] sm:$0xff] }
 0x86d   :  { %6519 = vmatprep.subr.bf16.mxu1 %v3204_v32  ;;  %v3300_v32 = vunpack.c.h.s8.bf16 %v1620_v10 }
 0x86f   :  { %6192 = vmatpush1.bf16.msra.mxu0 %v3201_v34  ;;  %v3299_v34 = vunpack.c.h.s8.bf16 %v1619_v46 }
 0x870   :  { %6520 = vmatpush1.bf16.msra.mxu1 %v3203_v37  ;;  %6193 = vmatprep.subr.bf16.mxu0 %v3218_v38  ;;  %v3314_v37 = vunpack.c.l.s8.bf16 %v1634_v40  ;;  %v1633_v38 = vld [vmem:[#allocation8 + $0x14e0] sm:$0xff] }
 0x871   :  { %6521 = vmatprep.subr.bf16.mxu1 %v3220_v39  ;;  %v1635_v39 = vld [vmem:[#allocation8 + $0x14f0] sm:$0xff]  ;;  %v3313_v49 = vunpack.c.l.s8.bf16 %v1633_v38  ;;  %v3329_v58 = vunpack.c.h.s8.bf16 %v1633_v38 }
 0x872   :  { %v3331_v62 = vunpack.c.h.s8.bf16 %v1635_v39 }
 0x873   :  { %6194 = vmatpush1.bf16.msra.mxu0 %v3217_v52  ;;  %v3315_v52 = vunpack.c.l.s8.bf16 %v1635_v39 }
 0x874   :  { %6522 = vmatpush1.bf16.msra.mxu1 %v3219_v59  ;;  %6195 = vmatprep.subr.bf16.mxu0 %v3234_v13  ;;  %v3332_v59 = vunpack.c.h.s8.bf16 %v1636_v48  ;;  %v1650_v13 = vld [vmem:[#allocation8 + $0x1568] sm:$0xff] }
 0x875   :  { %6523 = vmatprep.subr.bf16.mxu1 %v3236_v4  ;;  %v1652_v4 = vld [vmem:[#allocation8 + $0x1578] sm:$0xff]  ;;  %v3362_v0 = vunpack.c.h.s8.bf16 %v1650_v13 }
 0x877   :  { %6196 = vmatpush1.bf16.msra.mxu0 %v3233_v17  ;;  %v1649_v17 = vld [vmem:[#allocation8 + $0x1560] sm:$0xff] }
 0x878   :  { %6524 = vmatpush1.bf16.msra.mxu1 %v3235_v6  ;;  %6197 = vmatprep.subr.bf16.mxu0 %v3250_v8  ;;  %v3348_v6 = vunpack.c.l.s8.bf16 %v1652_v4  ;;  %v1651_v8 = vld [vmem:[#allocation8 + $0x1570] sm:$0xff]  ;;  %v3345_v9 = vunpack.c.l.s8.bf16 %v1649_v17 }
 0x879   :  { %6525 = vmatprep.subr.bf16.mxu1 %v3252_v5  ;;  %v3347_v5 = vunpack.c.l.s8.bf16 %v1651_v8  ;;  %v3363_v21 = vunpack.c.h.s8.bf16 %v1651_v8 }
 0x87b   :  { %6198 = vmatpush1.bf16.msra.mxu0 %v3249_v60  ;;  %v3364_v60 = vunpack.c.h.s8.bf16 %v1652_v4 }
 0x87c   :  { %6526 = vmatpush1.bf16.msra.mxu1 %v3251_v16  ;;  %6199 = vmatprep.subr.bf16.mxu0 %v3266_v18  ;;  %v1666_v16 = vld [vmem:[#allocation8 + $0x15e8] sm:$0xff]  ;;  %v1668_v18 = vld [vmem:[#allocation8 + $0x15f8] sm:$0xff] }
 0x87d   :  { %6527 = vmatprep.subr.bf16.mxu1 %v3268_v11  ;;  %v3361_v11 = vunpack.c.h.s8.bf16 %v1649_v17  ;;  %v3378_v10 = vunpack.c.l.s8.bf16 %v1666_v16  ;;  %v3394_v46 = vunpack.c.h.s8.bf16 %v1666_v16 }
 0x87f   :  { %6200 = vmatpush1.bf16.msra.mxu0 %v3265_v15  ;;  %v1665_v15 = vld [vmem:[#allocation8 + $0x15e0] sm:$0xff] }
 0x880   :  { %6528 = vmatpush1.bf16.msra.mxu1 %v3267_v27  ;;  %6210 = vmatprep.subr.bf16.mxu0 %v3282_v28  ;;  %v3380_v27 = vunpack.c.l.s8.bf16 %v1668_v18  ;;  %v1667_v28 = vld [vmem:[#allocation8 + $0x15f0] sm:$0xff]  ;;  %v3377_v2 = vunpack.c.l.s8.bf16 %v1665_v15 }
 0x881   :  { %6538 = vmatprep.subr.bf16.mxu1 %v3284_v26  ;;  %v3379_v26 = vunpack.c.l.s8.bf16 %v1667_v28 }
 0x882   :  { %6202 = vmatmul.mubr.bf16.vlgmr.msra.gmra.mrb[28].mxu0 %v9570_v54 }
 0x883   :  { %6530 = vmatmul.mubr.bf16.vlgmr.msra.gmra.mrb[28].mxu1 %v9570_v54  ;;  %6211 = vmatpush1.bf16.msra.mxu0 %v3281_v1  ;;  %v3330_v54 = vunpack.c.h.s8.bf16 %v1634_v40  ;;  %v3396_v1 = vunpack.c.h.s8.bf16 %v1668_v18  ;;  %v3393_v40 = vunpack.c.h.s8.bf16 %v1665_v15 }
 0x884   :  { %6242 = vmatprep.mubr.bf16.mxu0 %v9572_v61  ;;  %6539 = vmatpush1.bf16.msra.mxu1 %v3283_v29  ;;  %v1682_v29 = vld [vmem:[#allocation8 + $0x1668] sm:$0xff] }
 0x885   :  { %6570 = vmatprep.mubr.bf16.mxu1 %v9572_v61  ;;  %6212 = vmatprep.subr.bf16.mxu0 %v3298_v30  ;;  %v3346_v61 = vunpack.c.l.s8.bf16 %v1650_v13  ;;  %v1684_v30 = vld [vmem:[#allocation8 + $0x1678] sm:$0xff]  ;;  %v3410_v48 = vunpack.c.l.s8.bf16 %v1682_v29  ;;  %v3426_v39 = vunpack.c.h.s8.bf16 %v1682_v29 }
 0x886   :  { %6540 = vmatprep.subr.bf16.mxu1 %v3300_v32  ;;  %v3395_v32 = vunpack.c.h.s8.bf16 %v1667_v28 }
 0x887   :  { %6213 = vmatpush1.bf16.msra.mxu0 %v3297_v44  ;;  %v1681_v44 = vld [vmem:[#allocation8 + $0x1660] sm:$0xff] }
 0x888   :  { %6541 = vmatpush1.bf16.msra.mxu1 %v3299_v34  ;;  %6214 = vmatprep.subr.bf16.mxu0 %v3314_v37  ;;  %v3412_v34 = vunpack.c.l.s8.bf16 %v1684_v30  ;;  %v1683_v37 = vld [vmem:[#allocation8 + $0x1670] sm:$0xff]  ;;  %v3409_v38 = vunpack.c.l.s8.bf16 %v1681_v44 }
 0x889   :  { %6542 = vmatprep.subr.bf16.mxu1 %v3316_v23  ;;  %v3411_v23 = vunpack.c.l.s8.bf16 %v1683_v37  ;;  %v3427_v13 = vunpack.c.h.s8.bf16 %v1683_v37 }
 0x88b   :  { %6215 = vmatpush1.bf16.msra.mxu0 %v3313_v49  ;;  %v3428_v49 = vunpack.c.h.s8.bf16 %v1684_v30 }
 0x88c   :  { %6543 = vmatpush1.bf16.msra.mxu1 %v3315_v52  ;;  %6216 = vmatprep.subr.bf16.mxu0 %v3330_v54  ;;  %v1698_v52 = vld [vmem:[#allocation8 + $0x16e8] sm:$0xff]  ;;  %v1700_v54 = vld [vmem:[#allocation8 + $0x16f8] sm:$0xff] }
 0x88d   :  { %6544 = vmatprep.subr.bf16.mxu1 %v3332_v59  ;;  %v3425_v59 = vunpack.c.h.s8.bf16 %v1681_v44  ;;  %v3442_v4 = vunpack.c.l.s8.bf16 %v1698_v52  ;;  %v3458_v8 = vunpack.c.h.s8.bf16 %v1698_v52 }
 0x88f   :  { %6217 = vmatpush1.bf16.msra.mxu0 %v3329_v58  ;;  %v1697_v58 = vld [vmem:[#allocation8 + $0x16e0] sm:$0xff] }
 0x890   :  { %6545 = vmatpush1.bf16.msra.mxu1 %v3331_v62  ;;  %6218 = vmatprep.subr.bf16.mxu0 %v3346_v61  ;;  %v3444_v62 = vunpack.c.l.s8.bf16 %v1700_v54  ;;  %v1699_v61 = vld [vmem:[#allocation8 + $0x16f0] sm:$0xff]  ;;  %v3441_v17 = vunpack.c.l.s8.bf16 %v1697_v58 }
 0x891   :  { %6546 = vmatprep.subr.bf16.mxu1 %v3348_v6  ;;  %v3443_v6 = vunpack.c.l.s8.bf16 %v1699_v61  ;;  %v3459_v16 = vunpack.c.h.s8.bf16 %v1699_v61 }
 0x893   :  { %6219 = vmatpush1.bf16.msra.mxu0 %v3345_v9  ;;  %v3460_v9 = vunpack.c.h.s8.bf16 %v1700_v54 }
 0x894   :  { %6547 = vmatpush1.bf16.msra.mxu1 %v3347_v5  ;;  %6220 = vmatprep.subr.bf16.mxu0 %v3362_v0  ;;  %v1714_v5 = vld [vmem:[#allocation8 + $0x1768] sm:$0xff]  ;;  %v1716_v0 = vld [vmem:[#allocation8 + $0x1778] sm:$0xff] }
 0x895   :  { %6548 = vmatprep.subr.bf16.mxu1 %v3364_v60  ;;  %v3457_v60 = vunpack.c.h.s8.bf16 %v1697_v58  ;;  %v3474_v18 = vunpack.c.l.s8.bf16 %v1714_v5  ;;  %v3490_v28 = vunpack.c.h.s8.bf16 %v1714_v5 }
 0x897   :  { %6221 = vmatpush1.bf16.msra.mxu0 %v3361_v11  ;;  %v1713_v11 = vld [vmem:[#allocation8 + $0x1760] sm:$0xff] }
 0x898   :  { %6549 = vmatpush1.bf16.msra.mxu1 %v3363_v21  ;;  %6222 = vmatprep.subr.bf16.mxu0 %v3378_v10  ;;  %v3476_v21 = vunpack.c.l.s8.bf16 %v1716_v0  ;;  %v1715_v10 = vld [vmem:[#allocation8 + $0x1770] sm:$0xff]  ;;  %v3473_v15 = vunpack.c.l.s8.bf16 %v1713_v11 }
 0x899   :  { %6550 = vmatprep.subr.bf16.mxu1 %v3380_v27  ;;  %v3475_v27 = vunpack.c.l.s8.bf16 %v1715_v10  ;;  %v3491_v29 = vunpack.c.h.s8.bf16 %v1715_v10 }
 0x89b   :  { %6223 = vmatpush1.bf16.msra.mxu0 %v3377_v2  ;;  %v3492_v2 = vunpack.c.h.s8.bf16 %v1716_v0 }
 0x89c   :  { %6551 = vmatpush1.bf16.msra.mxu1 %v3379_v26  ;;  %6224 = vmatprep.subr.bf16.mxu0 %v3394_v46  ;;  %v1730_v26 = vld [vmem:[#allocation8 + $0x17e8] sm:$0xff]  ;;  %v1732_v46 = vld [vmem:[#allocation8 + $0x17f8] sm:$0xff] }
 0x89d   :  { %6552 = vmatprep.subr.bf16.mxu1 %v3396_v1  ;;  %v3489_v1 = vunpack.c.h.s8.bf16 %v1713_v11  ;;  %v3506_v30 = vunpack.c.l.s8.bf16 %v1730_v26  ;;  %v3522_v37 = vunpack.c.h.s8.bf16 %v1730_v26  ;;  %v1777_v26 = vld [vmem:[#allocation8 + $0x1960] sm:$0xff] }
 0x89f   :  { %6225 = vmatpush1.bf16.msra.mxu0 %v3393_v40  ;;  %v1729_v40 = vld [vmem:[#allocation8 + $0x17e0] sm:$0xff] }
 0x8a0   :  { %6553 = vmatpush1.bf16.msra.mxu1 %v3395_v32  ;;  %6226 = vmatprep.subr.bf16.mxu0 %v3410_v48  ;;  %v3508_v32 = vunpack.c.l.s8.bf16 %v1732_v46  ;;  %v1731_v48 = vld [vmem:[#allocation8 + $0x17f0] sm:$0xff]  ;;  %v3505_v44 = vunpack.c.l.s8.bf16 %v1729_v40 }
 0x8a1   :  { %6554 = vmatprep.subr.bf16.mxu1 %v3412_v34  ;;  %v3507_v34 = vunpack.c.l.s8.bf16 %v1731_v48  ;;  %v3523_v52 = vunpack.c.h.s8.bf16 %v1731_v48  ;;  %v1794_v48 = vld [vmem:[#allocation8 + $0x19e8] sm:$0xff] }
 0x8a3   :  { %6227 = vmatpush1.bf16.msra.mxu0 %v3409_v38  ;;  %v3524_v38 = vunpack.c.h.s8.bf16 %v1732_v46 }
 0x8a4   :  { %6555 = vmatpush1.bf16.msra.mxu1 %v3411_v23  ;;  %6228 = vmatprep.subr.bf16.mxu0 %v3426_v39  ;;  %v1746_v23 = vld [vmem:[#allocation8 + $0x1868] sm:$0xff]  ;;  %v1748_v39 = vld [vmem:[#allocation8 + $0x1878] sm:$0xff] }
 0x8a5   :  { %6556 = vmatprep.subr.bf16.mxu1 %v3428_v49  ;;  %v3521_v49 = vunpack.c.h.s8.bf16 %v1729_v40  ;;  %v3538_v54 = vunpack.c.l.s8.bf16 %v1746_v23  ;;  %v3554_v61 = vunpack.c.h.s8.bf16 %v1746_v23  ;;  %v1793_v23 = vld [vmem:[#allocation8 + $0x19e0] sm:$0xff] }
 0x8a7   :  { %6229 = vmatpush1.bf16.msra.mxu0 %v3425_v59  ;;  %v1745_v59 = vld [vmem:[#allocation8 + $0x1860] sm:$0xff] }
 0x8a8   :  { %6557 = vmatpush1.bf16.msra.mxu1 %v3427_v13  ;;  %6230 = vmatprep.subr.bf16.mxu0 %v3442_v4  ;;  %v3540_v13 = vunpack.c.l.s8.bf16 %v1748_v39  ;;  %v1747_v4 = vld [vmem:[#allocation8 + $0x1870] sm:$0xff]  ;;  %v3537_v58 = vunpack.c.l.s8.bf16 %v1745_v59 }
 0x8a9   :  { %6558 = vmatprep.subr.bf16.mxu1 %v3444_v62  ;;  %v3539_v62 = vunpack.c.l.s8.bf16 %v1747_v4  ;;  %v3555_v5 = vunpack.c.h.s8.bf16 %v1747_v4  ;;  %v1810_v4 = vld [vmem:[#allocation8 + $0x1a68] sm:$0xff] }
 0x8ab   :  { %6231 = vmatpush1.bf16.msra.mxu0 %v3441_v17  ;;  %v1762_v17 = vld [vmem:[#allocation8 + $0x18e8] sm:$0xff] }
 0x8ac   :  { %6559 = vmatpush1.bf16.msra.mxu1 %v3443_v6  ;;  %6232 = vmatprep.subr.bf16.mxu0 %v3458_v8  ;;  %v3556_v6 = vunpack.c.h.s8.bf16 %v1748_v39  ;;  %v1764_v8 = vld [vmem:[#allocation8 + $0x18f8] sm:$0xff]  ;;  %v3570_v0 = vunpack.c.l.s8.bf16 %v1762_v17 }
 0x8ad   :  { %6560 = vmatprep.subr.bf16.mxu1 %v3460_v9  ;;  %v3553_v9 = vunpack.c.h.s8.bf16 %v1745_v59  ;;  %v3588_v10 = vunpack.c.h.s8.bf16 %v1764_v8  ;;  %v3650_v59 = vunpack.c.h.s8.bf16 %v1794_v48 }
 0x8af   :  { %6233 = vmatpush1.bf16.msra.mxu0 %v3457_v60  ;;  %v1761_v60 = vld [vmem:[#allocation8 + $0x18e0] sm:$0xff] }
 0x8b0   :  { %6561 = vmatpush1.bf16.msra.mxu1 %v3459_v16  ;;  %6234 = vmatprep.subr.bf16.mxu0 %v3474_v18  ;;  %v3572_v16 = vunpack.c.l.s8.bf16 %v1764_v8  ;;  %v1763_v18 = vld [vmem:[#allocation8 + $0x18f0] sm:$0xff]  ;;  %v3569_v11 = vunpack.c.l.s8.bf16 %v1761_v60 }
 0x8b1   :  { %6562 = vmatprep.subr.bf16.mxu1 %v3476_v21  ;;  %v3571_v21 = vunpack.c.l.s8.bf16 %v1763_v18 }
 0x8b3   :  { %6235 = vmatpush1.bf16.msra.mxu0 %v3473_v15  ;;  %v1778_v15 = vld [vmem:[#allocation8 + $0x1968] sm:$0xff] }
 0x8b4   :  { %6563 = vmatpush1.bf16.msra.mxu1 %v3475_v27  ;;  %6236 = vmatprep.subr.bf16.mxu0 %v3490_v28  ;;  %v1780_v27 = vld [vmem:[#allocation8 + $0x1978] sm:$0xff]  ;;  %v3585_v28 = vunpack.c.h.s8.bf16 %v1761_v60  ;;  %v3618_v40 = vunpack.c.h.s8.bf16 %v1778_v15  ;;  %v3682_v60 = vunpack.c.h.s8.bf16 %v1810_v4 }
 0x8b5   :  { %6564 = vmatprep.subr.bf16.mxu1 %v3492_v2  ;;  %v3587_v2 = vunpack.c.h.s8.bf16 %v1763_v18  ;;  %v3604_v46 = vunpack.c.l.s8.bf16 %v1780_v27  ;;  %v1826_v18 = vld [vmem:[#allocation8 + $0x1ae8] sm:$0xff] }
 0x8b7   :  { %6237 = vmatpush1.bf16.msra.mxu0 %v3489_v1  ;;  %v1779_v1 = vld [vmem:[#allocation8 + $0x1970] sm:$0xff] }
 0x8b8   :  { %6565 = vmatpush1.bf16.msra.mxu1 %v3491_v29  ;;  %6238 = vmatprep.subr.bf16.mxu0 %v3506_v30  ;;  %v3601_v29 = vunpack.c.l.s8.bf16 %v1777_v26  ;;  %v3603_v30 = vunpack.c.l.s8.bf16 %v1779_v1 }
 0x8b9   :  { %6566 = vmatprep.subr.bf16.mxu1 %v3508_v32  ;;  %v3620_v32 = vunpack.c.h.s8.bf16 %v1780_v27 }
 0x8bb   :  { %6239 = vmatpush1.bf16.msra.mxu0 %v3505_v44  ;;  %v1796_v44 = vld [vmem:[#allocation8 + $0x19f8] sm:$0xff] }
 0x8bc   :  { %6567 = vmatpush1.bf16.msra.mxu1 %v3507_v34  ;;  %6240 = vmatprep.subr.bf16.mxu0 %v3522_v37  ;;  %v3617_v34 = vunpack.c.h.s8.bf16 %v1777_v26  ;;  %v3619_v37 = vunpack.c.h.s8.bf16 %v1779_v1  ;;  %v3636_v39 = vunpack.c.l.s8.bf16 %v1796_v44  ;;  %v3714_v26 = vunpack.c.h.s8.bf16 %v1826_v18  ;;  %v1842_v1 = vld [vmem:[#allocation8 + $0x1b68] sm:$0xff] }
 0x8bd   :  { %6568 = vmatprep.subr.bf16.mxu1 %v3524_v38  ;;  %v3634_v38 = vunpack.c.l.s8.bf16 %v1794_v48  ;;  %v1841_v48 = vld [vmem:[#allocation8 + $0x1b60] sm:$0xff] }
 0x8bf   :  { %6241 = vmatpush1.bf16.msra.mxu0 %v3521_v49  ;;  %v1795_v49 = vld [vmem:[#allocation8 + $0x19f0] sm:$0xff] }
 0x8c0   :  { %6569 = vmatpush1.bf16.msra.mxu1 %v3523_v52  ;;  %6251 = vmatprep.subr.bf16.mxu0 %v3538_v54  ;;  %v3633_v52 = vunpack.c.l.s8.bf16 %v1793_v23  ;;  %v3635_v54 = vunpack.c.l.s8.bf16 %v1795_v49 }
 0x8c1   :  { %6579 = vmatprep.subr.bf16.mxu1 %v3540_v13  ;;  %v3652_v13 = vunpack.c.h.s8.bf16 %v1796_v44 }
 0x8c2   :  { %6243 = vmatmul.mubr.bf16.vlgmr.msra.gmra.mrb[28].mxu0 %v9580_v20 }
 0x8c3   :  { %6571 = vmatmul.mubr.bf16.vlgmr.msra.gmra.mrb[28].mxu1 %v9580_v20  ;;  %6252 = vmatpush1.bf16.msra.mxu0 %v3537_v58  ;;  %v3586_v20 = vunpack.c.h.s8.bf16 %v1762_v17  ;;  %v1812_v58 = vld [vmem:[#allocation8 + $0x1a78] sm:$0xff]  ;;  %v3666_v17 = vunpack.c.l.s8.bf16 %v1810_v4  ;;  %v1857_v4 = vld [vmem:[#allocation8 + $0x1be0] sm:$0xff] }
 0x8c4   :  { %6283 = vmatprep.mubr.bf16.mxu0 %v9582_v25  ;;  %6580 = vmatpush1.bf16.msra.mxu1 %v3539_v62  ;;  %v3649_v62 = vunpack.c.h.s8.bf16 %v1793_v23  ;;  %v3668_v8 = vunpack.c.l.s8.bf16 %v1812_v58  ;;  %v3746_v23 = vunpack.c.h.s8.bf16 %v1842_v1 }
 0x8c5   :  { %6611 = vmatprep.mubr.bf16.mxu1 %v9582_v25  ;;  %6253 = vmatprep.subr.bf16.mxu0 %v3554_v61  ;;  %v3602_v25 = vunpack.c.l.s8.bf16 %v1778_v15  ;;  %v3651_v61 = vunpack.c.h.s8.bf16 %v1795_v49  ;;  %v1825_v15 = vld [vmem:[#allocation8 + $0x1ae0] sm:$0xff]  ;;  %v1858_v49 = vld [vmem:[#allocation8 + $0x1be8] sm:$0xff] }
 0x8c6   :  { %6581 = vmatprep.subr.bf16.mxu1 %v3556_v6  ;;  %v1809_v6 = vld [vmem:[#allocation8 + $0x1a60] sm:$0xff] }
 0x8c7   :  { %6254 = vmatpush1.bf16.msra.mxu0 %v3553_v9  ;;  %v1811_v9 = vld [vmem:[#allocation8 + $0x1a70] sm:$0xff] }
 0x8c8   :  { %6582 = vmatpush1.bf16.msra.mxu1 %v3555_v5  ;;  %6255 = vmatprep.subr.bf16.mxu0 %v3570_v0  ;;  %v3665_v5 = vunpack.c.l.s8.bf16 %v1809_v6  ;;  %v3667_v0 = vunpack.c.l.s8.bf16 %v1811_v9 }
 0x8c9   :  { %6583 = vmatprep.subr.bf16.mxu1 %v3572_v16  ;;  %v3684_v16 = vunpack.c.h.s8.bf16 %v1812_v58 }
 0x8cb   :  { %6256 = vmatpush1.bf16.msra.mxu0 %v3569_v11  ;;  %v1828_v11 = vld [vmem:[#allocation8 + $0x1af8] sm:$0xff] }
 0x8cc   :  { %6584 = vmatpush1.bf16.msra.mxu1 %v3571_v21  ;;  %6257 = vmatprep.subr.bf16.mxu0 %v3586_v20  ;;  %v3681_v21 = vunpack.c.h.s8.bf16 %v1809_v6  ;;  %v3683_v20 = vunpack.c.h.s8.bf16 %v1811_v9  ;;  %v3700_v27 = vunpack.c.l.s8.bf16 %v1828_v11  ;;  %v3778_v6 = vunpack.c.h.s8.bf16 %v1858_v49  ;;  %v1874_v9 = vld [vmem:[#allocation8 + $0x1c68] sm:$0xff] }
 0x8cd   :  { %6585 = vmatprep.subr.bf16.mxu1 %v3588_v10  ;;  %v3698_v10 = vunpack.c.l.s8.bf16 %v1826_v18  ;;  %v1873_v18 = vld [vmem:[#allocation8 + $0x1c60] sm:$0xff] }
 0x8cf   :  { %6258 = vmatpush1.bf16.msra.mxu0 %v3585_v28  ;;  %v1827_v28 = vld [vmem:[#allocation8 + $0x1af0] sm:$0xff] }
 0x8d0   :  { %6586 = vmatpush1.bf16.msra.mxu1 %v3587_v2  ;;  %6259 = vmatprep.subr.bf16.mxu0 %v3602_v25  ;;  %v3697_v2 = vunpack.c.l.s8.bf16 %v1825_v15  ;;  %v3699_v25 = vunpack.c.l.s8.bf16 %v1827_v28 }
 0x8d1   :  { %6587 = vmatprep.subr.bf16.mxu1 %v3604_v46  ;;  %v3716_v46 = vunpack.c.h.s8.bf16 %v1828_v11 }
 0x8d3   :  { %6260 = vmatpush1.bf16.msra.mxu0 %v3601_v29  ;;  %v1844_v29 = vld [vmem:[#allocation8 + $0x1b78] sm:$0xff] }
 0x8d4   :  { %6588 = vmatpush1.bf16.msra.mxu1 %v3603_v30  ;;  %6261 = vmatprep.subr.bf16.mxu0 %v3618_v40  ;;  %v3713_v30 = vunpack.c.h.s8.bf16 %v1825_v15  ;;  %v3715_v40 = vunpack.c.h.s8.bf16 %v1827_v28  ;;  %v3732_v44 = vunpack.c.l.s8.bf16 %v1844_v29  ;;  %v3810_v15 = vunpack.c.h.s8.bf16 %v1874_v9 }
 0x8d5   :  { %6589 = vmatprep.subr.bf16.mxu1 %v3620_v32  ;;  %v3730_v32 = vunpack.c.l.s8.bf16 %v1842_v1  ;;  %v1889_v1 = vld [vmem:[#allocation8 + $0x1ce0] sm:$0xff] }
 0x8d7   :  { %6262 = vmatpush1.bf16.msra.mxu0 %v3617_v34  ;;  %v1843_v34 = vld [vmem:[#allocation8 + $0x1b70] sm:$0xff] }
 0x8d8   :  { %6590 = vmatpush1.bf16.msra.mxu1 %v3619_v37  ;;  %6263 = vmatprep.subr.bf16.mxu0 %v3634_v38  ;;  %v3729_v37 = vunpack.c.l.s8.bf16 %v1841_v48  ;;  %v3731_v38 = vunpack.c.l.s8.bf16 %v1843_v34 }
 0x8d9   :  { %6591 = vmatprep.subr.bf16.mxu1 %v3636_v39  ;;  %v3748_v39 = vunpack.c.h.s8.bf16 %v1844_v29 }
 0x8db   :  { %6264 = vmatpush1.bf16.msra.mxu0 %v3633_v52  ;;  %v1860_v52 = vld [vmem:[#allocation8 + $0x1bf8] sm:$0xff] }
 0x8dc   :  { %6592 = vmatpush1.bf16.msra.mxu1 %v3635_v54  ;;  %6265 = vmatprep.subr.bf16.mxu0 %v3650_v59  ;;  %v3745_v54 = vunpack.c.h.s8.bf16 %v1841_v48  ;;  %v3747_v59 = vunpack.c.h.s8.bf16 %v1843_v34  ;;  %v3764_v58 = vunpack.c.l.s8.bf16 %v1860_v52  ;;  %v1908_v34 = vld [vmem:[#allocation8 + $0x1d78] sm:$0xff] }
 0x8dd   :  { %6593 = vmatprep.subr.bf16.mxu1 %v3652_v13  ;;  %v3762_v13 = vunpack.c.l.s8.bf16 %v1858_v49  ;;  %v1907_v49 = vld [vmem:[#allocation8 + $0x1d70] sm:$0xff] }
 0x8df   :  { %6266 = vmatpush1.bf16.msra.mxu0 %v3649_v62  ;;  %v1859_v62 = vld [vmem:[#allocation8 + $0x1bf0] sm:$0xff] }
 0x8e0   :  { %6594 = vmatpush1.bf16.msra.mxu1 %v3651_v61  ;;  %6267 = vmatprep.subr.bf16.mxu0 %v3666_v17  ;;  %v3761_v61 = vunpack.c.l.s8.bf16 %v1857_v4  ;;  %v3763_v17 = vunpack.c.l.s8.bf16 %v1859_v62 }
 0x8e1   :  { %6595 = vmatprep.subr.bf16.mxu1 %v3668_v8  ;;  %v3780_v8 = vunpack.c.h.s8.bf16 %v1860_v52 }
 0x8e3   :  { %6268 = vmatpush1.bf16.msra.mxu0 %v3665_v5  ;;  %v1876_v5 = vld [vmem:[#allocation8 + $0x1c78] sm:$0xff] }
 0x8e4   :  { %6596 = vmatpush1.bf16.msra.mxu1 %v3667_v0  ;;  %6269 = vmatprep.subr.bf16.mxu0 %v3682_v60  ;;  %v3777_v0 = vunpack.c.h.s8.bf16 %v1857_v4  ;;  %v3779_v60 = vunpack.c.h.s8.bf16 %v1859_v62  ;;  %v3796_v11 = vunpack.c.l.s8.bf16 %v1876_v5  ;;  %v3812_v28 = vunpack.c.h.s8.bf16 %v1876_v5  ;;  %v1922_v4 = vld [vmem:[#allocation8 + $0x1de8] sm:$0xff] }
 0x8e5   :  { %6597 = vmatprep.subr.bf16.mxu1 %v3684_v16  ;;  %v3794_v16 = vunpack.c.l.s8.bf16 %v1874_v9  ;;  %v1923_v9 = vld [vmem:[#allocation8 + $0x1df0] sm:$0xff] }
 0x8e7   :  { %6270 = vmatpush1.bf16.msra.mxu0 %v3681_v21  ;;  %v1875_v21 = vld [vmem:[#allocation8 + $0x1c70] sm:$0xff] }
 0x8e8   :  { %6598 = vmatpush1.bf16.msra.mxu1 %v3683_v20  ;;  %6271 = vmatprep.subr.bf16.mxu0 %v3698_v10  ;;  %v3793_v20 = vunpack.c.l.s8.bf16 %v1873_v18  ;;  %v3795_v10 = vunpack.c.l.s8.bf16 %v1875_v21 }
 0x8e9   :  { %6599 = vmatprep.subr.bf16.mxu1 %v3700_v27  ;;  %v1890_v27 = vld [vmem:[#allocation8 + $0x1ce8] sm:$0xff] }
 0x8eb   :  { %6272 = vmatpush1.bf16.msra.mxu0 %v3697_v2  ;;  %v1892_v2 = vld [vmem:[#allocation8 + $0x1cf8] sm:$0xff] }
 0x8ec   :  { %6600 = vmatpush1.bf16.msra.mxu1 %v3699_v25  ;;  %6273 = vmatprep.subr.bf16.mxu0 %v3714_v26  ;;  %v3809_v25 = vunpack.c.h.s8.bf16 %v1873_v18  ;;  %v3811_v26 = vunpack.c.h.s8.bf16 %v1875_v21  ;;  %v3828_v29 = vunpack.c.l.s8.bf16 %v1892_v2  ;;  %v3844_v48 = vunpack.c.h.s8.bf16 %v1892_v2  ;;  %v1938_v18 = vld [vmem:[#allocation8 + $0x1e68] sm:$0xff] }
 0x8ed   :  { %6601 = vmatprep.subr.bf16.mxu1 %v3716_v46  ;;  %v3826_v46 = vunpack.c.l.s8.bf16 %v1890_v27 }
 0x8ef   :  { %6274 = vmatpush1.bf16.msra.mxu0 %v3713_v30  ;;  %v1891_v30 = vld [vmem:[#allocation8 + $0x1cf0] sm:$0xff] }
 0x8f0   :  { %6602 = vmatpush1.bf16.msra.mxu1 %v3715_v40  ;;  %6275 = vmatprep.subr.bf16.mxu0 %v3730_v32  ;;  %v3825_v40 = vunpack.c.l.s8.bf16 %v1889_v1  ;;  %v3827_v32 = vunpack.c.l.s8.bf16 %v1891_v30 }
 0x8f1   :  { %6603 = vmatprep.subr.bf16.mxu1 %v3732_v44  ;;  %v1906_v44 = vld [vmem:[#allocation8 + $0x1d68] sm:$0xff] }
 0x8f3   :  { %6276 = vmatpush1.bf16.msra.mxu0 %v3729_v37  ;;  %v3841_v37 = vunpack.c.h.s8.bf16 %v1889_v1  ;;  %v1954_v1 = vld [vmem:[#allocation8 + $0x1ee8] sm:$0xff] }
 0x8f4   :  { %6604 = vmatpush1.bf16.msra.mxu1 %v3731_v38  ;;  %6277 = vmatprep.subr.bf16.mxu0 %v3746_v23  ;;  %v3843_v38 = vunpack.c.h.s8.bf16 %v1891_v30  ;;  %v1905_v23 = vld [vmem:[#allocation8 + $0x1d60] sm:$0xff] }
 0x8f5   :  { %6605 = vmatprep.subr.bf16.mxu1 %v3748_v39  ;;  %v3860_v39 = vunpack.c.l.s8.bf16 %v1908_v34  ;;  %v3857_v52 = vunpack.c.l.s8.bf16 %v1905_v23  ;;  %v3873_v62 = vunpack.c.h.s8.bf16 %v1905_v23  ;;  %v1970_v23 = vld [vmem:[#allocation8 + $0x1f68] sm:$0xff] }
 0x8f7   :  { %6278 = vmatpush1.bf16.msra.mxu0 %v3745_v54  ;;  %v3859_v54 = vunpack.c.l.s8.bf16 %v1907_v49 }
 0x8f8   :  { %6606 = vmatpush1.bf16.msra.mxu1 %v3747_v59  ;;  %6279 = vmatprep.subr.bf16.mxu0 %v3762_v13  ;;  %v3874_v59 = vunpack.c.h.s8.bf16 %v1906_v44  ;;  %v3876_v13 = vunpack.c.h.s8.bf16 %v1908_v34 }
 0x8f9   :  { %6607 = vmatprep.subr.bf16.mxu1 %v3764_v58  ;;  %v1924_v58 = vld [vmem:[#allocation8 + $0x1df8] sm:$0xff] }
 0x8fb   :  { %6280 = vmatpush1.bf16.msra.mxu0 %v3761_v61  ;;  %v3875_v61 = vunpack.c.h.s8.bf16 %v1907_v49 }
 0x8fc   :  { %6608 = vmatpush1.bf16.msra.mxu1 %v3763_v17  ;;  %6281 = vmatprep.subr.bf16.mxu0 %v3778_v6  ;;  %v3890_v17 = vunpack.c.l.s8.bf16 %v1922_v4  ;;  %v1921_v6 = vld [vmem:[#allocation8 + $0x1de0] sm:$0xff] }
 0x8fd   :  { %6609 = vmatprep.subr.bf16.mxu1 %v3780_v8  ;;  %v3892_v8 = vunpack.c.l.s8.bf16 %v1924_v58  ;;  %v3889_v5 = vunpack.c.l.s8.bf16 %v1921_v6  ;;  %v3905_v21 = vunpack.c.h.s8.bf16 %v1921_v6 }
 0x8ff   :  { %6282 = vmatpush1.bf16.msra.mxu0 %v3777_v0  ;;  %v3891_v0 = vunpack.c.l.s8.bf16 %v1923_v9 }
 0x900   :  { %6610 = vmatpush1.bf16.msra.mxu1 %v3779_v60  ;;  %6292 = vmatprep.subr.bf16.mxu0 %v3794_v16  ;;  %v3906_v60 = vunpack.c.h.s8.bf16 %v1922_v4  ;;  %v3908_v16 = vunpack.c.h.s8.bf16 %v1924_v58  ;;  %v1971_v4 = vld [vmem:[#allocation8 + $0x1f70] sm:$0xff]  ;;  %v9721_v58 = vld [vmem:[#allocation10] sm:$0xff] }
 0x901   :  { %6620 = vmatprep.subr.bf16.mxu1 %v3796_v11  ;;  %v1940_v11 = vld [vmem:[#allocation8 + $0x1e78] sm:$0xff] }
 0x902   :  { %6284 = vmatmul.mubr.bf16.vlgmr.msra.gmra.mrb[28].mxu0 %v9590_v51 }
 0x903   :  { %6612 = vmatmul.mubr.bf16.vlgmr.msra.gmra.mrb[28].mxu1 %v9590_v51  ;;  %6293 = vmatpush1.bf16.msra.mxu0 %v3793_v20  ;;  %v3842_v51 = vunpack.c.h.s8.bf16 %v1890_v27  ;;  %v3907_v20 = vunpack.c.h.s8.bf16 %v1923_v9  ;;  %v3924_v27 = vunpack.c.l.s8.bf16 %v1940_v11  ;;  %v6672_v9 = vrot.slane %v9721_v58, %v9448_v45 }
 0x904   :  { %6324 = vmatprep.mubr.bf16.mxu0 %v9592_v53  ;;  %6621 = vmatpush1.bf16.msra.mxu1 %v3795_v10  ;;  %v3922_v10 = vunpack.c.l.s8.bf16 %v1938_v18 }
 0x905   :  { %6652 = vmatprep.mubr.bf16.mxu1 %v9592_v53  ;;  %6294 = vmatprep.subr.bf16.mxu0 %v3810_v15  ;;  %v3858_v53 = vunpack.c.l.s8.bf16 %v1906_v44  ;;  %v1937_v15 = vld [vmem:[#allocation8 + $0x1e60] sm:$0xff]  ;;  %v1955_v44 = vld [vmem:[#allocation8 + $0x1ef0] sm:$0xff] }
 0x906   :  { %6622 = vmatprep.subr.bf16.mxu1 %v3812_v28  ;;  %v1939_v28 = vld [vmem:[#allocation8 + $0x1e70] sm:$0xff]  ;;  %v3921_v2 = vunpack.c.l.s8.bf16 %v1937_v15  ;;  %v3937_v30 = vunpack.c.h.s8.bf16 %v1937_v15  ;;  %v6746_v15 = vmul.f32 %v6672_v9, %v9621_v3  ;;  %v6668_v9 = vrot.slane %v9721_v58, %v9443_v43 }
 0x907   :  { %6295 = vmatpush1.bf16.msra.mxu0 %v3809_v25  ;;  %v3923_v25 = vunpack.c.l.s8.bf16 %v1939_v28 }
 0x908   :  { %6623 = vmatpush1.bf16.msra.mxu1 %v3811_v26  ;;  %6296 = vmatprep.subr.bf16.mxu0 %v3826_v46  ;;  %v3938_v26 = vunpack.c.h.s8.bf16 %v1938_v18  ;;  %v3940_v46 = vunpack.c.h.s8.bf16 %v1940_v11  ;;  %v4003_v18 = vunpack.c.h.s8.bf16 %v1971_v4 }
 0x909   :  { %6624 = vmatprep.subr.bf16.mxu1 %v3828_v29  ;;  %v1956_v29 = vld [vmem:[#allocation8 + $0x1ef8] sm:$0xff] }
 0x90b   :  { %6297 = vmatpush1.bf16.msra.mxu0 %v3825_v40  ;;  %v3939_v40 = vunpack.c.h.s8.bf16 %v1939_v28 }
 0x90c   :  { %6625 = vmatpush1.bf16.msra.mxu1 %v3827_v32  ;;  %6298 = vmatprep.subr.bf16.mxu0 %v3842_v51  ;;  %v3954_v32 = vunpack.c.l.s8.bf16 %v1954_v1  ;;  %v1953_v51 = vld [vmem:[#allocation8 + $0x1ee0] sm:$0xff] }
 0x90d   :  { %6626 = vmatprep.subr.bf16.mxu1 %v3844_v48  ;;  %v3956_v48 = vunpack.c.l.s8.bf16 %v1956_v29  ;;  %v3953_v34 = vunpack.c.l.s8.bf16 %v1953_v51  ;;  %v3969_v49 = vunpack.c.h.s8.bf16 %v1953_v51 }
 0x90f   :  { %6299 = vmatpush1.bf16.msra.mxu0 %v3841_v37  ;;  %v3955_v37 = vunpack.c.l.s8.bf16 %v1955_v44 }
 0x910   :  { %6627 = vmatpush1.bf16.msra.mxu1 %v3843_v38  ;;  %6300 = vmatprep.subr.bf16.mxu0 %v3858_v53  ;;  %v3970_v38 = vunpack.c.h.s8.bf16 %v1954_v1  ;;  %v3972_v53 = vunpack.c.h.s8.bf16 %v1956_v29 }
 0x911   :  { %6628 = vmatprep.subr.bf16.mxu1 %v3860_v39  ;;  %v1972_v39 = vld [vmem:[#allocation8 + $0x1f78] sm:$0xff] }
 0x912   :  { %v4004_v6 = vunpack.c.h.s8.bf16 %v1972_v39 }
 0x913   :  { %6301 = vmatpush1.bf16.msra.mxu0 %v3857_v52  ;;  %v3971_v52 = vunpack.c.h.s8.bf16 %v1955_v44  ;;  %v8912_v44 = vld [vmem:[%s10209_s6] sm:$0xff]  }
 0x914   :  { %6629 = vmatpush1.bf16.msra.mxu1 %v3859_v54  ;;  %6302 = vmatprep.subr.bf16.mxu0 %v3874_v59  ;;  %v3986_v54 = vunpack.c.l.s8.bf16 %v1970_v23  ;;  %v1969_v59 = vld [vmem:[#allocation8 + $0x1f60] sm:$0xff] }
 0x915   :  { %6630 = vmatprep.subr.bf16.mxu1 %v3876_v13  ;;  %v3988_v13 = vunpack.c.l.s8.bf16 %v1972_v39  ;;  %v8916_v39 = vld [vmem:[%s10209_s6 + $0x8] sm:$0xff]  }
 0x917   :  { %6303 = vmatpush1.bf16.msra.mxu0 %v3873_v62  ;;  %v3985_v62 = vunpack.c.l.s8.bf16 %v1969_v59 }
 0x918   :  { %6631 = vmatpush1.bf16.msra.mxu1 %v3875_v61  ;;  %6304 = vmatprep.subr.bf16.mxu0 %v3890_v17  ;;  %v3987_v61 = vunpack.c.l.s8.bf16 %v1971_v4  ;;  %v4002_v17 = vunpack.c.h.s8.bf16 %v1970_v23  ;;  %v8923_v4 = vld [vmem:[%s10209_s6 + $0xd8] sm:$0xff]  }
 0x919   :  { %6632 = vmatprep.subr.bf16.mxu1 %v3892_v8  ;;  %v1986_v8 = vld [vmem:[#allocation8 + $0x1fe8] sm:$0xff] }
 0x91a   :  { %v4018_v11 = vunpack.c.l.s8.bf16 %v1986_v8 }
 0x91b   :  { %6305 = vmatpush1.bf16.msra.mxu0 %v3889_v5  ;;  %v1988_v5 = vld [vmem:[#allocation8 + $0x1ff8] sm:$0xff] }
 0x91c   :  { %6633 = vmatpush1.bf16.msra.mxu1 %v3891_v0  ;;  %6306 = vmatprep.subr.bf16.mxu0 %v3906_v60  ;;  %v9725_v0 = vld [vmem:[#allocation11] sm:$0xff]  ;;  %v6680_v60 = vrot.slane %v9721_v58, %v9453_v47  ;;  %v4036_v1 = vunpack.c.h.s8.bf16 %v1988_v5 }
 0x91d   :  { %6634 = vmatprep.subr.bf16.mxu1 %v3908_v16  ;;  %v4001_v16 = vunpack.c.h.s8.bf16 %v1969_v59  ;;  %v8921_v59 = vld [vmem:[%s10209_s6 + $0x90] sm:$0xff]  }
 0x91e   :  { %v6748_v28 = vmul.f32 %v6680_v60, %v9623_v22  ;;  %v8910_v22 = vld [vmem:[%s10209_s6 + $0x40] sm:$0xff]   ;;  %v8930_v60 = vld [vmem:[%s10209_s6 + $0x68] sm:$0xff]  }
 0x91f   :  { %6307 = vmatpush1.bf16.msra.mxu0 %v3905_v21  ;;  %v1985_v21 = vld [vmem:[#allocation8 + $0x1fe0] sm:$0xff] }
 0x920   :  { %6635 = vmatpush1.bf16.msra.mxu1 %v3907_v20  ;;  %6308 = vmatprep.subr.bf16.mxu0 %v3922_v10  ;;  %v4020_v20 = vunpack.c.l.s8.bf16 %v1988_v5  ;;  %v1987_v10 = vld [vmem:[#allocation8 + $0x1ff0] sm:$0xff]  ;;  %v4033_v3 = vunpack.c.h.s8.bf16 %v1985_v21  ;;  %v8929_v5 = vld [vmem:[%s10209_s6 + $0xa0] sm:$0xff]  }
 0x921   :  { %6636 = vmatprep.subr.bf16.mxu1 %v3924_v27  ;;  %v6772_v27 = vrot.slane %v9725_v0, %v9448_v45 }
 0x923   :  { %6309 = vmatpush1.bf16.msra.mxu0 %v3921_v2  ;;  %v6780_v2 = vrot.slane %v9725_v0, %v9453_v47  ;;  %v6846_v29 = vadd.f32 %v6772_v27, %v6746_v15  ;;  %v6768_v15 = vrot.slane %v9725_v0, %v9443_v43  ;;  %v8933_v27 = vld [vmem:[%s10209_s6 + $0xa8] sm:$0xff]  }
 0x924   :  { %6637 = vmatpush1.bf16.msra.mxu1 %v3923_v25  ;;  %6310 = vmatprep.subr.bf16.mxu0 %v3938_v26  ;;  %v4017_v25 = vunpack.c.l.s8.bf16 %v1985_v21  ;;  %v4019_v26 = vunpack.c.l.s8.bf16 %v1987_v10  ;;  %v6696_v21 = vrot.slane %v9721_v58, %v9512_v50 }
 0x925   :  { %6638 = vmatprep.subr.bf16.mxu1 %v3940_v46  ;;  %v4034_v46 = vunpack.c.h.s8.bf16 %v1986_v8  ;;  %v6862_v51 = vmax.f32 %v6846_v29, 0.0  ;;  %v8928_v8 = vld [vmem:[%s10209_s6 + $0x20] sm:$0xff]   ;;  %v6796_v29 = vrot.slane %v9725_v0, %v9512_v50 }
 0x927   :  { %6311 = vmatpush1.bf16.msra.mxu0 %v3937_v30  ;;  %v6848_v30 = vadd.f32 %v6780_v2, %v6748_v28  ;;  %v8934_v28 = vld [vmem:[%s10209_s6 + $0x70] sm:$0xff]  }
 0x928   :  { %6639 = vmatpush1.bf16.msra.mxu1 %v3939_v40  ;;  %6312 = vmatprep.subr.bf16.mxu0 %v3954_v32  ;;  %v4035_v40 = vunpack.c.h.s8.bf16 %v1987_v10  ;;  %v8911_v32 = vld [vmem:[%s10209_s6 + $0xc0] sm:$0xff]   ;;  %v6745_v10 = vmul.f32 %v6668_v9, %v9617_v31  ;;  %v8935_v31 = vld [vmem:[%s10209_s6 + $0xf0] sm:$0xff]  }
 0x929   :  { %6640 = vmatprep.subr.bf16.mxu1 %v3956_v48  ;;  %v6864_v48 = vmax.f32 %v6848_v30, 0.0  ;;  %v8953_v9 = vld [vmem:[%s10209_s6 + $0x190] sm:$0xff]  }
 0x92a   :  { %v6845_v30 = vadd.f32 %v6768_v15, %v6745_v10  ;;  %v8960_v10 = vld [vmem:[%s10209_s6 + $0x120] sm:$0xff]   ;;  %v6684_v15 = vrot.slane %v9721_v58, %v9499_v35 }
 0x92b   :  { %6313 = vmatpush1.bf16.msra.mxu0 %v3953_v34  ;;  %v8913_v34 = vld [vmem:[%s10209_s6 + $0x80] sm:$0xff]   ;;  %v6880_v23 = vpack.c.bf16 %v6864_v48, %v6864_v48 }
 0x92c   :  { %6641 = vmatpush1.bf16.msra.mxu1 %v3955_v37  ;;  %6314 = vmatprep.subr.bf16.mxu0 %v3970_v38  ;;  %v8914_v37 = vld [vmem:[%s10209_s6 + $0x48] sm:$0xff]   ;;  %v6878_v38 = vpack.c.bf16 %v6862_v51, %v6862_v51  ;;  %v8940_v51 = vld [vmem:[%s10209_s6 + $0x38] sm:$0xff]   ;;  %v6861_v48 = vmax.f32 %v6845_v30, 0.0  ;;  %v8966_v30 = vld [vmem:[%s10209_s6 + $0x170] sm:$0xff]  }
 0x92d   :  { %6642 = vmatprep.subr.bf16.mxu1 %v3972_v53  ;;  %v8915_v53 = vld [vmem:[%s10209_s6 + $0xc8] sm:$0xff]  }
 0x92f   :  { %6315 = vmatpush1.bf16.msra.mxu0 %v3969_v49  ;;  %v8917_v49 = vld [vmem:[%s10209_s6 + $0x88] sm:$0xff]  }
 0x930   :  { %6643 = vmatpush1.bf16.msra.mxu1 %v3971_v52  ;;  %6316 = vmatprep.subr.bf16.mxu0 %v3986_v54  ;;  %v8918_v52 = vld [vmem:[%s10209_s6 + $0x50] sm:$0xff]  }
 0x931   :  { %6644 = vmatprep.subr.bf16.mxu1 %v3988_v13  ;;  %v8920_v54 = vld [vmem:[%s10209_s6 + $0x10] sm:$0xff]   ;;  %v8922_v13 = vld [vmem:[%s10209_s6 + $0x58] sm:$0xff]  }
 0x933   :  { %6317 = vmatpush1.bf16.msra.mxu0 %v3985_v62  ;;  %v8924_v62 = vld [vmem:[%s10209_s6 + $0x18] sm:$0xff]  }
 0x934   :  { %6645 = vmatpush1.bf16.msra.mxu1 %v3987_v61  ;;  %6318 = vmatprep.subr.bf16.mxu0 %v4002_v17  ;;  %v8925_v61 = vld [vmem:[%s10209_s6 + $0x98] sm:$0xff]   ;;  %v8926_v17 = vld [vmem:[%s10209_s6 + $0x60] sm:$0xff]  }
 0x935   :  { %6646 = vmatprep.subr.bf16.mxu1 %v4004_v6  ;;  %v8927_v6 = vld [vmem:[%s10209_s6 + $0xe0] sm:$0xff]  }
 0x937   :  { %6319 = vmatpush1.bf16.msra.mxu0 %v4001_v16  ;;  %v6676_v16 = vrot.slane %v9721_v58, %v9482_v56 }
 0x938   :  { %6647 = vmatpush1.bf16.msra.mxu1 %v4003_v18  ;;  %6320 = vmatprep.subr.bf16.mxu0 %v4018_v11  ;;  %v8931_v18 = vld [vmem:[%s10209_s6 + $0xe8] sm:$0xff]   ;;  %v6688_v11 = vrot.slane %v9721_v58, %v9502_v36 }
 0x939   :  { %6648 = vmatprep.subr.bf16.mxu1 %v4020_v20  ;;  %v8932_v20 = vld [vmem:[%s10209_s6 + $0x28] sm:$0xff]   ;;  %v6747_v2 = vmul.f32 %v6676_v16, %v9619_v19  ;;  %v8936_v19 = vld [vmem:[%s10209_s6 + $0x30] sm:$0xff]   ;;  %v8956_v16 = vld [vmem:[%s10209_s6 + $0x118] sm:$0xff]  }
 0x93b   :  { %6321 = vmatpush1.bf16.msra.mxu0 %v4017_v25  ;;  %v6776_v25 = vrot.slane %v9725_v0, %v9482_v56 }
 0x93c   :  { %6649 = vmatpush1.bf16.msra.mxu1 %v4019_v26  ;;  %6322 = vmatprep.subr.bf16.mxu0 %v4034_v46  ;;  %v6750_v26 = vmul.f32 %v6688_v11, %v9661_v55  ;;  %v6788_v46 = vrot.slane %v9725_v0, %v9502_v36  ;;  %v8937_v55 = vld [vmem:[%s10209_s6 + $0xb0] sm:$0xff]   ;;  %v8958_v11 = vld [vmem:[%s10209_s6 + $0x160] sm:$0xff]  }
 0x93d   :  { %6650 = vmatprep.subr.bf16.mxu1 %v4036_v1  ;;  %v6752_v1 = vmul.f32 %v6696_v21, %v9663_v57  ;;  %v6847_v57 = vadd.f32 %v6776_v25, %v6747_v2  ;;  %v8959_v21 = vld [vmem:[%s10209_s6 + $0x1e0] sm:$0xff]   ;;  %v6692_v2 = vrot.slane %v9721_v58, %v9507_v41  ;;  %v8963_v25 = vld [vmem:[%s10209_s6 + $0x1e8] sm:$0xff]   ;;  %v6749_v58 = vmul.f32 %v6684_v15, %v9657_v33  ;;  %v8967_v33 = vld [vmem:[%s10209_s6 + $0x1f0] sm:$0xff]  }
 0x93e   :  { %v8991_v15 = vld [vmem:[%s10209_s6 + $0x2e0] sm:$0xff]  }
 0x93f   :  { %6323 = vmatpush1.bf16.msra.mxu0 %v4033_v3  ;;  %v8938_v3 = vld [vmem:[%s10209_s6 + $0x78] sm:$0xff]  }
 0x940   :  { %6651 = vmatpush1.bf16.msra.mxu1 %v4035_v40  ;;  %8494 = vmatprep.subr.bf16.mxu0 %v8910_v22  ;;  %v8939_v40 = vld [vmem:[%s10209_s6 + $0xf8] sm:$0xff]   ;;  %v6850_v22 = vadd.f32 %v6788_v46, %v6750_v26  ;;  %v9927_v26 = vld [vmem:[#allocation11 + $0x8] sm:$0xff] }
 0x941   :  { %8516 = vmatprep.subr.bf16.mxu1 %v8911_v32  ;;  %v6852_v32 = vadd.f32 %v6796_v29, %v6752_v1  ;;  %v8964_v1 = vld [vmem:[%s10209_s6 + $0x128] sm:$0xff]   ;;  %v6784_v29 = vrot.slane %v9725_v0, %v9499_v35 }
 0x942   :  { %6325 = vmatmul.mubr.bf16.vlgmr.msra.gmra.mrb[28].mxu0 %v9599_v14 }
 0x943   :  { %6653 = vmatmul.mubr.bf16.vlgmr.msra.gmra.mrb[28].mxu1 %v9599_v14  ;;  %8495 = vmatpush3.bf16.msra.mxu0 %v8912_v44  ;;  %v8919_v14 = vld [vmem:[%s10209_s6 + $0xd0] sm:$0xff]   ;;  %v8941_v44 = vld [vmem:[%s10209_s6 + $0xb8] sm:$0xff]  }
 0x944   :  { %7956 = vmatprep.mubr.bf16.mxu0 %v6878_v38  ;;  %8517 = vmatpush3.bf16.msra.mxu1 %v8913_v34  ;;  %v8942_v34 = vld [vmem:[%s10209_s6 + $0x140] sm:$0xff]  }
 0x945   :  { %7996 = vmatprep.mubr.bf16.mxu1 %v6880_v23  ;;  %8496 = vmatprep.subr.bf16.mxu0 %v8914_v37  ;;  %v6863_v37 = vmax.f32 %v6847_v57, 0.0  ;;  %v8943_v38 = vld [vmem:[%s10209_s6 + $0x1c0] sm:$0xff]   ;;  %v6868_v23 = vmax.f32 %v6852_v32, 0.0  ;;  %v6812_v32 = vrot.slane %v9927_v26, %v9453_v47 }
 0x946   :  { %8518 = vmatprep.subr.bf16.mxu1 %v8915_v53  ;;  %v6866_v53 = vmax.f32 %v6850_v22, 0.0 }
 0x947   :  { %8497 = vmatpush3.bf16.msra.mxu0 %v8916_v39  ;;  %v8944_v39 = vld [vmem:[%s10209_s6 + $0x100] sm:$0xff]  }
 0x948   :  { %8519 = vmatpush3.bf16.msra.mxu1 %v8917_v49  ;;  %8498 = vmatprep.subr.bf16.mxu0 %v8918_v52  ;;  %v6877_v49 = vpack.c.bf16 %v6861_v48, %v6861_v48  ;;  %v8945_v52 = vld [vmem:[%s10209_s6 + $0x180] sm:$0xff]  }
 0x949   :  { %8520 = vmatprep.subr.bf16.mxu1 %v8919_v14  ;;  %v6879_v14 = vpack.c.bf16 %v6863_v37, %v6863_v37  ;;  %v8973_v37 = vld [vmem:[%s10209_s6 + $0x1b8] sm:$0xff]  }
 0x94b   :  { %8499 = vmatpush3.bf16.msra.mxu0 %v8920_v54  ;;  %v8946_v54 = vld [vmem:[%s10209_s6 + $0x148] sm:$0xff]  }
 0x94c   :  { %8521 = vmatpush3.bf16.msra.mxu1 %v8921_v59  ;;  %8500 = vmatprep.subr.bf16.mxu0 %v8922_v13  ;;  %v6882_v59 = vpack.c.bf16 %v6866_v53, %v6866_v53  ;;  %v8947_v13 = vld [vmem:[%s10209_s6 + $0x1c8] sm:$0xff]  }
 0x94d   :  { %8522 = vmatprep.subr.bf16.mxu1 %v8923_v4  ;;  %v6884_v4 = vpack.c.bf16 %v6868_v23, %v6868_v23  ;;  %v8975_v23 = vld [vmem:[%s10209_s6 + $0x2c0] sm:$0xff]  }
 0x94f   :  { %8501 = vmatpush3.bf16.msra.mxu0 %v8924_v62  ;;  %v8948_v62 = vld [vmem:[%s10209_s6 + $0x108] sm:$0xff]  }
 0x950   :  { %8523 = vmatpush3.bf16.msra.mxu1 %v8925_v61  ;;  %8502 = vmatprep.subr.bf16.mxu0 %v8926_v17  ;;  %v8949_v61 = vld [vmem:[%s10209_s6 + $0x188] sm:$0xff]   ;;  %v8950_v17 = vld [vmem:[%s10209_s6 + $0x150] sm:$0xff]  }
 0x951   :  { %8524 = vmatprep.subr.bf16.mxu1 %v8927_v6  ;;  %v8951_v6 = vld [vmem:[%s10209_s6 + $0x1d0] sm:$0xff]  }
 0x953   :  { %8503 = vmatpush3.bf16.msra.mxu0 %v8928_v8  ;;  %v8952_v8 = vld [vmem:[%s10209_s6 + $0x110] sm:$0xff]  }
 0x954   :  { %8525 = vmatpush3.bf16.msra.mxu1 %v8929_v5  ;;  %8504 = vmatprep.subr.bf16.mxu0 %v8930_v60  ;;  %v8954_v5 = vld [vmem:[%s10209_s6 + $0x158] sm:$0xff]  }
 0x955   :  { %8526 = vmatprep.subr.bf16.mxu1 %v8931_v18  ;;  %v8955_v60 = vld [vmem:[%s10209_s6 + $0x1d8] sm:$0xff]  }
 0x956   :  { %v8957_v18 = vld [vmem:[%s10209_s6 + $0x198] sm:$0xff]  }
 0x957   :  { %8505 = vmatpush3.bf16.msra.mxu0 %v8932_v20  ;;  %v9907_v20 = vld [vmem:[#allocation10 + $0x8] sm:$0xff] }
 0x958   :  { %8527 = vmatpush3.bf16.msra.mxu1 %v8933_v27  ;;  %8506 = vmatprep.subr.bf16.mxu0 %v8934_v28  ;;  %v8961_v27 = vld [vmem:[%s10209_s6 + $0x1a0] sm:$0xff]   ;;  %v8962_v28 = vld [vmem:[%s10209_s6 + $0x168] sm:$0xff]   ;;  %v6712_v46 = vrot.slane %v9907_v20, %v9453_v47  ;;  %v8971_v47 = vld [vmem:[%s10209_s6 + $0x1f8] sm:$0xff]  }
 0x959   :  { %8528 = vmatprep.subr.bf16.mxu1 %v8935_v31  ;;  %v6704_v31 = vrot.slane %v9907_v20, %v9448_v45 }
 0x95a   :  { %v6756_v22 = vmul.f32 %v6712_v46, %v9703_v24  ;;  %v8995_v46 = vld [vmem:[%s10209_s6 + $0x2e8] sm:$0xff]  }
 0x95b   :  { %8507 = vmatpush3.bf16.msra.mxu0 %v8936_v19  ;;  %v8965_v19 = vld [vmem:[%s10209_s6 + $0x1a8] sm:$0xff]   ;;  %v6754_v57 = vmul.f32 %v6704_v31, %v9701_v7  ;;  %v8969_v7 = vld [vmem:[%s10209_s6 + $0x1b0] sm:$0xff]   ;;  %v6708_v31 = vrot.slane %v9907_v20, %v9482_v56 }
 0x95c   :  { %8529 = vmatpush3.bf16.msra.mxu1 %v8937_v55  ;;  %8508 = vmatprep.subr.bf16.mxu0 %v8938_v3  ;;  %v6751_v55 = vmul.f32 %v6692_v2, %v9659_v63  ;;  %v6792_v3 = vrot.slane %v9725_v0, %v9507_v41  ;;  %v8968_v63 = vld [vmem:[%s10209_s6 + $0x130] sm:$0xff]   ;;  %v6849_v0 = vadd.f32 %v6784_v29, %v6749_v58  ;;  %v8993_v2 = vld [vmem:[%s10209_s6 + $0x2a0] sm:$0xff]  }
 0x95d   :  { %8530 = vmatprep.subr.bf16.mxu1 %v8939_v40  ;;  %v6804_v40 = vrot.slane %v9927_v26, %v9448_v45  ;;  %v8970_v45 = vld [vmem:[%s10209_s6 + $0x178] sm:$0xff]   ;;  %v6856_v48 = vadd.f32 %v6812_v32, %v6756_v22  ;;  %v6800_v29 = vrot.slane %v9927_v26, %v9443_v43 }
 0x95e   :  { %v6851_v24 = vadd.f32 %v6792_v3, %v6751_v55  ;;  %v6755_v55 = vmul.f32 %v6708_v31, %v9699_v12  ;;  %v6808_v3 = vrot.slane %v9927_v26, %v9482_v56  ;;  %v9001_v12 = vld [vmem:[%s10209_s6 + $0x2b0] sm:$0xff]   ;;  %v9002_v56 = vld [vmem:[%s10209_s6 + $0x278] sm:$0xff]   ;;  %v6728_v31 = vrot.slane %v9907_v20, %v9512_v50 }
 0x95f   :  { %8509 = vmatpush3.bf16.msra.mxu0 %v8940_v51  ;;  %v6854_v51 = vadd.f32 %v6804_v40, %v6754_v57  ;;  %v9003_v40 = vld [vmem:[%s10209_s6 + $0x2f8] sm:$0xff]  }
 0x960   :  { %8531 = vmatpush3.bf16.msra.mxu1 %v8941_v44  ;;  %8538 = vmatprep.subr.bf16.mxu0 %v8942_v34  ;;  %v8972_v44 = vld [vmem:[%s10209_s6 + $0x138] sm:$0xff]   ;;  %v6865_v34 = vmax.f32 %v6849_v0, 0.0  ;;  %v6867_v53 = vmax.f32 %v6851_v24, 0.0  ;;  %v6855_v57 = vadd.f32 %v6808_v3, %v6755_v55  ;;  %v9006_v0 = vld [vmem:[%s10209_s6 + $0x340] sm:$0xff]   ;;  %v6828_v55 = vrot.slane %v9927_v26, %v9512_v50 }
 0x961   :  { %8560 = vmatprep.subr.bf16.mxu1 %v8943_v38  ;;  %v8974_v38 = vld [vmem:[%s10209_s6 + $0x240] sm:$0xff]   ;;  %v9004_v22 = vld [vmem:[%s10209_s6 + $0x238] sm:$0xff]  }
 0x962   :  { %7957 = vmatmul.mubr.bf16.vlgmr.msra.gmra.mrb[32].mxu0 %v6877_v49  ;;  %v6872_v49 = vmax.f32 %v6856_v48, 0.0  ;;  %v9008_v24 = vld [vmem:[%s10209_s6 + $0x300] sm:$0xff]   ;;  %v9010_v48 = vld [vmem:[%s10209_s6 + $0x348] sm:$0xff]  }
 0x963   :  { %7997 = vmatmul.mubr.bf16.vlgmr.msra.gmra.mrb[32].mxu1 %v6879_v14  ;;  %8539 = vmatpush3.bf16.msra.mxu0 %v8944_v39  ;;  %v6870_v39 = vmax.f32 %v6854_v51, 0.0  ;;  %v6881_v14 = vpack.c.bf16 %v6865_v34, %v6865_v34  ;;  %v9009_v51 = vld [vmem:[%s10209_s6 + $0x380] sm:$0xff]   ;;  %v9011_v34 = vld [vmem:[%s10209_s6 + $0x3c8] sm:$0xff]  }
 0x964   :  { %8036 = vmatprep.mubr.bf16.mxu0 %v6882_v59  ;;  %8561 = vmatpush3.bf16.msra.mxu1 %v8945_v52  ;;  %v8976_v52 = vld [vmem:[%s10209_s6 + $0x200] sm:$0xff]   ;;  %v6883_v59 = vpack.c.bf16 %v6867_v53, %v6867_v53  ;;  %v9014_v53 = vld [vmem:[%s10209_s6 + $0x350] sm:$0xff]  }
 0x965   :  { %8076 = vmatprep.mubr.bf16.mxu1 %v6884_v4  ;;  %8540 = vmatprep.subr.bf16.mxu0 %v8946_v54  ;;  %v8977_v54 = vld [vmem:[%s10209_s6 + $0x280] sm:$0xff]   ;;  %v6886_v4 = vpack.c.bf16 %v6870_v39, %v6870_v39  ;;  %v9016_v39 = vld [vmem:[%s10209_s6 + $0x310] sm:$0xff]  }
 0x966   :  { %8562 = vmatprep.subr.bf16.mxu1 %v8947_v13  ;;  %v8978_v13 = vld [vmem:[%s10209_s6 + $0x248] sm:$0xff]  }
 0x967   :  { %8541 = vmatpush3.bf16.msra.mxu0 %v8948_v62  ;;  %v8979_v62 = vld [vmem:[%s10209_s6 + $0x2c8] sm:$0xff]  }
 0x968   :  { %8563 = vmatpush3.bf16.msra.mxu1 %v8949_v61  ;;  %8542 = vmatprep.subr.bf16.mxu0 %v8950_v17  ;;  %v6888_v61 = vpack.c.bf16 %v6872_v49, %v6872_v49  ;;  %v8980_v17 = vld [vmem:[%s10209_s6 + $0x208] sm:$0xff]   ;;  %v9017_v49 = vld [vmem:[%s10209_s6 + $0x390] sm:$0xff]  }
 0x969   :  { %8564 = vmatprep.subr.bf16.mxu1 %v8951_v6  ;;  %v8981_v6 = vld [vmem:[%s10209_s6 + $0x288] sm:$0xff]  }
 0x96b   :  { %8543 = vmatpush3.bf16.msra.mxu0 %v8952_v8  ;;  %v8982_v8 = vld [vmem:[%s10209_s6 + $0x250] sm:$0xff]  }
 0x96c   :  { %8565 = vmatpush3.bf16.msra.mxu1 %v8953_v9  ;;  %8544 = vmatprep.subr.bf16.mxu0 %v8954_v5  ;;  %v8983_v9 = vld [vmem:[%s10209_s6 + $0x2d0] sm:$0xff]  }
 0x96d   :  { %8566 = vmatprep.subr.bf16.mxu1 %v8955_v60  ;;  %v8984_v5 = vld [vmem:[%s10209_s6 + $0x210] sm:$0xff]  }
 0x96e   :  { %v8985_v60 = vld [vmem:[%s10209_s6 + $0x290] sm:$0xff]  }
 0x96f   :  { %8545 = vmatpush3.bf16.msra.mxu0 %v8956_v16  ;;  %v8986_v16 = vld [vmem:[%s10209_s6 + $0x258] sm:$0xff]  }
 0x970   :  { %8567 = vmatpush3.bf16.msra.mxu1 %v8957_v18  ;;  %8546 = vmatprep.subr.bf16.mxu0 %v8958_v11  ;;  %v8987_v18 = vld [vmem:[%s10209_s6 + $0x2d8] sm:$0xff]  }
 0x971   :  { %8568 = vmatprep.subr.bf16.mxu1 %v8959_v21  ;;  %v8988_v11 = vld [vmem:[%s10209_s6 + $0x218] sm:$0xff]  }
 0x972   :  { %v8989_v21 = vld [vmem:[%s10209_s6 + $0x298] sm:$0xff]  }
 0x973   :  { %8547 = vmatpush3.bf16.msra.mxu0 %v8960_v10  ;;  %v8990_v10 = vld [vmem:[%s10209_s6 + $0x260] sm:$0xff]  }
 0x974   :  { %8569 = vmatpush3.bf16.msra.mxu1 %v8961_v27  ;;  %8548 = vmatprep.subr.bf16.mxu0 %v8962_v28  ;;  %v8992_v27 = vld [vmem:[%s10209_s6 + $0x220] sm:$0xff]   ;;  %v6700_v28 = vrot.slane %v9907_v20, %v9443_v43  ;;  %v8999_v43 = vld [vmem:[%s10209_s6 + $0x2f0] sm:$0xff]  }
 0x975   :  { %8570 = vmatprep.subr.bf16.mxu1 %v8963_v25  ;;  %v8994_v25 = vld [vmem:[%s10209_s6 + $0x268] sm:$0xff]  }
 0x976   :  { %v6753_v58 = vmul.f32 %v6700_v28, %v9697_v42  ;;  %v9000_v42 = vld [vmem:[%s10209_s6 + $0x230] sm:$0xff]   ;;  %v6724_v28 = vrot.slane %v9907_v20, %v9507_v41 }
 0x977   :  { %8549 = vmatpush3.bf16.msra.mxu0 %v8964_v1  ;;  %v8996_v1 = vld [vmem:[%s10209_s6 + $0x228] sm:$0xff]  }
 0x978   :  { %8571 = vmatpush3.bf16.msra.mxu1 %v8965_v19  ;;  %8550 = vmatprep.subr.bf16.mxu0 %v8966_v30  ;;  %v8997_v19 = vld [vmem:[%s10209_s6 + $0x2a8] sm:$0xff]   ;;  %v8998_v30 = vld [vmem:[%s10209_s6 + $0x270] sm:$0xff]  }
 0x979   :  { %8572 = vmatprep.subr.bf16.mxu1 %v8967_v33  ;;  %v6853_v33 = vadd.f32 %v6800_v29, %v6753_v58  ;;  %v6820_v58 = vrot.slane %v9927_v26, %v9502_v36 }
 0x97b   :  { %8551 = vmatpush3.bf16.msra.mxu0 %v8968_v63  ;;  %v6869_v32 = vmax.f32 %v6853_v33, 0.0  ;;  %v9005_v63 = vld [vmem:[%s10209_s6 + $0x2b8] sm:$0xff]  }
 0x97c   :  { %8573 = vmatpush3.bf16.msra.mxu1 %v8969_v7  ;;  %8552 = vmatprep.subr.bf16.mxu0 %v8970_v45  ;;  %v6871_v7 = vmax.f32 %v6855_v57, 0.0  ;;  %v9007_v45 = vld [vmem:[%s10209_s6 + $0x3c0] sm:$0xff]  }
 0x97d   :  { %8574 = vmatprep.subr.bf16.mxu1 %v8971_v47  ;;  %v6885_v47 = vpack.c.bf16 %v6869_v32, %v6869_v32 }
 0x97f   :  { %8553 = vmatpush3.bf16.msra.mxu0 %v8972_v44  ;;  %v6887_v44 = vpack.c.bf16 %v6871_v7, %v6871_v7 }
 0x980   :  { %8575 = vmatpush3.bf16.msra.mxu1 %v8973_v37  ;;  %8582 = vmatprep.subr.bf16.mxu0 %v8974_v38  ;;  %v9012_v37 = vld [vmem:[%s10209_s6 + $0x308] sm:$0xff]  }
 0x981   :  { %8604 = vmatprep.subr.bf16.mxu1 %v8975_v23  ;;  %v9013_v38 = vld [vmem:[%s10209_s6 + $0x388] sm:$0xff]   ;;  %v9015_v23 = vld [vmem:[%s10209_s6 + $0x3d0] sm:$0xff]  }
 0x982   :  { %8037 = vmatmul.mubr.bf16.vlgmr.msra.gmra.mrb[36].mxu0 %v6881_v14  ;;  %v9019_v14 = vld [vmem:[%s10209_s6 + $0x3d8] sm:$0xff]  }
 0x983   :  { %8077 = vmatmul.mubr.bf16.vlgmr.msra.gmra.mrb[36].mxu1 %v6883_v59  ;;  %8583 = vmatpush3.bf16.msra.mxu0 %v8976_v52  ;;  %v9018_v52 = vld [vmem:[%s10209_s6 + $0x358] sm:$0xff]  }
 0x984   :  { %8116 = vmatprep.mubr.bf16.mxu0 %v6886_v4  ;;  %8605 = vmatpush3.bf16.msra.mxu1 %v8977_v54  ;;  %v9020_v54 = vld [vmem:[%s10209_s6 + $0x318] sm:$0xff]   ;;  %v9023_v4 = vld [vmem:[%s10209_s6 + $0x3e0] sm:$0xff]  }
 0x985   :  { %8156 = vmatprep.mubr.bf16.mxu1 %v6888_v61  ;;  %8584 = vmatprep.subr.bf16.mxu0 %v8978_v13  ;;  %v9021_v59 = vld [vmem:[%s10209_s6 + $0x398] sm:$0xff]   ;;  %v9022_v13 = vld [vmem:[%s10209_s6 + $0x360] sm:$0xff]  }
 0x986   :  { %8606 = vmatprep.subr.bf16.mxu1 %v8979_v62  ;;  %v9024_v62 = vld [vmem:[%s10209_s6 + $0x320] sm:$0xff]  }
 0x987   :  { %8585 = vmatpush3.bf16.msra.mxu0 %v8980_v17  ;;  %v9025_v61 = vld [vmem:[%s10209_s6 + $0x3a0] sm:$0xff]   ;;  %v9026_v17 = vld [vmem:[%s10209_s6 + $0x368] sm:$0xff]  }
 0x988   :  { %8607 = vmatpush3.bf16.msra.mxu1 %v8981_v6  ;;  %8586 = vmatprep.subr.bf16.mxu0 %v8982_v8  ;;  %v9027_v6 = vld [vmem:[%s10209_s6 + $0x3e8] sm:$0xff]  }
 0x989   :  { %8608 = vmatprep.subr.bf16.mxu1 %v8983_v9  ;;  %v9028_v8 = vld [vmem:[%s10209_s6 + $0x328] sm:$0xff]  }
 0x98a   :  { %v9029_v9 = vld [vmem:[%s10209_s6 + $0x3a8] sm:$0xff]  }
 0x98b   :  { %8587 = vmatpush3.bf16.msra.mxu0 %v8984_v5  ;;  %v9030_v5 = vld [vmem:[%s10209_s6 + $0x370] sm:$0xff]  }
 0x98c   :  { %8609 = vmatpush3.bf16.msra.mxu1 %v8985_v60  ;;  %8588 = vmatprep.subr.bf16.mxu0 %v8986_v16  ;;  %v9031_v60 = vld [vmem:[%s10209_s6 + $0x3f0] sm:$0xff]  }
 0x98d   :  { %8610 = vmatprep.subr.bf16.mxu1 %v8987_v18  ;;  %v9032_v16 = vld [vmem:[%s10209_s6 + $0x330] sm:$0xff]  }
 0x98e   :  { %v9033_v18 = vld [vmem:[%s10209_s6 + $0x3b0] sm:$0xff]  }
 0x98f   :  { %8589 = vmatpush3.bf16.msra.mxu0 %v8988_v11  ;;  %v9034_v11 = vld [vmem:[%s10209_s6 + $0x378] sm:$0xff]  }
 0x990   :  { %8611 = vmatpush3.bf16.msra.mxu1 %v8989_v21  ;;  %8590 = vmatprep.subr.bf16.mxu0 %v8990_v10  ;;  %v9035_v21 = vld [vmem:[%s10209_s6 + $0x3f8] sm:$0xff]  }
 0x991   :  { %8612 = vmatprep.subr.bf16.mxu1 %v8991_v15  ;;  %v9036_v10 = vld [vmem:[%s10209_s6 + $0x338] sm:$0xff]  }
 0x992   :  { %v9037_v15 = vld [vmem:[%s10209_s6 + $0x3b8] sm:$0xff]   ;;  %s9265_s6 = smov 32  }
 0x993   :  { %8591 = vmatpush3.bf16.msra.mxu0 %v8992_v27  ;;  %v6716_v27 = vrot.slane %v9907_v20, %v9499_v35 }
 0x994   :  { %8613 = vmatpush3.bf16.msra.mxu1 %v8993_v2  ;;  %8592 = vmatprep.subr.bf16.mxu0 %v8994_v25  ;;  %v6720_v2 = vrot.slane %v9907_v20, %v9502_v36  ;;  %v6816_v25 = vrot.slane %v9927_v26, %v9499_v35 }
 0x995   :  { %8614 = vmatprep.subr.bf16.mxu1 %v8995_v46 }
 0x997   :  { %8593 = vmatpush3.bf16.msra.mxu0 %v8996_v1  ;;  %v6824_v1 = vrot.slane %v9927_v26, %v9507_v41 }
 0x998   :  { %8615 = vmatpush3.bf16.msra.mxu1 %v8997_v19  ;;  %8594 = vmatprep.subr.bf16.mxu0 %v8998_v30 }
 0x999   :  { %8616 = vmatprep.subr.bf16.mxu1 %v8999_v43 }
 0x99b   :  { %8595 = vmatpush3.bf16.msra.mxu0 %v9000_v42 }
 0x99c   :  { %8617 = vmatpush3.bf16.msra.mxu1 %v9001_v12  ;;  %8596 = vmatprep.subr.bf16.mxu0 %v9002_v56 }
 0x99d   :  { %8618 = vmatprep.subr.bf16.mxu1 %v9003_v40 }
 0x99f   :  { %8597 = vmatpush3.bf16.msra.mxu0 %v9004_v22 }
 0x9a0   :  { %8619 = vmatpush3.bf16.msra.mxu1 %v9005_v63  ;;  %8626 = vmatprep.subr.bf16.mxu0 %v9006_v0 }
 0x9a1   :  { %8648 = vmatprep.subr.bf16.mxu1 %v9007_v45 }
 0x9a2   :  { %8117 = vmatmul.mubr.bf16.vlgmr.msra.gmra.mrb[40].mxu0 %v6885_v47 }
 0x9a3   :  { %8157 = vmatmul.mubr.bf16.vlgmr.msra.gmra.mrb[40].mxu1 %v6887_v44  ;;  %8627 = vmatpush3.bf16.msra.mxu0 %v9008_v24 }
 0x9a4   :  { %8649 = vmatpush3.bf16.msra.mxu1 %v9009_v51  ;;  %8628 = vmatprep.subr.bf16.mxu0 %v9010_v48  ;;  %v8364_v51 = vld [vmem:[#allocation13] ss:$0 sm:$0xff] }
 0x9a5   :  { %8650 = vmatprep.subr.bf16.mxu1 %v9011_v34 }
 0x9a7   :  { %8629 = vmatpush3.bf16.msra.mxu0 %v9012_v37 }
 0x9a8   :  { %8651 = vmatpush3.bf16.msra.mxu1 %v9013_v38  ;;  %8630 = vmatprep.subr.bf16.mxu0 %v9014_v53 }
 0x9a9   :  { %8652 = vmatprep.subr.bf16.mxu1 %v9015_v23 }
 0x9ab   :  { %8631 = vmatpush3.bf16.msra.mxu0 %v9016_v39 }
 0x9ac   :  { %8653 = vmatpush3.bf16.msra.mxu1 %v9017_v49  ;;  %8632 = vmatprep.subr.bf16.mxu0 %v9018_v52 }
 0x9ad   :  { %8654 = vmatprep.subr.bf16.mxu1 %v9019_v14 }
 0x9af   :  { %8633 = vmatpush3.bf16.msra.mxu0 %v9020_v54 }
 0x9b0   :  { %8655 = vmatpush3.bf16.msra.mxu1 %v9021_v59  ;;  %8634 = vmatprep.subr.bf16.mxu0 %v9022_v13 }
 0x9b1   :  { %8656 = vmatprep.subr.bf16.mxu1 %v9023_v4 }
 0x9b3   :  { %8635 = vmatpush3.bf16.msra.mxu0 %v9024_v62 }
 0x9b4   :  { %8657 = vmatpush3.bf16.msra.mxu1 %v9025_v61  ;;  %8636 = vmatprep.subr.bf16.mxu0 %v9026_v17 }
 0x9b5   :  { %8658 = vmatprep.subr.bf16.mxu1 %v9027_v6 }
 0x9b7   :  { %8637 = vmatpush3.bf16.msra.mxu0 %v9028_v8 }
 0x9b8   :  { %8659 = vmatpush3.bf16.msra.mxu1 %v9029_v9  ;;  %8638 = vmatprep.subr.bf16.mxu0 %v9030_v5 }
 0x9b9   :  { %8660 = vmatprep.subr.bf16.mxu1 %v9031_v60 }
 0x9bb   :  { %8639 = vmatpush3.bf16.msra.mxu0 %v9032_v16 }
 0x9bc   :  { %8661 = vmatpush3.bf16.msra.mxu1 %v9033_v18  ;;  %8640 = vmatprep.subr.bf16.mxu0 %v9034_v11 }
 0x9bd   :  { %8662 = vmatprep.subr.bf16.mxu1 %v9035_v21 }
 0x9bf   :  { %8641 = vmatpush3.bf16.msra.mxu0 %v9036_v10 }
 0x9c0   :  { %8663 = vmatpush3.bf16.msra.mxu1 %v9037_v15 }
 0xa15   :  { %v6326_v46 = vpop.f32.mrb[28].mxu0 }
 0xa16   :  { %v6757_v29 = vmul.f32 %v6716_v27, %v6326_v46  ;;  %v6654_v19 = vpop.f32.mrb[28].mxu1  ;;  %v6328_v30 = vpop.f32.mrb[29].mxu0 }
 0xa17   :  { %v6759_v3 = vmul.f32 %v6724_v28, %v6654_v19  ;;  %v6758_v43 = vmul.f32 %v6720_v2, %v6328_v30  ;;  %v6656_v42 = vpop.f32.mrb[29].mxu1  ;;  %v6330_v35 = vpop.f32.mrb[30].mxu0 }
 0xa18   :  { %v6857_v33 = vadd.f32 %v6816_v25, %v6757_v29  ;;  %v6760_v12 = vmul.f32 %v6728_v31, %v6656_v42  ;;  %v6658_v20 = vpop.f32.mrb[30].mxu1  ;;  %v6331_v56 = vpop.f32.mrb[31].mxu0 }
 0xa19   :  { %v6859_v57 = vadd.f32 %v6824_v1, %v6759_v3  ;;  %v6858_v40 = vadd.f32 %v6820_v58, %v6758_v43  ;;  %v6659_v41 = vpop.f32.mrb[31].mxu1 }
 0xa1a   :  { %v6873_v22 = vmax.f32 %v6857_v33, 0.0  ;;  %v6860_v32 = vadd.f32 %v6828_v55, %v6760_v12 }
 0xa1b   :  { %v6875_v36 = vmax.f32 %v6859_v57, 0.0  ;;  %v6874_v63 = vmax.f32 %v6858_v40, 0.0  ;;  %v8493_v57 = vld [vmem:[#allocation14] ss:$0 sm:$0xff] }
 0xa1c   :  { %v6876_v0 = vmax.f32 %v6860_v32, 0.0  ;;  %v6889_v45 = vpack.c.bf16 %v6873_v22, %v6873_v22 }
 0xa1d   :  { %v6890_v7 = vpack.c.bf16 %v6874_v63, %v6874_v63  ;;  %v6891_v50 = vpack.c.bf16 %v6875_v36, %v6875_v36 }
 0xa1e   :  { %v6892_v24 = vpack.c.bf16 %v6876_v0, %v6876_v0 }
 0xa1f   :  { %8196 = vmatprep.mubr.bf16.mxu0 %v6890_v7 }
 0xa20   :  { %8236 = vmatprep.mubr.bf16.mxu1 %v6892_v24  ;;  %8197 = vmatmul.mubr.bf16.vlgmr.msra.gmra.mrb[44].mxu0 %v6889_v45 }
 0xa21   :  { %8237 = vmatmul.mubr.bf16.vlgmr.msra.gmra.mrb[44].mxu1 %v6891_v50 }
 0xa35   :  { %v8510_v26 = vpop.f32.mrb[32].mxu0 }
 0xa36   :  { %v8532_v47 = vpop.f32.mrb[32].mxu1  ;;  %v8511_v48 = vpop.f32.mrb[33].mxu0 }
 0xa37   :  { %v8512_v44 = vadd.f32 %v8511_v48, %v8510_v26  ;;  %v8533_v34 = vpop.f32.mrb[33].mxu1  ;;  %v8513_v37 = vpop.f32.mrb[34].mxu0 }
 0xa38   :  { %v8534_v38 = vadd.f32 %v8533_v34, %v8532_v47  ;;  %v8535_v53 = vpop.f32.mrb[34].mxu1  ;;  %v8514_v23 = vpop.f32.mrb[35].mxu0 }
 0xa39   :  { %v7959_v39 = vadd.f32 %v8512_v44, %v8364_v51  ;;  %v8536_v49 = vpop.f32.mrb[35].mxu1 }
 0xa3b   :  { %v7999_v52 = vadd.f32 %v8534_v38, %v7959_v39 }
 0xa55   :  { %v8554_v14 = vpop.f32.mrb[36].mxu0 }
 0xa56   :  { %v8576_v54 = vpop.f32.mrb[36].mxu1  ;;  %v8555_v59 = vpop.f32.mrb[37].mxu0 }
 0xa57   :  { %v8556_v13 = vadd.f32 %v8555_v59, %v8554_v14  ;;  %v8577_v4 = vpop.f32.mrb[37].mxu1  ;;  %v8557_v62 = vpop.f32.mrb[38].mxu0 }
 0xa58   :  { %v8578_v61 = vadd.f32 %v8577_v4, %v8576_v54  ;;  %v8579_v17 = vpop.f32.mrb[38].mxu1  ;;  %v8558_v6 = vpop.f32.mrb[39].mxu0 }
 0xa59   :  { %v8039_v8 = vadd.f32 %v8556_v13, %v7999_v52  ;;  %v8580_v9 = vpop.f32.mrb[39].mxu1 }
 0xa5b   :  { %v8079_v5 = vadd.f32 %v8578_v61, %v8039_v8 }
 0xa75   :  { %v8598_v60 = vpop.f32.mrb[40].mxu0 }
 0xa76   :  { %v8620_v16 = vpop.f32.mrb[40].mxu1  ;;  %v8599_v18 = vpop.f32.mrb[41].mxu0 }
 0xa77   :  { %v8600_v11 = vadd.f32 %v8599_v18, %v8598_v60  ;;  %v8621_v21 = vpop.f32.mrb[41].mxu1  ;;  %v8601_v10 = vpop.f32.mrb[42].mxu0 }
 0xa78   :  { %v8622_v15 = vadd.f32 %v8621_v21, %v8620_v16  ;;  %v8623_v27 = vpop.f32.mrb[42].mxu1  ;;  %v8602_v28 = vpop.f32.mrb[43].mxu0 }
 0xa79   :  { %v8119_v2 = vadd.f32 %v8600_v11, %v8079_v5  ;;  %v8624_v25 = vpop.f32.mrb[43].mxu1 }
 0xa7b   :  { %v8159_v31 = vadd.f32 %v8622_v15, %v8119_v2 }
 0xaf3   :  { %v8642_v46 = vpop.f32.mrb[44].mxu0 }
 0xaf4   :  { %v8664_v1 = vpop.f32.mrb[44].mxu1  ;;  %v8643_v58 = vpop.f32.mrb[45].mxu0 }
 0xaf5   :  { %v8644_v29 = vadd.f32 %v8643_v58, %v8642_v46  ;;  %v8665_v19 = vpop.f32.mrb[45].mxu1  ;;  %v8645_v30 = vpop.f32.mrb[46].mxu0 }
 0xaf6   :  { %v8666_v55 = vadd.f32 %v8665_v19, %v8664_v1  ;;  %v8667_v3 = vpop.f32.mrb[46].mxu1  ;;  %v8646_v43 = vpop.f32.mrb[47].mxu0 }
 0xaf7   :  { %v8199_v42 = vadd.f32 %v8644_v29, %v8159_v31  ;;  %v8668_v35 = vpop.f32.mrb[47].mxu1 }
 0xaf9   :  { %v8239_v33 = vadd.f32 %v8666_v55, %v8199_v42 }
 0xafb   :  { %v8244_v12 = vmul.f32 0.5, %v8239_v33 }
 0xafd   :  { %v8245_v20 = vmul.f32 1.442695, %v8244_v12 }
 0xaff   :  { %9038 = vpow2.f32 %v8245_v20 }
 0xb09   :  { %v9039_v56 = vpop.eup %9038 }
 0xb0a   :  { %8268 = vrot.lane.b32.xlu1 %v9039_v56, %s9265_s6  ;;  %8255 = vrot.lane.b32.xlu0 %v9039_v56, %s9266_s11 }
 0xb0e   :  { %8263 = vrot.lane.b32.xlu0 %v8239_v33, %s9265_s6 }
 0xb7c   :  { %v8256_v40 = vpop.permute.xlu0 %8255  ;;  %v8269_v36 = vpop.permute.xlu1 %8268 }
 0xb7d   :  { %v8258_v41 = vmul.f32 %v8493_v57, %v8256_v40 }
 0xb7f   :  { %v8259_v22 = vadd.f32 %v8258_v41, %v8239_v33 }
 0xb80   :  { %v8264_v32 = vpop.permute.xlu0 %8263 }
 0xb81   :  { %8261 = vst.msk [vmem:[#allocation16] sm:$0xff] %vm8260_vm1, %v8259_v22 }
 0xb82   :  { %8267 = vst.msk [vmem:[#allocation16] sm:$0xff] %vm8266_vm2, %v8264_v32 }
 0xb83   :  { %8272 = vst.msk [vmem:[#allocation16] sm:$0xff] %vm8271_vm3, %v8269_v36 }
 0xb84   :  { %9229 = shalt.err (!%p9226_p12)
}
 0xb85   :  { %s9230_s2 = scalar_lea.hbm %s10212_s9, 128 }
 0xb86   :  { %p9231_p13 = scmp.ne.s32.totalorder %s10212_s9, %s9230_s2  ;;  %p9234_p0 = scmp.lt.u32.totalorder %s9230_s2, %s10212_s9 }
 0xb88   :  { %p9236_p1 = pnand %p9234_p0, %p9231_p13 }
 0xb8a   :  { %9239 = shalt.err (!%p9236_p1)
}
 0xb8b   :  { %8282 = dma.vmem_to_hbm [thread:$0]  %s8280_s1, 128, %s10212_s9, [#allocation4]  }
 0xb8c   :  { %9250 = dma.done.wait [#allocation4], 128  }
 0xb8d   :  { %9251 = vsyncadd [#allocation4], 4294967168 }
 0xb8e   :  { %8286 = vsyncpa [#allocation3], 1 }
 0xb8f   :  { %8287 = vsyncpa [#allocation6], 1 }
 0xb90   :  { %8288 = vsyncpa [#allocation9], 1 }
 0xb91   :  { %8289 = vsyncpa [#allocation12], 1 }
 0xb92   :  { %8290 = vsyncpa [#allocation15], 1 }
 0xb93   :  { %8291 = vsyncpa [#allocation4], 1 }

</bundles_post_ra>
